<compile_context>
chip_gen: v5e
topology: v5e:2x2
jax: 0.10.0
libtpu: 0.0.40
codegen_flags: <defaults>
</compile_context>

<pallas_src>
import jax
import jax.numpy as jnp
from jax.experimental import pallas as pl
from jax.experimental.pallas import tpu as pltpu


PLANES = [64, 128, 256, 512]
TILE_N = 32768  # 32 x 32768 x 2B(bf16) = 2 MiB per weight block


# ----------------------------------------------------------------------------
# Fused Pallas kernel: MLP (+ReLU) recomputed per tile, then one wide head tile.
# ----------------------------------------------------------------------------
def _fused_hypernet_kernel(x_ref, w1_ref, b1_ref, wcat_ref, bcat_ref, o_ref):
    # x_ref:[1,E] f32  w1_ref:[E,H] f32  b1_ref:[1,H] f32
    # wcat_ref:[H,TN] bf16  bcat_ref:[1,TN] f32  o_ref:[1,TN] f32
    feat = jnp.dot(x_ref[...], w1_ref[...], preferred_element_type=jnp.float32)
    feat = jnp.maximum(feat + b1_ref[...], 0.0)                   # [1, H] f32
    # bf16 x bf16 -> f32 on the MXU (weights are pre-packed in bf16).
    y = jnp.dot(feat.astype(jnp.bfloat16), wcat_ref[...],
                preferred_element_type=jnp.float32)               # [1, TN] f32
    o_ref[...] = (y + bcat_ref[...]).astype(o_ref.dtype)


def fused_hypernet_pallas(client_embedding, w1_t, b1, w_cat, b_cat, n_total):
    """Returns the flat [N_total] f32 concatenation of all 20 head outputs."""
    e = client_embedding.shape[0]
    h = w1_t.shape[1]
    n_pad = w_cat.shape[1]
    assert n_pad % TILE_N == 0
    n_tiles = n_pad // TILE_N

    x2 = client_embedding.reshape(1, e)
    b1_2 = b1.reshape(1, h)
    b_cat_2 = b_cat.reshape(1, n_pad)

    # Advisory cost for XLA's scheduler: this call is a ~23 MB HBM stream.
    bytes_accessed = (
        w_cat.size * w_cat.dtype.itemsize      # bf16 weight slab (dominant)
        + b_cat_2.size * 4                     # f32 bias slab
        + n_pad * 4                            # f32 output
        + (x2.size + w1_t.size + b1_2.size) * 4 * n_tiles)
    flops = 2 * e * h * n_tiles + 2 * h * n_pad
    cost = pl.CostEstimate(flops=flops, transcendentals=0,
                           bytes_accessed=bytes_accessed)

    out = pl.pallas_call(
        _fused_hypernet_kernel,
        out_shape=jax.ShapeDtypeStruct((1, n_pad), jnp.float32),
        grid_spec=pltpu.PrefetchScalarGridSpec(
            num_scalar_prefetch=0,
            grid=(n_tiles,),
            in_specs=[
                pl.BlockSpec((1, e), lambda j: (0, 0)),
                pl.BlockSpec((e, h), lambda j: (0, 0)),
                pl.BlockSpec((1, h), lambda j: (0, 0)),
                # Big bf16 weight slab: the only real HBM traffic.  2-deep
                # buffering already saturates DMA; spend VMEM on tile size.
                pl.BlockSpec((h, TILE_N), lambda j: (0, j),
                             pipeline_mode=pl.Buffered(2)),
                pl.BlockSpec((1, TILE_N), lambda j: (0, j)),
            ],
            out_specs=pl.BlockSpec((1, TILE_N), lambda j: (0, j)),
        ),
        compiler_params=pltpu.CompilerParams(
            dimension_semantics=("parallel",),   # megacore split on v7x
            vmem_limit_bytes=32 << 20,           # headroom over v5e 16 MiB default
        ),
        cost_estimate=cost,
    )(x2, w1_t, b1_2, w_cat, b_cat_2)
    return out.reshape(n_pad)[:n_total]


# ----------------------------------------------------------------------------
# Parameter construction (deterministic, in-script) in PyTorch layout.
# ----------------------------------------------------------------------------
def init_params(key, embedding_dim: int, hidden_dim: int):
    def linear_init(k, out_dim, in_dim):
        kw, kb = jax.random.split(k)
        bound = 1.0 / jnp.sqrt(in_dim)
        w = jax.random.uniform(kw, (out_dim, in_dim), jnp.float32, -bound, bound)
        b = jax.random.uniform(kb, (out_dim,), jnp.float32, -bound, bound)
        return w, b

    keys = jax.random.split(key, 1 + 4 * 5)
    params = {"mlp": linear_init(keys[0], hidden_dim, embedding_dim)}
    adapters = []
    ki = 1
    for plane in PLANES:
        heads = []
        out_dims = [plane, plane, plane * plane, plane, plane]
        for od in out_dims:
            heads.append(linear_init(keys[ki], od, hidden_dim))
            ki += 1
        adapters.append(heads)
    params["adapters"] = adapters
    return params


# ----------------------------------------------------------------------------
# One-time packing: transpose + concatenate + pad + bf16 cast (NOT in forward).
# ----------------------------------------------------------------------------
def build_packed_params(torch_params, tile_n: int = TILE_N):
    w1, b1 = torch_params["mlp"]            # w1: [H, E] (PyTorch layout)
    w_blocks, b_blocks, layout = [], [], []
    offset = 0
    for i, plane in enumerate(PLANES):
        prefix = "adapter." + str(i)
        names_shapes = [
            ("conv.0.weight", (plane,)),
            ("conv.0.bias", (plane,)),
            ("conv.1.weight", (plane, plane, 1, 1)),
            ("bn.weight", (plane,)),
            ("bn.bias", (plane,)),
        ]
        for (suffix, shape), (w, b) in zip(names_shapes,
                                           torch_params["adapters"][i]):
            n = w.shape[0]
            w_blocks.append(w.T)            # [H, n]  (one-time transpose)
            b_blocks.append(b)
            layout.append((prefix + suffix, offset, n, shape))
            offset += n

    w_cat = jnp.concatenate(w_blocks, axis=1)   # [H, N_total]
    b_cat = jnp.concatenate(b_blocks, axis=0)   # [N_total]
    n_total = offset
    n_pad = ((n_total + tile_n - 1) // tile_n) * tile_n
    pad = n_pad - n_total
    if pad:
        w_cat = jnp.pad(w_cat, ((0, 0), (0, pad)))
        b_cat = jnp.pad(b_cat, ((0, pad),))

    packed = {
        "w1_t": jnp.asarray(w1.T, jnp.float32),        # [E, H]
        "b1": jnp.asarray(b1, jnp.float32),            # [H]
        "w_cat": jnp.asarray(w_cat, jnp.bfloat16),     # [H, n_pad]  bf16 stream
        "b_cat": jnp.asarray(b_cat, jnp.float32),      # [n_pad]     f32 (tiny)
    }
    return packed, layout, n_total


# ----------------------------------------------------------------------------
# Forward pass (mirrors AdapterHyperNet.forward).
# TODO(synk): batching multiple client embeddings per call would amortize the
# weight stream across clients; the PyTorch module is single-embedding, so we
# keep batch=1 here.
# ----------------------------------------------------------------------------
def adapter_hypernet_forward(packed, layout, n_total, client_embedding):
    flat = fused_hypernet_pallas(
        client_embedding, packed["w1_t"], packed["b1"],
        packed["w_cat"], packed["b_cat"], n_total)
    weights = {}
    for name, off, n, shape in layout:
        weights[name] = flat[off:off + n].reshape(shape)
    return weights


# ----------------------------------------------------------------------------
# Pure-JAX references for correctness checking (PyTorch-layout params).
# ----------------------------------------------------------------------------
def reference_forward(params, client_embedding, weight_dtype=jnp.float32):
    w1, b1 = params["mlp"]
    features = jnp.maximum(client_embedding @ w1.T + b1, 0.0)
    feat_c = features.astype(weight_dtype)
    weights = {}
    for i, plane in enumerate(PLANES):
        keys = "adapter." + str(i)
        heads = params["adapters"][i]
        outs = [jnp.dot(feat_c, w.T.astype(weight_dtype),
                        preferred_element_type=jnp.float32) + b
                for (w, b) in heads]
        weights[keys + "conv.0.weight"] = outs[0].reshape(-1)
        weights[keys + "conv.0.bias"] = outs[1].reshape(-1)
        weights[keys + "conv.1.weight"] = outs[2].reshape(plane, plane, 1, 1)
        weights[keys + "bn.weight"] = outs[3].reshape(-1)
        weights[keys + "bn.bias"] = outs[4].reshape(-1)
    return weights


if __name__ == "__main__":
    embedding_dim = 32
    hidden_dim = 32

    key = jax.random.PRNGKey(0)
    k_params, k_input = jax.random.split(key)
    torch_params = init_params(k_params, embedding_dim, hidden_dim)
    packed, layout, n_total = build_packed_params(torch_params)
    client_embedding = jax.random.normal(k_input, (embedding_dim,), jnp.float32)

    out = adapter_hypernet_forward(packed, layout, n_total, client_embedding)
    out = jax.tree_util.tree_map(jax.block_until_ready, out)

    # Shape checks against the PyTorch module semantics.
    for i, plane in enumerate(PLANES):
        keys = "adapter." + str(i)
        assert out[keys + "conv.0.weight"].shape == (plane,)
        assert out[keys + "conv.0.bias"].shape == (plane,)
        assert out[keys + "conv.1.weight"].shape == (plane, plane, 1, 1)
        assert out[keys + "bn.weight"].shape == (plane,)
        assert out[keys + "bn.bias"].shape == (plane,)

    # Tight check vs a bf16-weight reference (same weight rounding as kernel).
    ref_bf16 = reference_forward(torch_params, client_embedding,
                                 weight_dtype=jnp.bfloat16)
    for name in out:
        assert jnp.allclose(out[name], ref_bf16[name],
                            atol=1e-3, rtol=1e-3), name

    # Deliberately relaxed check vs the full-precision reference: weights are
    # stored in bf16 (bandwidth optimization), so 1e-4 no longer applies.
    ref_f32 = reference_forward(torch_params, client_embedding,
                                weight_dtype=jnp.float32)
    for name in out:
        assert jnp.allclose(out[name], ref_f32[name],
                            atol=2e-2, rtol=2e-2), name

    print("KERNEL_OK")
</pallas_src>

<mosaic_0001>
module attributes {stable_mosaic.version = 11 : i64} {
  func.func @_fused_hypernet_kernel(%arg0: i32, %arg1: memref<1x32xf32, #tpu.memory_space<vmem>>, %arg2: memref<32x32xf32, #tpu.memory_space<vmem>>, %arg3: memref<1x32xf32, #tpu.memory_space<vmem>>, %arg4: memref<32x32768xbf16, #tpu.memory_space<vmem>>, %arg5: memref<1x32768xf32, #tpu.memory_space<vmem>>, %arg6: memref<1x32768xf32, #tpu.memory_space<vmem>>) attributes {dimension_semantics = [#tpu.dimension_semantics<parallel>], iteration_bounds = array<i64: 11>, scalar_prefetch = 0 : i64, scratch_operands = 0 : i64, tpu.core_type = #tpu.core_type<tc>, window_params = [{pipeline_mode = #tpu.pipeline_mode<synchronous>, transform_indices = @transform_0, window_bounds = array<i64: 1, 32>}, {pipeline_mode = #tpu.pipeline_mode<synchronous>, transform_indices = @transform_1, window_bounds = array<i64: 32, 32>}, {pipeline_mode = #tpu.pipeline_mode<synchronous>, transform_indices = @transform_2, window_bounds = array<i64: 1, 32>}, {pipeline_mode = #tpu.pipeline_mode<double_buffered>, transform_indices = @transform_3, window_bounds = array<i64: 32, 32768>}, {transform_indices = @transform_4, window_bounds = array<i64: 1, 32768>}, {transform_indices = @transform_5, window_bounds = array<i64: 1, 32768>}]} {
    %c0 = arith.constant 0 : index
    %c0_0 = arith.constant 0 : index
    %0 = vector.load %arg1[%c0, %c0_0] : memref<1x32xf32, #tpu.memory_space<vmem>>, vector<1x32xf32>
    %c0_1 = arith.constant 0 : index
    %c0_2 = arith.constant 0 : index
    %1 = vector.load %arg2[%c0_1, %c0_2] : memref<32x32xf32, #tpu.memory_space<vmem>>, vector<32x32xf32>
    %cst = arith.constant dense<0.000000e+00> : vector<1x32xf32>
    %2 = tpu.matmul %0, %1, %cst {dimension_numbers = #tpu.dot_dimension_numbers<[1], [0], [0], [1], [0, 0, 1, 1], [], []>} : vector<1x32xf32>, vector<32x32xf32>, vector<1x32xf32> -> vector<1x32xf32>
    %c0_3 = arith.constant 0 : index
    %c0_4 = arith.constant 0 : index
    %3 = vector.load %arg3[%c0_3, %c0_4] : memref<1x32xf32, #tpu.memory_space<vmem>>, vector<1x32xf32>
    %4 = arith.addf %2, %3 : vector<1x32xf32>
    %cst_5 = arith.constant 0.000000e+00 : f32
    %5 = vector.broadcast %cst_5 : f32 to vector<1x32xf32>
    %6 = arith.maximumf %4, %5 : vector<1x32xf32>
    %7 = arith.truncf %6 : vector<1x32xf32> to vector<1x32xbf16>
    %c0_6 = arith.constant 0 : index
    %c0_7 = arith.constant 0 : index
    %8 = vector.load %arg4[%c0_6, %c0_7] : memref<32x32768xbf16, #tpu.memory_space<vmem>>, vector<32x32768xbf16>
    %cst_8 = arith.constant dense<0.000000e+00> : vector<1x32768xf32>
    %9 = tpu.matmul %7, %8, %cst_8 {dimension_numbers = #tpu.dot_dimension_numbers<[1], [0], [0], [1], [0, 0, 1, 1], [], []>} : vector<1x32xbf16>, vector<32x32768xbf16>, vector<1x32768xf32> -> vector<1x32768xf32>
    %c0_9 = arith.constant 0 : index
    %c0_10 = arith.constant 0 : index
    %10 = vector.load %arg5[%c0_9, %c0_10] : memref<1x32768xf32, #tpu.memory_space<vmem>>, vector<1x32768xf32>
    %11 = arith.addf %9, %10 : vector<1x32768xf32>
    %c0_11 = arith.constant 0 : index
    %c0_12 = arith.constant 0 : index
    %12 = vector.load %arg6[%c0_11, %c0_12] : memref<1x32768xf32, #tpu.memory_space<vmem>>, vector<1x32768xf32>
    tpu.vector_store %arg6[%c0_11, %c0_12], %11 {strides = array<i32>} : memref<1x32768xf32, #tpu.memory_space<vmem>>, vector<1x32768xf32>,
    return
  }
  func.func @transform_0(%arg0: i32) -> (i32, i32) {
    %c0_i32 = arith.constant 0 : i32
    %c0_i32_0 = arith.constant 0 : i32
    %c0_i32_1 = arith.constant 0 : i32
    return %c0_i32, %c0_i32_0 : i32, i32
  }
  func.func @transform_1(%arg0: i32) -> (i32, i32) {
    %c0_i32 = arith.constant 0 : i32
    %c0_i32_0 = arith.constant 0 : i32
    %c0_i32_1 = arith.constant 0 : i32
    return %c0_i32, %c0_i32_0 : i32, i32
  }
  func.func @transform_2(%arg0: i32) -> (i32, i32) {
    %c0_i32 = arith.constant 0 : i32
    %c0_i32_0 = arith.constant 0 : i32
    %c0_i32_1 = arith.constant 0 : i32
    return %c0_i32, %c0_i32_0 : i32, i32
  }
  func.func @transform_3(%arg0: i32) -> (i32, i32) {
    %c0_i32 = arith.constant 0 : i32
    %c0_i32_0 = arith.constant 0 : i32
    return %c0_i32, %arg0 : i32, i32
  }
  func.func @transform_4(%arg0: i32) -> (i32, i32) {
    %c0_i32 = arith.constant 0 : i32
    %c0_i32_0 = arith.constant 0 : i32
    return %c0_i32, %arg0 : i32, i32
  }
  func.func @transform_5(%arg0: i32) -> (i32, i32) {
    %c0_i32 = arith.constant 0 : i32
    %c0_i32_0 = arith.constant 0 : i32
    return %c0_i32, %arg0 : i32, i32
  }
}

</mosaic_0001>

<bundles_post_ra>
// kernel: tpu_custom_call.1
= control target key start
LH: loop header
LB: loop body
LE: loop exit
PB: predicated region body
PF: predicated region fallthrough
CT: control target
= control target key end

     0   :  { %s13631_s0 = inlined_call_operand.hbm [shape: f32[1,32], index: 0, kind: input, shape index: {}]   ;;  %s13632_s1 = inlined_call_operand.hbm [shape: f32[32,32], index: 1, kind: input, shape index: {}]   ;;  %s13633_s2 = inlined_call_operand.hbm [shape: f32[1,32], index: 2, kind: input, shape index: {}]   ;;  %s13634_s3 = inlined_call_operand.hbm [shape: bf16[32,360448], index: 3, kind: input, shape index: {}]   ;;  %s13635_s4 = inlined_call_operand.hbm [shape: f32[1,360448], index: 4, kind: input, shape index: {}]   ;;  %s13636_s5 = inlined_call_operand.hbm [shape: f32[1,360448], index: 5, kind: output, shape index: {}]  }
   0x1   :  { %13642 = sst [smem:[#allocation19_spill]] %s13632_s1 }
   0x2   :  { %13643 = sst [smem:[#allocation20_spill]] %s13634_s3 }
   0x3   :  { %10 = vsyncpa [#allocation3], 0 }
   0x4   :  { %11 = vsyncpa [#allocation6], 0 }
   0x5   :  { %12 = vsyncpa [#allocation9], 0 }
   0x6   :  { %14 = vsyncpa [#allocation9 + $0x1], 0 }
   0x7   :  { %15 = vsyncpa [#allocation4], 0 }
   0x8   :  { %17 = vsyncpa [#allocation4 + $0x1], 0  ;;  %s11445_s18 = smov 0   ;;  %s11447_s19 = smov 0  }
   0x9   :  { %s11449_s20 = smov 0   ;;  %s11451_s21 = smov 0  }
   0xa LB: > { %s11466_s22 = sadd.s32 4294967295, %s11405_s21   ;;  %s8254_s23 = sadd.s32 4294967294, %s11405_s21   ;;  %s11405_s21 = sphi %s11451_s21, %s13661_s21   ;;  %s11401_s20 = sphi %s11449_s20, %s13665_s20   ;;  %s11397_s19 = sphi %s11447_s19, %s13664_s19   ;;  %s11393_s18 = sphi %s11445_s18, %s13663_s18  }
   0xb   : > { %p106_p0 = scmp.ne.s32.totalorder %s11397_s19, %s11393_s18  ;;  %p13638_p1 = scmp.eq.s32.totalorder %s11466_s22, 0 }
   0xc   : > { %p156_p2 = scmp.eq.s32.totalorder %s11466_s22, 10  ;;  %p162_p3 = scmp.eq.s32.totalorder %s8254_s23, 10 }
   0xd   : > { %p11475_p4 = por %p13638_p1, %p106_p0  ;;  %p8255_p5 = scmp.ge.s32.totalorder %s11405_s21, 1 }
   0xe   : > { %p11480_p6 = por %p162_p3, %p106_p0  ;;  %p169_p7 = scmp.lt.s32.totalorder %s11405_s21, 12 }
   0xf   : > { %s13647_s1 = sld [smem:[#allocation19_spill]]  ;;  %s11407_s30 = smov [#allocation5]  }
  0x10   : > { %s13645_s25 = scalar_select %p11480_p6, 1, 0 }
  0x11   : > { %p11488_p8 = pnand %p8255_p5, %p169_p7  ;;  %s194_s6 = sshll.u32 %s11407_s30, 4  ;;  %s195_s6 = int_to_ptr.vmem [resolvable:$true] %s194_s6 }
  0x12   : > { %13646 = sst [smem:[#allocation16_spill]] %s13645_s25  ;;  %s11501_s8 = sadd.s32 1, %s11405_s21  }
  0x13   : > { %p11112_p9 = pneg %p11488_p8  ;;  %13650 = sst [smem:[#allocation17_spill]] %s11501_s8 }
  0x14   : > { %s11408_s9 = smov 128   ;;  %s11409_s10 = smov 8  }
  0x15   : > { %s192_s28 = sshll.u32 %s13647_s1, 4  ;;  %p11496_p10 = pnand %p11112_p9, %p13638_p1  ;;  %s193_s28 = int_to_ptr.hbm [resolvable:$true] %s192_s28 }
  0x16   : > { %s90_s11 = ssub.s32 %s11405_s21, %s11501_s8  ;;  %s93_s12 = sadd.s32 1, %s11401_s20 }
  0x17   : > { %11118 = dma.hbm_to_vmem [thread:$0]  (!%p11496_p10), %s193_s28, 512, %s195_s6, [#allocation6], %s11408_s9, %s11408_s9, %s11409_s10  }
  0x18   : > { %p91_p11 = scmp.eq.s32.totalorder %s90_s11, 0  ;;  %p100_p12 = scmp.ne.s32.totalorder %s11401_s20, %s11397_s19 }
  0x19   : > { %p101_p13 = scmp.eq.s32.totalorder %s11405_s21, 0  ;;  %p11136_p0 = scmp.lt.s32.totalorder %s11405_s21, 11 }
  0x1a   : > { %s11513_s13 = scalar_select %p91_p11, %s11401_s20, %s93_s12  }
  0x1b   : > { %p102_p3 = por %p101_p13, %p100_p12  ;;  %p11517_p5 = por %p156_p2, %p100_p12 }
  0x1c   : > { %13651 = sst [smem:[#allocation18_spill]] %s11513_s13  ;;  %s220_s15 = sand.u32 1, %s11405_s21  }
  0x1d   : > { %s13637_s16 = sand.u32 1, %s11401_s20   ;;  %s10581_s23 = sshll.u32 %s11405_s21, 10 }
  0x1e   : > { %s8260_s17 = sshll.u32 %s13637_s16, 12  ;;  %s13653_s3 = sld [smem:[#allocation20_spill]] }
  0x1f   : > { %s224_s30 = scalar_lea.vmem [#allocation8], %s8260_s17  ;;  %p11531_p7 = pnand %p11136_p0, %p102_p3 }
  0x20   : > { %s232_s6 = sshll.u32 %s224_s30, 4  ;;  %s11535_s11 = scalar_lea.sflag [#allocation9], %s220_s15  ;;  %s233_s6 = int_to_ptr.vmem [resolvable:$true] %s232_s6 }
  0x21   : > { %p11215_p9 = pneg %p11531_p7 }
  0x24   : > { %s229_s28 = scalar_lea.hbm %s13653_s3, %s10581_s23  ;;  %s11218_s26 = scalar_lea.hbm %s13653_s3, 45056 }
  0x25   : > { %s230_s9 = sshll.u32 %s229_s28, 4  ;;  %s231_s9 = int_to_ptr.hbm [resolvable:$true] %s230_s9 }
  0x26   : > { %s11211_s12 = sshra.s32 %s231_s9, 4  ;;  %s11212_s12 = int_to_ptr.hbm [resolvable:$true] %s11211_s12 }
  0x27   : > { %s11213_s16 = scalar_lea.hbm %s11212_s12, 4096  ;;  %p11219_p13 = scmp.lt.s32.totalorder %s11212_s12, %s13653_s3 }
  0x28   : > { %p11214_p2 = scmp.ne.s32.totalorder %s11212_s12, %s11213_s16  ;;  %p11220_p0 = scmp.lt.s32.totalorder %s11218_s26, %s11213_s16 }
  0x2a   : > { %p11216_p11 = pnand %p11215_p9, %p11214_p2  ;;  %p11221_p3 = por %p11220_p0, %p11219_p13 }
  0x2c   : > { %p11217_p12 = pneg %p11216_p11 }
  0x2e   : > { %p11222_p1 = pnand %p11221_p3, %p11217_p12 }
  0x30   : > { %11225 = shalt.err (!%p11222_p1)
}
  0x31   : > { %s11410_s15 = smov 180224   ;;  %s11411_s30 = smov 16384  }
  0x32   : > { %s11412_s1 = smov 1024   ;;  %s181_s27 = sshll.u32 %s13631_s0, 4  ;;  %s182_s27 = int_to_ptr.hbm [resolvable:$true] %s181_s27 }
  0x33   : > { %11125 = dma.hbm_to_vmem [thread:$0]  (!%p11531_p7), %s231_s9, 65536, %s233_s6, %s11535_s11, %s11410_s15, %s11411_s30, %s11412_s1  }
  0x34   : > { %s11413_s16 = smov [#allocation2]   ;;  %s207_s3 = sshll.u32 %s13633_s2, 4  ;;  %s208_s3 = int_to_ptr.hbm [resolvable:$true] %s207_s3 }
  0x35   : > { %s183_s12 = sshll.u32 %s11413_s16, 4  ;;  %s11414_s13 = smov [#allocation7]   ;;  %s184_s12 = int_to_ptr.vmem [resolvable:$true] %s183_s12 }
  0x36   : > { %11115 = dma.hbm_to_vmem [thread:$0]  (!%p11496_p10), %s182_s27, 16, %s184_s12, [#allocation3]  }
  0x37   : > { %s209_s8 = sshll.u32 %s11414_s13, 4  ;;  %s13655_s25 = sand.u32 1, %s11401_s20   ;;  %s210_s8 = int_to_ptr.vmem [resolvable:$true] %s209_s8 }
  0x38   : > { %s8263_s1 = sshll.u32 %s13655_s25, 8  ;;  %s8264_s6 = sshll.u32 %s11405_s21, 8 }
  0x39   : > { %11121 = dma.hbm_to_vmem [thread:$0]  (!%p11496_p10), %s208_s3, 16, %s210_s8, [#allocation6]  }
  0x3a   : > { %s246_s9 = scalar_lea.vmem [#allocation10], %s8263_s1  ;;  %s250_s23 = scalar_lea.hbm %s13635_s4, %s8264_s6 }
  0x3b   : > { %s254_s15 = sshll.u32 %s246_s9, 4  ;;  %s252_s16 = sshll.u32 %s250_s23, 4  ;;  %s255_s15 = int_to_ptr.vmem [resolvable:$true] %s254_s15  ;;  %s253_s16 = int_to_ptr.hbm [resolvable:$true] %s252_s16 }
  0x3c   : > { %s11301_s27 = sshra.s32 %s253_s16, 4  ;;  %s11308_s7 = scalar_lea.hbm %s13635_s4, 2816  ;;  %s11302_s27 = int_to_ptr.hbm [resolvable:$true] %s11301_s27 }
  0x3d   : > { %s11303_s12 = scalar_lea.hbm %s11302_s27, 256  ;;  %p11309_p10 = scmp.lt.s32.totalorder %s11302_s27, %s13635_s4 }
  0x3e   : > { %p11304_p1 = scmp.ne.s32.totalorder %s11302_s27, %s11303_s12  ;;  %p11310_p12 = scmp.lt.s32.totalorder %s11308_s7, %s11303_s12 }
  0x40   : > { %p11306_p2 = pnand %p11304_p1, %p11215_p9  ;;  %p11311_p13 = por %p11310_p12, %p11309_p10 }
  0x42   : > { %p11307_p11 = pneg %p11306_p2 }
  0x44   : > { %p11312_p0 = pnand %p11311_p13, %p11307_p11 }
  0x46   : > { %11315 = shalt.err (!%p11312_p0)
}
  0x47   : > { %11128 = dma.hbm_to_vmem [thread:$0]  (!%p11531_p7), %s253_s16, 4096, %s255_s15, %s11535_s11  }
  0x48   : > { %263 = sbr.rel (%p11488_p8) target bundleno = 1377 (0x561), region = 40  ;;  %p13656_p9 = scmp.eq.s32.totalorder (!%p11488_p8), %s11466_s22, 0 }
  0x4d   : > { %11376 = dma.done.wait (%p13656_p9), [#allocation3], 16   ;;  %p13657_p3 = pmov %p13656_p9 }
  0x4f   : > { %11378 = vsyncadd (%p13657_p3), [#allocation3], 4294967280  ;;  %p13658_p1 = pmov %p13657_p3 }
  0x51   : > { %11380 = dma.done.wait (%p13658_p1), [#allocation6], 528   ;;  %p13659_p2 = pmov %p13658_p1 }
  0x52   : > { %s280_s10 = sand.u32 1, %s11466_s22   ;;  %s11591_s11 = sand.u32 1, %s11397_s19  }
  0x53   : > { %11382 = vsyncadd (%p13659_p2), [#allocation6], 4294966768  ;;  %s8269_s29 = sshll.u32 %s11591_s11, 12  ;;  %s281_s26 = scalar_lea.sflag [#allocation9], %s280_s10 }
  0x54   : > { %s11594_s28 = scalar_lea.vmem [#allocation8], %s8269_s29 }
  0x55   : > { %11384 = dma.done.wait (%p11475_p4), %s281_s26, 69632  }
  0x56   : > { %11386 = vsyncadd (%p11475_p4), %s281_s26, 4294897664  ;;  %v335_v0 = vld [vmem:[#allocation5 + $0x18] sm:$0xff]  ;;  %v334_v1 = vld [vmem:[#allocation5 + $0x10] sm:$0xff]  ;;  %vm337_vm0 = vcmask 261120   ;;  %s8270_s24 = sshll.u32 %s11591_s11, 8  ;;  %vm7822_vm1 = vcmask 1040384  }
  0x57   : > { %353 = vmatpush.msra.mxu0 %v335_v0  ;;  %v333_v2 = vld [vmem:[#allocation5 + $0x8] sm:$0xff]  ;;  %v332_v3 = vld [vmem:[#allocation5] sm:$0xff]  ;;  %v331_v4 = vld [vmem:[#allocation2] sm:$0x1]  ;;  %s11858_s1 = scalar_lea.vmem [#allocation10], %s8270_s24  ;;  %vm7824_vm2 = vcmask 1042434  }
  0x58   : > { %v9299_v5 = vld [vmem:[%s11594_s28 + $0x800] sm:$0xf]  ;;  %v10838_v7 = vld [vmem:[%s11594_s28 + $0x804] sm:$0xf]  ;;  %v9307_v10 = vld [vmem:[%s11594_s28 + $0x808] sm:$0xf] }
  0x59   : > { %354 = vmatpush.msra.mxu0 %v334_v1  ;;  %v10966_v6 = vld [vmem:[%s11594_s28 + $0xbfc] sm:$0xf0]  ;;  %v9301_v9 = vld [vmem:[%s11594_s28 + $0xc00] sm:$0xf0]  ;;  %v10967_v11 = vld [vmem:[%s11594_s28 + $0xc04] sm:$0xf0] }
  0x5a   : > { %v9300_v8 = vor.u32 %v10966_v6, %v9299_v5  ;;  %v9304_v12 = vor.u32 %v10838_v7, %v9301_v9  ;;  %v9308_v13 = vor.u32 %v10967_v11, %v9307_v10  ;;  %v10839_v14 = vld [vmem:[%s11594_s28 + $0x80c] sm:$0xf]  ;;  %v8275_v17 = vld [vmem:[%s11594_s28] sm:$0xf]  ;;  %v10582_v19 = vld [vmem:[%s11594_s28 + $0x4] sm:$0xf] }
  0x5b   : > { %355 = vmatpush.msra.mxu0 %v333_v2  ;;  %v9309_v15 = vld [vmem:[%s11594_s28 + $0xc08] sm:$0xf0]  ;;  %v10710_v18 = vld [vmem:[%s11594_s28 + $0x3fc] sm:$0xf0]  ;;  %v8277_v21 = vld [vmem:[%s11594_s28 + $0x400] sm:$0xf0] }
  0x5c   : > { %4020 = vmatpush.bf16.msra.mxu1 %v9300_v8  ;;  %v9312_v16 = vor.u32 %v10839_v14, %v9309_v15  ;;  %4033 = vmatpush.bf16.msra.mxu2 %v9304_v12  ;;  %v8276_v20 = vor.u32 %v10710_v18, %v8275_v17  ;;  %v8283_v22 = vld [vmem:[%s11594_s28 + $0x8] sm:$0xf]  ;;  %v8280_v24 = vor.u32 %v10582_v19, %v8277_v21  ;;  %v10583_v26 = vld [vmem:[%s11594_s28 + $0xc] sm:$0xf]  ;;  %v10840_v29 = vld [vmem:[%s11594_s28 + $0x814] sm:$0xf] }
  0x5d   : > { %356 = vmatpush.msra.mxu0 %v332_v3  ;;  %4046 = vmatpush.bf16.msra.mxu3 %v9308_v13  ;;  %v10711_v23 = vld [vmem:[%s11594_s28 + $0x404] sm:$0xf0]  ;;  %v8285_v27 = vld [vmem:[%s11594_s28 + $0x408] sm:$0xf0]  ;;  %v9317_v30 = vld [vmem:[%s11594_s28 + $0xc10] sm:$0xf0] }
  0x5e   : > { %8272 = vmatmul.msk.f32.vlgmr.msra.gmra.mxu0 %vm337_vm0, %v331_v4  ;;  %v8284_v25 = vor.u32 %v10711_v23, %v8283_v22  ;;  %v8288_v28 = vor.u32 %v10583_v26, %v8285_v27  ;;  %v9323_v31 = vld [vmem:[%s11594_s28 + $0x818] sm:$0xf]  ;;  %v9320_v32 = vor.u32 %v10840_v29, %v9317_v30  ;;  %v9315_v34 = vld [vmem:[%s11594_s28 + $0x810] sm:$0xf]  ;;  %v10841_v38 = vld [vmem:[%s11594_s28 + $0x81c] sm:$0xf] }
  0x5f   : > { %4059 = vmatpush.bf16.msrb.mxu0 %v9312_v16  ;;  %v10969_v33 = vld [vmem:[%s11594_s28 + $0xc14] sm:$0xf0]  ;;  %v10968_v35 = vld [vmem:[%s11594_s28 + $0xc0c] sm:$0xf0]  ;;  %v9325_v39 = vld [vmem:[%s11594_s28 + $0xc18] sm:$0xf0] }
  0x60   : > { %4021 = vmatpush.bf16.msra.mxu1 %v8276_v20  ;;  %4034 = vmatpush.bf16.msra.mxu2 %v8280_v24  ;;  %v9324_v36 = vor.u32 %v10969_v33, %v9323_v31  ;;  %v9316_v37 = vor.u32 %v10968_v35, %v9315_v34  ;;  %v10584_v40 = vld [vmem:[%s11594_s28 + $0x14] sm:$0xf]  ;;  %v9328_v41 = vor.u32 %v10841_v38, %v9325_v39  ;;  %v8299_v43 = vld [vmem:[%s11594_s28 + $0x18] sm:$0xf]  ;;  %v8291_v47 = vld [vmem:[%s11594_s28 + $0x10] sm:$0xf] }
  0x61   : > { %4047 = vmatpush.bf16.msra.mxu3 %v8284_v25  ;;  %v8293_v42 = vld [vmem:[%s11594_s28 + $0x410] sm:$0xf0]  ;;  %v10713_v44 = vld [vmem:[%s11594_s28 + $0x414] sm:$0xf0]  ;;  %v10712_v48 = vld [vmem:[%s11594_s28 + $0x40c] sm:$0xf0] }
  0x62   : > { %v8296_v45 = vor.u32 %v10584_v40, %v8293_v42  ;;  %v8300_v46 = vor.u32 %v10713_v44, %v8299_v43  ;;  %v10585_v49 = vld [vmem:[%s11594_s28 + $0x1c] sm:$0xf]  ;;  %v8292_v50 = vor.u32 %v10712_v48, %v8291_v47  ;;  %v10842_v56 = vld [vmem:[%s11594_s28 + $0x824] sm:$0xf]  ;;  %v9339_v58 = vld [vmem:[%s11594_s28 + $0x828] sm:$0xf] }
  0x63   : > { %4060 = vmatpush.bf16.msrb.mxu0 %v8288_v28  ;;  %v8301_v51 = vld [vmem:[%s11594_s28 + $0x418] sm:$0xf0]  ;;  %v9333_v57 = vld [vmem:[%s11594_s28 + $0xc20] sm:$0xf0]  ;;  %v10971_v59 = vld [vmem:[%s11594_s28 + $0xc24] sm:$0xf0] }
  0x64   : > { %4085 = vmatpush.bf16.msrb.mxu2 %v9320_v32  ;;  %4072 = vmatpush.bf16.msrb.mxu1 %v9316_v37  ;;  %v8304_v52 = vor.u32 %v10585_v49, %v8301_v51  ;;  %v336_v53 = vld [vmem:[#allocation7] sm:$0x1]  ;;  %v9331_v60 = vld [vmem:[%s11594_s28 + $0x820] sm:$0xf]  ;;  %v10843_v63 = vld [vmem:[%s11594_s28 + $0x82c] sm:$0xf]  ;;  %v9336_v2 = vor.u32 %v10842_v56, %v9333_v57  ;;  %v9340_v3 = vor.u32 %v10971_v59, %v9339_v58 }
  0x65   : > { %4098 = vmatpush.bf16.msrb.mxu3 %v9324_v36  ;;  %v10970_v61 = vld [vmem:[%s11594_s28 + $0xc1c] sm:$0xf0]  ;;  %v9341_v0 = vld [vmem:[%s11594_s28 + $0xc28] sm:$0xf0]  ;;  %v10586_v4 = vld [vmem:[%s11594_s28 + $0x24] sm:$0xf] }
  0x66   : > { %v8309_v5 = vld [vmem:[%s11594_s28 + $0x420] sm:$0xf0]  ;;  %v9332_v6 = vor.u32 %v10970_v61, %v9331_v60  ;;  %v9344_v7 = vor.u32 %v10843_v63, %v9341_v0  ;;  %v8315_v8 = vld [vmem:[%s11594_s28 + $0x28] sm:$0xf]  ;;  %v8307_v10 = vld [vmem:[%s11594_s28 + $0x20] sm:$0xf] }
  0x67   : > { %4111 = vmatpush.bf16.msra.mxu0 %v9328_v41  ;;  %v10715_v9 = vld [vmem:[%s11594_s28 + $0x424] sm:$0xf0]  ;;  %v10714_v11 = vld [vmem:[%s11594_s28 + $0x41c] sm:$0xf0]  ;;  %v10587_v12 = vld [vmem:[%s11594_s28 + $0x2c] sm:$0xf]  ;;  %v8312_v14 = vor.u32 %v10586_v4, %v8309_v5 }
  0x68   : > { %4086 = vmatpush.bf16.msrb.mxu2 %v8296_v45  ;;  %4073 = vmatpush.bf16.msrb.mxu1 %v8292_v50  ;;  %v8317_v13 = vld [vmem:[%s11594_s28 + $0x428] sm:$0xf0]  ;;  %v8316_v15 = vor.u32 %v10715_v9, %v8315_v8  ;;  %v8308_v16 = vor.u32 %v10714_v11, %v8307_v10  ;;  %v10844_v18 = vld [vmem:[%s11594_s28 + $0x834] sm:$0xf]  ;;  %v9355_v20 = vld [vmem:[%s11594_s28 + $0x838] sm:$0xf] }
  0x69   : > { %4099 = vmatpush.bf16.msrb.mxu3 %v8300_v46  ;;  %v8320_v17 = vor.u32 %v10587_v12, %v8317_v13  ;;  %v9349_v19 = vld [vmem:[%s11594_s28 + $0xc30] sm:$0xf0]  ;;  %v10973_v21 = vld [vmem:[%s11594_s28 + $0xc34] sm:$0xf0]  ;;  %v9347_v22 = vld [vmem:[%s11594_s28 + $0x830] sm:$0xf] }
  0x6a   : > { %v10972_v23 = vld [vmem:[%s11594_s28 + $0xc2c] sm:$0xf0]  ;;  %v10845_v24 = vld [vmem:[%s11594_s28 + $0x83c] sm:$0xf]  ;;  %v9352_v26 = vor.u32 %v10844_v18, %v9349_v19  ;;  %v9356_v27 = vor.u32 %v10973_v21, %v9355_v20  ;;  %v10588_v28 = vld [vmem:[%s11594_s28 + $0x34] sm:$0xf] }
  0x6b   : > { %4112 = vmatpush.bf16.msra.mxu0 %v8304_v52  ;;  %v9357_v25 = vld [vmem:[%s11594_s28 + $0xc38] sm:$0xf0]  ;;  %v8325_v29 = vld [vmem:[%s11594_s28 + $0x430] sm:$0xf0]  ;;  %v9348_v30 = vor.u32 %v10972_v23, %v9347_v22  ;;  %v8331_v32 = vld [vmem:[%s11594_s28 + $0x38] sm:$0xf] }
  0x6c   : > { %v9360_v31 = vor.u32 %v10845_v24, %v9357_v25  ;;  %v10717_v33 = vld [vmem:[%s11594_s28 + $0x434] sm:$0xf0]  ;;  %v8323_v34 = vld [vmem:[%s11594_s28 + $0x30] sm:$0xf]  ;;  %v10589_v36 = vld [vmem:[%s11594_s28 + $0x3c] sm:$0xf]  ;;  %v8328_v38 = vor.u32 %v10588_v28, %v8325_v29 }
  0x6d   : > { %v10716_v35 = vld [vmem:[%s11594_s28 + $0x42c] sm:$0xf0]  ;;  %v8333_v37 = vld [vmem:[%s11594_s28 + $0x438] sm:$0xf0]  ;;  %v8332_v39 = vor.u32 %v10717_v33, %v8331_v32  ;;  %v10846_v42 = vld [vmem:[%s11594_s28 + $0x844] sm:$0xf] }
  0x6e   : > { %v8324_v40 = vor.u32 %v10716_v35, %v8323_v34  ;;  %v8336_v41 = vor.u32 %v10589_v36, %v8333_v37  ;;  %v9365_v43 = vld [vmem:[%s11594_s28 + $0xc40] sm:$0xf0]  ;;  %v9371_v44 = vld [vmem:[%s11594_s28 + $0x848] sm:$0xf]  ;;  %v9363_v46 = vld [vmem:[%s11594_s28 + $0x840] sm:$0xf] }
  0x6f   : > { %v10975_v45 = vld [vmem:[%s11594_s28 + $0xc44] sm:$0xf0]  ;;  %v10974_v47 = vld [vmem:[%s11594_s28 + $0xc3c] sm:$0xf0]  ;;  %v10847_v48 = vld [vmem:[%s11594_s28 + $0x84c] sm:$0xf]  ;;  %v9368_v50 = vor.u32 %v10846_v42, %v9365_v43 }
  0x70   : > { %v9373_v49 = vld [vmem:[%s11594_s28 + $0xc48] sm:$0xf0]  ;;  %v9372_v51 = vor.u32 %v10975_v45, %v9371_v44  ;;  %v10590_v52 = vld [vmem:[%s11594_s28 + $0x44] sm:$0xf]  ;;  %v8347_v56 = vld [vmem:[%s11594_s28 + $0x48] sm:$0xf] }
  0x71   : > { %v10719_v57 = vld [vmem:[%s11594_s28 + $0x444] sm:$0xf0]  ;;  %v8339_v58 = vld [vmem:[%s11594_s28 + $0x40] sm:$0xf]  ;;  %v10591_v60 = vld [vmem:[%s11594_s28 + $0x4c] sm:$0xf] }
  0x72   : > { %v10718_v59 = vld [vmem:[%s11594_s28 + $0x43c] sm:$0xf0]  ;;  %v8349_v61 = vld [vmem:[%s11594_s28 + $0x448] sm:$0xf0]  ;;  %v8348_v63 = vor.u32 %v10719_v57, %v8347_v56  ;;  %v9381_v4 = vld [vmem:[%s11594_s28 + $0xc50] sm:$0xf0] }
  0x73   : > { %v8340_v0 = vor.u32 %v10718_v59, %v8339_v58  ;;  %v9387_v5 = vld [vmem:[%s11594_s28 + $0x858] sm:$0xf]  ;;  %v10976_v8 = vld [vmem:[%s11594_s28 + $0xc4c] sm:$0xf0]  ;;  %v10849_v9 = vld [vmem:[%s11594_s28 + $0x85c] sm:$0xf] }
  0x74   : > { %v9389_v10 = vld [vmem:[%s11594_s28 + $0xc58] sm:$0xf0]  ;;  %v10592_v13 = vld [vmem:[%s11594_s28 + $0x54] sm:$0xf]  ;;  %v10721_v18 = vld [vmem:[%s11594_s28 + $0x454] sm:$0xf0] }
  0x75   : > { %v8355_v19 = vld [vmem:[%s11594_s28 + $0x50] sm:$0xf]  ;;  %v10593_v21 = vld [vmem:[%s11594_s28 + $0x5c] sm:$0xf]  ;;  %v9397_v28 = vld [vmem:[%s11594_s28 + $0xc60] sm:$0xf0] }
  0x76   : > { %v10720_v20 = vld [vmem:[%s11594_s28 + $0x44c] sm:$0xf0]  ;;  %v8365_v22 = vld [vmem:[%s11594_s28 + $0x458] sm:$0xf0]  ;;  %v9403_v29 = vld [vmem:[%s11594_s28 + $0x868] sm:$0xf] }
  0x77   : > { %v8356_v25 = vor.u32 %v10720_v20, %v8355_v19  ;;  %v10978_v32 = vld [vmem:[%s11594_s28 + $0xc5c] sm:$0xf0]  ;;  %v10851_v33 = vld [vmem:[%s11594_s28 + $0x86c] sm:$0xf]  ;;  %v10594_v37 = vld [vmem:[%s11594_s28 + $0x64] sm:$0xf] }
  0x78   : > { %v9405_v34 = vld [vmem:[%s11594_s28 + $0xc68] sm:$0xf0]  ;;  %v10723_v42 = vld [vmem:[%s11594_s28 + $0x464] sm:$0xf0]  ;;  %v8371_v43 = vld [vmem:[%s11594_s28 + $0x60] sm:$0xf] }
  0x79   : > { %v10722_v44 = vld [vmem:[%s11594_s28 + $0x45c] sm:$0xf0]  ;;  %v10595_v45 = vld [vmem:[%s11594_s28 + $0x6c] sm:$0xf]  ;;  %v10980_v56 = vld [vmem:[%s11594_s28 + $0xc6c] sm:$0xf0] }
  0x7a   : > { %v10853_v57 = vld [vmem:[%s11594_s28 + $0x87c] sm:$0xf]  ;;  %v9437_v19 = vld [vmem:[%s11594_s28 + $0xc88] sm:$0xf0]  ;;  %vm7826_vm3 = vcmask 1041408   ;;  %vm7828_vm4 = vcmask 1044484  }
  0x7b   : > { %v9421_v58 = vld [vmem:[%s11594_s28 + $0xc78] sm:$0xf0]  ;;  %vm7830_vm5 = vcmask 1046534   ;;  %vm7832_vm6 = vcmask 1045508   ;;  %vm7834_vm7 = vcmask 1043456   ;;  %s11901_s6 = scalar_lea.vmem [#allocation11], %s8270_s24 }
  0x7c   : > { %s10578_s9 = sshll.u32 %s11466_s22, 8  ;;  %s8130_s22 = sshll.u32 %s11901_s6, 4  ;;  %s8131_s22 = int_to_ptr.vmem [resolvable:$true] %s8130_s22 }
  0x7d   : > { %s8128_s17 = scalar_lea.hbm %s13636_s5, %s10578_s9  ;;  %s8118_s16 = scalar_lea.sflag [#allocation4], %s11591_s11 }
  0x7e   : > { %s8132_s23 = sshll.u32 %s8128_s17, 4  ;;  %s11351_s7 = scalar_lea.hbm %s13636_s5, 2816  ;;  %s8133_s23 = int_to_ptr.hbm [resolvable:$true] %s8132_s23 }
  0x7f   : > { %s11345_s27 = sshra.s32 %s8133_s23, 4  ;;  %s11346_s27 = int_to_ptr.hbm [resolvable:$true] %s11345_s27 }
  0x80   : > { %s11347_s12 = scalar_lea.hbm %s11346_s27, 256  ;;  %p11352_p11 = scmp.lt.s32.totalorder %s11346_s27, %s13636_s5 }
  0x81   : > { %p11348_p4 = scmp.ne.s32.totalorder %s11346_s27, %s11347_s12  ;;  %p11353_p10 = scmp.lt.s32.totalorder %s11351_s7, %s11347_s12 }
  0x83   : > { %p11349_p8 = pnand %p11348_p4, %p11517_p5  ;;  %p11354_p12 = por %p11353_p10, %p11352_p11 }
  0x85   : > { %p11350_p7 = pneg %p11349_p8 }
  0x87   : > { %p11355_p13 = pnand %p11354_p12, %p11350_p7 }
  0xdb   : > { %v358_v54 = vpop.f32.mrf.mxu0 }
  0xdc   : > { %v359_v55 = vadd.f32 %v358_v54, %v336_v53  ;;  %v8341_v53 = vld [vmem:[%s11594_s28 + $0x440] sm:$0xf0]  ;;  %v9364_v54 = vor.u32 %v10974_v47, %v9363_v46  ;;  %v8381_v46 = vld [vmem:[%s11594_s28 + $0x468] sm:$0xf0] }
  0xde   : > { %v361_v62 = vmax.f32 %v359_v55, 0.0  ;;  %v9376_v55 = vor.u32 %v10847_v48, %v9373_v49  ;;  %v8372_v49 = vor.u32 %v10722_v44, %v8371_v43  ;;  %v9453_v43 = vld [vmem:[%s11594_s28 + $0xc98] sm:$0xf0] }
  0xe0   : > { %v11641_v1 = vpack.c.bf16 %v361_v62, %v361_v62  ;;  %v8344_v62 = vor.u32 %v10590_v52, %v8341_v53  ;;  %v9413_v52 = vld [vmem:[%s11594_s28 + $0xc70] sm:$0xf0]  ;;  %v9419_v53 = vld [vmem:[%s11594_s28 + $0x878] sm:$0xf] }
  0xe2   : > { %10321 = vmatmul.msk.bf16.vlgmr.msra.gmra.mxu1 %vm337_vm0, %v11641_v1  ;;  %10322 = vmatmul.msk.bf16.vlgmr.msra.gmra.mxu2 %vm337_vm0, %v11641_v1 }
  0xe3   : > { %10323 = vmatmul.msk.bf16.vlgmr.msra.gmra.mxu3 %vm337_vm0, %v11641_v1  ;;  %10324 = vmatmul.msk.bf16.vlgmr.msrb.gmra.mxu0 %vm337_vm0, %v11641_v1 }
  0xe4   : > { %4137 = vmatpush.bf16.msra.mxu2 %v9336_v2  ;;  %4150 = vmatpush.bf16.msra.mxu3 %v9340_v3  ;;  %v8352_v2 = vor.u32 %v10591_v60, %v8349_v61  ;;  %v10848_v3 = vld [vmem:[%s11594_s28 + $0x854] sm:$0xf] }
  0xe5   : > { %4124 = vmatpush.bf16.msra.mxu1 %v9332_v6  ;;  %4163 = vmatpush.bf16.msrb.mxu0 %v9344_v7  ;;  %v10977_v6 = vld [vmem:[%s11594_s28 + $0xc54] sm:$0xf0]  ;;  %v9379_v7 = vld [vmem:[%s11594_s28 + $0x850] sm:$0xf]  ;;  %v9384_v11 = vor.u32 %v10848_v3, %v9381_v4  ;;  %v10596_v61 = vld [vmem:[%s11594_s28 + $0x74] sm:$0xf] }
  0xe6   : > { %v9388_v12 = vor.u32 %v10977_v6, %v9387_v5  ;;  %v10725_v3 = vld [vmem:[%s11594_s28 + $0x474] sm:$0xf0]  ;;  %v8387_v4 = vld [vmem:[%s11594_s28 + $0x70] sm:$0xf]  ;;  %v10597_v6 = vld [vmem:[%s11594_s28 + $0x7c] sm:$0xf] }
  0xe7   : > { %v10724_v5 = vld [vmem:[%s11594_s28 + $0x46c] sm:$0xf0] }
  0xe8   : > { %4138 = vmatpush.bf16.msra.mxu2 %v8312_v14  ;;  %4151 = vmatpush.bf16.msra.mxu3 %v8316_v15  ;;  %v8357_v14 = vld [vmem:[%s11594_s28 + $0x450] sm:$0xf0]  ;;  %v9380_v15 = vor.u32 %v10976_v8, %v9379_v7  ;;  %v8397_v7 = vld [vmem:[%s11594_s28 + $0x478] sm:$0xf0] }
  0xe9   : > { %4125 = vmatpush.bf16.msra.mxu1 %v8308_v16  ;;  %4164 = vmatpush.bf16.msrb.mxu0 %v8320_v17  ;;  %v9392_v16 = vor.u32 %v10849_v9, %v9389_v10  ;;  %v8363_v17 = vld [vmem:[%s11594_s28 + $0x58] sm:$0xf]  ;;  %v8360_v23 = vor.u32 %v10592_v13, %v8357_v14  ;;  %v8388_v10 = vor.u32 %v10724_v5, %v8387_v4  ;;  %v9429_v13 = vld [vmem:[%s11594_s28 + $0xc80] sm:$0xf0]  ;;  %v9435_v14 = vld [vmem:[%s11594_s28 + $0x888] sm:$0xf] }
  0xea   : > { %v8364_v24 = vor.u32 %v10721_v18, %v8363_v17  ;;  %v10982_v17 = vld [vmem:[%s11594_s28 + $0xc7c] sm:$0xf0]  ;;  %v10855_v18 = vld [vmem:[%s11594_s28 + $0x88c] sm:$0xf] }
  0xeb   : > { %v9469_v4 = vld [vmem:[%s11594_s28 + $0xca8] sm:$0xf0] }
  0xf2   : > { %10325 = vmatmul.msk.bf16.vlgmr.msrb.gmra.mxu1 %vm337_vm0, %v11641_v1  ;;  %10326 = vmatmul.msk.bf16.vlgmr.msrb.gmra.mxu2 %vm337_vm0, %v11641_v1 }
  0xf3   : > { %10327 = vmatmul.msk.bf16.vlgmr.msrb.gmra.mxu3 %vm337_vm0, %v11641_v1  ;;  %10328 = vmatmul.msk.bf16.vlgmr.msra.gmra.mxu0 %vm337_vm0, %v11641_v1 }
  0xf4   : > { %4189 = vmatpush.bf16.msrb.mxu2 %v9352_v26  ;;  %4202 = vmatpush.bf16.msrb.mxu3 %v9356_v27  ;;  %v8368_v26 = vor.u32 %v10593_v21, %v8365_v22  ;;  %v10850_v27 = vld [vmem:[%s11594_s28 + $0x864] sm:$0xf] }
  0xf5   : > { %4176 = vmatpush.bf16.msrb.mxu1 %v9348_v30  ;;  %4215 = vmatpush.bf16.msra.mxu0 %v9360_v31  ;;  %v10979_v30 = vld [vmem:[%s11594_s28 + $0xc64] sm:$0xf0]  ;;  %v9395_v31 = vld [vmem:[%s11594_s28 + $0x860] sm:$0xf]  ;;  %v9400_v35 = vor.u32 %v10850_v27, %v9397_v28  ;;  %v10598_v22 = vld [vmem:[%s11594_s28 + $0x84] sm:$0xf] }
  0xf6   : > { %v9404_v36 = vor.u32 %v10979_v30, %v9403_v29  ;;  %v10727_v27 = vld [vmem:[%s11594_s28 + $0x484] sm:$0xf0]  ;;  %v8403_v28 = vld [vmem:[%s11594_s28 + $0x80] sm:$0xf]  ;;  %v10599_v30 = vld [vmem:[%s11594_s28 + $0x8c] sm:$0xf] }
  0xf7   : > { %v10726_v29 = vld [vmem:[%s11594_s28 + $0x47c] sm:$0xf0] }
  0xf8   : > { %4190 = vmatpush.bf16.msrb.mxu2 %v8328_v38  ;;  %4203 = vmatpush.bf16.msrb.mxu3 %v8332_v39  ;;  %v8373_v38 = vld [vmem:[%s11594_s28 + $0x460] sm:$0xf0]  ;;  %v9396_v39 = vor.u32 %v10978_v32, %v9395_v31  ;;  %v8413_v31 = vld [vmem:[%s11594_s28 + $0x488] sm:$0xf0] }
  0xf9   : > { %4177 = vmatpush.bf16.msrb.mxu1 %v8324_v40  ;;  %4216 = vmatpush.bf16.msra.mxu0 %v8336_v41  ;;  %v9408_v40 = vor.u32 %v10851_v33, %v9405_v34  ;;  %v8379_v41 = vld [vmem:[%s11594_s28 + $0x68] sm:$0xf]  ;;  %v8376_v47 = vor.u32 %v10594_v37, %v8373_v38  ;;  %v8404_v34 = vor.u32 %v10726_v29, %v8403_v28  ;;  %v9445_v37 = vld [vmem:[%s11594_s28 + $0xc90] sm:$0xf0]  ;;  %v9451_v38 = vld [vmem:[%s11594_s28 + $0x898] sm:$0xf] }
  0xfa   : > { %v8380_v48 = vor.u32 %v10723_v42, %v8379_v41  ;;  %v10984_v41 = vld [vmem:[%s11594_s28 + $0xc8c] sm:$0xf0]  ;;  %v10857_v42 = vld [vmem:[%s11594_s28 + $0x89c] sm:$0xf] }
 0x102   : > { %10329 = vmatmul.msk.bf16.vlgmr.msra.gmra.mxu1 %vm337_vm0, %v11641_v1  ;;  %10330 = vmatmul.msk.bf16.vlgmr.msra.gmra.mxu2 %vm337_vm0, %v11641_v1 }
 0x103   : > { %10331 = vmatmul.msk.bf16.vlgmr.msra.gmra.mxu3 %vm337_vm0, %v11641_v1  ;;  %10332 = vmatmul.msk.bf16.vlgmr.msrb.gmra.mxu0 %vm337_vm0, %v11641_v1 }
 0x104   : > { %4241 = vmatpush.bf16.msra.mxu2 %v9368_v50  ;;  %4254 = vmatpush.bf16.msra.mxu3 %v9372_v51  ;;  %v8384_v50 = vor.u32 %v10595_v45, %v8381_v46  ;;  %v10852_v51 = vld [vmem:[%s11594_s28 + $0x874] sm:$0xf] }
 0x105   : > { %4228 = vmatpush.bf16.msra.mxu1 %v9364_v54  ;;  %4267 = vmatpush.bf16.msrb.mxu0 %v9376_v55  ;;  %v10981_v54 = vld [vmem:[%s11594_s28 + $0xc74] sm:$0xf0]  ;;  %v9411_v55 = vld [vmem:[%s11594_s28 + $0x870] sm:$0xf]  ;;  %v9416_v59 = vor.u32 %v10852_v51, %v9413_v52  ;;  %v10600_v46 = vld [vmem:[%s11594_s28 + $0x94] sm:$0xf] }
 0x106   : > { %v9420_v60 = vor.u32 %v10981_v54, %v9419_v53  ;;  %v10729_v51 = vld [vmem:[%s11594_s28 + $0x494] sm:$0xf0]  ;;  %v8419_v52 = vld [vmem:[%s11594_s28 + $0x90] sm:$0xf]  ;;  %v10601_v54 = vld [vmem:[%s11594_s28 + $0x9c] sm:$0xf] }
 0x107   : > { %v10728_v53 = vld [vmem:[%s11594_s28 + $0x48c] sm:$0xf0] }
 0x108   : > { %4242 = vmatpush.bf16.msra.mxu2 %v8344_v62  ;;  %4255 = vmatpush.bf16.msra.mxu3 %v8348_v63  ;;  %v8389_v62 = vld [vmem:[%s11594_s28 + $0x470] sm:$0xf0]  ;;  %v9412_v63 = vor.u32 %v10980_v56, %v9411_v55  ;;  %v8429_v55 = vld [vmem:[%s11594_s28 + $0x498] sm:$0xf0] }
 0x109   : > { %4229 = vmatpush.bf16.msra.mxu1 %v8340_v0  ;;  %4268 = vmatpush.bf16.msrb.mxu0 %v8352_v2  ;;  %v9424_v0 = vor.u32 %v10853_v57, %v9421_v58  ;;  %v8395_v2 = vld [vmem:[%s11594_s28 + $0x78] sm:$0xf]  ;;  %v8392_v8 = vor.u32 %v10596_v61, %v8389_v62  ;;  %v8420_v58 = vor.u32 %v10728_v53, %v8419_v52  ;;  %v9461_v61 = vld [vmem:[%s11594_s28 + $0xca0] sm:$0xf0]  ;;  %v9467_v62 = vld [vmem:[%s11594_s28 + $0x8a8] sm:$0xf] }
 0x10a   : > { %v8396_v9 = vor.u32 %v10725_v3, %v8395_v2  ;;  %v10986_v2 = vld [vmem:[%s11594_s28 + $0xc9c] sm:$0xf0]  ;;  %v10859_v3 = vld [vmem:[%s11594_s28 + $0x8ac] sm:$0xf] }
 0x112   : > { %10333 = vmatmul.msk.bf16.vlgmr.msrb.gmra.mxu1 %vm337_vm0, %v11641_v1  ;;  %10334 = vmatmul.msk.bf16.vlgmr.msrb.gmra.mxu2 %vm337_vm0, %v11641_v1 }
 0x113   : > { %10335 = vmatmul.msk.bf16.vlgmr.msrb.gmra.mxu3 %vm337_vm0, %v11641_v1  ;;  %10336 = vmatmul.msk.bf16.vlgmr.msra.gmra.mxu0 %vm337_vm0, %v11641_v1 }
 0x114   : > { %4293 = vmatpush.bf16.msrb.mxu2 %v9384_v11  ;;  %4306 = vmatpush.bf16.msrb.mxu3 %v9388_v12  ;;  %v8400_v11 = vor.u32 %v10597_v6, %v8397_v7  ;;  %v10854_v12 = vld [vmem:[%s11594_s28 + $0x884] sm:$0xf] }
 0x115   : > { %4280 = vmatpush.bf16.msrb.mxu1 %v9380_v15  ;;  %4319 = vmatpush.bf16.msra.mxu0 %v9392_v16  ;;  %v10983_v15 = vld [vmem:[%s11594_s28 + $0xc84] sm:$0xf0]  ;;  %v9427_v16 = vld [vmem:[%s11594_s28 + $0x880] sm:$0xf]  ;;  %v9432_v20 = vor.u32 %v10854_v12, %v9429_v13  ;;  %v9472_v12 = vor.u32 %v10859_v3, %v9469_v4 }
 0x116   : > { %v9436_v21 = vor.u32 %v10983_v15, %v9435_v14  ;;  %v8443_v13 = vld [vmem:[%s11594_s28 + $0xa8] sm:$0xf]  ;;  %v8435_v15 = vld [vmem:[%s11594_s28 + $0xa0] sm:$0xf] }
 0x117   : > { %v10731_v14 = vld [vmem:[%s11594_s28 + $0x4a4] sm:$0xf0] }
 0x118   : > { %4294 = vmatpush.bf16.msrb.mxu2 %v8360_v23  ;;  %4307 = vmatpush.bf16.msrb.mxu3 %v8364_v24  ;;  %v8405_v23 = vld [vmem:[%s11594_s28 + $0x480] sm:$0xf0]  ;;  %v9428_v24 = vor.u32 %v10982_v17, %v9427_v16  ;;  %v10730_v16 = vld [vmem:[%s11594_s28 + $0x49c] sm:$0xf0]  ;;  %v10603_v17 = vld [vmem:[%s11594_s28 + $0xac] sm:$0xf] }
 0x119   : > { %4281 = vmatpush.bf16.msrb.mxu1 %v8356_v25  ;;  %4320 = vmatpush.bf16.msra.mxu0 %v8368_v26  ;;  %v9440_v25 = vor.u32 %v10855_v18, %v9437_v19  ;;  %v8411_v26 = vld [vmem:[%s11594_s28 + $0x88] sm:$0xf]  ;;  %v8408_v32 = vor.u32 %v10598_v22, %v8405_v23  ;;  %v8445_v18 = vld [vmem:[%s11594_s28 + $0x4a8] sm:$0xf0]  ;;  %v8436_v22 = vor.u32 %v10730_v16, %v8435_v15 }
 0x11a   : > { %v8412_v33 = vor.u32 %v10727_v27, %v8411_v26  ;;  %v8448_v23 = vor.u32 %v10603_v17, %v8445_v18  ;;  %v875_v27 = vld [vmem:[%s11858_s1] sm:$0xff] }
 0x11b   : > { %v3500_v28 = vperm.slane %v875_v27, 1  ;;  %v3501_v29 = vperm.slane %v875_v27, 2 }
 0x122   : > { %10337 = vmatmul.msk.bf16.vlgmr.msra.gmra.mxu1 %vm337_vm0, %v11641_v1  ;;  %10338 = vmatmul.msk.bf16.vlgmr.msra.gmra.mxu2 %vm337_vm0, %v11641_v1 }
 0x123   : > { %10339 = vmatmul.msk.bf16.vlgmr.msra.gmra.mxu3 %vm337_vm0, %v11641_v1  ;;  %10340 = vmatmul.msk.bf16.vlgmr.msrb.gmra.mxu0 %vm337_vm0, %v11641_v1 }
 0x124   : > { %4345 = vmatpush.bf16.msra.mxu2 %v9400_v35  ;;  %4358 = vmatpush.bf16.msra.mxu3 %v9404_v36  ;;  %v8416_v35 = vor.u32 %v10599_v30, %v8413_v31  ;;  %v10856_v36 = vld [vmem:[%s11594_s28 + $0x894] sm:$0xf] }
 0x125   : > { %4332 = vmatpush.bf16.msra.mxu1 %v9396_v39  ;;  %4371 = vmatpush.bf16.msrb.mxu0 %v9408_v40  ;;  %v10985_v39 = vld [vmem:[%s11594_s28 + $0xc94] sm:$0xf0]  ;;  %v9443_v40 = vld [vmem:[%s11594_s28 + $0x890] sm:$0xf]  ;;  %v9448_v44 = vor.u32 %v10856_v36, %v9445_v37  ;;  %v10860_v30 = vld [vmem:[%s11594_s28 + $0x8b4] sm:$0xf] }
 0x126   : > { %v9452_v45 = vor.u32 %v10985_v39, %v9451_v38  ;;  %v9477_v31 = vld [vmem:[%s11594_s28 + $0xcb0] sm:$0xf0]  ;;  %v10988_v37 = vld [vmem:[%s11594_s28 + $0xcac] sm:$0xf0]  ;;  %v10861_v38 = vld [vmem:[%s11594_s28 + $0x8bc] sm:$0xf] }
 0x127   : > { %v9485_v39 = vld [vmem:[%s11594_s28 + $0xcb8] sm:$0xf0] }
 0x128   : > { %4346 = vmatpush.bf16.msra.mxu2 %v8376_v47  ;;  %4359 = vmatpush.bf16.msra.mxu3 %v8380_v48  ;;  %v8421_v47 = vld [vmem:[%s11594_s28 + $0x490] sm:$0xf0]  ;;  %v9444_v48 = vor.u32 %v10984_v41, %v9443_v40  ;;  %v3502_v40 = vperm.slane %v875_v27, 3  ;;  %v3503_v41 = vperm.slane %v875_v27, 4  ;;  %v9488_v53 = vor.u32 %v10861_v38, %v9485_v39 }
 0x129   : > { %4333 = vmatpush.bf16.msra.mxu1 %v8372_v49  ;;  %4372 = vmatpush.bf16.msrb.mxu0 %v8384_v50  ;;  %v9456_v49 = vor.u32 %v10857_v42, %v9453_v43  ;;  %v8427_v50 = vld [vmem:[%s11594_s28 + $0x98] sm:$0xf]  ;;  %v8424_v56 = vor.u32 %v10600_v46, %v8421_v47  ;;  %v3506_v43 = vperm.slane %v875_v27, 7  ;;  %v3504_v46 = vperm.slane %v875_v27, 5 }
 0x12a   : > { %v8428_v57 = vor.u32 %v10729_v51, %v8427_v50  ;;  %v9480_v47 = vor.u32 %v10860_v30, %v9477_v31  ;;  %v8453_v50 = vld [vmem:[%s11594_s28 + $0x4b0] sm:$0xf0]  ;;  %v9499_v30 = vld [vmem:[%s11594_s28 + $0x8c8] sm:$0xf] }
 0x12b   : > { %v10991_v31 = vld [vmem:[%s11594_s28 + $0xcc4] sm:$0xf0] }
 0x132   : > { %10341 = vmatmul.msk.bf16.vlgmr.msrb.gmra.mxu1 %vm337_vm0, %v11641_v1  ;;  %10342 = vmatmul.msk.bf16.vlgmr.msrb.gmra.mxu2 %vm337_vm0, %v11641_v1 }
 0x133   : > { %10343 = vmatmul.msk.bf16.vlgmr.msrb.gmra.mxu3 %vm337_vm0, %v11641_v1  ;;  %10344 = vmatmul.msk.bf16.vlgmr.msra.gmra.mxu0 %vm337_vm0, %v11641_v1 }
 0x134   : > { %4397 = vmatpush.bf16.msrb.mxu2 %v9416_v59  ;;  %4410 = vmatpush.bf16.msrb.mxu3 %v9420_v60  ;;  %v8432_v59 = vor.u32 %v10601_v54, %v8429_v55  ;;  %v10858_v60 = vld [vmem:[%s11594_s28 + $0x8a4] sm:$0xf]  ;;  %v8459_v54 = vld [vmem:[%s11594_s28 + $0xb8] sm:$0xf] }
 0x135   : > { %4384 = vmatpush.bf16.msrb.mxu1 %v9412_v63  ;;  %4423 = vmatpush.bf16.msra.mxu0 %v9424_v0  ;;  %v10987_v63 = vld [vmem:[%s11594_s28 + $0xca4] sm:$0xf0]  ;;  %v9459_v0 = vld [vmem:[%s11594_s28 + $0x8a0] sm:$0xf]  ;;  %v9464_v7 = vor.u32 %v10858_v60, %v9461_v61  ;;  %v10733_v55 = vld [vmem:[%s11594_s28 + $0x4b4] sm:$0xf0] }
 0x136   : > { %v3499_v60 = vperm.slane %v875_v27, 0  ;;  %v8460_v3 = vor.u32 %v10733_v55, %v8459_v54 }
 0x138   : > { %4398 = vmatpush.bf16.msrb.mxu2 %v8392_v8  ;;  %4411 = vmatpush.bf16.msrb.mxu3 %v8396_v9  ;;  %v9468_v8 = vor.u32 %v10987_v63, %v9467_v62  ;;  %v10602_v9 = vld [vmem:[%s11594_s28 + $0xa4] sm:$0xf]  ;;  %v3505_v62 = vperm.slane %v875_v27, 6 }
 0x139   : > { %4385 = vmatpush.bf16.msrb.mxu1 %v8388_v10  ;;  %4424 = vmatpush.bf16.msra.mxu0 %v8400_v11  ;;  %v8437_v10 = vld [vmem:[%s11594_s28 + $0x4a0] sm:$0xf0]  ;;  %v9460_v11 = vor.u32 %v10986_v2, %v9459_v0 }
 0x13a   : > { %v8440_v19 = vor.u32 %v10602_v9, %v8437_v10  ;;  %v9493_v27 = vld [vmem:[%s11594_s28 + $0xcc0] sm:$0xf0] }
 0x142   : > { %10345 = vmatmul.msk.bf16.vlgmr.msra.gmra.mxu1 %vm337_vm0, %v11641_v1  ;;  %10346 = vmatmul.msk.bf16.vlgmr.msra.gmra.mxu2 %vm337_vm0, %v11641_v1 }
 0x143   : > { %10347 = vmatmul.msk.bf16.vlgmr.msra.gmra.mxu3 %vm337_vm0, %v11641_v1  ;;  %10348 = vmatmul.msk.bf16.vlgmr.msrb.gmra.mxu0 %vm337_vm0, %v11641_v1 }
 0x144   : > { %4449 = vmatpush.bf16.msra.mxu2 %v9432_v20  ;;  %4462 = vmatpush.bf16.msra.mxu3 %v9436_v21  ;;  %v8444_v20 = vor.u32 %v10731_v14, %v8443_v13 }
 0x145   : > { %4436 = vmatpush.bf16.msra.mxu1 %v9428_v24  ;;  %4475 = vmatpush.bf16.msrb.mxu0 %v9440_v25 }
 0x148   : > { %4450 = vmatpush.bf16.msra.mxu2 %v8408_v32  ;;  %4463 = vmatpush.bf16.msra.mxu3 %v8412_v33  ;;  %v9483_v33 = vld [vmem:[%s11594_s28 + $0x8b8] sm:$0xf] }
 0x149   : > { %4437 = vmatpush.bf16.msra.mxu1 %v8404_v34  ;;  %4476 = vmatpush.bf16.msrb.mxu0 %v8416_v35  ;;  %v10989_v34 = vld [vmem:[%s11594_s28 + $0xcb4] sm:$0xf0]  ;;  %v9475_v35 = vld [vmem:[%s11594_s28 + $0x8b0] sm:$0xf] }
 0x14a   : > { %v9476_v52 = vor.u32 %v10988_v37, %v9475_v35  ;;  %v10863_v35 = vld [vmem:[%s11594_s28 + $0x8cc] sm:$0xf] }
 0x152   : > { %10349 = vmatmul.msk.bf16.vlgmr.msrb.gmra.mxu1 %vm337_vm0, %v11641_v1  ;;  %10350 = vmatmul.msk.bf16.vlgmr.msrb.gmra.mxu2 %vm337_vm0, %v11641_v1 }
 0x153   : > { %10351 = vmatmul.msk.bf16.vlgmr.msrb.gmra.mxu3 %vm337_vm0, %v11641_v1  ;;  %10352 = vmatmul.msk.bf16.vlgmr.msra.gmra.mxu0 %vm337_vm0, %v11641_v1 }
 0x154   : > { %4501 = vmatpush.bf16.msrb.mxu2 %v9448_v44  ;;  %4514 = vmatpush.bf16.msrb.mxu3 %v9452_v45 }
 0x155   : > { %4488 = vmatpush.bf16.msrb.mxu1 %v9444_v48  ;;  %4527 = vmatpush.bf16.msra.mxu0 %v9456_v49  ;;  %v9484_v48 = vor.u32 %v10989_v34, %v9483_v33  ;;  %v10604_v49 = vld [vmem:[%s11594_s28 + $0xb4] sm:$0xf]  ;;  %v10990_v34 = vld [vmem:[%s11594_s28 + $0xcbc] sm:$0xf0] }
 0x156   : > { %v8456_v2 = vor.u32 %v10604_v49, %v8453_v50  ;;  %v10607_v49 = vld [vmem:[%s11594_s28 + $0xcc] sm:$0xf] }
 0x157   : > { %v8477_v50 = vld [vmem:[%s11594_s28 + $0x4c8] sm:$0xf0] }
 0x158   : > { %4502 = vmatpush.bf16.msrb.mxu2 %v8424_v56  ;;  %4515 = vmatpush.bf16.msrb.mxu3 %v8428_v57  ;;  %v8451_v56 = vld [vmem:[%s11594_s28 + $0xb0] sm:$0xf]  ;;  %v8480_v55 = vor.u32 %v10607_v49, %v8477_v50 }
 0x159   : > { %4489 = vmatpush.bf16.msrb.mxu1 %v8420_v58  ;;  %4528 = vmatpush.bf16.msra.mxu0 %v8432_v59  ;;  %v10732_v57 = vld [vmem:[%s11594_s28 + $0x4ac] sm:$0xf0]  ;;  %v10605_v58 = vld [vmem:[%s11594_s28 + $0xbc] sm:$0xf] }
 0x15a   : > { %v8461_v59 = vld [vmem:[%s11594_s28 + $0x4b8] sm:$0xf0]  ;;  %v8452_v9 = vor.u32 %v10732_v57, %v8451_v56 }
 0x15f   : > { %v11835_v5 = vpop.f32.mrf.mxu1 }
 0x160   : > { %v11837_v6 = vpop.f32.mrf.mxu0 }
 0x161   : > { %v4063_v61 = vadd.f32 %v11837_v6, %v3502_v40  ;;  %v8464_v6 = vor.u32 %v10605_v58, %v8461_v59  ;;  %v9500_v40 = vor.u32 %v10991_v31, %v9499_v30  ;;  %v876_v59 = vld [vmem:[%s11858_s1 + $0x8] sm:$0xff] }
 0x162   : > { %10353 = vmatmul.msk.bf16.vlgmr.msra.gmra.mxu1 %vm337_vm0, %v11641_v1  ;;  %10354 = vmatmul.msk.bf16.vlgmr.msra.gmra.mxu2 %vm337_vm0, %v11641_v1  ;;  %v3513_v31 = vperm.slane %v876_v59, 6 }
 0x163   : > { %10355 = vmatmul.msk.bf16.vlgmr.msra.gmra.mxu3 %vm337_vm0, %v11641_v1  ;;  %10356 = vmatmul.msk.bf16.vlgmr.msrb.gmra.mxu0 %vm337_vm0, %v11641_v1  ;;  %v7600_v13 = vrot.slane %v4063_v61, 5  ;;  %v3509_v61 = vperm.slane %v876_v59, 2 }
 0x164   : > { %4553 = vmatpush.bf16.msra.mxu2 %v9464_v7  ;;  %4566 = vmatpush.bf16.msra.mxu3 %v9468_v8 }
 0x165   : > { %v4036_v21 = vpop.f32.mrf.mxu2  ;;  %4540 = vmatpush.bf16.msra.mxu1 %v9460_v11  ;;  %4579 = vmatpush.bf16.msrb.mxu0 %v9472_v12  ;;  %v4024_v12 = vadd.f32 %v11835_v5, %v3499_v60  ;;  %v3508_v60 = vperm.slane %v876_v59, 1 }
 0x166   : > { %v4049_v24 = vpop.f32.mrf.mxu3  ;;  %v4037_v44 = vadd.f32 %v4036_v21, %v3500_v28 }
 0x167   : > { %v4025_v25 = vpop.f32.mrf.mxu1  ;;  %v4050_v51 = vadd.f32 %v4049_v24, %v3501_v29 }
 0x168   : > { %v4064_v26 = vpop.f32.mrf.mxu0  ;;  %4554 = vmatpush.bf16.msra.mxu2 %v8440_v19  ;;  %4567 = vmatpush.bf16.msra.mxu3 %v8444_v20  ;;  %v7598_v63 = vrot.slane %v4037_v44, 7 }
 0x169   : > { %4541 = vmatpush.bf16.msra.mxu1 %v8436_v22  ;;  %4580 = vmatpush.bf16.msrb.mxu0 %v8448_v23  ;;  %v7599_v4 = vrot.slane %v4050_v51, 6  ;;  %v10862_v26 = vld [vmem:[%s11594_s28 + $0x8c4] sm:$0xf] }
 0x16a   : > { %v7823_v19 = vsel %vm7822_vm1, %v4024_v12, %v7598_v63  ;;  %v9496_v39 = vor.u32 %v10862_v26, %v9493_v27  ;;  %v9509_v63 = vld [vmem:[%s11594_s28 + $0xcd0] sm:$0xf0]  ;;  %v10736_v26 = vld [vmem:[%s11594_s28 + $0x4cc] sm:$0xf0]  ;;  %v10609_v27 = vld [vmem:[%s11594_s28 + $0xdc] sm:$0xf] }
 0x16b   : > { %v7825_v20 = vsel %vm7824_vm2, %v7599_v4, %v7600_v13  ;;  %v9507_v4 = vld [vmem:[%s11594_s28 + $0x8d0] sm:$0xf]  ;;  %v3514_v13 = vperm.slane %v876_v59, 7 }
 0x16c   : > { %v7827_v24 = vsel %vm7826_vm3, %v7823_v19, %v7825_v20  ;;  %v10608_v19 = vld [vmem:[%s11594_s28 + $0xd4] sm:$0xf] }
 0x16d   : > { %v4038_v32 = vpop.f32.mrf.mxu2  ;;  %v8485_v20 = vld [vmem:[%s11594_s28 + $0x4d0] sm:$0xf0] }
 0x16e   : > { %v4051_v36 = vpop.f32.mrf.mxu3  ;;  %v9491_v32 = vld [vmem:[%s11594_s28 + $0x8c0] sm:$0xf] }
 0x16f   : > { %v4075_v42 = vpop.f32.mrf.mxu1  ;;  %v9501_v36 = vld [vmem:[%s11594_s28 + $0xcc8] sm:$0xf0] }
 0x170   : > { %v4114_v45 = vpop.f32.mrf.mxu0  ;;  %v4076_v0 = vadd.f32 %v4075_v42, %v3503_v41  ;;  %v10606_v41 = vld [vmem:[%s11594_s28 + $0xc4] sm:$0xf]  ;;  %v9504_v44 = vor.u32 %v10863_v35, %v9501_v36 }
 0x171   : > { %v4115_v7 = vadd.f32 %v4114_v45, %v3506_v43  ;;  %v8469_v42 = vld [vmem:[%s11594_s28 + $0x4c0] sm:$0xf0]  ;;  %v9492_v43 = vor.u32 %v10990_v34, %v9491_v32  ;;  %v8475_v45 = vld [vmem:[%s11594_s28 + $0xc8] sm:$0xf]  ;;  %v8488_v34 = vor.u32 %v10608_v19, %v8485_v20  ;;  %v10611_v19 = vld [vmem:[%s11594_s28 + $0xec] sm:$0xf] }
 0x172   : > { %10357 = vmatmul.msk.bf16.vlgmr.msrb.gmra.mxu1 %vm337_vm0, %v11641_v1  ;;  %10358 = vmatmul.msk.bf16.vlgmr.msrb.gmra.mxu2 %vm337_vm0, %v11641_v1  ;;  %v7601_v16 = vrot.slane %v4076_v0, 4  ;;  %v8472_v51 = vor.u32 %v10606_v41, %v8469_v42  ;;  %v8509_v20 = vld [vmem:[%s11594_s28 + $0x4e8] sm:$0xf0] }
 0x173   : > { %10359 = vmatmul.msk.bf16.vlgmr.msrb.gmra.mxu3 %vm337_vm0, %v11641_v1  ;;  %10360 = vmatmul.msk.bf16.vlgmr.msra.gmra.mxu0 %vm337_vm0, %v11641_v1  ;;  %v7604_v5 = vrot.slane %v4115_v7, 1 }
 0x174   : > { %4605 = vmatpush.bf16.msrb.mxu2 %v9480_v47  ;;  %4618 = vmatpush.bf16.msrb.mxu3 %v9484_v48  ;;  %v8467_v47 = vld [vmem:[%s11594_s28 + $0xc0] sm:$0xf] }
 0x175   : > { %v4088_v8 = vpop.f32.mrf.mxu2  ;;  %4592 = vmatpush.bf16.msrb.mxu1 %v9476_v52  ;;  %4631 = vmatpush.bf16.msra.mxu0 %v9488_v53  ;;  %v10734_v48 = vld [vmem:[%s11594_s28 + $0x4bc] sm:$0xf0] }
 0x176   : > { %v4089_v10 = vadd.f32 %v4088_v8, %v3504_v46  ;;  %v4101_v11 = vpop.f32.mrf.mxu3  ;;  %v10735_v46 = vld [vmem:[%s11594_s28 + $0x4c4] sm:$0xf0]  ;;  %v8468_v54 = vor.u32 %v10734_v48, %v8467_v47  ;;  %v10992_v8 = vld [vmem:[%s11594_s28 + $0xccc] sm:$0xf0] }
 0x177   : > { %v4102_v14 = vadd.f32 %v4101_v11, %v3505_v62  ;;  %v4077_v15 = vpop.f32.mrf.mxu1  ;;  %v8476_v52 = vor.u32 %v10735_v46, %v8475_v45  ;;  %v10864_v62 = vld [vmem:[%s11594_s28 + $0x8d4] sm:$0xf]  ;;  %v3511_v11 = vperm.slane %v876_v59, 4 }
 0x178   : > { %v7602_v17 = vrot.slane %v4089_v10, 3  ;;  %v4116_v18 = vpop.f32.mrf.mxu0  ;;  %4606 = vmatpush.bf16.msrb.mxu2 %v8456_v2  ;;  %4619 = vmatpush.bf16.msrb.mxu3 %v8460_v3  ;;  %v9515_v2 = vld [vmem:[%s11594_s28 + $0x8d8] sm:$0xf]  ;;  %v3510_v10 = vperm.slane %v876_v59, 3 }
 0x179   : > { %v7603_v21 = vrot.slane %v4102_v14, 2  ;;  %4593 = vmatpush.bf16.msrb.mxu1 %v8452_v9  ;;  %4632 = vmatpush.bf16.msra.mxu0 %v8464_v6  ;;  %v10993_v3 = vld [vmem:[%s11594_s28 + $0xcd4] sm:$0xf0]  ;;  %v10865_v9 = vld [vmem:[%s11594_s28 + $0x8dc] sm:$0xf] }
 0x17a   : > { %v7829_v22 = vsel %vm7828_vm4, %v7601_v16, %v7602_v17  ;;  %v9517_v6 = vld [vmem:[%s11594_s28 + $0xcd8] sm:$0xf0]  ;;  %v3512_v16 = vperm.slane %v876_v59, 5  ;;  %v9512_v17 = vor.u32 %v10864_v62, %v9509_v63  ;;  %v9516_v18 = vor.u32 %v10993_v3, %v9515_v2  ;;  %v10995_v63 = vld [vmem:[%s11594_s28 + $0xce4] sm:$0xf0] }
 0x17b   : > { %v7831_v23 = vsel %vm7830_vm5, %v7603_v21, %v7604_v5  ;;  %v9508_v21 = vor.u32 %v10992_v8, %v9507_v4  ;;  %v10994_v2 = vld [vmem:[%s11594_s28 + $0xcdc] sm:$0xf0]  ;;  %v10867_v4 = vld [vmem:[%s11594_s28 + $0x8ec] sm:$0xf] }
 0x17c   : > { %v7833_v25 = vsel %vm7832_vm6, %v7829_v22, %v7831_v23  ;;  %v9520_v22 = vor.u32 %v10865_v9, %v9517_v6  ;;  %v8491_v23 = vld [vmem:[%s11594_s28 + $0xd8] sm:$0xf] }
 0x17d   : > { %v7835_v28 = vsel %vm7834_vm7, %v7827_v24, %v7833_v25  ;;  %v4090_v29 = vpop.f32.mrf.mxu2  ;;  %v10737_v24 = vld [vmem:[%s11594_s28 + $0x4d4] sm:$0xf0]  ;;  %v8483_v25 = vld [vmem:[%s11594_s28 + $0xd0] sm:$0xf] }
 0x17e   : > { %8085 = vst [vmem:[%s11901_s6] sm:$0xff] %v7835_v28  ;;  %v4103_v33 = vpop.f32.mrf.mxu3  ;;  %v8493_v28 = vld [vmem:[%s11594_s28 + $0x4d8] sm:$0xf0]  ;;  %v3507_v29 = vperm.slane %v876_v59, 0  ;;  %v8492_v35 = vor.u32 %v10737_v24, %v8491_v23  ;;  %v8484_v41 = vor.u32 %v10736_v26, %v8483_v25  ;;  %v9525_v59 = vld [vmem:[%s11594_s28 + $0xce0] sm:$0xf0]  ;;  %v8512_v24 = vor.u32 %v10611_v19, %v8509_v20 }
 0x17f   : > { %v11907_v37 = vpop.f32.mrf.mxu1 }
 0x180   : > { %v11909_v38 = vpop.f32.mrf.mxu0 }
 0x181   : > { %v4167_v30 = vadd.f32 %v11909_v38, %v3510_v10  ;;  %v8496_v38 = vor.u32 %v10609_v27, %v8493_v28  ;;  %v877_v28 = vld [vmem:[%s11858_s1 + $0x10] sm:$0xff] }
 0x182   : > { %10361 = vmatmul.msk.bf16.vlgmr.msra.gmra.mxu1 %vm337_vm0, %v11641_v1  ;;  %10362 = vmatmul.msk.bf16.vlgmr.msra.gmra.mxu2 %vm337_vm0, %v11641_v1 }
 0x183   : > { %10363 = vmatmul.msk.bf16.vlgmr.msra.gmra.mxu3 %vm337_vm0, %v11641_v1  ;;  %10364 = vmatmul.msk.bf16.vlgmr.msrb.gmra.mxu0 %vm337_vm0, %v11641_v1  ;;  %v7607_v45 = vrot.slane %v4167_v30, 5  ;;  %v3517_v30 = vperm.slane %v877_v28, 2 }
 0x184   : > { %4657 = vmatpush.bf16.msra.mxu2 %v9496_v39  ;;  %4670 = vmatpush.bf16.msra.mxu3 %v9500_v40 }
 0x185   : > { %v4140_v53 = vpop.f32.mrf.mxu2  ;;  %4644 = vmatpush.bf16.msra.mxu1 %v9492_v43  ;;  %4683 = vmatpush.bf16.msrb.mxu0 %v9504_v44  ;;  %v4128_v44 = vadd.f32 %v11907_v37, %v3507_v29  ;;  %v3516_v29 = vperm.slane %v877_v28, 1 }
 0x186   : > { %v4153_v56 = vpop.f32.mrf.mxu3  ;;  %v4141_v14 = vadd.f32 %v4140_v53, %v3508_v60  ;;  %v9531_v60 = vld [vmem:[%s11594_s28 + $0x8e8] sm:$0xf] }
 0x187   : > { %v4129_v57 = vpop.f32.mrf.mxu1  ;;  %v4154_v5 = vadd.f32 %v4153_v56, %v3509_v61  ;;  %v9532_v10 = vor.u32 %v10995_v63, %v9531_v60  ;;  %v8525_v60 = vld [vmem:[%s11594_s28 + $0x4f8] sm:$0xf0]  ;;  %v3521_v63 = vperm.slane %v877_v28, 6 }
 0x188   : > { %v4168_v58 = vpop.f32.mrf.mxu0  ;;  %4658 = vmatpush.bf16.msra.mxu2 %v8472_v51  ;;  %4671 = vmatpush.bf16.msra.mxu3 %v8476_v52  ;;  %v7605_v32 = vrot.slane %v4141_v14, 7 }
 0x189   : > { %4645 = vmatpush.bf16.msra.mxu1 %v8468_v54  ;;  %4684 = vmatpush.bf16.msrb.mxu0 %v8480_v55  ;;  %v7606_v36 = vrot.slane %v4154_v5, 6  ;;  %v10866_v58 = vld [vmem:[%s11594_s28 + $0x8e4] sm:$0xf] }
 0x18a   : > { %v7836_v51 = vsel %vm7822_vm1, %v4128_v44, %v7605_v32  ;;  %v9528_v6 = vor.u32 %v10866_v58, %v9525_v59  ;;  %v9541_v32 = vld [vmem:[%s11594_s28 + $0xcf0] sm:$0xf0]  ;;  %v10740_v58 = vld [vmem:[%s11594_s28 + $0x4ec] sm:$0xf0]  ;;  %v10613_v59 = vld [vmem:[%s11594_s28 + $0xfc] sm:$0xf] }
 0x18b   : > { %v7837_v52 = vsel %vm7824_vm2, %v7606_v36, %v7607_v45  ;;  %v9539_v36 = vld [vmem:[%s11594_s28 + $0x8f0] sm:$0xf]  ;;  %v3522_v45 = vperm.slane %v877_v28, 7 }
 0x18c   : > { %v7838_v56 = vsel %vm7826_vm3, %v7836_v51, %v7837_v52  ;;  %v10612_v51 = vld [vmem:[%s11594_s28 + $0xf4] sm:$0xf] }
 0x18d   : > { %v4142_v0 = vpop.f32.mrf.mxu2  ;;  %v8517_v52 = vld [vmem:[%s11594_s28 + $0x4f0] sm:$0xf0] }
 0x18e   : > { %v4155_v7 = vpop.f32.mrf.mxu3  ;;  %v9523_v0 = vld [vmem:[%s11594_s28 + $0x8e0] sm:$0xf] }
 0x18f   : > { %v4179_v12 = vpop.f32.mrf.mxu1  ;;  %v9533_v7 = vld [vmem:[%s11594_s28 + $0xce8] sm:$0xf0] }
 0x190   : > { %v4218_v15 = vpop.f32.mrf.mxu0  ;;  %v4180_v33 = vadd.f32 %v4179_v12, %v3511_v11  ;;  %v10610_v11 = vld [vmem:[%s11594_s28 + $0xe4] sm:$0xf]  ;;  %v9536_v14 = vor.u32 %v10867_v4, %v9533_v7 }
 0x191   : > { %v4219_v39 = vadd.f32 %v4218_v15, %v3514_v13  ;;  %v8501_v12 = vld [vmem:[%s11594_s28 + $0x4e0] sm:$0xf0]  ;;  %v9524_v13 = vor.u32 %v10994_v2, %v9523_v0  ;;  %v8507_v15 = vld [vmem:[%s11594_s28 + $0xe8] sm:$0xf] }
 0x192   : > { %10365 = vmatmul.msk.bf16.vlgmr.msrb.gmra.mxu1 %vm337_vm0, %v11641_v1  ;;  %10366 = vmatmul.msk.bf16.vlgmr.msrb.gmra.mxu2 %vm337_vm0, %v11641_v1  ;;  %v7608_v48 = vrot.slane %v4180_v33, 4  ;;  %v8504_v5 = vor.u32 %v10610_v11, %v8501_v12 }
 0x193   : > { %10367 = vmatmul.msk.bf16.vlgmr.msrb.gmra.mxu3 %vm337_vm0, %v11641_v1  ;;  %10368 = vmatmul.msk.bf16.vlgmr.msra.gmra.mxu0 %vm337_vm0, %v11641_v1  ;;  %v7611_v53 = vrot.slane %v4219_v39, 1 }
 0x194   : > { %4709 = vmatpush.bf16.msrb.mxu2 %v9512_v17  ;;  %4722 = vmatpush.bf16.msrb.mxu3 %v9516_v18  ;;  %v8499_v17 = vld [vmem:[%s11594_s28 + $0xe0] sm:$0xf] }
 0x195   : > { %v4192_v40 = vpop.f32.mrf.mxu2  ;;  %4696 = vmatpush.bf16.msrb.mxu1 %v9508_v21  ;;  %4735 = vmatpush.bf16.msra.mxu0 %v9520_v22  ;;  %v10738_v18 = vld [vmem:[%s11594_s28 + $0x4dc] sm:$0xf0] }
 0x196   : > { %v4193_v42 = vadd.f32 %v4192_v40, %v3512_v16  ;;  %v4205_v43 = vpop.f32.mrf.mxu3  ;;  %v10739_v16 = vld [vmem:[%s11594_s28 + $0x4e4] sm:$0xf0]  ;;  %v8500_v23 = vor.u32 %v10738_v18, %v8499_v17  ;;  %v10996_v40 = vld [vmem:[%s11594_s28 + $0xcec] sm:$0xf0] }
 0x197   : > { %v4206_v46 = vadd.f32 %v4205_v43, %v3513_v31  ;;  %v4181_v47 = vpop.f32.mrf.mxu1  ;;  %v8508_v21 = vor.u32 %v10739_v16, %v8507_v15  ;;  %v10868_v31 = vld [vmem:[%s11594_s28 + $0x8f4] sm:$0xf]  ;;  %v3519_v43 = vperm.slane %v877_v28, 4 }
 0x198   : > { %v7609_v49 = vrot.slane %v4193_v42, 3  ;;  %v4220_v50 = vpop.f32.mrf.mxu0  ;;  %4710 = vmatpush.bf16.msrb.mxu2 %v8488_v34  ;;  %4723 = vmatpush.bf16.msrb.mxu3 %v8492_v35  ;;  %v9547_v34 = vld [vmem:[%s11594_s28 + $0x8f8] sm:$0xf]  ;;  %v3518_v42 = vperm.slane %v877_v28, 3 }
 0x199   : > { %v7610_v37 = vrot.slane %v4206_v46, 2  ;;  %4697 = vmatpush.bf16.msrb.mxu1 %v8484_v41  ;;  %4736 = vmatpush.bf16.msra.mxu0 %v8496_v38  ;;  %v10997_v35 = vld [vmem:[%s11594_s28 + $0xcf4] sm:$0xf0]  ;;  %v10869_v41 = vld [vmem:[%s11594_s28 + $0x8fc] sm:$0xf] }
 0x19a   : > { %v7839_v54 = vsel %vm7828_vm4, %v7608_v48, %v7609_v49  ;;  %v9549_v38 = vld [vmem:[%s11594_s28 + $0xcf8] sm:$0xf0]  ;;  %v3520_v48 = vperm.slane %v877_v28, 5  ;;  %v9544_v49 = vor.u32 %v10868_v31, %v9541_v32  ;;  %v9548_v50 = vor.u32 %v10997_v35, %v9547_v34  ;;  %v10999_v32 = vld [vmem:[%s11594_s28 + $0xd04] sm:$0xf0] }
 0x19b   : > { %v7840_v55 = vsel %vm7830_vm5, %v7610_v37, %v7611_v53  ;;  %v9540_v37 = vor.u32 %v10996_v40, %v9539_v36  ;;  %v10998_v34 = vld [vmem:[%s11594_s28 + $0xcfc] sm:$0xf0]  ;;  %v10871_v36 = vld [vmem:[%s11594_s28 + $0x90c] sm:$0xf] }
 0x19c   : > { %v7841_v57 = vsel %vm7832_vm6, %v7839_v54, %v7840_v55  ;;  %v9552_v54 = vor.u32 %v10869_v41, %v9549_v38  ;;  %v8523_v55 = vld [vmem:[%s11594_s28 + $0xf8] sm:$0xf] }
 0x19d   : > { %v7842_v61 = vsel %vm7834_vm7, %v7838_v56, %v7841_v57  ;;  %v4194_v62 = vpop.f32.mrf.mxu2  ;;  %v10741_v56 = vld [vmem:[%s11594_s28 + $0x4f4] sm:$0xf0]  ;;  %v8515_v57 = vld [vmem:[%s11594_s28 + $0xf0] sm:$0xf] }
 0x19e   : > { %8086 = vst [vmem:[%s11901_s6 + $0x8] sm:$0xff] %v7842_v61  ;;  %v4207_v3 = vpop.f32.mrf.mxu3  ;;  %v3515_v61 = vperm.slane %v877_v28, 0  ;;  %v8524_v4 = vor.u32 %v10741_v56, %v8523_v55  ;;  %v8516_v11 = vor.u32 %v10740_v58, %v8515_v57  ;;  %v9557_v28 = vld [vmem:[%s11594_s28 + $0xd00] sm:$0xf0] }
 0x19f   : > { %v11970_v8 = vpop.f32.mrf.mxu1  ;;  %v8520_v3 = vor.u32 %v10612_v51, %v8517_v52  ;;  %v10615_v51 = vld [vmem:[%s11594_s28 + $0x10c] sm:$0xf] }
 0x1a0   : > { %v11972_v9 = vpop.f32.mrf.mxu0  ;;  %v8541_v52 = vld [vmem:[%s11594_s28 + $0x508] sm:$0xf0] }
 0x1a1   : > { %v4271_v62 = vadd.f32 %v11972_v9, %v3518_v42  ;;  %v8528_v9 = vor.u32 %v10613_v59, %v8525_v60  ;;  %v8544_v56 = vor.u32 %v10615_v51, %v8541_v52  ;;  %v878_v60 = vld [vmem:[%s11858_s1 + $0x18] sm:$0xff] }
 0x1a2   : > { %10369 = vmatmul.msk.bf16.vlgmr.msra.gmra.mxu1 %vm337_vm0, %v11641_v1  ;;  %10370 = vmatmul.msk.bf16.vlgmr.msra.gmra.mxu2 %vm337_vm0, %v11641_v1 }
 0x1a3   : > { %10371 = vmatmul.msk.bf16.vlgmr.msra.gmra.mxu3 %vm337_vm0, %v11641_v1  ;;  %10372 = vmatmul.msk.bf16.vlgmr.msrb.gmra.mxu0 %vm337_vm0, %v11641_v1  ;;  %v7614_v15 = vrot.slane %v4271_v62, 5  ;;  %v3525_v62 = vperm.slane %v878_v60, 2 }
 0x1a4   : > { %4761 = vmatpush.bf16.msra.mxu2 %v9528_v6  ;;  %4774 = vmatpush.bf16.msra.mxu3 %v9532_v10 }
 0x1a5   : > { %v4244_v22 = vpop.f32.mrf.mxu2  ;;  %4748 = vmatpush.bf16.msra.mxu1 %v9524_v13  ;;  %4787 = vmatpush.bf16.msrb.mxu0 %v9536_v14  ;;  %v4232_v14 = vadd.f32 %v11970_v8, %v3515_v61  ;;  %v3524_v61 = vperm.slane %v878_v60, 1 }
 0x1a6   : > { %v4257_v25 = vpop.f32.mrf.mxu3  ;;  %v4245_v46 = vadd.f32 %v4244_v22, %v3516_v29  ;;  %v9563_v29 = vld [vmem:[%s11594_s28 + $0x908] sm:$0xf] }
 0x1a7   : > { %v4233_v26 = vpop.f32.mrf.mxu1  ;;  %v4258_v53 = vadd.f32 %v4257_v25, %v3517_v30  ;;  %v9564_v42 = vor.u32 %v10999_v32, %v9563_v29  ;;  %v8557_v29 = vld [vmem:[%s11594_s28 + $0x518] sm:$0xf0]  ;;  %v3529_v32 = vperm.slane %v878_v60, 6 }
 0x1a8   : > { %v4272_v27 = vpop.f32.mrf.mxu0  ;;  %4762 = vmatpush.bf16.msra.mxu2 %v8504_v5  ;;  %4775 = vmatpush.bf16.msra.mxu3 %v8508_v21  ;;  %v7612_v0 = vrot.slane %v4245_v46, 7 }
 0x1a9   : > { %4749 = vmatpush.bf16.msra.mxu1 %v8500_v23  ;;  %4788 = vmatpush.bf16.msrb.mxu0 %v8512_v24  ;;  %v7613_v7 = vrot.slane %v4258_v53, 6  ;;  %v10870_v27 = vld [vmem:[%s11594_s28 + $0x904] sm:$0xf] }
 0x1aa   : > { %v7843_v5 = vsel %vm7822_vm1, %v4232_v14, %v7612_v0  ;;  %v9560_v38 = vor.u32 %v10870_v27, %v9557_v28  ;;  %v9573_v0 = vld [vmem:[%s11594_s28 + $0xd10] sm:$0xf0]  ;;  %v10744_v27 = vld [vmem:[%s11594_s28 + $0x50c] sm:$0xf0]  ;;  %v10617_v28 = vld [vmem:[%s11594_s28 + $0x11c] sm:$0xf] }
 0x1ab   : > { %v7844_v21 = vsel %vm7824_vm2, %v7613_v7, %v7614_v15  ;;  %v9571_v7 = vld [vmem:[%s11594_s28 + $0x910] sm:$0xf]  ;;  %v3530_v15 = vperm.slane %v878_v60, 7 }
 0x1ac   : > { %v7845_v25 = vsel %vm7826_vm3, %v7843_v5, %v7844_v21  ;;  %v10616_v5 = vld [vmem:[%s11594_s28 + $0x114] sm:$0xf] }
 0x1ad   : > { %v4246_v33 = vpop.f32.mrf.mxu2  ;;  %v8549_v21 = vld [vmem:[%s11594_s28 + $0x510] sm:$0xf0] }
 0x1ae   : > { %v4259_v39 = vpop.f32.mrf.mxu3  ;;  %v9555_v33 = vld [vmem:[%s11594_s28 + $0x900] sm:$0xf] }
 0x1af   : > { %v4283_v44 = vpop.f32.mrf.mxu1  ;;  %v9565_v39 = vld [vmem:[%s11594_s28 + $0xd08] sm:$0xf0] }
 0x1b0   : > { %v4322_v47 = vpop.f32.mrf.mxu0  ;;  %v4284_v2 = vadd.f32 %v4283_v44, %v3519_v43  ;;  %v10614_v43 = vld [vmem:[%s11594_s28 + $0x104] sm:$0xf]  ;;  %v9568_v46 = vor.u32 %v10871_v36, %v9565_v39 }
 0x1b1   : > { %v4323_v6 = vadd.f32 %v4322_v47, %v3522_v45  ;;  %v8533_v44 = vld [vmem:[%s11594_s28 + $0x500] sm:$0xf0]  ;;  %v9556_v45 = vor.u32 %v10998_v34, %v9555_v33  ;;  %v8539_v47 = vld [vmem:[%s11594_s28 + $0x108] sm:$0xf] }
 0x1b2   : > { %10373 = vmatmul.msk.bf16.vlgmr.msrb.gmra.mxu1 %vm337_vm0, %v11641_v1  ;;  %10374 = vmatmul.msk.bf16.vlgmr.msrb.gmra.mxu2 %vm337_vm0, %v11641_v1  ;;  %v7615_v18 = vrot.slane %v4284_v2, 4  ;;  %v8536_v53 = vor.u32 %v10614_v43, %v8533_v44 }
 0x1b3   : > { %10375 = vmatmul.msk.bf16.vlgmr.msrb.gmra.mxu3 %vm337_vm0, %v11641_v1  ;;  %10376 = vmatmul.msk.bf16.vlgmr.msra.gmra.mxu0 %vm337_vm0, %v11641_v1  ;;  %v7618_v22 = vrot.slane %v4323_v6, 1 }
 0x1b4   : > { %4813 = vmatpush.bf16.msrb.mxu2 %v9544_v49  ;;  %4826 = vmatpush.bf16.msrb.mxu3 %v9548_v50  ;;  %v8531_v49 = vld [vmem:[%s11594_s28 + $0x100] sm:$0xf] }
 0x1b5   : > { %v4296_v10 = vpop.f32.mrf.mxu2  ;;  %4800 = vmatpush.bf16.msrb.mxu1 %v9540_v37  ;;  %4839 = vmatpush.bf16.msra.mxu0 %v9552_v54  ;;  %v10742_v50 = vld [vmem:[%s11594_s28 + $0x4fc] sm:$0xf0] }
 0x1b6   : > { %v4297_v12 = vadd.f32 %v4296_v10, %v3520_v48  ;;  %v4309_v13 = vpop.f32.mrf.mxu3  ;;  %v10743_v48 = vld [vmem:[%s11594_s28 + $0x504] sm:$0xf0]  ;;  %v8532_v55 = vor.u32 %v10742_v50, %v8531_v49  ;;  %v11000_v10 = vld [vmem:[%s11594_s28 + $0xd0c] sm:$0xf0] }
 0x1b7   : > { %v4310_v16 = vadd.f32 %v4309_v13, %v3521_v63  ;;  %v4285_v17 = vpop.f32.mrf.mxu1  ;;  %v8540_v37 = vor.u32 %v10743_v48, %v8539_v47  ;;  %v10872_v63 = vld [vmem:[%s11594_s28 + $0x914] sm:$0xf]  ;;  %v3527_v13 = vperm.slane %v878_v60, 4 }
 0x1b8   : > { %v7616_v19 = vrot.slane %v4297_v12, 3  ;;  %v4324_v20 = vpop.f32.mrf.mxu0  ;;  %4814 = vmatpush.bf16.msrb.mxu2 %v8520_v3  ;;  %4827 = vmatpush.bf16.msrb.mxu3 %v8524_v4  ;;  %v9579_v3 = vld [vmem:[%s11594_s28 + $0x918] sm:$0xf]  ;;  %v3526_v12 = vperm.slane %v878_v60, 3 }
 0x1b9   : > { %v7617_v8 = vrot.slane %v4310_v16, 2  ;;  %4801 = vmatpush.bf16.msrb.mxu1 %v8516_v11  ;;  %4840 = vmatpush.bf16.msra.mxu0 %v8528_v9  ;;  %v11001_v4 = vld [vmem:[%s11594_s28 + $0xd14] sm:$0xf0]  ;;  %v10873_v11 = vld [vmem:[%s11594_s28 + $0x91c] sm:$0xf] }
 0x1ba   : > { %v7846_v23 = vsel %vm7828_vm4, %v7615_v18, %v7616_v19  ;;  %v9581_v9 = vld [vmem:[%s11594_s28 + $0xd18] sm:$0xf0]  ;;  %v3528_v18 = vperm.slane %v878_v60, 5  ;;  %v9576_v19 = vor.u32 %v10872_v63, %v9573_v0  ;;  %v9580_v20 = vor.u32 %v11001_v4, %v9579_v3  ;;  %v11003_v0 = vld [vmem:[%s11594_s28 + $0xd24] sm:$0xf0] }
 0x1bb   : > { %v7847_v24 = vsel %vm7830_vm5, %v7617_v8, %v7618_v22  ;;  %v9572_v8 = vor.u32 %v11000_v10, %v9571_v7  ;;  %v11002_v3 = vld [vmem:[%s11594_s28 + $0xd1c] sm:$0xf0]  ;;  %v10875_v7 = vld [vmem:[%s11594_s28 + $0x92c] sm:$0xf] }
 0x1bc   : > { %v7848_v26 = vsel %vm7832_vm6, %v7846_v23, %v7847_v24  ;;  %v9584_v23 = vor.u32 %v10873_v11, %v9581_v9  ;;  %v8555_v24 = vld [vmem:[%s11594_s28 + $0x118] sm:$0xf] }
 0x1bd   : > { %v7849_v30 = vsel %vm7834_vm7, %v7845_v25, %v7848_v26  ;;  %v4298_v31 = vpop.f32.mrf.mxu2  ;;  %v10745_v25 = vld [vmem:[%s11594_s28 + $0x514] sm:$0xf0]  ;;  %v8547_v26 = vld [vmem:[%s11594_s28 + $0x110] sm:$0xf] }
 0x1be   : > { %8087 = vst [vmem:[%s11901_s6 + $0x10] sm:$0xff] %v7849_v30  ;;  %v4311_v35 = vpop.f32.mrf.mxu3  ;;  %v3523_v30 = vperm.slane %v878_v60, 0  ;;  %v8556_v36 = vor.u32 %v10745_v25, %v8555_v24  ;;  %v8548_v43 = vor.u32 %v10744_v27, %v8547_v26  ;;  %v9589_v60 = vld [vmem:[%s11594_s28 + $0xd20] sm:$0xf0] }
 0x1bf   : > { %v12033_v40 = vpop.f32.mrf.mxu1  ;;  %v8552_v35 = vor.u32 %v10616_v5, %v8549_v21  ;;  %v10619_v5 = vld [vmem:[%s11594_s28 + $0x12c] sm:$0xf] }
 0x1c0   : > { %v12035_v41 = vpop.f32.mrf.mxu0  ;;  %v8573_v21 = vld [vmem:[%s11594_s28 + $0x528] sm:$0xf0] }
 0x1c1   : > { %v4375_v31 = vadd.f32 %v12035_v41, %v3526_v12  ;;  %v8560_v41 = vor.u32 %v10617_v28, %v8557_v29  ;;  %v8576_v25 = vor.u32 %v10619_v5, %v8573_v21  ;;  %v879_v29 = vld [vmem:[%s11858_s1 + $0x20] sm:$0xff] }
 0x1c2   : > { %10377 = vmatmul.msk.bf16.vlgmr.msra.gmra.mxu1 %vm337_vm0, %v11641_v1  ;;  %10378 = vmatmul.msk.bf16.vlgmr.msra.gmra.mxu2 %vm337_vm0, %v11641_v1 }
 0x1c3   : > { %10379 = vmatmul.msk.bf16.vlgmr.msra.gmra.mxu3 %vm337_vm0, %v11641_v1  ;;  %10380 = vmatmul.msk.bf16.vlgmr.msrb.gmra.mxu0 %vm337_vm0, %v11641_v1  ;;  %v7621_v47 = vrot.slane %v4375_v31, 5  ;;  %v3533_v31 = vperm.slane %v879_v29, 2 }
 0x1c4   : > { %4865 = vmatpush.bf16.msra.mxu2 %v9560_v38  ;;  %4878 = vmatpush.bf16.msra.mxu3 %v9564_v42 }
 0x1c5   : > { %v4348_v54 = vpop.f32.mrf.mxu2  ;;  %4852 = vmatpush.bf16.msra.mxu1 %v9556_v45  ;;  %4891 = vmatpush.bf16.msrb.mxu0 %v9568_v46  ;;  %v4336_v46 = vadd.f32 %v12033_v40, %v3523_v30  ;;  %v3532_v30 = vperm.slane %v879_v29, 1 }
 0x1c6   : > { %v4361_v57 = vpop.f32.mrf.mxu3  ;;  %v4349_v16 = vadd.f32 %v4348_v54, %v3524_v61  ;;  %v9595_v61 = vld [vmem:[%s11594_s28 + $0x928] sm:$0xf] }
 0x1c7   : > { %v4337_v58 = vpop.f32.mrf.mxu1  ;;  %v4362_v22 = vadd.f32 %v4361_v57, %v3525_v62  ;;  %v9596_v12 = vor.u32 %v11003_v0, %v9595_v61  ;;  %v8589_v61 = vld [vmem:[%s11594_s28 + $0x538] sm:$0xf0]  ;;  %v3537_v0 = vperm.slane %v879_v29, 6 }
 0x1c8   : > { %v4376_v59 = vpop.f32.mrf.mxu0  ;;  %4866 = vmatpush.bf16.msra.mxu2 %v8536_v53  ;;  %4879 = vmatpush.bf16.msra.mxu3 %v8540_v37  ;;  %v7619_v33 = vrot.slane %v4349_v16, 7 }
 0x1c9   : > { %4853 = vmatpush.bf16.msra.mxu1 %v8532_v55  ;;  %4892 = vmatpush.bf16.msrb.mxu0 %v8544_v56  ;;  %v7620_v39 = vrot.slane %v4362_v22, 6  ;;  %v10874_v59 = vld [vmem:[%s11594_s28 + $0x924] sm:$0xf] }
 0x1ca   : > { %v7850_v53 = vsel %vm7822_vm1, %v4336_v46, %v7619_v33  ;;  %v9592_v9 = vor.u32 %v10874_v59, %v9589_v60  ;;  %v9605_v33 = vld [vmem:[%s11594_s28 + $0xd30] sm:$0xf0]  ;;  %v10748_v59 = vld [vmem:[%s11594_s28 + $0x52c] sm:$0xf0]  ;;  %v10621_v60 = vld [vmem:[%s11594_s28 + $0x13c] sm:$0xf] }
 0x1cb   : > { %v7851_v37 = vsel %vm7824_vm2, %v7620_v39, %v7621_v47  ;;  %v9603_v39 = vld [vmem:[%s11594_s28 + $0x930] sm:$0xf]  ;;  %v3538_v47 = vperm.slane %v879_v29, 7 }
 0x1cc   : > { %v7852_v57 = vsel %vm7826_vm3, %v7850_v53, %v7851_v37  ;;  %v10620_v53 = vld [vmem:[%s11594_s28 + $0x134] sm:$0xf] }
 0x1cd   : > { %v4350_v2 = vpop.f32.mrf.mxu2  ;;  %v8581_v37 = vld [vmem:[%s11594_s28 + $0x530] sm:$0xf0] }
 0x1ce   : > { %v4363_v6 = vpop.f32.mrf.mxu3  ;;  %v9587_v2 = vld [vmem:[%s11594_s28 + $0x920] sm:$0xf] }
 0x1cf   : > { %v4387_v14 = vpop.f32.mrf.mxu1  ;;  %v9597_v6 = vld [vmem:[%s11594_s28 + $0xd28] sm:$0xf0] }
 0x1d0   : > { %v4426_v17 = vpop.f32.mrf.mxu0  ;;  %v4388_v34 = vadd.f32 %v4387_v14, %v3527_v13  ;;  %v10618_v13 = vld [vmem:[%s11594_s28 + $0x124] sm:$0xf]  ;;  %v9600_v16 = vor.u32 %v10875_v7, %v9597_v6 }
 0x1d1   : > { %v4427_v38 = vadd.f32 %v4426_v17, %v3530_v15  ;;  %v8565_v14 = vld [vmem:[%s11594_s28 + $0x520] sm:$0xf0]  ;;  %v9588_v15 = vor.u32 %v11002_v3, %v9587_v2  ;;  %v8571_v17 = vld [vmem:[%s11594_s28 + $0x128] sm:$0xf] }
 0x1d2   : > { %10381 = vmatmul.msk.bf16.vlgmr.msrb.gmra.mxu1 %vm337_vm0, %v11641_v1  ;;  %10382 = vmatmul.msk.bf16.vlgmr.msrb.gmra.mxu2 %vm337_vm0, %v11641_v1  ;;  %v7622_v50 = vrot.slane %v4388_v34, 4  ;;  %v8568_v22 = vor.u32 %v10618_v13, %v8565_v14 }
 0x1d3   : > { %10383 = vmatmul.msk.bf16.vlgmr.msrb.gmra.mxu3 %vm337_vm0, %v11641_v1  ;;  %10384 = vmatmul.msk.bf16.vlgmr.msra.gmra.mxu0 %vm337_vm0, %v11641_v1  ;;  %v7625_v54 = vrot.slane %v4427_v38, 1 }
 0x1d4   : > { %4917 = vmatpush.bf16.msrb.mxu2 %v9576_v19  ;;  %4930 = vmatpush.bf16.msrb.mxu3 %v9580_v20  ;;  %v8563_v19 = vld [vmem:[%s11594_s28 + $0x120] sm:$0xf] }
 0x1d5   : > { %v4400_v42 = vpop.f32.mrf.mxu2  ;;  %4904 = vmatpush.bf16.msrb.mxu1 %v9572_v8  ;;  %4943 = vmatpush.bf16.msra.mxu0 %v9584_v23  ;;  %v10746_v20 = vld [vmem:[%s11594_s28 + $0x51c] sm:$0xf0] }
 0x1d6   : > { %v4401_v44 = vadd.f32 %v4400_v42, %v3528_v18  ;;  %v4413_v45 = vpop.f32.mrf.mxu3  ;;  %v10747_v18 = vld [vmem:[%s11594_s28 + $0x524] sm:$0xf0]  ;;  %v8564_v24 = vor.u32 %v10746_v20, %v8563_v19  ;;  %v11004_v42 = vld [vmem:[%s11594_s28 + $0xd2c] sm:$0xf0] }
 0x1d7   : > { %v4414_v48 = vadd.f32 %v4413_v45, %v3529_v32  ;;  %v4389_v49 = vpop.f32.mrf.mxu1  ;;  %v8572_v8 = vor.u32 %v10747_v18, %v8571_v17  ;;  %v10876_v32 = vld [vmem:[%s11594_s28 + $0x934] sm:$0xf]  ;;  %v3535_v45 = vperm.slane %v879_v29, 4 }
 0x1d8   : > { %v7623_v51 = vrot.slane %v4401_v44, 3  ;;  %v4428_v52 = vpop.f32.mrf.mxu0  ;;  %4918 = vmatpush.bf16.msrb.mxu2 %v8552_v35  ;;  %4931 = vmatpush.bf16.msrb.mxu3 %v8556_v36  ;;  %v9611_v35 = vld [vmem:[%s11594_s28 + $0x938] sm:$0xf]  ;;  %v3534_v44 = vperm.slane %v879_v29, 3 }
 0x1d9   : > { %v7624_v40 = vrot.slane %v4414_v48, 2  ;;  %4905 = vmatpush.bf16.msrb.mxu1 %v8548_v43  ;;  %4944 = vmatpush.bf16.msra.mxu0 %v8560_v41  ;;  %v11005_v36 = vld [vmem:[%s11594_s28 + $0xd34] sm:$0xf0]  ;;  %v10877_v43 = vld [vmem:[%s11594_s28 + $0x93c] sm:$0xf] }
 0x1da   : > { %v7853_v55 = vsel %vm7828_vm4, %v7622_v50, %v7623_v51  ;;  %v9613_v41 = vld [vmem:[%s11594_s28 + $0xd38] sm:$0xf0]  ;;  %v3536_v50 = vperm.slane %v879_v29, 5  ;;  %v9608_v51 = vor.u32 %v10876_v32, %v9605_v33  ;;  %v9612_v52 = vor.u32 %v11005_v36, %v9611_v35  ;;  %v11007_v33 = vld [vmem:[%s11594_s28 + $0xd44] sm:$0xf0] }
 0x1db   : > { %v7854_v56 = vsel %vm7830_vm5, %v7624_v40, %v7625_v54  ;;  %v9604_v40 = vor.u32 %v11004_v42, %v9603_v39  ;;  %v11006_v35 = vld [vmem:[%s11594_s28 + $0xd3c] sm:$0xf0]  ;;  %v10879_v39 = vld [vmem:[%s11594_s28 + $0x94c] sm:$0xf] }
 0x1dc   : > { %v7855_v58 = vsel %vm7832_vm6, %v7853_v55, %v7854_v56  ;;  %v9616_v55 = vor.u32 %v10877_v43, %v9613_v41  ;;  %v8587_v56 = vld [vmem:[%s11594_s28 + $0x138] sm:$0xf] }
 0x1dd   : > { %v7856_v62 = vsel %vm7834_vm7, %v7852_v57, %v7855_v58  ;;  %v4402_v63 = vpop.f32.mrf.mxu2  ;;  %v10749_v57 = vld [vmem:[%s11594_s28 + $0x534] sm:$0xf0]  ;;  %v8579_v58 = vld [vmem:[%s11594_s28 + $0x130] sm:$0xf] }
 0x1de   : > { %8088 = vst [vmem:[%s11901_s6 + $0x18] sm:$0xff] %v7856_v62  ;;  %v4415_v4 = vpop.f32.mrf.mxu3  ;;  %v3531_v62 = vperm.slane %v879_v29, 0  ;;  %v8588_v7 = vor.u32 %v10749_v57, %v8587_v56  ;;  %v8580_v13 = vor.u32 %v10748_v59, %v8579_v58  ;;  %v9621_v29 = vld [vmem:[%s11594_s28 + $0xd40] sm:$0xf0] }
 0x1df   : > { %v12096_v10 = vpop.f32.mrf.mxu1  ;;  %v8584_v4 = vor.u32 %v10620_v53, %v8581_v37  ;;  %v10623_v53 = vld [vmem:[%s11594_s28 + $0x14c] sm:$0xf] }
 0x1e0   : > { %v12098_v11 = vpop.f32.mrf.mxu0  ;;  %v8605_v37 = vld [vmem:[%s11594_s28 + $0x548] sm:$0xf0] }
 0x1e1   : > { %v4479_v63 = vadd.f32 %v12098_v11, %v3534_v44  ;;  %v8592_v11 = vor.u32 %v10621_v60, %v8589_v61  ;;  %v8608_v57 = vor.u32 %v10623_v53, %v8605_v37  ;;  %v880_v61 = vld [vmem:[%s11858_s1 + $0x28] sm:$0xff] }
 0x1e2   : > { %10385 = vmatmul.msk.bf16.vlgmr.msra.gmra.mxu1 %vm337_vm0, %v11641_v1  ;;  %10386 = vmatmul.msk.bf16.vlgmr.msra.gmra.mxu2 %vm337_vm0, %v11641_v1 }
 0x1e3   : > { %10387 = vmatmul.msk.bf16.vlgmr.msra.gmra.mxu3 %vm337_vm0, %v11641_v1  ;;  %10388 = vmatmul.msk.bf16.vlgmr.msrb.gmra.mxu0 %vm337_vm0, %v11641_v1  ;;  %v7628_v17 = vrot.slane %v4479_v63, 5  ;;  %v3541_v63 = vperm.slane %v880_v61, 2 }
 0x1e4   : > { %4969 = vmatpush.bf16.msra.mxu2 %v9592_v9  ;;  %4982 = vmatpush.bf16.msra.mxu3 %v9596_v12 }
 0x1e5   : > { %v4452_v23 = vpop.f32.mrf.mxu2  ;;  %4956 = vmatpush.bf16.msra.mxu1 %v9588_v15  ;;  %4995 = vmatpush.bf16.msrb.mxu0 %v9600_v16  ;;  %v4440_v16 = vadd.f32 %v12096_v10, %v3531_v62  ;;  %v3540_v62 = vperm.slane %v880_v61, 1 }
 0x1e6   : > { %v4465_v26 = vpop.f32.mrf.mxu3  ;;  %v4453_v48 = vadd.f32 %v4452_v23, %v3532_v30  ;;  %v9627_v30 = vld [vmem:[%s11594_s28 + $0x948] sm:$0xf] }
 0x1e7   : > { %v4441_v27 = vpop.f32.mrf.mxu1  ;;  %v4466_v54 = vadd.f32 %v4465_v26, %v3533_v31  ;;  %v9628_v44 = vor.u32 %v11007_v33, %v9627_v30  ;;  %v8621_v30 = vld [vmem:[%s11594_s28 + $0x558] sm:$0xf0]  ;;  %v3545_v33 = vperm.slane %v880_v61, 6 }
 0x1e8   : > { %v4480_v28 = vpop.f32.mrf.mxu0  ;;  %4970 = vmatpush.bf16.msra.mxu2 %v8568_v22  ;;  %4983 = vmatpush.bf16.msra.mxu3 %v8572_v8  ;;  %v7626_v2 = vrot.slane %v4453_v48, 7 }
 0x1e9   : > { %4957 = vmatpush.bf16.msra.mxu1 %v8564_v24  ;;  %4996 = vmatpush.bf16.msrb.mxu0 %v8576_v25  ;;  %v7627_v6 = vrot.slane %v4466_v54, 6  ;;  %v10878_v28 = vld [vmem:[%s11594_s28 + $0x944] sm:$0xf] }
 0x1ea   : > { %v7857_v22 = vsel %vm7822_vm1, %v4440_v16, %v7626_v2  ;;  %v9624_v41 = vor.u32 %v10878_v28, %v9621_v29  ;;  %v9637_v2 = vld [vmem:[%s11594_s28 + $0xd50] sm:$0xf0]  ;;  %v10752_v28 = vld [vmem:[%s11594_s28 + $0x54c] sm:$0xf0]  ;;  %v10625_v29 = vld [vmem:[%s11594_s28 + $0x15c] sm:$0xf] }
 0x1eb   : > { %v7858_v8 = vsel %vm7824_vm2, %v7627_v6, %v7628_v17  ;;  %v9635_v6 = vld [vmem:[%s11594_s28 + $0x950] sm:$0xf]  ;;  %v3546_v17 = vperm.slane %v880_v61, 7 }
 0x1ec   : > { %v7859_v26 = vsel %vm7826_vm3, %v7857_v22, %v7858_v8  ;;  %v10624_v22 = vld [vmem:[%s11594_s28 + $0x154] sm:$0xf] }
 0x1ed   : > { %v4454_v34 = vpop.f32.mrf.mxu2  ;;  %v8613_v8 = vld [vmem:[%s11594_s28 + $0x550] sm:$0xf0] }
 0x1ee   : > { %v4467_v38 = vpop.f32.mrf.mxu3  ;;  %v9619_v34 = vld [vmem:[%s11594_s28 + $0x940] sm:$0xf] }
 0x1ef   : > { %v4491_v46 = vpop.f32.mrf.mxu1  ;;  %v9629_v38 = vld [vmem:[%s11594_s28 + $0xd48] sm:$0xf0] }
 0x1f0   : > { %v4530_v49 = vpop.f32.mrf.mxu0  ;;  %v4492_v3 = vadd.f32 %v4491_v46, %v3535_v45  ;;  %v10622_v45 = vld [vmem:[%s11594_s28 + $0x144] sm:$0xf]  ;;  %v9632_v48 = vor.u32 %v10879_v39, %v9629_v38 }
 0x1f1   : > { %v4531_v9 = vadd.f32 %v4530_v49, %v3538_v47  ;;  %v8597_v46 = vld [vmem:[%s11594_s28 + $0x540] sm:$0xf0]  ;;  %v9620_v47 = vor.u32 %v11006_v35, %v9619_v34  ;;  %v8603_v49 = vld [vmem:[%s11594_s28 + $0x148] sm:$0xf] }
 0x1f2   : > { %10389 = vmatmul.msk.bf16.vlgmr.msrb.gmra.mxu1 %vm337_vm0, %v11641_v1  ;;  %10390 = vmatmul.msk.bf16.vlgmr.msrb.gmra.mxu2 %vm337_vm0, %v11641_v1  ;;  %v7629_v20 = vrot.slane %v4492_v3, 4  ;;  %v8600_v54 = vor.u32 %v10622_v45, %v8597_v46 }
 0x1f3   : > { %10391 = vmatmul.msk.bf16.vlgmr.msrb.gmra.mxu3 %vm337_vm0, %v11641_v1  ;;  %10392 = vmatmul.msk.bf16.vlgmr.msra.gmra.mxu0 %vm337_vm0, %v11641_v1  ;;  %v7632_v23 = vrot.slane %v4531_v9, 1 }
 0x1f4   : > { %5021 = vmatpush.bf16.msrb.mxu2 %v9608_v51  ;;  %5034 = vmatpush.bf16.msrb.mxu3 %v9612_v52  ;;  %v8595_v51 = vld [vmem:[%s11594_s28 + $0x140] sm:$0xf] }
 0x1f5   : > { %v4504_v12 = vpop.f32.mrf.mxu2  ;;  %5008 = vmatpush.bf16.msrb.mxu1 %v9604_v40  ;;  %5047 = vmatpush.bf16.msra.mxu0 %v9616_v55  ;;  %v10750_v52 = vld [vmem:[%s11594_s28 + $0x53c] sm:$0xf0] }
 0x1f6   : > { %v4505_v14 = vadd.f32 %v4504_v12, %v3536_v50  ;;  %v4517_v15 = vpop.f32.mrf.mxu3  ;;  %v10751_v50 = vld [vmem:[%s11594_s28 + $0x544] sm:$0xf0]  ;;  %v8596_v56 = vor.u32 %v10750_v52, %v8595_v51  ;;  %v11008_v12 = vld [vmem:[%s11594_s28 + $0xd4c] sm:$0xf0] }
 0x1f7   : > { %v4518_v18 = vadd.f32 %v4517_v15, %v3537_v0  ;;  %v4493_v19 = vpop.f32.mrf.mxu1  ;;  %v8604_v40 = vor.u32 %v10751_v50, %v8603_v49  ;;  %v10880_v0 = vld [vmem:[%s11594_s28 + $0x954] sm:$0xf]  ;;  %v3543_v15 = vperm.slane %v880_v61, 4 }
 0x1f8   : > { %v7630_v5 = vrot.slane %v4505_v14, 3  ;;  %v4532_v21 = vpop.f32.mrf.mxu0  ;;  %5022 = vmatpush.bf16.msrb.mxu2 %v8584_v4  ;;  %5035 = vmatpush.bf16.msrb.mxu3 %v8588_v7  ;;  %v9643_v4 = vld [vmem:[%s11594_s28 + $0x958] sm:$0xf]  ;;  %v3542_v14 = vperm.slane %v880_v61, 3 }
 0x1f9   : > { %v7631_v10 = vrot.slane %v4518_v18, 2  ;;  %5009 = vmatpush.bf16.msrb.mxu1 %v8580_v13  ;;  %5048 = vmatpush.bf16.msra.mxu0 %v8592_v11  ;;  %v11009_v7 = vld [vmem:[%s11594_s28 + $0xd54] sm:$0xf0]  ;;  %v10881_v13 = vld [vmem:[%s11594_s28 + $0x95c] sm:$0xf] }
 0x1fa   : > { %v7860_v24 = vsel %vm7828_vm4, %v7629_v20, %v7630_v5  ;;  %v9645_v11 = vld [vmem:[%s11594_s28 + $0xd58] sm:$0xf0]  ;;  %v3544_v20 = vperm.slane %v880_v61, 5  ;;  %v9640_v5 = vor.u32 %v10880_v0, %v9637_v2  ;;  %v9644_v21 = vor.u32 %v11009_v7, %v9643_v4  ;;  %v11011_v2 = vld [vmem:[%s11594_s28 + $0xd64] sm:$0xf0] }
 0x1fb   : > { %v7861_v25 = vsel %vm7830_vm5, %v7631_v10, %v7632_v23  ;;  %v9636_v10 = vor.u32 %v11008_v12, %v9635_v6  ;;  %v11010_v4 = vld [vmem:[%s11594_s28 + $0xd5c] sm:$0xf0]  ;;  %v10883_v6 = vld [vmem:[%s11594_s28 + $0x96c] sm:$0xf] }
 0x1fc   : > { %v7862_v27 = vsel %vm7832_vm6, %v7860_v24, %v7861_v25  ;;  %v9648_v24 = vor.u32 %v10881_v13, %v9645_v11  ;;  %v8619_v25 = vld [vmem:[%s11594_s28 + $0x158] sm:$0xf] }
 0x1fd   : > { %v7863_v31 = vsel %vm7834_vm7, %v7859_v26, %v7862_v27  ;;  %v4506_v32 = vpop.f32.mrf.mxu2  ;;  %v10753_v26 = vld [vmem:[%s11594_s28 + $0x554] sm:$0xf0]  ;;  %v8611_v27 = vld [vmem:[%s11594_s28 + $0x150] sm:$0xf] }
 0x1fe   : > { %8089 = vst [vmem:[%s11901_s6 + $0x20] sm:$0xff] %v7863_v31  ;;  %v4519_v36 = vpop.f32.mrf.mxu3  ;;  %v3539_v31 = vperm.slane %v880_v61, 0  ;;  %v8620_v39 = vor.u32 %v10753_v26, %v8619_v25  ;;  %v8612_v45 = vor.u32 %v10752_v28, %v8611_v27  ;;  %v9653_v61 = vld [vmem:[%s11594_s28 + $0xd60] sm:$0xf0] }
 0x1ff   : > { %v12159_v42 = vpop.f32.mrf.mxu1  ;;  %v8616_v36 = vor.u32 %v10624_v22, %v8613_v8  ;;  %v10627_v22 = vld [vmem:[%s11594_s28 + $0x16c] sm:$0xf] }
 0x200   : > { %v12161_v43 = vpop.f32.mrf.mxu0  ;;  %v8637_v8 = vld [vmem:[%s11594_s28 + $0x568] sm:$0xf0] }
 0x201   : > { %v4583_v32 = vadd.f32 %v12161_v43, %v3542_v14  ;;  %v8624_v43 = vor.u32 %v10625_v29, %v8621_v30  ;;  %v8640_v26 = vor.u32 %v10627_v22, %v8637_v8  ;;  %v881_v30 = vld [vmem:[%s11858_s1 + $0x30] sm:$0xff] }
 0x202   : > { %10393 = vmatmul.msk.bf16.vlgmr.msra.gmra.mxu1 %vm337_vm0, %v11641_v1  ;;  %10394 = vmatmul.msk.bf16.vlgmr.msra.gmra.mxu2 %vm337_vm0, %v11641_v1 }
 0x203   : > { %10395 = vmatmul.msk.bf16.vlgmr.msra.gmra.mxu3 %vm337_vm0, %v11641_v1  ;;  %10396 = vmatmul.msk.bf16.vlgmr.msrb.gmra.mxu0 %vm337_vm0, %v11641_v1  ;;  %v7635_v49 = vrot.slane %v4583_v32, 5  ;;  %v3549_v32 = vperm.slane %v881_v30, 2 }
 0x204   : > { %5073 = vmatpush.bf16.msra.mxu2 %v9624_v41  ;;  %5086 = vmatpush.bf16.msra.mxu3 %v9628_v44 }
 0x205   : > { %v4556_v55 = vpop.f32.mrf.mxu2  ;;  %5060 = vmatpush.bf16.msra.mxu1 %v9620_v47  ;;  %5099 = vmatpush.bf16.msrb.mxu0 %v9632_v48  ;;  %v4544_v48 = vadd.f32 %v12159_v42, %v3539_v31  ;;  %v3548_v31 = vperm.slane %v881_v30, 1 }
 0x206   : > { %v4569_v58 = vpop.f32.mrf.mxu3  ;;  %v4557_v18 = vadd.f32 %v4556_v55, %v3540_v62  ;;  %v9659_v62 = vld [vmem:[%s11594_s28 + $0x968] sm:$0xf] }
 0x207   : > { %v4545_v59 = vpop.f32.mrf.mxu1  ;;  %v4570_v23 = vadd.f32 %v4569_v58, %v3541_v63  ;;  %v9660_v14 = vor.u32 %v11011_v2, %v9659_v62  ;;  %v8653_v62 = vld [vmem:[%s11594_s28 + $0x578] sm:$0xf0]  ;;  %v3553_v2 = vperm.slane %v881_v30, 6 }
 0x208   : > { %v4584_v60 = vpop.f32.mrf.mxu0  ;;  %5074 = vmatpush.bf16.msra.mxu2 %v8600_v54  ;;  %5087 = vmatpush.bf16.msra.mxu3 %v8604_v40  ;;  %v7633_v34 = vrot.slane %v4557_v18, 7 }
 0x209   : > { %5061 = vmatpush.bf16.msra.mxu1 %v8596_v56  ;;  %5100 = vmatpush.bf16.msrb.mxu0 %v8608_v57  ;;  %v7634_v38 = vrot.slane %v4570_v23, 6  ;;  %v10882_v60 = vld [vmem:[%s11594_s28 + $0x964] sm:$0xf] }
 0x20a   : > { %v7864_v54 = vsel %vm7822_vm1, %v4544_v48, %v7633_v34  ;;  %v9656_v11 = vor.u32 %v10882_v60, %v9653_v61  ;;  %v9669_v34 = vld [vmem:[%s11594_s28 + $0xd70] sm:$0xf0]  ;;  %v10756_v60 = vld [vmem:[%s11594_s28 + $0x56c] sm:$0xf0]  ;;  %v10629_v61 = vld [vmem:[%s11594_s28 + $0x17c] sm:$0xf] }
 0x20b   : > { %v7865_v40 = vsel %vm7824_vm2, %v7634_v38, %v7635_v49  ;;  %v9667_v38 = vld [vmem:[%s11594_s28 + $0x970] sm:$0xf]  ;;  %v3554_v49 = vperm.slane %v881_v30, 7 }
 0x20c   : > { %v7866_v58 = vsel %vm7826_vm3, %v7864_v54, %v7865_v40  ;;  %v10628_v54 = vld [vmem:[%s11594_s28 + $0x174] sm:$0xf] }
 0x20d   : > { %v4558_v3 = vpop.f32.mrf.mxu2  ;;  %v8645_v40 = vld [vmem:[%s11594_s28 + $0x570] sm:$0xf0] }
 0x20e   : > { %v4571_v9 = vpop.f32.mrf.mxu3  ;;  %v9651_v3 = vld [vmem:[%s11594_s28 + $0x960] sm:$0xf] }
 0x20f   : > { %v4595_v16 = vpop.f32.mrf.mxu1  ;;  %v9661_v9 = vld [vmem:[%s11594_s28 + $0xd68] sm:$0xf0] }
 0x210   : > { %v4634_v19 = vpop.f32.mrf.mxu0  ;;  %v4596_v35 = vadd.f32 %v4595_v16, %v3543_v15  ;;  %v10626_v15 = vld [vmem:[%s11594_s28 + $0x164] sm:$0xf]  ;;  %v9664_v18 = vor.u32 %v10883_v6, %v9661_v9 }
 0x211   : > { %v4635_v41 = vadd.f32 %v4634_v19, %v3546_v17  ;;  %v8629_v16 = vld [vmem:[%s11594_s28 + $0x560] sm:$0xf0]  ;;  %v9652_v17 = vor.u32 %v11010_v4, %v9651_v3  ;;  %v8635_v19 = vld [vmem:[%s11594_s28 + $0x168] sm:$0xf] }
 0x212   : > { %10397 = vmatmul.msk.bf16.vlgmr.msrb.gmra.mxu1 %vm337_vm0, %v11641_v1  ;;  %10398 = vmatmul.msk.bf16.vlgmr.msrb.gmra.mxu2 %vm337_vm0, %v11641_v1  ;;  %v7636_v52 = vrot.slane %v4596_v35, 4  ;;  %v8632_v23 = vor.u32 %v10626_v15, %v8629_v16 }
 0x213   : > { %10399 = vmatmul.msk.bf16.vlgmr.msrb.gmra.mxu3 %vm337_vm0, %v11641_v1  ;;  %10400 = vmatmul.msk.bf16.vlgmr.msra.gmra.mxu0 %vm337_vm0, %v11641_v1  ;;  %v7639_v55 = vrot.slane %v4635_v41, 1 }
 0x214   : > { %5125 = vmatpush.bf16.msrb.mxu2 %v9640_v5  ;;  %5138 = vmatpush.bf16.msrb.mxu3 %v9644_v21  ;;  %v8627_v5 = vld [vmem:[%s11594_s28 + $0x160] sm:$0xf] }
 0x215   : > { %v4608_v44 = vpop.f32.mrf.mxu2  ;;  %5112 = vmatpush.bf16.msrb.mxu1 %v9636_v10  ;;  %5151 = vmatpush.bf16.msra.mxu0 %v9648_v24  ;;  %v10754_v21 = vld [vmem:[%s11594_s28 + $0x55c] sm:$0xf0] }
 0x216   : > { %v4609_v46 = vadd.f32 %v4608_v44, %v3544_v20  ;;  %v4621_v47 = vpop.f32.mrf.mxu3  ;;  %v10755_v20 = vld [vmem:[%s11594_s28 + $0x564] sm:$0xf0]  ;;  %v8628_v25 = vor.u32 %v10754_v21, %v8627_v5  ;;  %v11012_v44 = vld [vmem:[%s11594_s28 + $0xd6c] sm:$0xf0] }
 0x217   : > { %v4622_v50 = vadd.f32 %v4621_v47, %v3545_v33  ;;  %v4597_v51 = vpop.f32.mrf.mxu1  ;;  %v8636_v10 = vor.u32 %v10755_v20, %v8635_v19  ;;  %v10884_v33 = vld [vmem:[%s11594_s28 + $0x974] sm:$0xf]  ;;  %v3551_v47 = vperm.slane %v881_v30, 4 }
 0x218   : > { %v7637_v53 = vrot.slane %v4609_v46, 3  ;;  %v4636_v37 = vpop.f32.mrf.mxu0  ;;  %5126 = vmatpush.bf16.msrb.mxu2 %v8616_v36  ;;  %5139 = vmatpush.bf16.msrb.mxu3 %v8620_v39  ;;  %v9675_v36 = vld [vmem:[%s11594_s28 + $0x978] sm:$0xf]  ;;  %v3550_v46 = vperm.slane %v881_v30, 3 }
 0x219   : > { %v7638_v42 = vrot.slane %v4622_v50, 2  ;;  %5113 = vmatpush.bf16.msrb.mxu1 %v8612_v45  ;;  %5152 = vmatpush.bf16.msra.mxu0 %v8624_v43  ;;  %v11013_v39 = vld [vmem:[%s11594_s28 + $0xd74] sm:$0xf0]  ;;  %v10885_v45 = vld [vmem:[%s11594_s28 + $0x97c] sm:$0xf] }
 0x21a   : > { %v7867_v56 = vsel %vm7828_vm4, %v7636_v52, %v7637_v53  ;;  %v9677_v43 = vld [vmem:[%s11594_s28 + $0xd78] sm:$0xf0]  ;;  %v3552_v52 = vperm.slane %v881_v30, 5  ;;  %v9672_v53 = vor.u32 %v10884_v33, %v9669_v34  ;;  %v9676_v37 = vor.u32 %v11013_v39, %v9675_v36  ;;  %v11015_v34 = vld [vmem:[%s11594_s28 + $0xd84] sm:$0xf0] }
 0x21b   : > { %v7868_v57 = vsel %vm7830_vm5, %v7638_v42, %v7639_v55  ;;  %v9668_v42 = vor.u32 %v11012_v44, %v9667_v38  ;;  %v11014_v36 = vld [vmem:[%s11594_s28 + $0xd7c] sm:$0xf0]  ;;  %v10887_v38 = vld [vmem:[%s11594_s28 + $0x98c] sm:$0xf] }
 0x21c   : > { %v7869_v59 = vsel %vm7832_vm6, %v7867_v56, %v7868_v57  ;;  %v9680_v56 = vor.u32 %v10885_v45, %v9677_v43  ;;  %v8651_v57 = vld [vmem:[%s11594_s28 + $0x178] sm:$0xf] }
 0x21d   : > { %v7870_v63 = vsel %vm7834_vm7, %v7866_v58, %v7869_v59  ;;  %v4610_v0 = vpop.f32.mrf.mxu2  ;;  %v10757_v58 = vld [vmem:[%s11594_s28 + $0x574] sm:$0xf0]  ;;  %v8643_v59 = vld [vmem:[%s11594_s28 + $0x170] sm:$0xf] }
 0x21e   : > { %8090 = vst [vmem:[%s11901_s6 + $0x28] sm:$0xff] %v7870_v63  ;;  %v4623_v7 = vpop.f32.mrf.mxu3  ;;  %v3547_v63 = vperm.slane %v881_v30, 0  ;;  %v8652_v6 = vor.u32 %v10757_v58, %v8651_v57  ;;  %v8644_v15 = vor.u32 %v10756_v60, %v8643_v59  ;;  %v9685_v30 = vld [vmem:[%s11594_s28 + $0xd80] sm:$0xf0] }
 0x21f   : > { %v12222_v12 = vpop.f32.mrf.mxu1  ;;  %v8648_v7 = vor.u32 %v10628_v54, %v8645_v40  ;;  %v10631_v54 = vld [vmem:[%s11594_s28 + $0x18c] sm:$0xf] }
 0x220   : > { %v12224_v13 = vpop.f32.mrf.mxu0  ;;  %v8669_v40 = vld [vmem:[%s11594_s28 + $0x588] sm:$0xf0] }
 0x221   : > { %v4687_v0 = vadd.f32 %v12224_v13, %v3550_v46  ;;  %v8656_v13 = vor.u32 %v10629_v61, %v8653_v62  ;;  %v8672_v58 = vor.u32 %v10631_v54, %v8669_v40  ;;  %v882_v62 = vld [vmem:[%s11858_s1 + $0x38] sm:$0xff] }
 0x222   : > { %10401 = vmatmul.msk.bf16.vlgmr.msra.gmra.mxu1 %vm337_vm0, %v11641_v1  ;;  %10402 = vmatmul.msk.bf16.vlgmr.msra.gmra.mxu2 %vm337_vm0, %v11641_v1 }
 0x223   : > { %10403 = vmatmul.msk.bf16.vlgmr.msra.gmra.mxu3 %vm337_vm0, %v11641_v1  ;;  %10404 = vmatmul.msk.bf16.vlgmr.msrb.gmra.mxu0 %vm337_vm0, %v11641_v1  ;;  %v7642_v19 = vrot.slane %v4687_v0, 5  ;;  %v3557_v0 = vperm.slane %v882_v62, 2 }
 0x224   : > { %5177 = vmatpush.bf16.msra.mxu2 %v9656_v11  ;;  %5190 = vmatpush.bf16.msra.mxu3 %v9660_v14 }
 0x225   : > { %v4660_v24 = vpop.f32.mrf.mxu2  ;;  %5164 = vmatpush.bf16.msra.mxu1 %v9652_v17  ;;  %5203 = vmatpush.bf16.msrb.mxu0 %v9664_v18  ;;  %v4648_v18 = vadd.f32 %v12222_v12, %v3547_v63  ;;  %v3556_v63 = vperm.slane %v882_v62, 1 }
 0x226   : > { %v4673_v27 = vpop.f32.mrf.mxu3  ;;  %v4661_v50 = vadd.f32 %v4660_v24, %v3548_v31  ;;  %v9691_v31 = vld [vmem:[%s11594_s28 + $0x988] sm:$0xf] }
 0x227   : > { %v4649_v28 = vpop.f32.mrf.mxu1  ;;  %v4674_v55 = vadd.f32 %v4673_v27, %v3549_v32  ;;  %v9692_v46 = vor.u32 %v11015_v34, %v9691_v31  ;;  %v8685_v31 = vld [vmem:[%s11594_s28 + $0x598] sm:$0xf0]  ;;  %v3561_v34 = vperm.slane %v882_v62, 6 }
 0x228   : > { %v4688_v29 = vpop.f32.mrf.mxu0  ;;  %5178 = vmatpush.bf16.msra.mxu2 %v8632_v23  ;;  %5191 = vmatpush.bf16.msra.mxu3 %v8636_v10  ;;  %v7640_v3 = vrot.slane %v4661_v50, 7 }
 0x229   : > { %5165 = vmatpush.bf16.msra.mxu1 %v8628_v25  ;;  %5204 = vmatpush.bf16.msrb.mxu0 %v8640_v26  ;;  %v7641_v9 = vrot.slane %v4674_v55, 6  ;;  %v10886_v29 = vld [vmem:[%s11594_s28 + $0x984] sm:$0xf] }
 0x22a   : > { %v7871_v23 = vsel %vm7822_vm1, %v4648_v18, %v7640_v3  ;;  %v9688_v43 = vor.u32 %v10886_v29, %v9685_v30  ;;  %v9701_v3 = vld [vmem:[%s11594_s28 + $0xd90] sm:$0xf0]  ;;  %v10760_v29 = vld [vmem:[%s11594_s28 + $0x58c] sm:$0xf0]  ;;  %v10633_v30 = vld [vmem:[%s11594_s28 + $0x19c] sm:$0xf] }
 0x22b   : > { %v7872_v10 = vsel %vm7824_vm2, %v7641_v9, %v7642_v19  ;;  %v9699_v9 = vld [vmem:[%s11594_s28 + $0x990] sm:$0xf]  ;;  %v3562_v19 = vperm.slane %v882_v62, 7 }
 0x22c   : > { %v7873_v27 = vsel %vm7826_vm3, %v7871_v23, %v7872_v10  ;;  %v10632_v23 = vld [vmem:[%s11594_s28 + $0x194] sm:$0xf] }
 0x22d   : > { %v4662_v35 = vpop.f32.mrf.mxu2  ;;  %v8677_v10 = vld [vmem:[%s11594_s28 + $0x590] sm:$0xf0] }
 0x22e   : > { %v4675_v41 = vpop.f32.mrf.mxu3  ;;  %v9683_v35 = vld [vmem:[%s11594_s28 + $0x980] sm:$0xf] }
 0x22f   : > { %v4699_v48 = vpop.f32.mrf.mxu1  ;;  %v9693_v41 = vld [vmem:[%s11594_s28 + $0xd88] sm:$0xf0] }
 0x230   : > { %v4738_v51 = vpop.f32.mrf.mxu0  ;;  %v4700_v4 = vadd.f32 %v4699_v48, %v3551_v47  ;;  %v10630_v47 = vld [vmem:[%s11594_s28 + $0x184] sm:$0xf]  ;;  %v9696_v50 = vor.u32 %v10887_v38, %v9693_v41 }
 0x231   : > { %v4739_v11 = vadd.f32 %v4738_v51, %v3554_v49  ;;  %v8661_v48 = vld [vmem:[%s11594_s28 + $0x580] sm:$0xf0]  ;;  %v9684_v49 = vor.u32 %v11014_v36, %v9683_v35  ;;  %v8667_v51 = vld [vmem:[%s11594_s28 + $0x188] sm:$0xf] }
 0x232   : > { %10405 = vmatmul.msk.bf16.vlgmr.msrb.gmra.mxu1 %vm337_vm0, %v11641_v1  ;;  %10406 = vmatmul.msk.bf16.vlgmr.msrb.gmra.mxu2 %vm337_vm0, %v11641_v1  ;;  %v7643_v21 = vrot.slane %v4700_v4, 4  ;;  %v8664_v55 = vor.u32 %v10630_v47, %v8661_v48 }
 0x233   : > { %10407 = vmatmul.msk.bf16.vlgmr.msrb.gmra.mxu3 %vm337_vm0, %v11641_v1  ;;  %10408 = vmatmul.msk.bf16.vlgmr.msra.gmra.mxu0 %vm337_vm0, %v11641_v1  ;;  %v7646_v24 = vrot.slane %v4739_v11, 1 }
 0x234   : > { %5229 = vmatpush.bf16.msrb.mxu2 %v9672_v53  ;;  %5242 = vmatpush.bf16.msrb.mxu3 %v9676_v37  ;;  %v8659_v53 = vld [vmem:[%s11594_s28 + $0x180] sm:$0xf] }
 0x235   : > { %v4712_v14 = vpop.f32.mrf.mxu2  ;;  %5216 = vmatpush.bf16.msrb.mxu1 %v9668_v42  ;;  %5255 = vmatpush.bf16.msra.mxu0 %v9680_v56  ;;  %v10758_v37 = vld [vmem:[%s11594_s28 + $0x57c] sm:$0xf0] }
 0x236   : > { %v4713_v16 = vadd.f32 %v4712_v14, %v3552_v52  ;;  %v4725_v17 = vpop.f32.mrf.mxu3  ;;  %v10759_v52 = vld [vmem:[%s11594_s28 + $0x584] sm:$0xf0]  ;;  %v8660_v57 = vor.u32 %v10758_v37, %v8659_v53  ;;  %v11016_v14 = vld [vmem:[%s11594_s28 + $0xd8c] sm:$0xf0] }
 0x237   : > { %v4726_v20 = vadd.f32 %v4725_v17, %v3553_v2  ;;  %v4701_v5 = vpop.f32.mrf.mxu1  ;;  %v8668_v42 = vor.u32 %v10759_v52, %v8667_v51  ;;  %v10888_v2 = vld [vmem:[%s11594_s28 + $0x994] sm:$0xf]  ;;  %v3559_v17 = vperm.slane %v882_v62, 4 }
 0x238   : > { %v7644_v22 = vrot.slane %v4713_v16, 3  ;;  %v4740_v8 = vpop.f32.mrf.mxu0  ;;  %5230 = vmatpush.bf16.msrb.mxu2 %v8648_v7  ;;  %5243 = vmatpush.bf16.msrb.mxu3 %v8652_v6  ;;  %v9707_v7 = vld [vmem:[%s11594_s28 + $0x998] sm:$0xf]  ;;  %v3558_v16 = vperm.slane %v882_v62, 3 }
 0x239   : > { %v7645_v12 = vrot.slane %v4726_v20, 2  ;;  %5217 = vmatpush.bf16.msrb.mxu1 %v8644_v15  ;;  %5256 = vmatpush.bf16.msra.mxu0 %v8656_v13  ;;  %v11017_v6 = vld [vmem:[%s11594_s28 + $0xd94] sm:$0xf0]  ;;  %v10889_v15 = vld [vmem:[%s11594_s28 + $0x99c] sm:$0xf] }
 0x23a   : > { %v7874_v25 = vsel %vm7828_vm4, %v7643_v21, %v7644_v22  ;;  %v9709_v13 = vld [vmem:[%s11594_s28 + $0xd98] sm:$0xf0]  ;;  %v3560_v21 = vperm.slane %v882_v62, 5  ;;  %v9704_v22 = vor.u32 %v10888_v2, %v9701_v3  ;;  %v9708_v8 = vor.u32 %v11017_v6, %v9707_v7  ;;  %v11019_v3 = vld [vmem:[%s11594_s28 + $0xda4] sm:$0xf0] }
 0x23b   : > { %v7875_v26 = vsel %vm7830_vm5, %v7645_v12, %v7646_v24  ;;  %v9700_v12 = vor.u32 %v11016_v14, %v9699_v9  ;;  %v11018_v7 = vld [vmem:[%s11594_s28 + $0xd9c] sm:$0xf0]  ;;  %v10891_v9 = vld [vmem:[%s11594_s28 + $0x9ac] sm:$0xf] }
 0x23c   : > { %v7876_v28 = vsel %vm7832_vm6, %v7874_v25, %v7875_v26  ;;  %v9712_v25 = vor.u32 %v10889_v15, %v9709_v13  ;;  %v8683_v26 = vld [vmem:[%s11594_s28 + $0x198] sm:$0xf] }
 0x23d   : > { %v7877_v32 = vsel %vm7834_vm7, %v7873_v27, %v7876_v28  ;;  %v4714_v33 = vpop.f32.mrf.mxu2  ;;  %v10761_v27 = vld [vmem:[%s11594_s28 + $0x594] sm:$0xf0]  ;;  %v8675_v28 = vld [vmem:[%s11594_s28 + $0x190] sm:$0xf] }
 0x23e   : > { %8091 = vst [vmem:[%s11901_s6 + $0x30] sm:$0xff] %v7877_v32  ;;  %v4727_v39 = vpop.f32.mrf.mxu3  ;;  %v3555_v32 = vperm.slane %v882_v62, 0  ;;  %v8684_v38 = vor.u32 %v10761_v27, %v8683_v26  ;;  %v8676_v47 = vor.u32 %v10760_v29, %v8675_v28  ;;  %v9717_v62 = vld [vmem:[%s11594_s28 + $0xda0] sm:$0xf0] }
 0x23f   : > { %v12285_v44 = vpop.f32.mrf.mxu1  ;;  %v8680_v39 = vor.u32 %v10632_v23, %v8677_v10  ;;  %v10635_v23 = vld [vmem:[%s11594_s28 + $0x1ac] sm:$0xf] }
 0x240   : > { %v12287_v45 = vpop.f32.mrf.mxu0  ;;  %v8701_v10 = vld [vmem:[%s11594_s28 + $0x5a8] sm:$0xf0] }
 0x241   : > { %v4791_v33 = vadd.f32 %v12287_v45, %v3558_v16  ;;  %v8688_v45 = vor.u32 %v10633_v30, %v8685_v31  ;;  %v8704_v27 = vor.u32 %v10635_v23, %v8701_v10  ;;  %v883_v31 = vld [vmem:[%s11858_s1 + $0x40] sm:$0xff] }
 0x242   : > { %10409 = vmatmul.msk.bf16.vlgmr.msra.gmra.mxu1 %vm337_vm0, %v11641_v1  ;;  %10410 = vmatmul.msk.bf16.vlgmr.msra.gmra.mxu2 %vm337_vm0, %v11641_v1 }
 0x243   : > { %10411 = vmatmul.msk.bf16.vlgmr.msra.gmra.mxu3 %vm337_vm0, %v11641_v1  ;;  %10412 = vmatmul.msk.bf16.vlgmr.msrb.gmra.mxu0 %vm337_vm0, %v11641_v1  ;;  %v7649_v51 = vrot.slane %v4791_v33, 5  ;;  %v3565_v33 = vperm.slane %v883_v31, 2 }
 0x244   : > { %5281 = vmatpush.bf16.msra.mxu2 %v9688_v43  ;;  %5294 = vmatpush.bf16.msra.mxu3 %v9692_v46 }
 0x245   : > { %v4764_v56 = vpop.f32.mrf.mxu2  ;;  %5268 = vmatpush.bf16.msra.mxu1 %v9684_v49  ;;  %5307 = vmatpush.bf16.msrb.mxu0 %v9696_v50  ;;  %v4752_v50 = vadd.f32 %v12285_v44, %v3555_v32  ;;  %v3564_v32 = vperm.slane %v883_v31, 1 }
 0x246   : > { %v4777_v59 = vpop.f32.mrf.mxu3  ;;  %v4765_v20 = vadd.f32 %v4764_v56, %v3556_v63  ;;  %v9723_v63 = vld [vmem:[%s11594_s28 + $0x9a8] sm:$0xf] }
 0x247   : > { %v4753_v60 = vpop.f32.mrf.mxu1  ;;  %v4778_v24 = vadd.f32 %v4777_v59, %v3557_v0  ;;  %v9724_v16 = vor.u32 %v11019_v3, %v9723_v63  ;;  %v8717_v63 = vld [vmem:[%s11594_s28 + $0x5b8] sm:$0xf0]  ;;  %v3569_v3 = vperm.slane %v883_v31, 6 }
 0x248   : > { %v4792_v61 = vpop.f32.mrf.mxu0  ;;  %5282 = vmatpush.bf16.msra.mxu2 %v8664_v55  ;;  %5295 = vmatpush.bf16.msra.mxu3 %v8668_v42  ;;  %v7647_v35 = vrot.slane %v4765_v20, 7 }
 0x249   : > { %5269 = vmatpush.bf16.msra.mxu1 %v8660_v57  ;;  %5308 = vmatpush.bf16.msrb.mxu0 %v8672_v58  ;;  %v7648_v41 = vrot.slane %v4778_v24, 6  ;;  %v10890_v61 = vld [vmem:[%s11594_s28 + $0x9a4] sm:$0xf] }
 0x24a   : > { %v7878_v55 = vsel %vm7822_vm1, %v4752_v50, %v7647_v35  ;;  %v9720_v13 = vor.u32 %v10890_v61, %v9717_v62  ;;  %v9733_v35 = vld [vmem:[%s11594_s28 + $0xdb0] sm:$0xf0]  ;;  %v10764_v61 = vld [vmem:[%s11594_s28 + $0x5ac] sm:$0xf0]  ;;  %v10637_v62 = vld [vmem:[%s11594_s28 + $0x1bc] sm:$0xf] }
 0x24b   : > { %v7879_v42 = vsel %vm7824_vm2, %v7648_v41, %v7649_v51  ;;  %v9731_v41 = vld [vmem:[%s11594_s28 + $0x9b0] sm:$0xf]  ;;  %v3570_v51 = vperm.slane %v883_v31, 7 }
 0x24c   : > { %v7880_v59 = vsel %vm7826_vm3, %v7878_v55, %v7879_v42  ;;  %v10636_v55 = vld [vmem:[%s11594_s28 + $0x1b4] sm:$0xf] }
 0x24d   : > { %v4766_v4 = vpop.f32.mrf.mxu2  ;;  %v8709_v42 = vld [vmem:[%s11594_s28 + $0x5b0] sm:$0xf0] }
 0x24e   : > { %v4779_v11 = vpop.f32.mrf.mxu3  ;;  %v9715_v4 = vld [vmem:[%s11594_s28 + $0x9a0] sm:$0xf] }
 0x24f   : > { %v4803_v18 = vpop.f32.mrf.mxu1  ;;  %v9725_v11 = vld [vmem:[%s11594_s28 + $0xda8] sm:$0xf0] }
 0x250   : > { %v4842_v5 = vpop.f32.mrf.mxu0  ;;  %v4804_v36 = vadd.f32 %v4803_v18, %v3559_v17  ;;  %v10634_v17 = vld [vmem:[%s11594_s28 + $0x1a4] sm:$0xf]  ;;  %v9728_v20 = vor.u32 %v10891_v9, %v9725_v11 }
 0x251   : > { %v4843_v43 = vadd.f32 %v4842_v5, %v3562_v19  ;;  %v8693_v18 = vld [vmem:[%s11594_s28 + $0x5a0] sm:$0xf0]  ;;  %v9716_v19 = vor.u32 %v11018_v7, %v9715_v4  ;;  %v8699_v5 = vld [vmem:[%s11594_s28 + $0x1a8] sm:$0xf] }
 0x252   : > { %10413 = vmatmul.msk.bf16.vlgmr.msrb.gmra.mxu1 %vm337_vm0, %v11641_v1  ;;  %10414 = vmatmul.msk.bf16.vlgmr.msrb.gmra.mxu2 %vm337_vm0, %v11641_v1  ;;  %v7650_v37 = vrot.slane %v4804_v36, 4  ;;  %v8696_v24 = vor.u32 %v10634_v17, %v8693_v18 }
 0x253   : > { %10415 = vmatmul.msk.bf16.vlgmr.msrb.gmra.mxu3 %vm337_vm0, %v11641_v1  ;;  %10416 = vmatmul.msk.bf16.vlgmr.msra.gmra.mxu0 %vm337_vm0, %v11641_v1  ;;  %v7653_v56 = vrot.slane %v4843_v43, 1 }
 0x254   : > { %5333 = vmatpush.bf16.msrb.mxu2 %v9704_v22  ;;  %5346 = vmatpush.bf16.msrb.mxu3 %v9708_v8  ;;  %v8691_v22 = vld [vmem:[%s11594_s28 + $0x1a0] sm:$0xf] }
 0x255   : > { %v4816_v46 = vpop.f32.mrf.mxu2  ;;  %5320 = vmatpush.bf16.msrb.mxu1 %v9700_v12  ;;  %5359 = vmatpush.bf16.msra.mxu0 %v9712_v25  ;;  %v10762_v8 = vld [vmem:[%s11594_s28 + $0x59c] sm:$0xf0] }
 0x256   : > { %v4817_v48 = vadd.f32 %v4816_v46, %v3560_v21  ;;  %v4829_v49 = vpop.f32.mrf.mxu3  ;;  %v10763_v21 = vld [vmem:[%s11594_s28 + $0x5a4] sm:$0xf0]  ;;  %v8692_v26 = vor.u32 %v10762_v8, %v8691_v22  ;;  %v11020_v46 = vld [vmem:[%s11594_s28 + $0xdac] sm:$0xf0] }
 0x257   : > { %v4830_v52 = vadd.f32 %v4829_v49, %v3561_v34  ;;  %v4805_v53 = vpop.f32.mrf.mxu1  ;;  %v8700_v12 = vor.u32 %v10763_v21, %v8699_v5  ;;  %v10892_v34 = vld [vmem:[%s11594_s28 + $0x9b4] sm:$0xf]  ;;  %v3567_v49 = vperm.slane %v883_v31, 4 }
 0x258   : > { %v7651_v54 = vrot.slane %v4817_v48, 3  ;;  %v4844_v40 = vpop.f32.mrf.mxu0  ;;  %5334 = vmatpush.bf16.msrb.mxu2 %v8680_v39  ;;  %5347 = vmatpush.bf16.msrb.mxu3 %v8684_v38  ;;  %v9739_v39 = vld [vmem:[%s11594_s28 + $0x9b8] sm:$0xf]  ;;  %v3566_v48 = vperm.slane %v883_v31, 3 }
 0x259   : > { %v7652_v44 = vrot.slane %v4830_v52, 2  ;;  %5321 = vmatpush.bf16.msrb.mxu1 %v8676_v47  ;;  %5360 = vmatpush.bf16.msra.mxu0 %v8688_v45  ;;  %v11021_v38 = vld [vmem:[%s11594_s28 + $0xdb4] sm:$0xf0]  ;;  %v10893_v47 = vld [vmem:[%s11594_s28 + $0x9bc] sm:$0xf] }
 0x25a   : > { %v7881_v57 = vsel %vm7828_vm4, %v7650_v37, %v7651_v54  ;;  %v9741_v45 = vld [vmem:[%s11594_s28 + $0xdb8] sm:$0xf0]  ;;  %v3568_v37 = vperm.slane %v883_v31, 5  ;;  %v9736_v54 = vor.u32 %v10892_v34, %v9733_v35  ;;  %v9740_v40 = vor.u32 %v11021_v38, %v9739_v39  ;;  %v11023_v35 = vld [vmem:[%s11594_s28 + $0xdc4] sm:$0xf0] }
 0x25b   : > { %v7882_v58 = vsel %vm7830_vm5, %v7652_v44, %v7653_v56  ;;  %v9732_v44 = vor.u32 %v11020_v46, %v9731_v41  ;;  %v11022_v39 = vld [vmem:[%s11594_s28 + $0xdbc] sm:$0xf0]  ;;  %v10895_v41 = vld [vmem:[%s11594_s28 + $0x9cc] sm:$0xf] }
 0x25c   : > { %v7883_v60 = vsel %vm7832_vm6, %v7881_v57, %v7882_v58  ;;  %v9744_v57 = vor.u32 %v10893_v47, %v9741_v45  ;;  %v8715_v58 = vld [vmem:[%s11594_s28 + $0x1b8] sm:$0xf] }
 0x25d   : > { %v7884_v0 = vsel %vm7834_vm7, %v7880_v59, %v7883_v60  ;;  %v4818_v2 = vpop.f32.mrf.mxu2  ;;  %v10765_v59 = vld [vmem:[%s11594_s28 + $0x5b4] sm:$0xf0]  ;;  %v8707_v60 = vld [vmem:[%s11594_s28 + $0x1b0] sm:$0xf] }
 0x25e   : > { %8092 = vst [vmem:[%s11901_s6 + $0x38] sm:$0xff] %v7884_v0  ;;  %v4831_v6 = vpop.f32.mrf.mxu3  ;;  %v3563_v0 = vperm.slane %v883_v31, 0  ;;  %v8716_v9 = vor.u32 %v10765_v59, %v8715_v58  ;;  %v8708_v17 = vor.u32 %v10764_v61, %v8707_v60  ;;  %v9749_v31 = vld [vmem:[%s11594_s28 + $0xdc0] sm:$0xf0] }
 0x25f   : > { %v12348_v14 = vpop.f32.mrf.mxu1  ;;  %v8712_v6 = vor.u32 %v10636_v55, %v8709_v42  ;;  %v10639_v55 = vld [vmem:[%s11594_s28 + $0x1cc] sm:$0xf] }
 0x260   : > { %v12350_v15 = vpop.f32.mrf.mxu0  ;;  %v8733_v42 = vld [vmem:[%s11594_s28 + $0x5c8] sm:$0xf0] }
 0x261   : > { %v4895_v2 = vadd.f32 %v12350_v15, %v3566_v48  ;;  %v8720_v15 = vor.u32 %v10637_v62, %v8717_v63  ;;  %v8736_v59 = vor.u32 %v10639_v55, %v8733_v42  ;;  %v884_v63 = vld [vmem:[%s11858_s1 + $0x48] sm:$0xff] }
 0x262   : > { %10417 = vmatmul.msk.bf16.vlgmr.msra.gmra.mxu1 %vm337_vm0, %v11641_v1  ;;  %10418 = vmatmul.msk.bf16.vlgmr.msra.gmra.mxu2 %vm337_vm0, %v11641_v1 }
 0x263   : > { %10419 = vmatmul.msk.bf16.vlgmr.msra.gmra.mxu3 %vm337_vm0, %v11641_v1  ;;  %10420 = vmatmul.msk.bf16.vlgmr.msrb.gmra.mxu0 %vm337_vm0, %v11641_v1  ;;  %v7656_v5 = vrot.slane %v4895_v2, 5  ;;  %v3573_v2 = vperm.slane %v884_v63, 2 }
 0x264   : > { %5385 = vmatpush.bf16.msra.mxu2 %v9720_v13  ;;  %5398 = vmatpush.bf16.msra.mxu3 %v9724_v16 }
 0x265   : > { %v4868_v25 = vpop.f32.mrf.mxu2  ;;  %5372 = vmatpush.bf16.msra.mxu1 %v9716_v19  ;;  %5411 = vmatpush.bf16.msrb.mxu0 %v9728_v20  ;;  %v4856_v20 = vadd.f32 %v12348_v14, %v3563_v0  ;;  %v3572_v0 = vperm.slane %v884_v63, 1 }
 0x266   : > { %v4881_v28 = vpop.f32.mrf.mxu3  ;;  %v4869_v52 = vadd.f32 %v4868_v25, %v3564_v32  ;;  %v9755_v32 = vld [vmem:[%s11594_s28 + $0x9c8] sm:$0xf] }
 0x267   : > { %v4857_v29 = vpop.f32.mrf.mxu1  ;;  %v4882_v56 = vadd.f32 %v4881_v28, %v3565_v33  ;;  %v9756_v48 = vor.u32 %v11023_v35, %v9755_v32  ;;  %v8749_v32 = vld [vmem:[%s11594_s28 + $0x5d8] sm:$0xf0]  ;;  %v3577_v35 = vperm.slane %v884_v63, 6 }
 0x268   : > { %v4896_v30 = vpop.f32.mrf.mxu0  ;;  %5386 = vmatpush.bf16.msra.mxu2 %v8696_v24  ;;  %5399 = vmatpush.bf16.msra.mxu3 %v8700_v12  ;;  %v7654_v4 = vrot.slane %v4869_v52, 7 }
 0x269   : > { %5373 = vmatpush.bf16.msra.mxu1 %v8692_v26  ;;  %5412 = vmatpush.bf16.msrb.mxu0 %v8704_v27  ;;  %v7655_v11 = vrot.slane %v4882_v56, 6  ;;  %v10894_v30 = vld [vmem:[%s11594_s28 + $0x9c4] sm:$0xf] }
 0x26a   : > { %v7885_v24 = vsel %vm7822_vm1, %v4856_v20, %v7654_v4  ;;  %v9752_v45 = vor.u32 %v10894_v30, %v9749_v31  ;;  %v9765_v4 = vld [vmem:[%s11594_s28 + $0xdd0] sm:$0xf0]  ;;  %v10768_v30 = vld [vmem:[%s11594_s28 + $0x5cc] sm:$0xf0]  ;;  %v10641_v31 = vld [vmem:[%s11594_s28 + $0x1dc] sm:$0xf] }
 0x26b   : > { %v7886_v12 = vsel %vm7824_vm2, %v7655_v11, %v7656_v5  ;;  %v9763_v11 = vld [vmem:[%s11594_s28 + $0x9d0] sm:$0xf]  ;;  %v3578_v5 = vperm.slane %v884_v63, 7 }
 0x26c   : > { %v7887_v28 = vsel %vm7826_vm3, %v7885_v24, %v7886_v12  ;;  %v10640_v24 = vld [vmem:[%s11594_s28 + $0x1d4] sm:$0xf] }
 0x26d   : > { %v4870_v36 = vpop.f32.mrf.mxu2  ;;  %v8741_v12 = vld [vmem:[%s11594_s28 + $0x5d0] sm:$0xf0] }
 0x26e   : > { %v4883_v43 = vpop.f32.mrf.mxu3  ;;  %v9747_v36 = vld [vmem:[%s11594_s28 + $0x9c0] sm:$0xf] }
 0x26f   : > { %v4907_v50 = vpop.f32.mrf.mxu1  ;;  %v9757_v43 = vld [vmem:[%s11594_s28 + $0xdc8] sm:$0xf0] }
 0x270   : > { %v4946_v53 = vpop.f32.mrf.mxu0  ;;  %v4908_v7 = vadd.f32 %v4907_v50, %v3567_v49  ;;  %v10638_v49 = vld [vmem:[%s11594_s28 + $0x1c4] sm:$0xf]  ;;  %v9760_v52 = vor.u32 %v10895_v41, %v9757_v43 }
 0x271   : > { %v4947_v13 = vadd.f32 %v4946_v53, %v3570_v51  ;;  %v8725_v50 = vld [vmem:[%s11594_s28 + $0x5c0] sm:$0xf0]  ;;  %v9748_v51 = vor.u32 %v11022_v39, %v9747_v36  ;;  %v8731_v53 = vld [vmem:[%s11594_s28 + $0x1c8] sm:$0xf] }
 0x272   : > { %10421 = vmatmul.msk.bf16.vlgmr.msrb.gmra.mxu1 %vm337_vm0, %v11641_v1  ;;  %10422 = vmatmul.msk.bf16.vlgmr.msrb.gmra.mxu2 %vm337_vm0, %v11641_v1  ;;  %v7657_v8 = vrot.slane %v4908_v7, 4  ;;  %v8728_v56 = vor.u32 %v10638_v49, %v8725_v50 }
 0x273   : > { %10423 = vmatmul.msk.bf16.vlgmr.msrb.gmra.mxu3 %vm337_vm0, %v11641_v1  ;;  %10424 = vmatmul.msk.bf16.vlgmr.msra.gmra.mxu0 %vm337_vm0, %v11641_v1  ;;  %v7660_v25 = vrot.slane %v4947_v13, 1 }
 0x274   : > { %5437 = vmatpush.bf16.msrb.mxu2 %v9736_v54  ;;  %5450 = vmatpush.bf16.msrb.mxu3 %v9740_v40  ;;  %v8723_v54 = vld [vmem:[%s11594_s28 + $0x1c0] sm:$0xf] }
 0x275   : > { %v4920_v16 = vpop.f32.mrf.mxu2  ;;  %5424 = vmatpush.bf16.msrb.mxu1 %v9732_v44  ;;  %5463 = vmatpush.bf16.msra.mxu0 %v9744_v57  ;;  %v10766_v40 = vld [vmem:[%s11594_s28 + $0x5bc] sm:$0xf0] }
 0x276   : > { %v4921_v18 = vadd.f32 %v4920_v16, %v3568_v37  ;;  %v4933_v19 = vpop.f32.mrf.mxu3  ;;  %v10767_v37 = vld [vmem:[%s11594_s28 + $0x5c4] sm:$0xf0]  ;;  %v8724_v58 = vor.u32 %v10766_v40, %v8723_v54  ;;  %v11024_v16 = vld [vmem:[%s11594_s28 + $0xdcc] sm:$0xf0] }
 0x277   : > { %v4934_v21 = vadd.f32 %v4933_v19, %v3569_v3  ;;  %v4909_v22 = vpop.f32.mrf.mxu1  ;;  %v8732_v44 = vor.u32 %v10767_v37, %v8731_v53  ;;  %v10896_v3 = vld [vmem:[%s11594_s28 + $0x9d4] sm:$0xf]  ;;  %v3575_v19 = vperm.slane %v884_v63, 4 }
 0x278   : > { %v7658_v23 = vrot.slane %v4921_v18, 3  ;;  %v4948_v10 = vpop.f32.mrf.mxu0  ;;  %5438 = vmatpush.bf16.msrb.mxu2 %v8712_v6  ;;  %5451 = vmatpush.bf16.msrb.mxu3 %v8716_v9  ;;  %v9771_v6 = vld [vmem:[%s11594_s28 + $0x9d8] sm:$0xf]  ;;  %v3574_v18 = vperm.slane %v884_v63, 3 }
 0x279   : > { %v7659_v14 = vrot.slane %v4934_v21, 2  ;;  %5425 = vmatpush.bf16.msrb.mxu1 %v8708_v17  ;;  %5464 = vmatpush.bf16.msra.mxu0 %v8720_v15  ;;  %v11025_v9 = vld [vmem:[%s11594_s28 + $0xdd4] sm:$0xf0]  ;;  %v10897_v17 = vld [vmem:[%s11594_s28 + $0x9dc] sm:$0xf] }
 0x27a   : > { %v7888_v26 = vsel %vm7828_vm4, %v7657_v8, %v7658_v23  ;;  %v9773_v15 = vld [vmem:[%s11594_s28 + $0xdd8] sm:$0xf0]  ;;  %v3576_v8 = vperm.slane %v884_v63, 5  ;;  %v9768_v23 = vor.u32 %v10896_v3, %v9765_v4  ;;  %v9772_v10 = vor.u32 %v11025_v9, %v9771_v6  ;;  %v11027_v4 = vld [vmem:[%s11594_s28 + $0xde4] sm:$0xf0] }
 0x27b   : > { %v7889_v27 = vsel %vm7830_vm5, %v7659_v14, %v7660_v25  ;;  %v9764_v14 = vor.u32 %v11024_v16, %v9763_v11  ;;  %v11026_v6 = vld [vmem:[%s11594_s28 + $0xddc] sm:$0xf0]  ;;  %v10899_v11 = vld [vmem:[%s11594_s28 + $0x9ec] sm:$0xf] }
 0x27c   : > { %v7890_v29 = vsel %vm7832_vm6, %v7888_v26, %v7889_v27  ;;  %v9776_v26 = vor.u32 %v10897_v17, %v9773_v15  ;;  %v8747_v27 = vld [vmem:[%s11594_s28 + $0x1d8] sm:$0xf] }
 0x27d   : > { %v7891_v33 = vsel %vm7834_vm7, %v7887_v28, %v7890_v29  ;;  %v4922_v34 = vpop.f32.mrf.mxu2  ;;  %v10769_v28 = vld [vmem:[%s11594_s28 + $0x5d4] sm:$0xf0]  ;;  %v8739_v29 = vld [vmem:[%s11594_s28 + $0x1d0] sm:$0xf] }
 0x27e   : > { %8093 = vst [vmem:[%s11901_s6 + $0x40] sm:$0xff] %v7891_v33  ;;  %v4935_v38 = vpop.f32.mrf.mxu3  ;;  %v3571_v33 = vperm.slane %v884_v63, 0  ;;  %v8748_v41 = vor.u32 %v10769_v28, %v8747_v27  ;;  %v8740_v49 = vor.u32 %v10768_v30, %v8739_v29  ;;  %v9781_v63 = vld [vmem:[%s11594_s28 + $0xde0] sm:$0xf0] }
 0x27f   : > { %v12411_v46 = vpop.f32.mrf.mxu1  ;;  %v8744_v38 = vor.u32 %v10640_v24, %v8741_v12  ;;  %v10643_v24 = vld [vmem:[%s11594_s28 + $0x1ec] sm:$0xf] }
 0x280   : > { %v12413_v47 = vpop.f32.mrf.mxu0  ;;  %v8765_v12 = vld [vmem:[%s11594_s28 + $0x5e8] sm:$0xf0] }
 0x281   : > { %v4999_v34 = vadd.f32 %v12413_v47, %v3574_v18  ;;  %v8752_v47 = vor.u32 %v10641_v31, %v8749_v32  ;;  %v8768_v28 = vor.u32 %v10643_v24, %v8765_v12  ;;  %v885_v32 = vld [vmem:[%s11858_s1 + $0x50] sm:$0xff] }
 0x282   : > { %10425 = vmatmul.msk.bf16.vlgmr.msra.gmra.mxu1 %vm337_vm0, %v11641_v1  ;;  %10426 = vmatmul.msk.bf16.vlgmr.msra.gmra.mxu2 %vm337_vm0, %v11641_v1 }
 0x283   : > { %10427 = vmatmul.msk.bf16.vlgmr.msra.gmra.mxu3 %vm337_vm0, %v11641_v1  ;;  %10428 = vmatmul.msk.bf16.vlgmr.msrb.gmra.mxu0 %vm337_vm0, %v11641_v1  ;;  %v7663_v53 = vrot.slane %v4999_v34, 5  ;;  %v3581_v34 = vperm.slane %v885_v32, 2 }
 0x284   : > { %5489 = vmatpush.bf16.msra.mxu2 %v9752_v45  ;;  %5502 = vmatpush.bf16.msra.mxu3 %v9756_v48 }
 0x285   : > { %v4972_v57 = vpop.f32.mrf.mxu2  ;;  %5476 = vmatpush.bf16.msra.mxu1 %v9748_v51  ;;  %5515 = vmatpush.bf16.msrb.mxu0 %v9760_v52  ;;  %v4960_v52 = vadd.f32 %v12411_v46, %v3571_v33  ;;  %v3580_v33 = vperm.slane %v885_v32, 1 }
 0x286   : > { %v4985_v60 = vpop.f32.mrf.mxu3  ;;  %v4973_v21 = vadd.f32 %v4972_v57, %v3572_v0  ;;  %v9787_v0 = vld [vmem:[%s11594_s28 + $0x9e8] sm:$0xf] }
 0x287   : > { %v4961_v61 = vpop.f32.mrf.mxu1  ;;  %v4986_v25 = vadd.f32 %v4985_v60, %v3573_v2  ;;  %v9788_v18 = vor.u32 %v11027_v4, %v9787_v0  ;;  %v8781_v0 = vld [vmem:[%s11594_s28 + $0x5f8] sm:$0xf0]  ;;  %v3585_v4 = vperm.slane %v885_v32, 6 }
 0x288   : > { %v5000_v62 = vpop.f32.mrf.mxu0  ;;  %5490 = vmatpush.bf16.msra.mxu2 %v8728_v56  ;;  %5503 = vmatpush.bf16.msra.mxu3 %v8732_v44  ;;  %v7661_v36 = vrot.slane %v4973_v21, 7 }
 0x289   : > { %5477 = vmatpush.bf16.msra.mxu1 %v8724_v58  ;;  %5516 = vmatpush.bf16.msrb.mxu0 %v8736_v59  ;;  %v7662_v43 = vrot.slane %v4986_v25, 6  ;;  %v10898_v62 = vld [vmem:[%s11594_s28 + $0x9e4] sm:$0xf] }
 0x28a   : > { %v7892_v56 = vsel %vm7822_vm1, %v4960_v52, %v7661_v36  ;;  %v9784_v15 = vor.u32 %v10898_v62, %v9781_v63  ;;  %v9797_v36 = vld [vmem:[%s11594_s28 + $0xdf0] sm:$0xf0]  ;;  %v10772_v62 = vld [vmem:[%s11594_s28 + $0x5ec] sm:$0xf0]  ;;  %v10645_v63 = vld [vmem:[%s11594_s28 + $0x1fc] sm:$0xf] }
 0x28b   : > { %v7893_v44 = vsel %vm7824_vm2, %v7662_v43, %v7663_v53  ;;  %v9795_v43 = vld [vmem:[%s11594_s28 + $0x9f0] sm:$0xf]  ;;  %v3586_v53 = vperm.slane %v885_v32, 7 }
 0x28c   : > { %v7894_v60 = vsel %vm7826_vm3, %v7892_v56, %v7893_v44  ;;  %v10644_v56 = vld [vmem:[%s11594_s28 + $0x1f4] sm:$0xf] }
 0x28d   : > { %v4974_v7 = vpop.f32.mrf.mxu2  ;;  %v8773_v44 = vld [vmem:[%s11594_s28 + $0x5f0] sm:$0xf0] }
 0x28e   : > { %v4987_v13 = vpop.f32.mrf.mxu3  ;;  %v9779_v7 = vld [vmem:[%s11594_s28 + $0x9e0] sm:$0xf] }
 0x28f   : > { %v5011_v20 = vpop.f32.mrf.mxu1  ;;  %v9789_v13 = vld [vmem:[%s11594_s28 + $0xde8] sm:$0xf0] }
 0x290   : > { %v5050_v22 = vpop.f32.mrf.mxu0  ;;  %v5012_v39 = vadd.f32 %v5011_v20, %v3575_v19  ;;  %v10642_v19 = vld [vmem:[%s11594_s28 + $0x1e4] sm:$0xf]  ;;  %v9792_v21 = vor.u32 %v10899_v11, %v9789_v13 }
 0x291   : > { %v5051_v45 = vadd.f32 %v5050_v22, %v3578_v5  ;;  %v8757_v20 = vld [vmem:[%s11594_s28 + $0x5e0] sm:$0xf0]  ;;  %v9780_v5 = vor.u32 %v11026_v6, %v9779_v7  ;;  %v8763_v22 = vld [vmem:[%s11594_s28 + $0x1e8] sm:$0xf] }
 0x292   : > { %10429 = vmatmul.msk.bf16.vlgmr.msrb.gmra.mxu1 %vm337_vm0, %v11641_v1  ;;  %10430 = vmatmul.msk.bf16.vlgmr.msrb.gmra.mxu2 %vm337_vm0, %v11641_v1  ;;  %v7664_v40 = vrot.slane %v5012_v39, 4  ;;  %v8760_v25 = vor.u32 %v10642_v19, %v8757_v20 }
 0x293   : > { %10431 = vmatmul.msk.bf16.vlgmr.msrb.gmra.mxu3 %vm337_vm0, %v11641_v1  ;;  %10432 = vmatmul.msk.bf16.vlgmr.msra.gmra.mxu0 %vm337_vm0, %v11641_v1  ;;  %v7667_v57 = vrot.slane %v5051_v45, 1 }
 0x294   : > { %5541 = vmatpush.bf16.msrb.mxu2 %v9768_v23  ;;  %5554 = vmatpush.bf16.msrb.mxu3 %v9772_v10  ;;  %v8755_v23 = vld [vmem:[%s11594_s28 + $0x1e0] sm:$0xf] }
 0x295   : > { %v5024_v48 = vpop.f32.mrf.mxu2  ;;  %5528 = vmatpush.bf16.msrb.mxu1 %v9764_v14  ;;  %5567 = vmatpush.bf16.msra.mxu0 %v9776_v26  ;;  %v10770_v10 = vld [vmem:[%s11594_s28 + $0x5dc] sm:$0xf0] }
 0x296   : > { %v5025_v50 = vadd.f32 %v5024_v48, %v3576_v8  ;;  %v5037_v51 = vpop.f32.mrf.mxu3  ;;  %v10771_v8 = vld [vmem:[%s11594_s28 + $0x5e4] sm:$0xf0]  ;;  %v8756_v27 = vor.u32 %v10770_v10, %v8755_v23  ;;  %v11028_v48 = vld [vmem:[%s11594_s28 + $0xdec] sm:$0xf0] }
 0x297   : > { %v5038_v37 = vadd.f32 %v5037_v51, %v3577_v35  ;;  %v5013_v54 = vpop.f32.mrf.mxu1  ;;  %v8764_v14 = vor.u32 %v10771_v8, %v8763_v22  ;;  %v10900_v35 = vld [vmem:[%s11594_s28 + $0x9f4] sm:$0xf]  ;;  %v3583_v51 = vperm.slane %v885_v32, 4 }
 0x298   : > { %v7665_v55 = vrot.slane %v5025_v50, 3  ;;  %v5052_v42 = vpop.f32.mrf.mxu0  ;;  %5542 = vmatpush.bf16.msrb.mxu2 %v8744_v38  ;;  %5555 = vmatpush.bf16.msrb.mxu3 %v8748_v41  ;;  %v9803_v38 = vld [vmem:[%s11594_s28 + $0x9f8] sm:$0xf]  ;;  %v3582_v50 = vperm.slane %v885_v32, 3 }
 0x299   : > { %v7666_v46 = vrot.slane %v5038_v37, 2  ;;  %5529 = vmatpush.bf16.msrb.mxu1 %v8740_v49  ;;  %5568 = vmatpush.bf16.msra.mxu0 %v8752_v47  ;;  %v11029_v41 = vld [vmem:[%s11594_s28 + $0xdf4] sm:$0xf0]  ;;  %v10901_v49 = vld [vmem:[%s11594_s28 + $0x9fc] sm:$0xf] }
 0x29a   : > { %v7895_v58 = vsel %vm7828_vm4, %v7664_v40, %v7665_v55  ;;  %v9805_v47 = vld [vmem:[%s11594_s28 + $0xdf8] sm:$0xf0]  ;;  %v3584_v40 = vperm.slane %v885_v32, 5  ;;  %v9800_v55 = vor.u32 %v10900_v35, %v9797_v36  ;;  %v9804_v42 = vor.u32 %v11029_v41, %v9803_v38  ;;  %v11031_v36 = vld [vmem:[%s11594_s28 + $0xe04] sm:$0xf0] }
 0x29b   : > { %v7896_v59 = vsel %vm7830_vm5, %v7666_v46, %v7667_v57  ;;  %v9796_v46 = vor.u32 %v11028_v48, %v9795_v43  ;;  %v11030_v38 = vld [vmem:[%s11594_s28 + $0xdfc] sm:$0xf0]  ;;  %v10903_v43 = vld [vmem:[%s11594_s28 + $0xa0c] sm:$0xf] }
 0x29c   : > { %v7897_v61 = vsel %vm7832_vm6, %v7895_v58, %v7896_v59  ;;  %v9808_v58 = vor.u32 %v10901_v49, %v9805_v47  ;;  %v8779_v59 = vld [vmem:[%s11594_s28 + $0x1f8] sm:$0xf] }
 0x29d   : > { %v7898_v2 = vsel %vm7834_vm7, %v7894_v60, %v7897_v61  ;;  %v5026_v3 = vpop.f32.mrf.mxu2  ;;  %v10773_v60 = vld [vmem:[%s11594_s28 + $0x5f4] sm:$0xf0]  ;;  %v8771_v61 = vld [vmem:[%s11594_s28 + $0x1f0] sm:$0xf] }
 0x29e   : > { %8094 = vst [vmem:[%s11901_s6 + $0x48] sm:$0xff] %v7898_v2  ;;  %v5039_v9 = vpop.f32.mrf.mxu3  ;;  %v3579_v2 = vperm.slane %v885_v32, 0  ;;  %v8780_v11 = vor.u32 %v10773_v60, %v8779_v59  ;;  %v8772_v19 = vor.u32 %v10772_v62, %v8771_v61  ;;  %v9813_v32 = vld [vmem:[%s11594_s28 + $0xe00] sm:$0xf0] }
 0x29f   : > { %v12474_v16 = vpop.f32.mrf.mxu1  ;;  %v8776_v9 = vor.u32 %v10644_v56, %v8773_v44  ;;  %v10647_v56 = vld [vmem:[%s11594_s28 + $0x20c] sm:$0xf] }
 0x2a0   : > { %v12476_v17 = vpop.f32.mrf.mxu0  ;;  %v8797_v44 = vld [vmem:[%s11594_s28 + $0x608] sm:$0xf0] }
 0x2a1   : > { %v5103_v3 = vadd.f32 %v12476_v17, %v3582_v50  ;;  %v8784_v17 = vor.u32 %v10645_v63, %v8781_v0  ;;  %v8800_v60 = vor.u32 %v10647_v56, %v8797_v44  ;;  %v886_v0 = vld [vmem:[%s11858_s1 + $0x58] sm:$0xff] }
 0x2a2   : > { %10433 = vmatmul.msk.bf16.vlgmr.msra.gmra.mxu1 %vm337_vm0, %v11641_v1  ;;  %10434 = vmatmul.msk.bf16.vlgmr.msra.gmra.mxu2 %vm337_vm0, %v11641_v1 }
 0x2a3   : > { %10435 = vmatmul.msk.bf16.vlgmr.msra.gmra.mxu3 %vm337_vm0, %v11641_v1  ;;  %10436 = vmatmul.msk.bf16.vlgmr.msrb.gmra.mxu0 %vm337_vm0, %v11641_v1  ;;  %v7670_v22 = vrot.slane %v5103_v3, 5  ;;  %v3589_v3 = vperm.slane %v886_v0, 2 }
 0x2a4   : > { %5593 = vmatpush.bf16.msra.mxu2 %v9784_v15  ;;  %5606 = vmatpush.bf16.msra.mxu3 %v9788_v18 }
 0x2a5   : > { %v5076_v26 = vpop.f32.mrf.mxu2  ;;  %5580 = vmatpush.bf16.msra.mxu1 %v9780_v5  ;;  %5619 = vmatpush.bf16.msrb.mxu0 %v9792_v21  ;;  %v5064_v21 = vadd.f32 %v12474_v16, %v3579_v2  ;;  %v3588_v2 = vperm.slane %v886_v0, 1 }
 0x2a6   : > { %v5089_v29 = vpop.f32.mrf.mxu3  ;;  %v5077_v37 = vadd.f32 %v5076_v26, %v3580_v33  ;;  %v9819_v33 = vld [vmem:[%s11594_s28 + $0xa08] sm:$0xf] }
 0x2a7   : > { %v5065_v30 = vpop.f32.mrf.mxu1  ;;  %v5090_v57 = vadd.f32 %v5089_v29, %v3581_v34  ;;  %v9820_v50 = vor.u32 %v11031_v36, %v9819_v33  ;;  %v8813_v33 = vld [vmem:[%s11594_s28 + $0x618] sm:$0xf0]  ;;  %v3593_v36 = vperm.slane %v886_v0, 6 }
 0x2a8   : > { %v5104_v31 = vpop.f32.mrf.mxu0  ;;  %5594 = vmatpush.bf16.msra.mxu2 %v8760_v25  ;;  %5607 = vmatpush.bf16.msra.mxu3 %v8764_v14  ;;  %v7668_v7 = vrot.slane %v5077_v37, 7 }
 0x2a9   : > { %5581 = vmatpush.bf16.msra.mxu1 %v8756_v27  ;;  %5620 = vmatpush.bf16.msrb.mxu0 %v8768_v28  ;;  %v7669_v13 = vrot.slane %v5090_v57, 6  ;;  %v10902_v31 = vld [vmem:[%s11594_s28 + $0xa04] sm:$0xf] }
 0x2aa   : > { %v7899_v25 = vsel %vm7822_vm1, %v5064_v21, %v7668_v7  ;;  %v9816_v47 = vor.u32 %v10902_v31, %v9813_v32  ;;  %v9829_v7 = vld [vmem:[%s11594_s28 + $0xe10] sm:$0xf0]  ;;  %v10776_v31 = vld [vmem:[%s11594_s28 + $0x60c] sm:$0xf0]  ;;  %v10649_v32 = vld [vmem:[%s11594_s28 + $0x21c] sm:$0xf] }
 0x2ab   : > { %v7900_v14 = vsel %vm7824_vm2, %v7669_v13, %v7670_v22  ;;  %v9827_v13 = vld [vmem:[%s11594_s28 + $0xa10] sm:$0xf]  ;;  %v3594_v22 = vperm.slane %v886_v0, 7 }
 0x2ac   : > { %v7901_v29 = vsel %vm7826_vm3, %v7899_v25, %v7900_v14  ;;  %v10648_v25 = vld [vmem:[%s11594_s28 + $0x214] sm:$0xf] }
 0x2ad   : > { %v5078_v39 = vpop.f32.mrf.mxu2  ;;  %v8805_v14 = vld [vmem:[%s11594_s28 + $0x610] sm:$0xf0] }
 0x2ae   : > { %v5091_v45 = vpop.f32.mrf.mxu3  ;;  %v9811_v39 = vld [vmem:[%s11594_s28 + $0xa00] sm:$0xf] }
 0x2af   : > { %v5115_v52 = vpop.f32.mrf.mxu1  ;;  %v9821_v45 = vld [vmem:[%s11594_s28 + $0xe08] sm:$0xf0] }
 0x2b0   : > { %v5154_v54 = vpop.f32.mrf.mxu0  ;;  %v5116_v6 = vadd.f32 %v5115_v52, %v3583_v51  ;;  %v10646_v51 = vld [vmem:[%s11594_s28 + $0x204] sm:$0xf]  ;;  %v9824_v37 = vor.u32 %v10903_v43, %v9821_v45 }
 0x2b1   : > { %v5155_v15 = vadd.f32 %v5154_v54, %v3586_v53  ;;  %v8789_v52 = vld [vmem:[%s11594_s28 + $0x600] sm:$0xf0]  ;;  %v9812_v53 = vor.u32 %v11030_v38, %v9811_v39  ;;  %v8795_v54 = vld [vmem:[%s11594_s28 + $0x208] sm:$0xf] }
 0x2b2   : > { %10437 = vmatmul.msk.bf16.vlgmr.msrb.gmra.mxu1 %vm337_vm0, %v11641_v1  ;;  %10438 = vmatmul.msk.bf16.vlgmr.msrb.gmra.mxu2 %vm337_vm0, %v11641_v1  ;;  %v7671_v10 = vrot.slane %v5116_v6, 4  ;;  %v8792_v57 = vor.u32 %v10646_v51, %v8789_v52 }
 0x2b3   : > { %10439 = vmatmul.msk.bf16.vlgmr.msrb.gmra.mxu3 %vm337_vm0, %v11641_v1  ;;  %10440 = vmatmul.msk.bf16.vlgmr.msra.gmra.mxu0 %vm337_vm0, %v11641_v1  ;;  %v7674_v26 = vrot.slane %v5155_v15, 1 }
 0x2b4   : > { %5645 = vmatpush.bf16.msrb.mxu2 %v9800_v55  ;;  %5658 = vmatpush.bf16.msrb.mxu3 %v9804_v42  ;;  %v8787_v55 = vld [vmem:[%s11594_s28 + $0x200] sm:$0xf] }
 0x2b5   : > { %v5128_v18 = vpop.f32.mrf.mxu2  ;;  %5632 = vmatpush.bf16.msrb.mxu1 %v9796_v46  ;;  %5671 = vmatpush.bf16.msra.mxu0 %v9808_v58  ;;  %v10774_v42 = vld [vmem:[%s11594_s28 + $0x5fc] sm:$0xf0] }
 0x2b6   : > { %v5129_v20 = vadd.f32 %v5128_v18, %v3584_v40  ;;  %v5141_v5 = vpop.f32.mrf.mxu3  ;;  %v10775_v40 = vld [vmem:[%s11594_s28 + $0x604] sm:$0xf0]  ;;  %v8788_v59 = vor.u32 %v10774_v42, %v8787_v55  ;;  %v11032_v18 = vld [vmem:[%s11594_s28 + $0xe0c] sm:$0xf0] }
 0x2b7   : > { %v5142_v8 = vadd.f32 %v5141_v5, %v3585_v4  ;;  %v5117_v23 = vpop.f32.mrf.mxu1  ;;  %v8796_v46 = vor.u32 %v10775_v40, %v8795_v54  ;;  %v10904_v4 = vld [vmem:[%s11594_s28 + $0xa14] sm:$0xf]  ;;  %v3591_v5 = vperm.slane %v886_v0, 4 }
 0x2b8   : > { %v7672_v24 = vrot.slane %v5129_v20, 3  ;;  %v5156_v12 = vpop.f32.mrf.mxu0  ;;  %5646 = vmatpush.bf16.msrb.mxu2 %v8776_v9  ;;  %5659 = vmatpush.bf16.msrb.mxu3 %v8780_v11  ;;  %v9835_v9 = vld [vmem:[%s11594_s28 + $0xa18] sm:$0xf]  ;;  %v3590_v20 = vperm.slane %v886_v0, 3 }
 0x2b9   : > { %v7673_v16 = vrot.slane %v5142_v8, 2  ;;  %5633 = vmatpush.bf16.msrb.mxu1 %v8772_v19  ;;  %5672 = vmatpush.bf16.msra.mxu0 %v8784_v17  ;;  %v11033_v11 = vld [vmem:[%s11594_s28 + $0xe14] sm:$0xf0]  ;;  %v10905_v19 = vld [vmem:[%s11594_s28 + $0xa1c] sm:$0xf] }
 0x2ba   : > { %v7902_v27 = vsel %vm7828_vm4, %v7671_v10, %v7672_v24  ;;  %v9837_v17 = vld [vmem:[%s11594_s28 + $0xe18] sm:$0xf0]  ;;  %v3592_v10 = vperm.slane %v886_v0, 5  ;;  %v9832_v24 = vor.u32 %v10904_v4, %v9829_v7  ;;  %v9836_v12 = vor.u32 %v11033_v11, %v9835_v9  ;;  %v11035_v7 = vld [vmem:[%s11594_s28 + $0xe24] sm:$0xf0] }
 0x2bb   : > { %v7903_v28 = vsel %vm7830_vm5, %v7673_v16, %v7674_v26  ;;  %v9828_v16 = vor.u32 %v11032_v18, %v9827_v13  ;;  %v11034_v9 = vld [vmem:[%s11594_s28 + $0xe1c] sm:$0xf0]  ;;  %v10907_v13 = vld [vmem:[%s11594_s28 + $0xa2c] sm:$0xf] }
 0x2bc   : > { %v7904_v30 = vsel %vm7832_vm6, %v7902_v27, %v7903_v28  ;;  %v9840_v27 = vor.u32 %v10905_v19, %v9837_v17  ;;  %v8811_v28 = vld [vmem:[%s11594_s28 + $0x218] sm:$0xf] }
 0x2bd   : > { %v7905_v34 = vsel %vm7834_vm7, %v7901_v29, %v7904_v30  ;;  %v5130_v35 = vpop.f32.mrf.mxu2  ;;  %v10777_v29 = vld [vmem:[%s11594_s28 + $0x614] sm:$0xf0]  ;;  %v8803_v30 = vld [vmem:[%s11594_s28 + $0x210] sm:$0xf] }
 0x2be   : > { %8095 = vst [vmem:[%s11901_s6 + $0x50] sm:$0xff] %v7905_v34  ;;  %v5143_v41 = vpop.f32.mrf.mxu3  ;;  %v3587_v34 = vperm.slane %v886_v0, 0  ;;  %v8812_v43 = vor.u32 %v10777_v29, %v8811_v28  ;;  %v8804_v51 = vor.u32 %v10776_v31, %v8803_v30  ;;  %v9845_v0 = vld [vmem:[%s11594_s28 + $0xe20] sm:$0xf0] }
 0x2bf   : > { %v12537_v48 = vpop.f32.mrf.mxu1  ;;  %v8808_v41 = vor.u32 %v10648_v25, %v8805_v14  ;;  %v10651_v25 = vld [vmem:[%s11594_s28 + $0x22c] sm:$0xf] }
 0x2c0   : > { %v12539_v49 = vpop.f32.mrf.mxu0  ;;  %v8829_v14 = vld [vmem:[%s11594_s28 + $0x628] sm:$0xf0] }
 0x2c1   : > { %v5207_v35 = vadd.f32 %v12539_v49, %v3590_v20  ;;  %v8816_v49 = vor.u32 %v10649_v32, %v8813_v33  ;;  %v8832_v29 = vor.u32 %v10651_v25, %v8829_v14  ;;  %v887_v33 = vld [vmem:[%s11858_s1 + $0x60] sm:$0xff] }
 0x2c2   : > { %10441 = vmatmul.msk.bf16.vlgmr.msra.gmra.mxu1 %vm337_vm0, %v11641_v1  ;;  %10442 = vmatmul.msk.bf16.vlgmr.msra.gmra.mxu2 %vm337_vm0, %v11641_v1 }
 0x2c3   : > { %10443 = vmatmul.msk.bf16.vlgmr.msra.gmra.mxu3 %vm337_vm0, %v11641_v1  ;;  %10444 = vmatmul.msk.bf16.vlgmr.msrb.gmra.mxu0 %vm337_vm0, %v11641_v1  ;;  %v7677_v54 = vrot.slane %v5207_v35, 5  ;;  %v3597_v35 = vperm.slane %v887_v33, 2 }
 0x2c4   : > { %5697 = vmatpush.bf16.msra.mxu2 %v9816_v47  ;;  %5710 = vmatpush.bf16.msra.mxu3 %v9820_v50 }
 0x2c5   : > { %v5180_v58 = vpop.f32.mrf.mxu2  ;;  %5684 = vmatpush.bf16.msra.mxu1 %v9812_v53  ;;  %5723 = vmatpush.bf16.msrb.mxu0 %v9824_v37  ;;  %v5168_v37 = vadd.f32 %v12537_v48, %v3587_v34  ;;  %v3596_v34 = vperm.slane %v887_v33, 1 }
 0x2c6   : > { %v5193_v61 = vpop.f32.mrf.mxu3  ;;  %v5181_v8 = vadd.f32 %v5180_v58, %v3588_v2  ;;  %v9851_v2 = vld [vmem:[%s11594_s28 + $0xa28] sm:$0xf] }
 0x2c7   : > { %v5169_v62 = vpop.f32.mrf.mxu1  ;;  %v5194_v26 = vadd.f32 %v5193_v61, %v3589_v3  ;;  %v9852_v20 = vor.u32 %v11035_v7, %v9851_v2  ;;  %v8845_v2 = vld [vmem:[%s11594_s28 + $0x638] sm:$0xf0]  ;;  %v3601_v7 = vperm.slane %v887_v33, 6 }
 0x2c8   : > { %v5208_v63 = vpop.f32.mrf.mxu0  ;;  %5698 = vmatpush.bf16.msra.mxu2 %v8792_v57  ;;  %5711 = vmatpush.bf16.msra.mxu3 %v8796_v46  ;;  %v7675_v39 = vrot.slane %v5181_v8, 7 }
 0x2c9   : > { %5685 = vmatpush.bf16.msra.mxu1 %v8788_v59  ;;  %5724 = vmatpush.bf16.msrb.mxu0 %v8800_v60  ;;  %v7676_v45 = vrot.slane %v5194_v26, 6  ;;  %v10906_v63 = vld [vmem:[%s11594_s28 + $0xa24] sm:$0xf] }
 0x2ca   : > { %v7906_v57 = vsel %vm7822_vm1, %v5168_v37, %v7675_v39  ;;  %v9848_v17 = vor.u32 %v10906_v63, %v9845_v0  ;;  %v9861_v39 = vld [vmem:[%s11594_s28 + $0xe30] sm:$0xf0]  ;;  %v10780_v63 = vld [vmem:[%s11594_s28 + $0x62c] sm:$0xf0]  ;;  %v10653_v0 = vld [vmem:[%s11594_s28 + $0x23c] sm:$0xf] }
 0x2cb   : > { %v7907_v46 = vsel %vm7824_vm2, %v7676_v45, %v7677_v54  ;;  %v9859_v45 = vld [vmem:[%s11594_s28 + $0xa30] sm:$0xf]  ;;  %v3602_v54 = vperm.slane %v887_v33, 7 }
 0x2cc   : > { %v7908_v61 = vsel %vm7826_vm3, %v7906_v57, %v7907_v46  ;;  %v10652_v57 = vld [vmem:[%s11594_s28 + $0x234] sm:$0xf] }
 0x2cd   : > { %v5182_v6 = vpop.f32.mrf.mxu2  ;;  %v8837_v46 = vld [vmem:[%s11594_s28 + $0x630] sm:$0xf0] }
 0x2ce   : > { %v5195_v15 = vpop.f32.mrf.mxu3  ;;  %v9843_v6 = vld [vmem:[%s11594_s28 + $0xa20] sm:$0xf] }
 0x2cf   : > { %v5219_v21 = vpop.f32.mrf.mxu1  ;;  %v9853_v15 = vld [vmem:[%s11594_s28 + $0xe28] sm:$0xf0] }
 0x2d0   : > { %v5258_v23 = vpop.f32.mrf.mxu0  ;;  %v5220_v38 = vadd.f32 %v5219_v21, %v3591_v5  ;;  %v10650_v5 = vld [vmem:[%s11594_s28 + $0x224] sm:$0xf]  ;;  %v9856_v8 = vor.u32 %v10907_v13, %v9853_v15 }
 0x2d1   : > { %v5259_v47 = vadd.f32 %v5258_v23, %v3594_v22  ;;  %v8821_v21 = vld [vmem:[%s11594_s28 + $0x620] sm:$0xf0]  ;;  %v9844_v22 = vor.u32 %v11034_v9, %v9843_v6  ;;  %v8827_v23 = vld [vmem:[%s11594_s28 + $0x228] sm:$0xf] }
 0x2d2   : > { %10445 = vmatmul.msk.bf16.vlgmr.msrb.gmra.mxu1 %vm337_vm0, %v11641_v1  ;;  %10446 = vmatmul.msk.bf16.vlgmr.msrb.gmra.mxu2 %vm337_vm0, %v11641_v1  ;;  %v7678_v42 = vrot.slane %v5220_v38, 4  ;;  %v8824_v26 = vor.u32 %v10650_v5, %v8821_v21 }
 0x2d3   : > { %10447 = vmatmul.msk.bf16.vlgmr.msrb.gmra.mxu3 %vm337_vm0, %v11641_v1  ;;  %10448 = vmatmul.msk.bf16.vlgmr.msra.gmra.mxu0 %vm337_vm0, %v11641_v1  ;;  %v7681_v58 = vrot.slane %v5259_v47, 1 }
 0x2d4   : > { %5749 = vmatpush.bf16.msrb.mxu2 %v9832_v24  ;;  %5762 = vmatpush.bf16.msrb.mxu3 %v9836_v12  ;;  %v8819_v24 = vld [vmem:[%s11594_s28 + $0x220] sm:$0xf] }
 0x2d5   : > { %v5232_v50 = vpop.f32.mrf.mxu2  ;;  %5736 = vmatpush.bf16.msrb.mxu1 %v9828_v16  ;;  %5775 = vmatpush.bf16.msra.mxu0 %v9840_v27  ;;  %v10778_v12 = vld [vmem:[%s11594_s28 + $0x61c] sm:$0xf0] }
 0x2d6   : > { %v5233_v52 = vadd.f32 %v5232_v50, %v3592_v10  ;;  %v5245_v53 = vpop.f32.mrf.mxu3  ;;  %v10779_v10 = vld [vmem:[%s11594_s28 + $0x624] sm:$0xf0]  ;;  %v8820_v28 = vor.u32 %v10778_v12, %v8819_v24  ;;  %v11036_v50 = vld [vmem:[%s11594_s28 + $0xe2c] sm:$0xf0] }
 0x2d7   : > { %v5246_v40 = vadd.f32 %v5245_v53, %v3593_v36  ;;  %v5221_v55 = vpop.f32.mrf.mxu1  ;;  %v8828_v16 = vor.u32 %v10779_v10, %v8827_v23  ;;  %v10908_v36 = vld [vmem:[%s11594_s28 + $0xa34] sm:$0xf]  ;;  %v3599_v53 = vperm.slane %v887_v33, 4 }
 0x2d8   : > { %v7679_v56 = vrot.slane %v5233_v52, 3  ;;  %v5260_v44 = vpop.f32.mrf.mxu0  ;;  %5750 = vmatpush.bf16.msrb.mxu2 %v8808_v41  ;;  %5763 = vmatpush.bf16.msrb.mxu3 %v8812_v43  ;;  %v9867_v41 = vld [vmem:[%s11594_s28 + $0xa38] sm:$0xf]  ;;  %v3598_v52 = vperm.slane %v887_v33, 3 }
 0x2d9   : > { %v7680_v48 = vrot.slane %v5246_v40, 2  ;;  %5737 = vmatpush.bf16.msrb.mxu1 %v8804_v51  ;;  %5776 = vmatpush.bf16.msra.mxu0 %v8816_v49  ;;  %v11037_v43 = vld [vmem:[%s11594_s28 + $0xe34] sm:$0xf0]  ;;  %v10909_v51 = vld [vmem:[%s11594_s28 + $0xa3c] sm:$0xf] }
 0x2da   : > { %v7909_v59 = vsel %vm7828_vm4, %v7678_v42, %v7679_v56  ;;  %v9869_v49 = vld [vmem:[%s11594_s28 + $0xe38] sm:$0xf0]  ;;  %v3600_v42 = vperm.slane %v887_v33, 5  ;;  %v9864_v56 = vor.u32 %v10908_v36, %v9861_v39  ;;  %v9868_v44 = vor.u32 %v11037_v43, %v9867_v41  ;;  %v11039_v39 = vld [vmem:[%s11594_s28 + $0xe44] sm:$0xf0] }
 0x2db   : > { %v7910_v60 = vsel %vm7830_vm5, %v7680_v48, %v7681_v58  ;;  %v9860_v48 = vor.u32 %v11036_v50, %v9859_v45  ;;  %v11038_v41 = vld [vmem:[%s11594_s28 + $0xe3c] sm:$0xf0]  ;;  %v10911_v45 = vld [vmem:[%s11594_s28 + $0xa4c] sm:$0xf] }
 0x2dc   : > { %v7911_v62 = vsel %vm7832_vm6, %v7909_v59, %v7910_v60  ;;  %v9872_v59 = vor.u32 %v10909_v51, %v9869_v49  ;;  %v8843_v60 = vld [vmem:[%s11594_s28 + $0x238] sm:$0xf] }
 0x2dd   : > { %v7912_v3 = vsel %vm7834_vm7, %v7908_v61, %v7911_v62  ;;  %v5234_v4 = vpop.f32.mrf.mxu2  ;;  %v10781_v61 = vld [vmem:[%s11594_s28 + $0x634] sm:$0xf0]  ;;  %v8835_v62 = vld [vmem:[%s11594_s28 + $0x230] sm:$0xf] }
 0x2de   : > { %8096 = vst [vmem:[%s11901_s6 + $0x58] sm:$0xff] %v7912_v3  ;;  %v5247_v11 = vpop.f32.mrf.mxu3  ;;  %v3595_v3 = vperm.slane %v887_v33, 0  ;;  %v8844_v13 = vor.u32 %v10781_v61, %v8843_v60  ;;  %v8836_v5 = vor.u32 %v10780_v63, %v8835_v62  ;;  %v9877_v33 = vld [vmem:[%s11594_s28 + $0xe40] sm:$0xf0] }
 0x2df   : > { %v12600_v18 = vpop.f32.mrf.mxu1  ;;  %v8840_v11 = vor.u32 %v10652_v57, %v8837_v46  ;;  %v10655_v57 = vld [vmem:[%s11594_s28 + $0x24c] sm:$0xf] }
 0x2e0   : > { %v12602_v19 = vpop.f32.mrf.mxu0  ;;  %v8861_v46 = vld [vmem:[%s11594_s28 + $0x648] sm:$0xf0] }
 0x2e1   : > { %v5311_v4 = vadd.f32 %v12602_v19, %v3598_v52  ;;  %v8848_v19 = vor.u32 %v10653_v0, %v8845_v2  ;;  %v8864_v61 = vor.u32 %v10655_v57, %v8861_v46  ;;  %v888_v2 = vld [vmem:[%s11858_s1 + $0x68] sm:$0xff] }
 0x2e2   : > { %10449 = vmatmul.msk.bf16.vlgmr.msra.gmra.mxu1 %vm337_vm0, %v11641_v1  ;;  %10450 = vmatmul.msk.bf16.vlgmr.msra.gmra.mxu2 %vm337_vm0, %v11641_v1 }
 0x2e3   : > { %10451 = vmatmul.msk.bf16.vlgmr.msra.gmra.mxu3 %vm337_vm0, %v11641_v1  ;;  %10452 = vmatmul.msk.bf16.vlgmr.msrb.gmra.mxu0 %vm337_vm0, %v11641_v1  ;;  %v7684_v23 = vrot.slane %v5311_v4, 5  ;;  %v3605_v4 = vperm.slane %v888_v2, 2 }
 0x2e4   : > { %5801 = vmatpush.bf16.msra.mxu2 %v9848_v17  ;;  %5814 = vmatpush.bf16.msra.mxu3 %v9852_v20 }
 0x2e5   : > { %v5284_v27 = vpop.f32.mrf.mxu2  ;;  %5788 = vmatpush.bf16.msra.mxu1 %v9844_v22  ;;  %5827 = vmatpush.bf16.msrb.mxu0 %v9856_v8  ;;  %v5272_v8 = vadd.f32 %v12600_v18, %v3595_v3  ;;  %v3604_v3 = vperm.slane %v888_v2, 1 }
 0x2e6   : > { %v5297_v30 = vpop.f32.mrf.mxu3  ;;  %v5285_v40 = vadd.f32 %v5284_v27, %v3596_v34  ;;  %v9883_v34 = vld [vmem:[%s11594_s28 + $0xa48] sm:$0xf] }
 0x2e7   : > { %v5273_v31 = vpop.f32.mrf.mxu1  ;;  %v5298_v58 = vadd.f32 %v5297_v30, %v3597_v35  ;;  %v9884_v52 = vor.u32 %v11039_v39, %v9883_v34  ;;  %v8877_v34 = vld [vmem:[%s11594_s28 + $0x658] sm:$0xf0]  ;;  %v3609_v39 = vperm.slane %v888_v2, 6 }
 0x2e8   : > { %v5312_v32 = vpop.f32.mrf.mxu0  ;;  %5802 = vmatpush.bf16.msra.mxu2 %v8824_v26  ;;  %5815 = vmatpush.bf16.msra.mxu3 %v8828_v16  ;;  %v7682_v6 = vrot.slane %v5285_v40, 7 }
 0x2e9   : > { %5789 = vmatpush.bf16.msra.mxu1 %v8820_v28  ;;  %5828 = vmatpush.bf16.msrb.mxu0 %v8832_v29  ;;  %v7683_v15 = vrot.slane %v5298_v58, 6  ;;  %v10910_v32 = vld [vmem:[%s11594_s28 + $0xa44] sm:$0xf] }
 0x2ea   : > { %v7913_v26 = vsel %vm7822_vm1, %v5272_v8, %v7682_v6  ;;  %v9880_v49 = vor.u32 %v10910_v32, %v9877_v33  ;;  %v9893_v6 = vld [vmem:[%s11594_s28 + $0xe50] sm:$0xf0]  ;;  %v10784_v32 = vld [vmem:[%s11594_s28 + $0x64c] sm:$0xf0]  ;;  %v10657_v33 = vld [vmem:[%s11594_s28 + $0x25c] sm:$0xf] }
 0x2eb   : > { %v7914_v16 = vsel %vm7824_vm2, %v7683_v15, %v7684_v23  ;;  %v9891_v15 = vld [vmem:[%s11594_s28 + $0xa50] sm:$0xf]  ;;  %v3610_v23 = vperm.slane %v888_v2, 7 }
 0x2ec   : > { %v7915_v30 = vsel %vm7826_vm3, %v7913_v26, %v7914_v16  ;;  %v10656_v26 = vld [vmem:[%s11594_s28 + $0x254] sm:$0xf] }
 0x2ed   : > { %v5286_v38 = vpop.f32.mrf.mxu2  ;;  %v8869_v16 = vld [vmem:[%s11594_s28 + $0x650] sm:$0xf0] }
 0x2ee   : > { %v5299_v47 = vpop.f32.mrf.mxu3  ;;  %v9875_v38 = vld [vmem:[%s11594_s28 + $0xa40] sm:$0xf] }
 0x2ef   : > { %v5323_v37 = vpop.f32.mrf.mxu1  ;;  %v9885_v47 = vld [vmem:[%s11594_s28 + $0xe48] sm:$0xf0] }
 0x2f0   : > { %v5362_v55 = vpop.f32.mrf.mxu0  ;;  %v5324_v9 = vadd.f32 %v5323_v37, %v3599_v53  ;;  %v10654_v53 = vld [vmem:[%s11594_s28 + $0x244] sm:$0xf]  ;;  %v9888_v40 = vor.u32 %v10911_v45, %v9885_v47 }
 0x2f1   : > { %v5363_v17 = vadd.f32 %v5362_v55, %v3602_v54  ;;  %v8853_v37 = vld [vmem:[%s11594_s28 + $0x640] sm:$0xf0]  ;;  %v9876_v54 = vor.u32 %v11038_v41, %v9875_v38  ;;  %v8859_v55 = vld [vmem:[%s11594_s28 + $0x248] sm:$0xf] }
 0x2f2   : > { %10453 = vmatmul.msk.bf16.vlgmr.msrb.gmra.mxu1 %vm337_vm0, %v11641_v1  ;;  %10454 = vmatmul.msk.bf16.vlgmr.msrb.gmra.mxu2 %vm337_vm0, %v11641_v1  ;;  %v7685_v12 = vrot.slane %v5324_v9, 4  ;;  %v8856_v58 = vor.u32 %v10654_v53, %v8853_v37 }
 0x2f3   : > { %10455 = vmatmul.msk.bf16.vlgmr.msrb.gmra.mxu3 %vm337_vm0, %v11641_v1  ;;  %10456 = vmatmul.msk.bf16.vlgmr.msra.gmra.mxu0 %vm337_vm0, %v11641_v1  ;;  %v7688_v27 = vrot.slane %v5363_v17, 1 }
 0x2f4   : > { %5853 = vmatpush.bf16.msrb.mxu2 %v9864_v56  ;;  %5866 = vmatpush.bf16.msrb.mxu3 %v9868_v44  ;;  %v8851_v56 = vld [vmem:[%s11594_s28 + $0x240] sm:$0xf] }
 0x2f5   : > { %v5336_v20 = vpop.f32.mrf.mxu2  ;;  %5840 = vmatpush.bf16.msrb.mxu1 %v9860_v48  ;;  %5879 = vmatpush.bf16.msra.mxu0 %v9872_v59  ;;  %v10782_v44 = vld [vmem:[%s11594_s28 + $0x63c] sm:$0xf0] }
 0x2f6   : > { %v5337_v21 = vadd.f32 %v5336_v20, %v3600_v42  ;;  %v5349_v22 = vpop.f32.mrf.mxu3  ;;  %v10783_v42 = vld [vmem:[%s11594_s28 + $0x644] sm:$0xf0]  ;;  %v8852_v60 = vor.u32 %v10782_v44, %v8851_v56  ;;  %v11040_v20 = vld [vmem:[%s11594_s28 + $0xe4c] sm:$0xf0] }
 0x2f7   : > { %v5350_v10 = vadd.f32 %v5349_v22, %v3601_v7  ;;  %v5325_v24 = vpop.f32.mrf.mxu1  ;;  %v8860_v48 = vor.u32 %v10783_v42, %v8859_v55  ;;  %v10912_v7 = vld [vmem:[%s11594_s28 + $0xa54] sm:$0xf]  ;;  %v3607_v22 = vperm.slane %v888_v2, 4 }
 0x2f8   : > { %v7686_v25 = vrot.slane %v5337_v21, 3  ;;  %v5364_v14 = vpop.f32.mrf.mxu0  ;;  %5854 = vmatpush.bf16.msrb.mxu2 %v8840_v11  ;;  %5867 = vmatpush.bf16.msrb.mxu3 %v8844_v13  ;;  %v9899_v11 = vld [vmem:[%s11594_s28 + $0xa58] sm:$0xf]  ;;  %v3606_v21 = vperm.slane %v888_v2, 3 }
 0x2f9   : > { %v7687_v18 = vrot.slane %v5350_v10, 2  ;;  %5841 = vmatpush.bf16.msrb.mxu1 %v8836_v5  ;;  %5880 = vmatpush.bf16.msra.mxu0 %v8848_v19  ;;  %v11041_v13 = vld [vmem:[%s11594_s28 + $0xe54] sm:$0xf0]  ;;  %v10913_v5 = vld [vmem:[%s11594_s28 + $0xa5c] sm:$0xf] }
 0x2fa   : > { %v7916_v28 = vsel %vm7828_vm4, %v7685_v12, %v7686_v25  ;;  %v9901_v19 = vld [vmem:[%s11594_s28 + $0xe58] sm:$0xf0]  ;;  %v3608_v12 = vperm.slane %v888_v2, 5  ;;  %v9896_v25 = vor.u32 %v10912_v7, %v9893_v6  ;;  %v9900_v14 = vor.u32 %v11041_v13, %v9899_v11  ;;  %v11043_v6 = vld [vmem:[%s11594_s28 + $0xe64] sm:$0xf0] }
 0x2fb   : > { %v7917_v29 = vsel %vm7830_vm5, %v7687_v18, %v7688_v27  ;;  %v9892_v18 = vor.u32 %v11040_v20, %v9891_v15  ;;  %v11042_v11 = vld [vmem:[%s11594_s28 + $0xe5c] sm:$0xf0]  ;;  %v10915_v15 = vld [vmem:[%s11594_s28 + $0xa6c] sm:$0xf] }
 0x2fc   : > { %v7918_v31 = vsel %vm7832_vm6, %v7916_v28, %v7917_v29  ;;  %v9904_v28 = vor.u32 %v10913_v5, %v9901_v19  ;;  %v8875_v29 = vld [vmem:[%s11594_s28 + $0x258] sm:$0xf] }
 0x2fd   : > { %v7919_v35 = vsel %vm7834_vm7, %v7915_v30, %v7918_v31  ;;  %v5338_v36 = vpop.f32.mrf.mxu2  ;;  %v10785_v30 = vld [vmem:[%s11594_s28 + $0x654] sm:$0xf0]  ;;  %v8867_v31 = vld [vmem:[%s11594_s28 + $0x250] sm:$0xf] }
 0x2fe   : > { %8097 = vst [vmem:[%s11901_s6 + $0x60] sm:$0xff] %v7919_v35  ;;  %v5351_v43 = vpop.f32.mrf.mxu3  ;;  %v3603_v35 = vperm.slane %v888_v2, 0  ;;  %v8876_v45 = vor.u32 %v10785_v30, %v8875_v29  ;;  %v8868_v53 = vor.u32 %v10784_v32, %v8867_v31  ;;  %v9909_v2 = vld [vmem:[%s11594_s28 + $0xe60] sm:$0xf0] }
 0x2ff   : > { %v12663_v50 = vpop.f32.mrf.mxu1  ;;  %v8872_v43 = vor.u32 %v10656_v26, %v8869_v16  ;;  %v10659_v26 = vld [vmem:[%s11594_s28 + $0x26c] sm:$0xf] }
 0x300   : > { %v12665_v51 = vpop.f32.mrf.mxu0  ;;  %v8893_v16 = vld [vmem:[%s11594_s28 + $0x668] sm:$0xf0] }
 0x301   : > { %v5415_v36 = vadd.f32 %v12665_v51, %v3606_v21  ;;  %v8880_v51 = vor.u32 %v10657_v33, %v8877_v34  ;;  %v8896_v30 = vor.u32 %v10659_v26, %v8893_v16  ;;  %v889_v34 = vld [vmem:[%s11858_s1 + $0x70] sm:$0xff] }
 0x302   : > { %10457 = vmatmul.msk.bf16.vlgmr.msra.gmra.mxu1 %vm337_vm0, %v11641_v1  ;;  %10458 = vmatmul.msk.bf16.vlgmr.msra.gmra.mxu2 %vm337_vm0, %v11641_v1 }
 0x303   : > { %10459 = vmatmul.msk.bf16.vlgmr.msra.gmra.mxu3 %vm337_vm0, %v11641_v1  ;;  %10460 = vmatmul.msk.bf16.vlgmr.msrb.gmra.mxu0 %vm337_vm0, %v11641_v1  ;;  %v7691_v55 = vrot.slane %v5415_v36, 5  ;;  %v3613_v36 = vperm.slane %v889_v34, 2 }
 0x304   : > { %5905 = vmatpush.bf16.msra.mxu2 %v9880_v49  ;;  %5918 = vmatpush.bf16.msra.mxu3 %v9884_v52 }
 0x305   : > { %v5388_v59 = vpop.f32.mrf.mxu2  ;;  %5892 = vmatpush.bf16.msra.mxu1 %v9876_v54  ;;  %5931 = vmatpush.bf16.msrb.mxu0 %v9888_v40  ;;  %v5376_v40 = vadd.f32 %v12663_v50, %v3603_v35  ;;  %v3612_v35 = vperm.slane %v889_v34, 1 }
 0x306   : > { %v5401_v62 = vpop.f32.mrf.mxu3  ;;  %v5389_v10 = vadd.f32 %v5388_v59, %v3604_v3  ;;  %v9915_v3 = vld [vmem:[%s11594_s28 + $0xa68] sm:$0xf] }
 0x307   : > { %v5377_v63 = vpop.f32.mrf.mxu1  ;;  %v5402_v27 = vadd.f32 %v5401_v62, %v3605_v4  ;;  %v9916_v21 = vor.u32 %v11043_v6, %v9915_v3  ;;  %v8909_v3 = vld [vmem:[%s11594_s28 + $0x678] sm:$0xf0]  ;;  %v3617_v6 = vperm.slane %v889_v34, 6 }
 0x308   : > { %v5416_v0 = vpop.f32.mrf.mxu0  ;;  %5906 = vmatpush.bf16.msra.mxu2 %v8856_v58  ;;  %5919 = vmatpush.bf16.msra.mxu3 %v8860_v48  ;;  %v7689_v38 = vrot.slane %v5389_v10, 7 }
 0x309   : > { %5893 = vmatpush.bf16.msra.mxu1 %v8852_v60  ;;  %5932 = vmatpush.bf16.msrb.mxu0 %v8864_v61  ;;  %v7690_v47 = vrot.slane %v5402_v27, 6  ;;  %v10914_v0 = vld [vmem:[%s11594_s28 + $0xa64] sm:$0xf] }
 0x30a   : > { %v7920_v58 = vsel %vm7822_vm1, %v5376_v40, %v7689_v38  ;;  %v9912_v19 = vor.u32 %v10914_v0, %v9909_v2  ;;  %v9925_v38 = vld [vmem:[%s11594_s28 + $0xe70] sm:$0xf0]  ;;  %v10788_v0 = vld [vmem:[%s11594_s28 + $0x66c] sm:$0xf0]  ;;  %v10661_v2 = vld [vmem:[%s11594_s28 + $0x27c] sm:$0xf] }
 0x30b   : > { %v7921_v48 = vsel %vm7824_vm2, %v7690_v47, %v7691_v55  ;;  %v9923_v47 = vld [vmem:[%s11594_s28 + $0xa70] sm:$0xf]  ;;  %v3618_v55 = vperm.slane %v889_v34, 7 }
 0x30c   : > { %v7922_v62 = vsel %vm7826_vm3, %v7920_v58, %v7921_v48  ;;  %v10660_v58 = vld [vmem:[%s11594_s28 + $0x274] sm:$0xf] }
 0x30d   : > { %v5390_v9 = vpop.f32.mrf.mxu2  ;;  %v8901_v48 = vld [vmem:[%s11594_s28 + $0x670] sm:$0xf0] }
 0x30e   : > { %v5403_v17 = vpop.f32.mrf.mxu3  ;;  %v9907_v9 = vld [vmem:[%s11594_s28 + $0xa60] sm:$0xf] }
 0x30f   : > { %v5427_v8 = vpop.f32.mrf.mxu1  ;;  %v9917_v17 = vld [vmem:[%s11594_s28 + $0xe68] sm:$0xf0] }
 0x310   : > { %v5466_v24 = vpop.f32.mrf.mxu0  ;;  %v5428_v41 = vadd.f32 %v5427_v8, %v3607_v22  ;;  %v10658_v22 = vld [vmem:[%s11594_s28 + $0x264] sm:$0xf]  ;;  %v9920_v10 = vor.u32 %v10915_v15, %v9917_v17 }
 0x311   : > { %v5467_v49 = vadd.f32 %v5466_v24, %v3610_v23  ;;  %v8885_v8 = vld [vmem:[%s11594_s28 + $0x660] sm:$0xf0]  ;;  %v9908_v23 = vor.u32 %v11042_v11, %v9907_v9  ;;  %v8891_v24 = vld [vmem:[%s11594_s28 + $0x268] sm:$0xf] }
 0x312   : > { %10461 = vmatmul.msk.bf16.vlgmr.msrb.gmra.mxu1 %vm337_vm0, %v11641_v1  ;;  %10462 = vmatmul.msk.bf16.vlgmr.msrb.gmra.mxu2 %vm337_vm0, %v11641_v1  ;;  %v7692_v44 = vrot.slane %v5428_v41, 4  ;;  %v8888_v27 = vor.u32 %v10658_v22, %v8885_v8 }
 0x313   : > { %10463 = vmatmul.msk.bf16.vlgmr.msrb.gmra.mxu3 %vm337_vm0, %v11641_v1  ;;  %10464 = vmatmul.msk.bf16.vlgmr.msra.gmra.mxu0 %vm337_vm0, %v11641_v1  ;;  %v7695_v59 = vrot.slane %v5467_v49, 1 }
 0x314   : > { %5957 = vmatpush.bf16.msrb.mxu2 %v9896_v25  ;;  %5970 = vmatpush.bf16.msrb.mxu3 %v9900_v14  ;;  %v8883_v25 = vld [vmem:[%s11594_s28 + $0x260] sm:$0xf] }
 0x315   : > { %v5440_v52 = vpop.f32.mrf.mxu2  ;;  %5944 = vmatpush.bf16.msrb.mxu1 %v9892_v18  ;;  %5983 = vmatpush.bf16.msra.mxu0 %v9904_v28  ;;  %v10786_v14 = vld [vmem:[%s11594_s28 + $0x65c] sm:$0xf0] }
 0x316   : > { %v5441_v37 = vadd.f32 %v5440_v52, %v3608_v12  ;;  %v5453_v54 = vpop.f32.mrf.mxu3  ;;  %v10787_v12 = vld [vmem:[%s11594_s28 + $0x664] sm:$0xf0]  ;;  %v8884_v29 = vor.u32 %v10786_v14, %v8883_v25  ;;  %v11044_v52 = vld [vmem:[%s11594_s28 + $0xe6c] sm:$0xf0] }
 0x317   : > { %v5454_v42 = vadd.f32 %v5453_v54, %v3609_v39  ;;  %v5429_v56 = vpop.f32.mrf.mxu1  ;;  %v8892_v18 = vor.u32 %v10787_v12, %v8891_v24  ;;  %v10916_v39 = vld [vmem:[%s11594_s28 + $0xa74] sm:$0xf]  ;;  %v3615_v54 = vperm.slane %v889_v34, 4 }
 0x318   : > { %v7693_v57 = vrot.slane %v5441_v37, 3  ;;  %v5468_v46 = vpop.f32.mrf.mxu0  ;;  %5958 = vmatpush.bf16.msrb.mxu2 %v8872_v43  ;;  %5971 = vmatpush.bf16.msrb.mxu3 %v8876_v45  ;;  %v9931_v43 = vld [vmem:[%s11594_s28 + $0xa78] sm:$0xf]  ;;  %v3614_v37 = vperm.slane %v889_v34, 3 }
 0x319   : > { %v7694_v50 = vrot.slane %v5454_v42, 2  ;;  %5945 = vmatpush.bf16.msrb.mxu1 %v8868_v53  ;;  %5984 = vmatpush.bf16.msra.mxu0 %v8880_v51  ;;  %v11045_v45 = vld [vmem:[%s11594_s28 + $0xe74] sm:$0xf0]  ;;  %v10917_v53 = vld [vmem:[%s11594_s28 + $0xa7c] sm:$0xf] }
 0x31a   : > { %v7923_v60 = vsel %vm7828_vm4, %v7692_v44, %v7693_v57  ;;  %v9933_v51 = vld [vmem:[%s11594_s28 + $0xe78] sm:$0xf0]  ;;  %v3616_v44 = vperm.slane %v889_v34, 5  ;;  %v9928_v57 = vor.u32 %v10916_v39, %v9925_v38  ;;  %v9932_v46 = vor.u32 %v11045_v45, %v9931_v43  ;;  %v11047_v38 = vld [vmem:[%s11594_s28 + $0xe84] sm:$0xf0] }
 0x31b   : > { %v7924_v61 = vsel %vm7830_vm5, %v7694_v50, %v7695_v59  ;;  %v9924_v50 = vor.u32 %v11044_v52, %v9923_v47  ;;  %v11046_v43 = vld [vmem:[%s11594_s28 + $0xe7c] sm:$0xf0]  ;;  %v10919_v47 = vld [vmem:[%s11594_s28 + $0xa8c] sm:$0xf] }
 0x31c   : > { %v7925_v63 = vsel %vm7832_vm6, %v7923_v60, %v7924_v61  ;;  %v9936_v60 = vor.u32 %v10917_v53, %v9933_v51  ;;  %v8907_v61 = vld [vmem:[%s11594_s28 + $0x278] sm:$0xf] }
 0x31d   : > { %v7926_v4 = vsel %vm7834_vm7, %v7922_v62, %v7925_v63  ;;  %v5442_v7 = vpop.f32.mrf.mxu2  ;;  %v10789_v62 = vld [vmem:[%s11594_s28 + $0x674] sm:$0xf0]  ;;  %v8899_v63 = vld [vmem:[%s11594_s28 + $0x270] sm:$0xf] }
 0x31e   : > { %8098 = vst [vmem:[%s11901_s6 + $0x68] sm:$0xff] %v7926_v4  ;;  %v5455_v13 = vpop.f32.mrf.mxu3  ;;  %v3611_v4 = vperm.slane %v889_v34, 0  ;;  %v8908_v15 = vor.u32 %v10789_v62, %v8907_v61  ;;  %v8900_v22 = vor.u32 %v10788_v0, %v8899_v63  ;;  %v9941_v34 = vld [vmem:[%s11594_s28 + $0xe80] sm:$0xf0] }
 0x31f   : > { %v12726_v20 = vpop.f32.mrf.mxu1  ;;  %v8904_v13 = vor.u32 %v10660_v58, %v8901_v48  ;;  %v10663_v58 = vld [vmem:[%s11594_s28 + $0x28c] sm:$0xf] }
 0x320   : > { %v12728_v5 = vpop.f32.mrf.mxu0  ;;  %v8925_v48 = vld [vmem:[%s11594_s28 + $0x688] sm:$0xf0] }
 0x321   : > { %v5519_v7 = vadd.f32 %v12728_v5, %v3614_v37  ;;  %v8912_v5 = vor.u32 %v10661_v2, %v8909_v3  ;;  %v8928_v62 = vor.u32 %v10663_v58, %v8925_v48  ;;  %v890_v3 = vld [vmem:[%s11858_s1 + $0x78] sm:$0xff] }
 0x322   : > { %10465 = vmatmul.msk.bf16.vlgmr.msra.gmra.mxu1 %vm337_vm0, %v11641_v1  ;;  %10466 = vmatmul.msk.bf16.vlgmr.msra.gmra.mxu2 %vm337_vm0, %v11641_v1 }
 0x323   : > { %10467 = vmatmul.msk.bf16.vlgmr.msra.gmra.mxu3 %vm337_vm0, %v11641_v1  ;;  %10468 = vmatmul.msk.bf16.vlgmr.msrb.gmra.mxu0 %vm337_vm0, %v11641_v1  ;;  %v7698_v24 = vrot.slane %v5519_v7, 5  ;;  %v3621_v7 = vperm.slane %v890_v3, 2 }
 0x324   : > { %6009 = vmatpush.bf16.msra.mxu2 %v9912_v19  ;;  %6022 = vmatpush.bf16.msra.mxu3 %v9916_v21 }
 0x325   : > { %v5492_v28 = vpop.f32.mrf.mxu2  ;;  %5996 = vmatpush.bf16.msra.mxu1 %v9908_v23  ;;  %6035 = vmatpush.bf16.msrb.mxu0 %v9920_v10  ;;  %v5480_v10 = vadd.f32 %v12726_v20, %v3611_v4  ;;  %v3620_v4 = vperm.slane %v890_v3, 1 }
 0x326   : > { %v5505_v31 = vpop.f32.mrf.mxu3  ;;  %v5493_v42 = vadd.f32 %v5492_v28, %v3612_v35  ;;  %v9947_v35 = vld [vmem:[%s11594_s28 + $0xa88] sm:$0xf] }
 0x327   : > { %v5481_v32 = vpop.f32.mrf.mxu1  ;;  %v5506_v59 = vadd.f32 %v5505_v31, %v3613_v36  ;;  %v9948_v37 = vor.u32 %v11047_v38, %v9947_v35  ;;  %v8941_v35 = vld [vmem:[%s11594_s28 + $0x698] sm:$0xf0]  ;;  %v3625_v38 = vperm.slane %v890_v3, 6 }
 0x328   : > { %v5520_v33 = vpop.f32.mrf.mxu0  ;;  %6010 = vmatpush.bf16.msra.mxu2 %v8888_v27  ;;  %6023 = vmatpush.bf16.msra.mxu3 %v8892_v18  ;;  %v7696_v9 = vrot.slane %v5493_v42, 7 }
 0x329   : > { %5997 = vmatpush.bf16.msra.mxu1 %v8884_v29  ;;  %6036 = vmatpush.bf16.msrb.mxu0 %v8896_v30  ;;  %v7697_v17 = vrot.slane %v5506_v59, 6  ;;  %v10918_v33 = vld [vmem:[%s11594_s28 + $0xa84] sm:$0xf] }
 0x32a   : > { %v7927_v27 = vsel %vm7822_vm1, %v5480_v10, %v7696_v9  ;;  %v9944_v51 = vor.u32 %v10918_v33, %v9941_v34  ;;  %v9957_v9 = vld [vmem:[%s11594_s28 + $0xe90] sm:$0xf0]  ;;  %v10792_v33 = vld [vmem:[%s11594_s28 + $0x68c] sm:$0xf0]  ;;  %v10665_v34 = vld [vmem:[%s11594_s28 + $0x29c] sm:$0xf] }
 0x32b   : > { %v7928_v18 = vsel %vm7824_vm2, %v7697_v17, %v7698_v24  ;;  %v9955_v17 = vld [vmem:[%s11594_s28 + $0xa90] sm:$0xf]  ;;  %v3626_v24 = vperm.slane %v890_v3, 7 }
 0x32c   : > { %v7929_v31 = vsel %vm7826_vm3, %v7927_v27, %v7928_v18  ;;  %v10664_v27 = vld [vmem:[%s11594_s28 + $0x294] sm:$0xf] }
 0x32d   : > { %v5494_v41 = vpop.f32.mrf.mxu2  ;;  %v8933_v18 = vld [vmem:[%s11594_s28 + $0x690] sm:$0xf0] }
 0x32e   : > { %v5507_v49 = vpop.f32.mrf.mxu3  ;;  %v9939_v41 = vld [vmem:[%s11594_s28 + $0xa80] sm:$0xf] }
 0x32f   : > { %v5531_v40 = vpop.f32.mrf.mxu1  ;;  %v9949_v49 = vld [vmem:[%s11594_s28 + $0xe88] sm:$0xf0] }
 0x330   : > { %v5570_v56 = vpop.f32.mrf.mxu0  ;;  %v5532_v11 = vadd.f32 %v5531_v40, %v3615_v54  ;;  %v10662_v54 = vld [vmem:[%s11594_s28 + $0x284] sm:$0xf]  ;;  %v9952_v42 = vor.u32 %v10919_v47, %v9949_v49 }
 0x331   : > { %v5571_v19 = vadd.f32 %v5570_v56, %v3618_v55  ;;  %v8917_v40 = vld [vmem:[%s11594_s28 + $0x680] sm:$0xf0]  ;;  %v9940_v55 = vor.u32 %v11046_v43, %v9939_v41  ;;  %v8923_v56 = vld [vmem:[%s11594_s28 + $0x288] sm:$0xf] }
 0x332   : > { %10469 = vmatmul.msk.bf16.vlgmr.msrb.gmra.mxu1 %vm337_vm0, %v11641_v1  ;;  %10470 = vmatmul.msk.bf16.vlgmr.msrb.gmra.mxu2 %vm337_vm0, %v11641_v1  ;;  %v7699_v14 = vrot.slane %v5532_v11, 4  ;;  %v8920_v59 = vor.u32 %v10662_v54, %v8917_v40 }
 0x333   : > { %10471 = vmatmul.msk.bf16.vlgmr.msrb.gmra.mxu3 %vm337_vm0, %v11641_v1  ;;  %10472 = vmatmul.msk.bf16.vlgmr.msra.gmra.mxu0 %vm337_vm0, %v11641_v1  ;;  %v7702_v28 = vrot.slane %v5571_v19, 1 }
 0x334   : > { %6061 = vmatpush.bf16.msrb.mxu2 %v9928_v57  ;;  %6074 = vmatpush.bf16.msrb.mxu3 %v9932_v46  ;;  %v8915_v57 = vld [vmem:[%s11594_s28 + $0x280] sm:$0xf] }
 0x335   : > { %v5544_v21 = vpop.f32.mrf.mxu2  ;;  %6048 = vmatpush.bf16.msrb.mxu1 %v9924_v50  ;;  %6087 = vmatpush.bf16.msra.mxu0 %v9936_v60  ;;  %v10790_v46 = vld [vmem:[%s11594_s28 + $0x67c] sm:$0xf0] }
 0x336   : > { %v5545_v8 = vadd.f32 %v5544_v21, %v3616_v44  ;;  %v5557_v23 = vpop.f32.mrf.mxu3  ;;  %v10791_v44 = vld [vmem:[%s11594_s28 + $0x684] sm:$0xf0]  ;;  %v8916_v61 = vor.u32 %v10790_v46, %v8915_v57  ;;  %v11048_v21 = vld [vmem:[%s11594_s28 + $0xe8c] sm:$0xf0] }
 0x337   : > { %v5558_v12 = vadd.f32 %v5557_v23, %v3617_v6  ;;  %v5533_v25 = vpop.f32.mrf.mxu1  ;;  %v8924_v50 = vor.u32 %v10791_v44, %v8923_v56  ;;  %v10920_v6 = vld [vmem:[%s11594_s28 + $0xa94] sm:$0xf]  ;;  %v3623_v23 = vperm.slane %v890_v3, 4 }
 0x338   : > { %v7700_v26 = vrot.slane %v5545_v8, 3  ;;  %v5572_v16 = vpop.f32.mrf.mxu0  ;;  %6062 = vmatpush.bf16.msrb.mxu2 %v8904_v13  ;;  %6075 = vmatpush.bf16.msrb.mxu3 %v8908_v15  ;;  %v9963_v13 = vld [vmem:[%s11594_s28 + $0xa98] sm:$0xf]  ;;  %v3622_v8 = vperm.slane %v890_v3, 3 }
 0x339   : > { %v7701_v20 = vrot.slane %v5558_v12, 2  ;;  %6049 = vmatpush.bf16.msrb.mxu1 %v8900_v22  ;;  %6088 = vmatpush.bf16.msra.mxu0 %v8912_v5  ;;  %v11049_v15 = vld [vmem:[%s11594_s28 + $0xe94] sm:$0xf0]  ;;  %v10921_v22 = vld [vmem:[%s11594_s28 + $0xa9c] sm:$0xf] }
 0x33a   : > { %v7930_v29 = vsel %vm7828_vm4, %v7699_v14, %v7700_v26  ;;  %v9965_v5 = vld [vmem:[%s11594_s28 + $0xe98] sm:$0xf0]  ;;  %v3624_v14 = vperm.slane %v890_v3, 5  ;;  %v9960_v26 = vor.u32 %v10920_v6, %v9957_v9  ;;  %v9964_v16 = vor.u32 %v11049_v15, %v9963_v13  ;;  %v11051_v9 = vld [vmem:[%s11594_s28 + $0xea4] sm:$0xf0] }
 0x33b   : > { %v7931_v30 = vsel %vm7830_vm5, %v7701_v20, %v7702_v28  ;;  %v9956_v20 = vor.u32 %v11048_v21, %v9955_v17  ;;  %v11050_v13 = vld [vmem:[%s11594_s28 + $0xe9c] sm:$0xf0]  ;;  %v10923_v17 = vld [vmem:[%s11594_s28 + $0xaac] sm:$0xf] }
 0x33c   : > { %v7932_v32 = vsel %vm7832_vm6, %v7930_v29, %v7931_v30  ;;  %v9968_v29 = vor.u32 %v10921_v22, %v9965_v5  ;;  %v8939_v30 = vld [vmem:[%s11594_s28 + $0x298] sm:$0xf] }
 0x33d   : > { %v7933_v36 = vsel %vm7834_vm7, %v7929_v31, %v7932_v32  ;;  %v5546_v39 = vpop.f32.mrf.mxu2  ;;  %v10793_v31 = vld [vmem:[%s11594_s28 + $0x694] sm:$0xf0]  ;;  %v8931_v32 = vld [vmem:[%s11594_s28 + $0x290] sm:$0xf] }
 0x33e   : > { %8099 = vst [vmem:[%s11901_s6 + $0x70] sm:$0xff] %v7933_v36  ;;  %v5559_v45 = vpop.f32.mrf.mxu3  ;;  %v3619_v36 = vperm.slane %v890_v3, 0  ;;  %v8940_v47 = vor.u32 %v10793_v31, %v8939_v30  ;;  %v8932_v54 = vor.u32 %v10792_v33, %v8931_v32  ;;  %v9973_v3 = vld [vmem:[%s11594_s28 + $0xea0] sm:$0xf0] }
 0x33f   : > { %v12789_v52 = vpop.f32.mrf.mxu1  ;;  %v8936_v45 = vor.u32 %v10664_v27, %v8933_v18  ;;  %v10667_v27 = vld [vmem:[%s11594_s28 + $0x2ac] sm:$0xf] }
 0x340   : > { %v12791_v53 = vpop.f32.mrf.mxu0  ;;  %v8957_v18 = vld [vmem:[%s11594_s28 + $0x6a8] sm:$0xf0] }
 0x341   : > { %v5623_v39 = vadd.f32 %v12791_v53, %v3622_v8  ;;  %v8944_v53 = vor.u32 %v10665_v34, %v8941_v35  ;;  %v8960_v31 = vor.u32 %v10667_v27, %v8957_v18  ;;  %v891_v35 = vld [vmem:[%s11858_s1 + $0x80] sm:$0xff] }
 0x342   : > { %10473 = vmatmul.msk.bf16.vlgmr.msra.gmra.mxu1 %vm337_vm0, %v11641_v1  ;;  %10474 = vmatmul.msk.bf16.vlgmr.msra.gmra.mxu2 %vm337_vm0, %v11641_v1 }
 0x343   : > { %10475 = vmatmul.msk.bf16.vlgmr.msra.gmra.mxu3 %vm337_vm0, %v11641_v1  ;;  %10476 = vmatmul.msk.bf16.vlgmr.msrb.gmra.mxu0 %vm337_vm0, %v11641_v1  ;;  %v7705_v56 = vrot.slane %v5623_v39, 5  ;;  %v3629_v39 = vperm.slane %v891_v35, 2 }
 0x344   : > { %6113 = vmatpush.bf16.msra.mxu2 %v9944_v51  ;;  %6126 = vmatpush.bf16.msra.mxu3 %v9948_v37 }
 0x345   : > { %v5596_v60 = vpop.f32.mrf.mxu2  ;;  %6100 = vmatpush.bf16.msra.mxu1 %v9940_v55  ;;  %6139 = vmatpush.bf16.msrb.mxu0 %v9952_v42  ;;  %v5584_v42 = vadd.f32 %v12789_v52, %v3619_v36  ;;  %v3628_v36 = vperm.slane %v891_v35, 1 }
 0x346   : > { %v5609_v63 = vpop.f32.mrf.mxu3  ;;  %v5597_v12 = vadd.f32 %v5596_v60, %v3620_v4  ;;  %v9979_v4 = vld [vmem:[%s11594_s28 + $0xaa8] sm:$0xf] }
 0x347   : > { %v5585_v0 = vpop.f32.mrf.mxu1  ;;  %v5610_v28 = vadd.f32 %v5609_v63, %v3621_v7  ;;  %v9980_v8 = vor.u32 %v11051_v9, %v9979_v4  ;;  %v8973_v4 = vld [vmem:[%s11594_s28 + $0x6b8] sm:$0xf0]  ;;  %v3633_v9 = vperm.slane %v891_v35, 6 }
 0x348   : > { %v5624_v2 = vpop.f32.mrf.mxu0  ;;  %6114 = vmatpush.bf16.msra.mxu2 %v8920_v59  ;;  %6127 = vmatpush.bf16.msra.mxu3 %v8924_v50  ;;  %v7703_v41 = vrot.slane %v5597_v12, 7 }
 0x349   : > { %6101 = vmatpush.bf16.msra.mxu1 %v8916_v61  ;;  %6140 = vmatpush.bf16.msrb.mxu0 %v8928_v62  ;;  %v7704_v49 = vrot.slane %v5610_v28, 6  ;;  %v10922_v2 = vld [vmem:[%s11594_s28 + $0xaa4] sm:$0xf] }
 0x34a   : > { %v7934_v59 = vsel %vm7822_vm1, %v5584_v42, %v7703_v41  ;;  %v9976_v5 = vor.u32 %v10922_v2, %v9973_v3  ;;  %v9989_v41 = vld [vmem:[%s11594_s28 + $0xeb0] sm:$0xf0]  ;;  %v10796_v2 = vld [vmem:[%s11594_s28 + $0x6ac] sm:$0xf0]  ;;  %v10669_v3 = vld [vmem:[%s11594_s28 + $0x2bc] sm:$0xf] }
 0x34b   : > { %v7935_v50 = vsel %vm7824_vm2, %v7704_v49, %v7705_v56  ;;  %v9987_v49 = vld [vmem:[%s11594_s28 + $0xab0] sm:$0xf]  ;;  %v3634_v56 = vperm.slane %v891_v35, 7 }
 0x34c   : > { %v7936_v63 = vsel %vm7826_vm3, %v7934_v59, %v7935_v50  ;;  %v10668_v59 = vld [vmem:[%s11594_s28 + $0x2b4] sm:$0xf] }
 0x34d   : > { %v5598_v11 = vpop.f32.mrf.mxu2  ;;  %v8965_v50 = vld [vmem:[%s11594_s28 + $0x6b0] sm:$0xf0] }
 0x34e   : > { %v5611_v19 = vpop.f32.mrf.mxu3  ;;  %v9971_v11 = vld [vmem:[%s11594_s28 + $0xaa0] sm:$0xf] }
 0x34f   : > { %v5635_v10 = vpop.f32.mrf.mxu1  ;;  %v9981_v19 = vld [vmem:[%s11594_s28 + $0xea8] sm:$0xf0] }
 0x350   : > { %v5674_v25 = vpop.f32.mrf.mxu0  ;;  %v5636_v43 = vadd.f32 %v5635_v10, %v3623_v23  ;;  %v10666_v23 = vld [vmem:[%s11594_s28 + $0x2a4] sm:$0xf]  ;;  %v9984_v12 = vor.u32 %v10923_v17, %v9981_v19 }
 0x351   : > { %v5675_v51 = vadd.f32 %v5674_v25, %v3626_v24  ;;  %v8949_v10 = vld [vmem:[%s11594_s28 + $0x6a0] sm:$0xf0]  ;;  %v9972_v24 = vor.u32 %v11050_v13, %v9971_v11  ;;  %v8955_v25 = vld [vmem:[%s11594_s28 + $0x2a8] sm:$0xf] }
 0x352   : > { %10477 = vmatmul.msk.bf16.vlgmr.msrb.gmra.mxu1 %vm337_vm0, %v11641_v1  ;;  %10478 = vmatmul.msk.bf16.vlgmr.msrb.gmra.mxu2 %vm337_vm0, %v11641_v1  ;;  %v7706_v46 = vrot.slane %v5636_v43, 4  ;;  %v8952_v28 = vor.u32 %v10666_v23, %v8949_v10 }
 0x353   : > { %10479 = vmatmul.msk.bf16.vlgmr.msrb.gmra.mxu3 %vm337_vm0, %v11641_v1  ;;  %10480 = vmatmul.msk.bf16.vlgmr.msra.gmra.mxu0 %vm337_vm0, %v11641_v1  ;;  %v7709_v60 = vrot.slane %v5675_v51, 1 }
 0x354   : > { %6165 = vmatpush.bf16.msrb.mxu2 %v9960_v26  ;;  %6178 = vmatpush.bf16.msrb.mxu3 %v9964_v16  ;;  %v8947_v26 = vld [vmem:[%s11594_s28 + $0x2a0] sm:$0xf] }
 0x355   : > { %v5648_v37 = vpop.f32.mrf.mxu2  ;;  %6152 = vmatpush.bf16.msrb.mxu1 %v9956_v20  ;;  %6191 = vmatpush.bf16.msra.mxu0 %v9968_v29  ;;  %v10794_v16 = vld [vmem:[%s11594_s28 + $0x69c] sm:$0xf0] }
 0x356   : > { %v5649_v40 = vadd.f32 %v5648_v37, %v3624_v14  ;;  %v5661_v55 = vpop.f32.mrf.mxu3  ;;  %v10795_v14 = vld [vmem:[%s11594_s28 + $0x6a4] sm:$0xf0]  ;;  %v8948_v30 = vor.u32 %v10794_v16, %v8947_v26  ;;  %v11052_v37 = vld [vmem:[%s11594_s28 + $0xeac] sm:$0xf0] }
 0x357   : > { %v5662_v44 = vadd.f32 %v5661_v55, %v3625_v38  ;;  %v5637_v57 = vpop.f32.mrf.mxu1  ;;  %v8956_v20 = vor.u32 %v10795_v14, %v8955_v25  ;;  %v10924_v38 = vld [vmem:[%s11594_s28 + $0xab4] sm:$0xf]  ;;  %v3631_v55 = vperm.slane %v891_v35, 4 }
 0x358   : > { %v7707_v58 = vrot.slane %v5649_v40, 3  ;;  %v5676_v48 = vpop.f32.mrf.mxu0  ;;  %6166 = vmatpush.bf16.msrb.mxu2 %v8936_v45  ;;  %6179 = vmatpush.bf16.msrb.mxu3 %v8940_v47  ;;  %v9995_v45 = vld [vmem:[%s11594_s28 + $0xab8] sm:$0xf]  ;;  %v3630_v40 = vperm.slane %v891_v35, 3 }
 0x359   : > { %v7708_v52 = vrot.slane %v5662_v44, 2  ;;  %6153 = vmatpush.bf16.msrb.mxu1 %v8932_v54  ;;  %6192 = vmatpush.bf16.msra.mxu0 %v8944_v53  ;;  %v11053_v47 = vld [vmem:[%s11594_s28 + $0xeb4] sm:$0xf0]  ;;  %v10925_v54 = vld [vmem:[%s11594_s28 + $0xabc] sm:$0xf] }
 0x35a   : > { %v7937_v61 = vsel %vm7828_vm4, %v7706_v46, %v7707_v58  ;;  %v9997_v53 = vld [vmem:[%s11594_s28 + $0xeb8] sm:$0xf0]  ;;  %v3632_v46 = vperm.slane %v891_v35, 5  ;;  %v9992_v58 = vor.u32 %v10924_v38, %v9989_v41  ;;  %v9996_v48 = vor.u32 %v11053_v47, %v9995_v45  ;;  %v11055_v41 = vld [vmem:[%s11594_s28 + $0xec4] sm:$0xf0] }
 0x35b   : > { %v7938_v62 = vsel %vm7830_vm5, %v7708_v52, %v7709_v60  ;;  %v9988_v52 = vor.u32 %v11052_v37, %v9987_v49  ;;  %v11054_v45 = vld [vmem:[%s11594_s28 + $0xebc] sm:$0xf0]  ;;  %v10927_v49 = vld [vmem:[%s11594_s28 + $0xacc] sm:$0xf] }
 0x35c   : > { %v7939_v0 = vsel %vm7832_vm6, %v7937_v61, %v7938_v62  ;;  %v10000_v61 = vor.u32 %v10925_v54, %v9997_v53  ;;  %v8971_v62 = vld [vmem:[%s11594_s28 + $0x2b8] sm:$0xf] }
 0x35d   : > { %v7940_v7 = vsel %vm7834_vm7, %v7936_v63, %v7939_v0  ;;  %v5650_v6 = vpop.f32.mrf.mxu2  ;;  %v10797_v63 = vld [vmem:[%s11594_s28 + $0x6b4] sm:$0xf0]  ;;  %v8963_v0 = vld [vmem:[%s11594_s28 + $0x2b0] sm:$0xf] }
 0x35e   : > { %8100 = vst [vmem:[%s11901_s6 + $0x78] sm:$0xff] %v7940_v7  ;;  %v5663_v15 = vpop.f32.mrf.mxu3  ;;  %v3627_v7 = vperm.slane %v891_v35, 0  ;;  %v8972_v17 = vor.u32 %v10797_v63, %v8971_v62  ;;  %v8964_v23 = vor.u32 %v10796_v2, %v8963_v0  ;;  %v10005_v35 = vld [vmem:[%s11594_s28 + $0xec0] sm:$0xf0] }
 0x35f   : > { %v12852_v21 = vpop.f32.mrf.mxu1  ;;  %v8968_v15 = vor.u32 %v10668_v59, %v8965_v50  ;;  %v10671_v59 = vld [vmem:[%s11594_s28 + $0x2cc] sm:$0xf] }
 0x360   : > { %v12854_v22 = vpop.f32.mrf.mxu0  ;;  %v8989_v50 = vld [vmem:[%s11594_s28 + $0x6c8] sm:$0xf0] }
 0x361   : > { %v5727_v6 = vadd.f32 %v12854_v22, %v3630_v40  ;;  %v8976_v22 = vor.u32 %v10669_v3, %v8973_v4  ;;  %v8992_v63 = vor.u32 %v10671_v59, %v8989_v50  ;;  %v892_v4 = vld [vmem:[%s11858_s1 + $0x88] sm:$0xff] }
 0x362   : > { %10481 = vmatmul.msk.bf16.vlgmr.msra.gmra.mxu1 %vm337_vm0, %v11641_v1  ;;  %10482 = vmatmul.msk.bf16.vlgmr.msra.gmra.mxu2 %vm337_vm0, %v11641_v1 }
 0x363   : > { %10483 = vmatmul.msk.bf16.vlgmr.msra.gmra.mxu3 %vm337_vm0, %v11641_v1  ;;  %10484 = vmatmul.msk.bf16.vlgmr.msrb.gmra.mxu0 %vm337_vm0, %v11641_v1  ;;  %v7712_v25 = vrot.slane %v5727_v6, 5  ;;  %v3637_v6 = vperm.slane %v892_v4, 2 }
 0x364   : > { %6217 = vmatpush.bf16.msra.mxu2 %v9976_v5  ;;  %6230 = vmatpush.bf16.msra.mxu3 %v9980_v8 }
 0x365   : > { %v5700_v29 = vpop.f32.mrf.mxu2  ;;  %6204 = vmatpush.bf16.msra.mxu1 %v9972_v24  ;;  %6243 = vmatpush.bf16.msrb.mxu0 %v9984_v12  ;;  %v5688_v12 = vadd.f32 %v12852_v21, %v3627_v7  ;;  %v3636_v7 = vperm.slane %v892_v4, 1 }
 0x366   : > { %v5713_v32 = vpop.f32.mrf.mxu3  ;;  %v5701_v44 = vadd.f32 %v5700_v29, %v3628_v36  ;;  %v10011_v36 = vld [vmem:[%s11594_s28 + $0xac8] sm:$0xf] }
 0x367   : > { %v5689_v33 = vpop.f32.mrf.mxu1  ;;  %v5714_v60 = vadd.f32 %v5713_v32, %v3629_v39  ;;  %v10012_v40 = vor.u32 %v11055_v41, %v10011_v36  ;;  %v9005_v36 = vld [vmem:[%s11594_s28 + $0x6d8] sm:$0xf0]  ;;  %v3641_v41 = vperm.slane %v892_v4, 6 }
 0x368   : > { %v5728_v34 = vpop.f32.mrf.mxu0  ;;  %6218 = vmatpush.bf16.msra.mxu2 %v8952_v28  ;;  %6231 = vmatpush.bf16.msra.mxu3 %v8956_v20  ;;  %v7710_v11 = vrot.slane %v5701_v44, 7 }
 0x369   : > { %6205 = vmatpush.bf16.msra.mxu1 %v8948_v30  ;;  %6244 = vmatpush.bf16.msrb.mxu0 %v8960_v31  ;;  %v7711_v19 = vrot.slane %v5714_v60, 6  ;;  %v10926_v34 = vld [vmem:[%s11594_s28 + $0xac4] sm:$0xf] }
 0x36a   : > { %v7941_v28 = vsel %vm7822_vm1, %v5688_v12, %v7710_v11  ;;  %v10008_v53 = vor.u32 %v10926_v34, %v10005_v35  ;;  %v10021_v11 = vld [vmem:[%s11594_s28 + $0xed0] sm:$0xf0]  ;;  %v10800_v34 = vld [vmem:[%s11594_s28 + $0x6cc] sm:$0xf0]  ;;  %v10673_v35 = vld [vmem:[%s11594_s28 + $0x2dc] sm:$0xf] }
 0x36b   : > { %v7942_v20 = vsel %vm7824_vm2, %v7711_v19, %v7712_v25  ;;  %v10019_v19 = vld [vmem:[%s11594_s28 + $0xad0] sm:$0xf]  ;;  %v3642_v25 = vperm.slane %v892_v4, 7 }
 0x36c   : > { %v7943_v32 = vsel %vm7826_vm3, %v7941_v28, %v7942_v20  ;;  %v10672_v28 = vld [vmem:[%s11594_s28 + $0x2d4] sm:$0xf] }
 0x36d   : > { %v5702_v43 = vpop.f32.mrf.mxu2  ;;  %v8997_v20 = vld [vmem:[%s11594_s28 + $0x6d0] sm:$0xf0] }
 0x36e   : > { %v5715_v51 = vpop.f32.mrf.mxu3  ;;  %v10003_v43 = vld [vmem:[%s11594_s28 + $0xac0] sm:$0xf] }
 0x36f   : > { %v5739_v42 = vpop.f32.mrf.mxu1  ;;  %v10013_v51 = vld [vmem:[%s11594_s28 + $0xec8] sm:$0xf0] }
 0x370   : > { %v5778_v57 = vpop.f32.mrf.mxu0  ;;  %v5740_v13 = vadd.f32 %v5739_v42, %v3631_v55  ;;  %v10670_v55 = vld [vmem:[%s11594_s28 + $0x2c4] sm:$0xf]  ;;  %v10016_v44 = vor.u32 %v10927_v49, %v10013_v51 }
 0x371   : > { %v5779_v5 = vadd.f32 %v5778_v57, %v3634_v56  ;;  %v8981_v42 = vld [vmem:[%s11594_s28 + $0x6c0] sm:$0xf0]  ;;  %v10004_v56 = vor.u32 %v11054_v45, %v10003_v43  ;;  %v8987_v57 = vld [vmem:[%s11594_s28 + $0x2c8] sm:$0xf] }
 0x372   : > { %10485 = vmatmul.msk.bf16.vlgmr.msrb.gmra.mxu1 %vm337_vm0, %v11641_v1  ;;  %10486 = vmatmul.msk.bf16.vlgmr.msrb.gmra.mxu2 %vm337_vm0, %v11641_v1  ;;  %v7713_v16 = vrot.slane %v5740_v13, 4  ;;  %v8984_v60 = vor.u32 %v10670_v55, %v8981_v42 }
 0x373   : > { %10487 = vmatmul.msk.bf16.vlgmr.msrb.gmra.mxu3 %vm337_vm0, %v11641_v1  ;;  %10488 = vmatmul.msk.bf16.vlgmr.msra.gmra.mxu0 %vm337_vm0, %v11641_v1  ;;  %v7716_v29 = vrot.slane %v5779_v5, 1 }
 0x374   : > { %6269 = vmatpush.bf16.msrb.mxu2 %v9992_v58  ;;  %6282 = vmatpush.bf16.msrb.mxu3 %v9996_v48  ;;  %v8979_v58 = vld [vmem:[%s11594_s28 + $0x2c0] sm:$0xf] }
 0x375   : > { %v5752_v8 = vpop.f32.mrf.mxu2  ;;  %6256 = vmatpush.bf16.msrb.mxu1 %v9988_v52  ;;  %6295 = vmatpush.bf16.msra.mxu0 %v10000_v61  ;;  %v10798_v48 = vld [vmem:[%s11594_s28 + $0x6bc] sm:$0xf0] }
 0x376   : > { %v5753_v10 = vadd.f32 %v5752_v8, %v3632_v46  ;;  %v5765_v24 = vpop.f32.mrf.mxu3  ;;  %v10799_v46 = vld [vmem:[%s11594_s28 + $0x6c4] sm:$0xf0]  ;;  %v8980_v62 = vor.u32 %v10798_v48, %v8979_v58  ;;  %v11056_v8 = vld [vmem:[%s11594_s28 + $0xecc] sm:$0xf0] }
 0x377   : > { %v5766_v14 = vadd.f32 %v5765_v24, %v3633_v9  ;;  %v5741_v26 = vpop.f32.mrf.mxu1  ;;  %v8988_v52 = vor.u32 %v10799_v46, %v8987_v57  ;;  %v10928_v9 = vld [vmem:[%s11594_s28 + $0xad4] sm:$0xf]  ;;  %v3639_v24 = vperm.slane %v892_v4, 4 }
 0x378   : > { %v7714_v27 = vrot.slane %v5753_v10, 3  ;;  %v5780_v18 = vpop.f32.mrf.mxu0  ;;  %6270 = vmatpush.bf16.msrb.mxu2 %v8968_v15  ;;  %6283 = vmatpush.bf16.msrb.mxu3 %v8972_v17  ;;  %v10027_v15 = vld [vmem:[%s11594_s28 + $0xad8] sm:$0xf]  ;;  %v3638_v10 = vperm.slane %v892_v4, 3 }
 0x379   : > { %v7715_v21 = vrot.slane %v5766_v14, 2  ;;  %6257 = vmatpush.bf16.msrb.mxu1 %v8964_v23  ;;  %6296 = vmatpush.bf16.msra.mxu0 %v8976_v22  ;;  %v11057_v17 = vld [vmem:[%s11594_s28 + $0xed4] sm:$0xf0]  ;;  %v10929_v23 = vld [vmem:[%s11594_s28 + $0xadc] sm:$0xf] }
 0x37a   : > { %v7944_v30 = vsel %vm7828_vm4, %v7713_v16, %v7714_v27  ;;  %v10029_v22 = vld [vmem:[%s11594_s28 + $0xed8] sm:$0xf0]  ;;  %v3640_v16 = vperm.slane %v892_v4, 5  ;;  %v10024_v27 = vor.u32 %v10928_v9, %v10021_v11  ;;  %v10028_v18 = vor.u32 %v11057_v17, %v10027_v15  ;;  %v11059_v11 = vld [vmem:[%s11594_s28 + $0xee4] sm:$0xf0] }
 0x37b   : > { %v7945_v31 = vsel %vm7830_vm5, %v7715_v21, %v7716_v29  ;;  %v10020_v21 = vor.u32 %v11056_v8, %v10019_v19  ;;  %v11058_v15 = vld [vmem:[%s11594_s28 + $0xedc] sm:$0xf0]  ;;  %v10931_v19 = vld [vmem:[%s11594_s28 + $0xaec] sm:$0xf] }
 0x37c   : > { %v7946_v33 = vsel %vm7832_vm6, %v7944_v30, %v7945_v31  ;;  %v10032_v30 = vor.u32 %v10929_v23, %v10029_v22  ;;  %v9003_v31 = vld [vmem:[%s11594_s28 + $0x2d8] sm:$0xf] }
 0x37d   : > { %v7947_v39 = vsel %vm7834_vm7, %v7943_v32, %v7946_v33  ;;  %v5754_v38 = vpop.f32.mrf.mxu2  ;;  %v10801_v32 = vld [vmem:[%s11594_s28 + $0x6d4] sm:$0xf0]  ;;  %v8995_v33 = vld [vmem:[%s11594_s28 + $0x2d0] sm:$0xf] }
 0x37e   : > { %8101 = vst [vmem:[%s11901_s6 + $0x80] sm:$0xff] %v7947_v39  ;;  %v5767_v47 = vpop.f32.mrf.mxu3  ;;  %v3635_v39 = vperm.slane %v892_v4, 0  ;;  %v9004_v49 = vor.u32 %v10801_v32, %v9003_v31  ;;  %v8996_v55 = vor.u32 %v10800_v34, %v8995_v33  ;;  %v10037_v4 = vld [vmem:[%s11594_s28 + $0xee0] sm:$0xf0] }
 0x37f   : > { %v12915_v37 = vpop.f32.mrf.mxu1  ;;  %v9000_v47 = vor.u32 %v10672_v28, %v8997_v20  ;;  %v10675_v28 = vld [vmem:[%s11594_s28 + $0x2ec] sm:$0xf] }
 0x380   : > { %v12917_v54 = vpop.f32.mrf.mxu0  ;;  %v9021_v20 = vld [vmem:[%s11594_s28 + $0x6e8] sm:$0xf0] }
 0x381   : > { %v5831_v38 = vadd.f32 %v12917_v54, %v3638_v10  ;;  %v9008_v54 = vor.u32 %v10673_v35, %v9005_v36  ;;  %v9024_v32 = vor.u32 %v10675_v28, %v9021_v20  ;;  %v893_v36 = vld [vmem:[%s11858_s1 + $0x90] sm:$0xff] }
 0x382   : > { %10489 = vmatmul.msk.bf16.vlgmr.msra.gmra.mxu1 %vm337_vm0, %v11641_v1  ;;  %10490 = vmatmul.msk.bf16.vlgmr.msra.gmra.mxu2 %vm337_vm0, %v11641_v1 }
 0x383   : > { %10491 = vmatmul.msk.bf16.vlgmr.msra.gmra.mxu3 %vm337_vm0, %v11641_v1  ;;  %10492 = vmatmul.msk.bf16.vlgmr.msrb.gmra.mxu0 %vm337_vm0, %v11641_v1  ;;  %v7719_v57 = vrot.slane %v5831_v38, 5  ;;  %v3645_v38 = vperm.slane %v893_v36, 2 }
 0x384   : > { %6321 = vmatpush.bf16.msra.mxu2 %v10008_v53  ;;  %6334 = vmatpush.bf16.msra.mxu3 %v10012_v40 }
 0x385   : > { %v5804_v61 = vpop.f32.mrf.mxu2  ;;  %6308 = vmatpush.bf16.msra.mxu1 %v10004_v56  ;;  %6347 = vmatpush.bf16.msrb.mxu0 %v10016_v44  ;;  %v5792_v44 = vadd.f32 %v12915_v37, %v3635_v39  ;;  %v3644_v39 = vperm.slane %v893_v36, 1 }
 0x386   : > { %v5817_v0 = vpop.f32.mrf.mxu3  ;;  %v5805_v14 = vadd.f32 %v5804_v61, %v3636_v7  ;;  %v10043_v7 = vld [vmem:[%s11594_s28 + $0xae8] sm:$0xf] }
 0x387   : > { %v5793_v2 = vpop.f32.mrf.mxu1  ;;  %v5818_v29 = vadd.f32 %v5817_v0, %v3637_v6  ;;  %v10044_v10 = vor.u32 %v11059_v11, %v10043_v7  ;;  %v9037_v7 = vld [vmem:[%s11594_s28 + $0x6f8] sm:$0xf0]  ;;  %v3649_v11 = vperm.slane %v893_v36, 6 }
 0x388   : > { %v5832_v3 = vpop.f32.mrf.mxu0  ;;  %6322 = vmatpush.bf16.msra.mxu2 %v8984_v60  ;;  %6335 = vmatpush.bf16.msra.mxu3 %v8988_v52  ;;  %v7717_v43 = vrot.slane %v5805_v14, 7 }
 0x389   : > { %6309 = vmatpush.bf16.msra.mxu1 %v8980_v62  ;;  %6348 = vmatpush.bf16.msrb.mxu0 %v8992_v63  ;;  %v7718_v51 = vrot.slane %v5818_v29, 6  ;;  %v10930_v3 = vld [vmem:[%s11594_s28 + $0xae4] sm:$0xf] }
 0x38a   : > { %v7948_v60 = vsel %vm7822_vm1, %v5792_v44, %v7717_v43  ;;  %v10040_v22 = vor.u32 %v10930_v3, %v10037_v4  ;;  %v10053_v43 = vld [vmem:[%s11594_s28 + $0xef0] sm:$0xf0]  ;;  %v10804_v3 = vld [vmem:[%s11594_s28 + $0x6ec] sm:$0xf0]  ;;  %v10677_v4 = vld [vmem:[%s11594_s28 + $0x2fc] sm:$0xf] }
 0x38b   : > { %v7949_v52 = vsel %vm7824_vm2, %v7718_v51, %v7719_v57  ;;  %v10051_v51 = vld [vmem:[%s11594_s28 + $0xaf0] sm:$0xf]  ;;  %v3650_v57 = vperm.slane %v893_v36, 7 }
 0x38c   : > { %v7950_v0 = vsel %vm7826_vm3, %v7948_v60, %v7949_v52  ;;  %v10676_v60 = vld [vmem:[%s11594_s28 + $0x2f4] sm:$0xf] }
 0x38d   : > { %v5806_v13 = vpop.f32.mrf.mxu2  ;;  %v9029_v52 = vld [vmem:[%s11594_s28 + $0x6f0] sm:$0xf0] }
 0x38e   : > { %v5819_v5 = vpop.f32.mrf.mxu3  ;;  %v10035_v13 = vld [vmem:[%s11594_s28 + $0xae0] sm:$0xf] }
 0x38f   : > { %v5843_v12 = vpop.f32.mrf.mxu1  ;;  %v10045_v5 = vld [vmem:[%s11594_s28 + $0xee8] sm:$0xf0] }
 0x390   : > { %v5882_v26 = vpop.f32.mrf.mxu0  ;;  %v5844_v45 = vadd.f32 %v5843_v12, %v3639_v24  ;;  %v10674_v24 = vld [vmem:[%s11594_s28 + $0x2e4] sm:$0xf]  ;;  %v10048_v14 = vor.u32 %v10931_v19, %v10045_v5 }
 0x391   : > { %v5883_v53 = vadd.f32 %v5882_v26, %v3642_v25  ;;  %v9013_v12 = vld [vmem:[%s11594_s28 + $0x6e0] sm:$0xf0]  ;;  %v10036_v25 = vor.u32 %v11058_v15, %v10035_v13  ;;  %v9019_v26 = vld [vmem:[%s11594_s28 + $0x2e8] sm:$0xf] }
 0x392   : > { %10493 = vmatmul.msk.bf16.vlgmr.msrb.gmra.mxu1 %vm337_vm0, %v11641_v1  ;;  %10494 = vmatmul.msk.bf16.vlgmr.msrb.gmra.mxu2 %vm337_vm0, %v11641_v1  ;;  %v7720_v48 = vrot.slane %v5844_v45, 4  ;;  %v9016_v29 = vor.u32 %v10674_v24, %v9013_v12 }
 0x393   : > { %10495 = vmatmul.msk.bf16.vlgmr.msrb.gmra.mxu3 %vm337_vm0, %v11641_v1  ;;  %10496 = vmatmul.msk.bf16.vlgmr.msra.gmra.mxu0 %vm337_vm0, %v11641_v1  ;;  %v7723_v61 = vrot.slane %v5883_v53, 1 }
 0x394   : > { %6373 = vmatpush.bf16.msrb.mxu2 %v10024_v27  ;;  %6386 = vmatpush.bf16.msrb.mxu3 %v10028_v18  ;;  %v9011_v27 = vld [vmem:[%s11594_s28 + $0x2e0] sm:$0xf] }
 0x395   : > { %v5856_v40 = vpop.f32.mrf.mxu2  ;;  %6360 = vmatpush.bf16.msrb.mxu1 %v10020_v21  ;;  %6399 = vmatpush.bf16.msra.mxu0 %v10032_v30  ;;  %v10802_v18 = vld [vmem:[%s11594_s28 + $0x6dc] sm:$0xf0] }
 0x396   : > { %v5857_v42 = vadd.f32 %v5856_v40, %v3640_v16  ;;  %v5869_v56 = vpop.f32.mrf.mxu3  ;;  %v10803_v16 = vld [vmem:[%s11594_s28 + $0x6e4] sm:$0xf0]  ;;  %v9012_v31 = vor.u32 %v10802_v18, %v9011_v27  ;;  %v11060_v40 = vld [vmem:[%s11594_s28 + $0xeec] sm:$0xf0] }
 0x397   : > { %v5870_v46 = vadd.f32 %v5869_v56, %v3641_v41  ;;  %v5845_v58 = vpop.f32.mrf.mxu1  ;;  %v9020_v21 = vor.u32 %v10803_v16, %v9019_v26  ;;  %v10932_v41 = vld [vmem:[%s11594_s28 + $0xaf4] sm:$0xf]  ;;  %v3647_v56 = vperm.slane %v893_v36, 4 }
 0x398   : > { %v7721_v59 = vrot.slane %v5857_v42, 3  ;;  %v5884_v50 = vpop.f32.mrf.mxu0  ;;  %6374 = vmatpush.bf16.msrb.mxu2 %v9000_v47  ;;  %6387 = vmatpush.bf16.msrb.mxu3 %v9004_v49  ;;  %v10059_v47 = vld [vmem:[%s11594_s28 + $0xaf8] sm:$0xf]  ;;  %v3646_v42 = vperm.slane %v893_v36, 3 }
 0x399   : > { %v7722_v37 = vrot.slane %v5870_v46, 2  ;;  %6361 = vmatpush.bf16.msrb.mxu1 %v8996_v55  ;;  %6400 = vmatpush.bf16.msra.mxu0 %v9008_v54  ;;  %v11061_v49 = vld [vmem:[%s11594_s28 + $0xef4] sm:$0xf0]  ;;  %v10933_v55 = vld [vmem:[%s11594_s28 + $0xafc] sm:$0xf] }
 0x39a   : > { %v7951_v62 = vsel %vm7828_vm4, %v7720_v48, %v7721_v59  ;;  %v10061_v54 = vld [vmem:[%s11594_s28 + $0xef8] sm:$0xf0]  ;;  %v3648_v48 = vperm.slane %v893_v36, 5  ;;  %v10056_v59 = vor.u32 %v10932_v41, %v10053_v43  ;;  %v10060_v50 = vor.u32 %v11061_v49, %v10059_v47  ;;  %v11063_v43 = vld [vmem:[%s11594_s28 + $0xf04] sm:$0xf0] }
 0x39b   : > { %v7952_v63 = vsel %vm7830_vm5, %v7722_v37, %v7723_v61  ;;  %v10052_v37 = vor.u32 %v11060_v40, %v10051_v51  ;;  %v11062_v47 = vld [vmem:[%s11594_s28 + $0xefc] sm:$0xf0]  ;;  %v10935_v51 = vld [vmem:[%s11594_s28 + $0xb0c] sm:$0xf] }
 0x39c   : > { %v7953_v2 = vsel %vm7832_vm6, %v7951_v62, %v7952_v63  ;;  %v10064_v62 = vor.u32 %v10933_v55, %v10061_v54  ;;  %v9035_v63 = vld [vmem:[%s11594_s28 + $0x2f8] sm:$0xf] }
 0x39d   : > { %v7954_v6 = vsel %vm7834_vm7, %v7950_v0, %v7953_v2  ;;  %v5858_v9 = vpop.f32.mrf.mxu2  ;;  %v10805_v0 = vld [vmem:[%s11594_s28 + $0x6f4] sm:$0xf0]  ;;  %v9027_v2 = vld [vmem:[%s11594_s28 + $0x2f0] sm:$0xf] }
 0x39e   : > { %8102 = vst [vmem:[%s11901_s6 + $0x88] sm:$0xff] %v7954_v6  ;;  %v5871_v17 = vpop.f32.mrf.mxu3  ;;  %v3643_v6 = vperm.slane %v893_v36, 0  ;;  %v9036_v19 = vor.u32 %v10805_v0, %v9035_v63  ;;  %v9028_v24 = vor.u32 %v10804_v3, %v9027_v2  ;;  %v10069_v36 = vld [vmem:[%s11594_s28 + $0xf00] sm:$0xf0] }
 0x39f   : > { %v12978_v8 = vpop.f32.mrf.mxu1  ;;  %v9032_v17 = vor.u32 %v10676_v60, %v9029_v52  ;;  %v10679_v60 = vld [vmem:[%s11594_s28 + $0x30c] sm:$0xf] }
 0x3a0   : > { %v12980_v23 = vpop.f32.mrf.mxu0  ;;  %v9053_v52 = vld [vmem:[%s11594_s28 + $0x708] sm:$0xf0] }
 0x3a1   : > { %v5935_v9 = vadd.f32 %v12980_v23, %v3646_v42  ;;  %v9040_v23 = vor.u32 %v10677_v4, %v9037_v7  ;;  %v9056_v0 = vor.u32 %v10679_v60, %v9053_v52  ;;  %v894_v7 = vld [vmem:[%s11858_s1 + $0x98] sm:$0xff] }
 0x3a2   : > { %10497 = vmatmul.msk.bf16.vlgmr.msra.gmra.mxu1 %vm337_vm0, %v11641_v1  ;;  %10498 = vmatmul.msk.bf16.vlgmr.msra.gmra.mxu2 %vm337_vm0, %v11641_v1 }
 0x3a3   : > { %10499 = vmatmul.msk.bf16.vlgmr.msra.gmra.mxu3 %vm337_vm0, %v11641_v1  ;;  %10500 = vmatmul.msk.bf16.vlgmr.msrb.gmra.mxu0 %vm337_vm0, %v11641_v1  ;;  %v7726_v26 = vrot.slane %v5935_v9, 5  ;;  %v3653_v9 = vperm.slane %v894_v7, 2 }
 0x3a4   : > { %6425 = vmatpush.bf16.msra.mxu2 %v10040_v22  ;;  %6438 = vmatpush.bf16.msra.mxu3 %v10044_v10 }
 0x3a5   : > { %v5908_v30 = vpop.f32.mrf.mxu2  ;;  %6412 = vmatpush.bf16.msra.mxu1 %v10036_v25  ;;  %6451 = vmatpush.bf16.msrb.mxu0 %v10048_v14  ;;  %v5896_v14 = vadd.f32 %v12978_v8, %v3643_v6  ;;  %v3652_v6 = vperm.slane %v894_v7, 1 }
 0x3a6   : > { %v5921_v33 = vpop.f32.mrf.mxu3  ;;  %v5909_v46 = vadd.f32 %v5908_v30, %v3644_v39  ;;  %v10075_v39 = vld [vmem:[%s11594_s28 + $0xb08] sm:$0xf] }
 0x3a7   : > { %v5897_v34 = vpop.f32.mrf.mxu1  ;;  %v5922_v61 = vadd.f32 %v5921_v33, %v3645_v38  ;;  %v10076_v42 = vor.u32 %v11063_v43, %v10075_v39  ;;  %v9069_v39 = vld [vmem:[%s11594_s28 + $0x718] sm:$0xf0]  ;;  %v3657_v43 = vperm.slane %v894_v7, 6 }
 0x3a8   : > { %v5936_v35 = vpop.f32.mrf.mxu0  ;;  %6426 = vmatpush.bf16.msra.mxu2 %v9016_v29  ;;  %6439 = vmatpush.bf16.msra.mxu3 %v9020_v21  ;;  %v7724_v13 = vrot.slane %v5909_v46, 7 }
 0x3a9   : > { %6413 = vmatpush.bf16.msra.mxu1 %v9012_v31  ;;  %6452 = vmatpush.bf16.msrb.mxu0 %v9024_v32  ;;  %v7725_v5 = vrot.slane %v5922_v61, 6  ;;  %v10934_v35 = vld [vmem:[%s11594_s28 + $0xb04] sm:$0xf] }
 0x3aa   : > { %v7955_v29 = vsel %vm7822_vm1, %v5896_v14, %v7724_v13  ;;  %v10072_v54 = vor.u32 %v10934_v35, %v10069_v36  ;;  %v10085_v13 = vld [vmem:[%s11594_s28 + $0xf10] sm:$0xf0]  ;;  %v10808_v35 = vld [vmem:[%s11594_s28 + $0x70c] sm:$0xf0]  ;;  %v10681_v36 = vld [vmem:[%s11594_s28 + $0x31c] sm:$0xf] }
 0x3ab   : > { %v7956_v21 = vsel %vm7824_vm2, %v7725_v5, %v7726_v26  ;;  %v10083_v5 = vld [vmem:[%s11594_s28 + $0xb10] sm:$0xf]  ;;  %v3658_v26 = vperm.slane %v894_v7, 7 }
 0x3ac   : > { %v7957_v33 = vsel %vm7826_vm3, %v7955_v29, %v7956_v21  ;;  %v10680_v29 = vld [vmem:[%s11594_s28 + $0x314] sm:$0xf] }
 0x3ad   : > { %v5910_v45 = vpop.f32.mrf.mxu2  ;;  %v9061_v21 = vld [vmem:[%s11594_s28 + $0x710] sm:$0xf0] }
 0x3ae   : > { %v5923_v53 = vpop.f32.mrf.mxu3  ;;  %v10067_v45 = vld [vmem:[%s11594_s28 + $0xb00] sm:$0xf] }
 0x3af   : > { %v5947_v44 = vpop.f32.mrf.mxu1  ;;  %v10077_v53 = vld [vmem:[%s11594_s28 + $0xf08] sm:$0xf0] }
 0x3b0   : > { %v5986_v58 = vpop.f32.mrf.mxu0  ;;  %v5948_v15 = vadd.f32 %v5947_v44, %v3647_v56  ;;  %v10678_v56 = vld [vmem:[%s11594_s28 + $0x304] sm:$0xf]  ;;  %v10080_v46 = vor.u32 %v10935_v51, %v10077_v53 }
 0x3b1   : > { %v5987_v22 = vadd.f32 %v5986_v58, %v3650_v57  ;;  %v9045_v44 = vld [vmem:[%s11594_s28 + $0x700] sm:$0xf0]  ;;  %v10068_v57 = vor.u32 %v11062_v47, %v10067_v45  ;;  %v9051_v58 = vld [vmem:[%s11594_s28 + $0x308] sm:$0xf] }
 0x3b2   : > { %10501 = vmatmul.msk.bf16.vlgmr.msrb.gmra.mxu1 %vm337_vm0, %v11641_v1  ;;  %10502 = vmatmul.msk.bf16.vlgmr.msrb.gmra.mxu2 %vm337_vm0, %v11641_v1  ;;  %v7727_v18 = vrot.slane %v5948_v15, 4  ;;  %v9048_v61 = vor.u32 %v10678_v56, %v9045_v44 }
 0x3b3   : > { %10503 = vmatmul.msk.bf16.vlgmr.msrb.gmra.mxu3 %vm337_vm0, %v11641_v1  ;;  %10504 = vmatmul.msk.bf16.vlgmr.msra.gmra.mxu0 %vm337_vm0, %v11641_v1  ;;  %v7730_v30 = vrot.slane %v5987_v22, 1 }
 0x3b4   : > { %6477 = vmatpush.bf16.msrb.mxu2 %v10056_v59  ;;  %6490 = vmatpush.bf16.msrb.mxu3 %v10060_v50  ;;  %v9043_v59 = vld [vmem:[%s11594_s28 + $0x300] sm:$0xf] }
 0x3b5   : > { %v5960_v10 = vpop.f32.mrf.mxu2  ;;  %6464 = vmatpush.bf16.msrb.mxu1 %v10052_v37  ;;  %6503 = vmatpush.bf16.msra.mxu0 %v10064_v62  ;;  %v10806_v50 = vld [vmem:[%s11594_s28 + $0x6fc] sm:$0xf0] }
 0x3b6   : > { %v5961_v12 = vadd.f32 %v5960_v10, %v3648_v48  ;;  %v5973_v25 = vpop.f32.mrf.mxu3  ;;  %v10807_v48 = vld [vmem:[%s11594_s28 + $0x704] sm:$0xf0]  ;;  %v9044_v63 = vor.u32 %v10806_v50, %v9043_v59  ;;  %v11064_v10 = vld [vmem:[%s11594_s28 + $0xf0c] sm:$0xf0] }
 0x3b7   : > { %v5974_v16 = vadd.f32 %v5973_v25, %v3649_v11  ;;  %v5949_v27 = vpop.f32.mrf.mxu1  ;;  %v9052_v37 = vor.u32 %v10807_v48, %v9051_v58  ;;  %v10936_v11 = vld [vmem:[%s11594_s28 + $0xb14] sm:$0xf]  ;;  %v3655_v25 = vperm.slane %v894_v7, 4 }
 0x3b8   : > { %v7728_v28 = vrot.slane %v5961_v12, 3  ;;  %v5988_v20 = vpop.f32.mrf.mxu0  ;;  %6478 = vmatpush.bf16.msrb.mxu2 %v9032_v17  ;;  %6491 = vmatpush.bf16.msrb.mxu3 %v9036_v19  ;;  %v10091_v17 = vld [vmem:[%s11594_s28 + $0xb18] sm:$0xf]  ;;  %v3654_v12 = vperm.slane %v894_v7, 3 }
 0x3b9   : > { %v7729_v8 = vrot.slane %v5974_v16, 2  ;;  %6465 = vmatpush.bf16.msrb.mxu1 %v9028_v24  ;;  %6504 = vmatpush.bf16.msra.mxu0 %v9040_v23  ;;  %v11065_v19 = vld [vmem:[%s11594_s28 + $0xf14] sm:$0xf0]  ;;  %v10937_v24 = vld [vmem:[%s11594_s28 + $0xb1c] sm:$0xf] }
 0x3ba   : > { %v7958_v31 = vsel %vm7828_vm4, %v7727_v18, %v7728_v28  ;;  %v10093_v23 = vld [vmem:[%s11594_s28 + $0xf18] sm:$0xf0]  ;;  %v3656_v18 = vperm.slane %v894_v7, 5  ;;  %v10088_v28 = vor.u32 %v10936_v11, %v10085_v13  ;;  %v10092_v20 = vor.u32 %v11065_v19, %v10091_v17  ;;  %v11067_v13 = vld [vmem:[%s11594_s28 + $0xf24] sm:$0xf0] }
 0x3bb   : > { %v7959_v32 = vsel %vm7830_vm5, %v7729_v8, %v7730_v30  ;;  %v10084_v8 = vor.u32 %v11064_v10, %v10083_v5  ;;  %v11066_v17 = vld [vmem:[%s11594_s28 + $0xf1c] sm:$0xf0]  ;;  %v10939_v5 = vld [vmem:[%s11594_s28 + $0xb2c] sm:$0xf] }
 0x3bc   : > { %v7960_v34 = vsel %vm7832_vm6, %v7958_v31, %v7959_v32  ;;  %v10096_v31 = vor.u32 %v10937_v24, %v10093_v23  ;;  %v9067_v32 = vld [vmem:[%s11594_s28 + $0x318] sm:$0xf] }
 0x3bd   : > { %v7961_v38 = vsel %vm7834_vm7, %v7957_v33, %v7960_v34  ;;  %v5962_v41 = vpop.f32.mrf.mxu2  ;;  %v10809_v33 = vld [vmem:[%s11594_s28 + $0x714] sm:$0xf0]  ;;  %v9059_v34 = vld [vmem:[%s11594_s28 + $0x310] sm:$0xf] }
 0x3be   : > { %8103 = vst [vmem:[%s11901_s6 + $0x90] sm:$0xff] %v7961_v38  ;;  %v5975_v49 = vpop.f32.mrf.mxu3  ;;  %v3651_v38 = vperm.slane %v894_v7, 0  ;;  %v9068_v51 = vor.u32 %v10809_v33, %v9067_v32  ;;  %v9060_v56 = vor.u32 %v10808_v35, %v9059_v34  ;;  %v10101_v7 = vld [vmem:[%s11594_s28 + $0xf20] sm:$0xf0] }
 0x3bf   : > { %v13041_v40 = vpop.f32.mrf.mxu1  ;;  %v9064_v49 = vor.u32 %v10680_v29, %v9061_v21  ;;  %v10683_v29 = vld [vmem:[%s11594_s28 + $0x32c] sm:$0xf] }
 0x3c0   : > { %v13043_v55 = vpop.f32.mrf.mxu0  ;;  %v9085_v21 = vld [vmem:[%s11594_s28 + $0x728] sm:$0xf0] }
 0x3c1   : > { %v6039_v41 = vadd.f32 %v13043_v55, %v3654_v12  ;;  %v9072_v55 = vor.u32 %v10681_v36, %v9069_v39  ;;  %v9088_v33 = vor.u32 %v10683_v29, %v9085_v21  ;;  %v895_v39 = vld [vmem:[%s11858_s1 + $0xa0] sm:$0xff] }
 0x3c2   : > { %10505 = vmatmul.msk.bf16.vlgmr.msra.gmra.mxu1 %vm337_vm0, %v11641_v1  ;;  %10506 = vmatmul.msk.bf16.vlgmr.msra.gmra.mxu2 %vm337_vm0, %v11641_v1 }
 0x3c3   : > { %10507 = vmatmul.msk.bf16.vlgmr.msra.gmra.mxu3 %vm337_vm0, %v11641_v1  ;;  %10508 = vmatmul.msk.bf16.vlgmr.msrb.gmra.mxu0 %vm337_vm0, %v11641_v1  ;;  %v7733_v58 = vrot.slane %v6039_v41, 5  ;;  %v3661_v41 = vperm.slane %v895_v39, 2 }
 0x3c4   : > { %6529 = vmatpush.bf16.msra.mxu2 %v10072_v54  ;;  %6542 = vmatpush.bf16.msra.mxu3 %v10076_v42 }
 0x3c5   : > { %v6012_v62 = vpop.f32.mrf.mxu2  ;;  %6516 = vmatpush.bf16.msra.mxu1 %v10068_v57  ;;  %6555 = vmatpush.bf16.msrb.mxu0 %v10080_v46  ;;  %v6000_v46 = vadd.f32 %v13041_v40, %v3651_v38  ;;  %v3660_v38 = vperm.slane %v895_v39, 1 }
 0x3c6   : > { %v6025_v2 = vpop.f32.mrf.mxu3  ;;  %v6013_v16 = vadd.f32 %v6012_v62, %v3652_v6  ;;  %v10107_v6 = vld [vmem:[%s11594_s28 + $0xb28] sm:$0xf] }
 0x3c7   : > { %v6001_v3 = vpop.f32.mrf.mxu1  ;;  %v6026_v30 = vadd.f32 %v6025_v2, %v3653_v9  ;;  %v10108_v12 = vor.u32 %v11067_v13, %v10107_v6  ;;  %v9101_v6 = vld [vmem:[%s11594_s28 + $0x738] sm:$0xf0]  ;;  %v3665_v13 = vperm.slane %v895_v39, 6 }
 0x3c8   : > { %v6040_v4 = vpop.f32.mrf.mxu0  ;;  %6530 = vmatpush.bf16.msra.mxu2 %v9048_v61  ;;  %6543 = vmatpush.bf16.msra.mxu3 %v9052_v37  ;;  %v7731_v45 = vrot.slane %v6013_v16, 7 }
 0x3c9   : > { %6517 = vmatpush.bf16.msra.mxu1 %v9044_v63  ;;  %6556 = vmatpush.bf16.msrb.mxu0 %v9056_v0  ;;  %v7732_v53 = vrot.slane %v6026_v30, 6  ;;  %v10938_v4 = vld [vmem:[%s11594_s28 + $0xb24] sm:$0xf] }
 0x3ca   : > { %v7962_v61 = vsel %vm7822_vm1, %v6000_v46, %v7731_v45  ;;  %v10104_v23 = vor.u32 %v10938_v4, %v10101_v7  ;;  %v10117_v45 = vld [vmem:[%s11594_s28 + $0xf30] sm:$0xf0]  ;;  %v10812_v4 = vld [vmem:[%s11594_s28 + $0x72c] sm:$0xf0]  ;;  %v10685_v7 = vld [vmem:[%s11594_s28 + $0x33c] sm:$0xf] }
 0x3cb   : > { %v7963_v37 = vsel %vm7824_vm2, %v7732_v53, %v7733_v58  ;;  %v10115_v53 = vld [vmem:[%s11594_s28 + $0xb30] sm:$0xf]  ;;  %v3666_v58 = vperm.slane %v895_v39, 7 }
 0x3cc   : > { %v7964_v2 = vsel %vm7826_vm3, %v7962_v61, %v7963_v37  ;;  %v10684_v61 = vld [vmem:[%s11594_s28 + $0x334] sm:$0xf] }
 0x3cd   : > { %v6014_v15 = vpop.f32.mrf.mxu2  ;;  %v9093_v37 = vld [vmem:[%s11594_s28 + $0x730] sm:$0xf0] }
 0x3ce   : > { %v6027_v22 = vpop.f32.mrf.mxu3  ;;  %v10099_v15 = vld [vmem:[%s11594_s28 + $0xb20] sm:$0xf] }
 0x3cf   : > { %v6051_v14 = vpop.f32.mrf.mxu1  ;;  %v10109_v22 = vld [vmem:[%s11594_s28 + $0xf28] sm:$0xf0] }
 0x3d0   : > { %v6090_v27 = vpop.f32.mrf.mxu0  ;;  %v6052_v47 = vadd.f32 %v6051_v14, %v3655_v25  ;;  %v10682_v25 = vld [vmem:[%s11594_s28 + $0x324] sm:$0xf]  ;;  %v10112_v16 = vor.u32 %v10939_v5, %v10109_v22 }
 0x3d1   : > { %v6091_v54 = vadd.f32 %v6090_v27, %v3658_v26  ;;  %v9077_v14 = vld [vmem:[%s11594_s28 + $0x720] sm:$0xf0]  ;;  %v10100_v26 = vor.u32 %v11066_v17, %v10099_v15  ;;  %v9083_v27 = vld [vmem:[%s11594_s28 + $0x328] sm:$0xf] }
 0x3d2   : > { %10509 = vmatmul.msk.bf16.vlgmr.msrb.gmra.mxu1 %vm337_vm0, %v11641_v1  ;;  %10510 = vmatmul.msk.bf16.vlgmr.msrb.gmra.mxu2 %vm337_vm0, %v11641_v1  ;;  %v7734_v50 = vrot.slane %v6052_v47, 4  ;;  %v9080_v30 = vor.u32 %v10682_v25, %v9077_v14 }
 0x3d3   : > { %10511 = vmatmul.msk.bf16.vlgmr.msrb.gmra.mxu3 %vm337_vm0, %v11641_v1  ;;  %10512 = vmatmul.msk.bf16.vlgmr.msra.gmra.mxu0 %vm337_vm0, %v11641_v1  ;;  %v7737_v62 = vrot.slane %v6091_v54, 1 }
 0x3d4   : > { %6581 = vmatpush.bf16.msrb.mxu2 %v10088_v28  ;;  %6594 = vmatpush.bf16.msrb.mxu3 %v10092_v20  ;;  %v9075_v28 = vld [vmem:[%s11594_s28 + $0x320] sm:$0xf] }
 0x3d5   : > { %v6064_v42 = vpop.f32.mrf.mxu2  ;;  %6568 = vmatpush.bf16.msrb.mxu1 %v10084_v8  ;;  %6607 = vmatpush.bf16.msra.mxu0 %v10096_v31  ;;  %v10810_v20 = vld [vmem:[%s11594_s28 + $0x71c] sm:$0xf0] }
 0x3d6   : > { %v6065_v44 = vadd.f32 %v6064_v42, %v3656_v18  ;;  %v6077_v57 = vpop.f32.mrf.mxu3  ;;  %v10811_v18 = vld [vmem:[%s11594_s28 + $0x724] sm:$0xf0]  ;;  %v9076_v32 = vor.u32 %v10810_v20, %v9075_v28  ;;  %v11068_v42 = vld [vmem:[%s11594_s28 + $0xf2c] sm:$0xf0] }
 0x3d7   : > { %v6078_v48 = vadd.f32 %v6077_v57, %v3657_v43  ;;  %v6053_v59 = vpop.f32.mrf.mxu1  ;;  %v9084_v8 = vor.u32 %v10811_v18, %v9083_v27  ;;  %v10940_v43 = vld [vmem:[%s11594_s28 + $0xb34] sm:$0xf]  ;;  %v3663_v57 = vperm.slane %v895_v39, 4 }
 0x3d8   : > { %v7735_v60 = vrot.slane %v6065_v44, 3  ;;  %v6092_v52 = vpop.f32.mrf.mxu0  ;;  %6582 = vmatpush.bf16.msrb.mxu2 %v9064_v49  ;;  %6595 = vmatpush.bf16.msrb.mxu3 %v9068_v51  ;;  %v10123_v49 = vld [vmem:[%s11594_s28 + $0xb38] sm:$0xf]  ;;  %v3662_v44 = vperm.slane %v895_v39, 3 }
 0x3d9   : > { %v7736_v40 = vrot.slane %v6078_v48, 2  ;;  %6569 = vmatpush.bf16.msrb.mxu1 %v9060_v56  ;;  %6608 = vmatpush.bf16.msra.mxu0 %v9072_v55  ;;  %v11069_v51 = vld [vmem:[%s11594_s28 + $0xf34] sm:$0xf0]  ;;  %v10941_v56 = vld [vmem:[%s11594_s28 + $0xb3c] sm:$0xf] }
 0x3da   : > { %v7965_v63 = vsel %vm7828_vm4, %v7734_v50, %v7735_v60  ;;  %v10125_v55 = vld [vmem:[%s11594_s28 + $0xf38] sm:$0xf0]  ;;  %v3664_v50 = vperm.slane %v895_v39, 5  ;;  %v10120_v60 = vor.u32 %v10940_v43, %v10117_v45  ;;  %v10124_v52 = vor.u32 %v11069_v51, %v10123_v49  ;;  %v11071_v45 = vld [vmem:[%s11594_s28 + $0xf44] sm:$0xf0] }
 0x3db   : > { %v7966_v0 = vsel %vm7830_vm5, %v7736_v40, %v7737_v62  ;;  %v10116_v40 = vor.u32 %v11068_v42, %v10115_v53  ;;  %v11070_v49 = vld [vmem:[%s11594_s28 + $0xf3c] sm:$0xf0]  ;;  %v10943_v53 = vld [vmem:[%s11594_s28 + $0xb4c] sm:$0xf] }
 0x3dc   : > { %v7967_v3 = vsel %vm7832_vm6, %v7965_v63, %v7966_v0  ;;  %v10128_v63 = vor.u32 %v10941_v56, %v10125_v55  ;;  %v9099_v0 = vld [vmem:[%s11594_s28 + $0x338] sm:$0xf] }
 0x3dd   : > { %v7968_v9 = vsel %vm7834_vm7, %v7964_v2, %v7967_v3  ;;  %v6066_v11 = vpop.f32.mrf.mxu2  ;;  %v10813_v2 = vld [vmem:[%s11594_s28 + $0x734] sm:$0xf0]  ;;  %v9091_v3 = vld [vmem:[%s11594_s28 + $0x330] sm:$0xf] }
 0x3de   : > { %8104 = vst [vmem:[%s11901_s6 + $0x98] sm:$0xff] %v7968_v9  ;;  %v6079_v19 = vpop.f32.mrf.mxu3  ;;  %v3659_v9 = vperm.slane %v895_v39, 0  ;;  %v9100_v5 = vor.u32 %v10813_v2, %v9099_v0  ;;  %v9092_v25 = vor.u32 %v10812_v4, %v9091_v3  ;;  %v10133_v39 = vld [vmem:[%s11594_s28 + $0xf40] sm:$0xf0] }
 0x3df   : > { %v13104_v10 = vpop.f32.mrf.mxu1  ;;  %v9096_v19 = vor.u32 %v10684_v61, %v9093_v37  ;;  %v10687_v61 = vld [vmem:[%s11594_s28 + $0x34c] sm:$0xf] }
 0x3e0   : > { %v13106_v24 = vpop.f32.mrf.mxu0  ;;  %v9117_v37 = vld [vmem:[%s11594_s28 + $0x748] sm:$0xf0] }
 0x3e1   : > { %v6143_v11 = vadd.f32 %v13106_v24, %v3662_v44  ;;  %v9104_v24 = vor.u32 %v10685_v7, %v9101_v6  ;;  %v9120_v2 = vor.u32 %v10687_v61, %v9117_v37  ;;  %v896_v6 = vld [vmem:[%s11858_s1 + $0xa8] sm:$0xff] }
 0x3e2   : > { %10513 = vmatmul.msk.bf16.vlgmr.msra.gmra.mxu1 %vm337_vm0, %v11641_v1  ;;  %10514 = vmatmul.msk.bf16.vlgmr.msra.gmra.mxu2 %vm337_vm0, %v11641_v1 }
 0x3e3   : > { %10515 = vmatmul.msk.bf16.vlgmr.msra.gmra.mxu3 %vm337_vm0, %v11641_v1  ;;  %10516 = vmatmul.msk.bf16.vlgmr.msrb.gmra.mxu0 %vm337_vm0, %v11641_v1  ;;  %v7740_v27 = vrot.slane %v6143_v11, 5  ;;  %v3669_v11 = vperm.slane %v896_v6, 2 }
 0x3e4   : > { %6633 = vmatpush.bf16.msra.mxu2 %v10104_v23  ;;  %6646 = vmatpush.bf16.msra.mxu3 %v10108_v12 }
 0x3e5   : > { %v6116_v31 = vpop.f32.mrf.mxu2  ;;  %6620 = vmatpush.bf16.msra.mxu1 %v10100_v26  ;;  %6659 = vmatpush.bf16.msrb.mxu0 %v10112_v16  ;;  %v6104_v16 = vadd.f32 %v13104_v10, %v3659_v9  ;;  %v3668_v9 = vperm.slane %v896_v6, 1 }
 0x3e6   : > { %v6129_v34 = vpop.f32.mrf.mxu3  ;;  %v6117_v48 = vadd.f32 %v6116_v31, %v3660_v38  ;;  %v10139_v38 = vld [vmem:[%s11594_s28 + $0xb48] sm:$0xf] }
 0x3e7   : > { %v6105_v35 = vpop.f32.mrf.mxu1  ;;  %v6130_v62 = vadd.f32 %v6129_v34, %v3661_v41  ;;  %v10140_v44 = vor.u32 %v11071_v45, %v10139_v38  ;;  %v9133_v38 = vld [vmem:[%s11594_s28 + $0x758] sm:$0xf0]  ;;  %v3673_v45 = vperm.slane %v896_v6, 6 }
 0x3e8   : > { %v6144_v36 = vpop.f32.mrf.mxu0  ;;  %6634 = vmatpush.bf16.msra.mxu2 %v9080_v30  ;;  %6647 = vmatpush.bf16.msra.mxu3 %v9084_v8  ;;  %v7738_v15 = vrot.slane %v6117_v48, 7 }
 0x3e9   : > { %6621 = vmatpush.bf16.msra.mxu1 %v9076_v32  ;;  %6660 = vmatpush.bf16.msrb.mxu0 %v9088_v33  ;;  %v7739_v22 = vrot.slane %v6130_v62, 6  ;;  %v10942_v36 = vld [vmem:[%s11594_s28 + $0xb44] sm:$0xf] }
 0x3ea   : > { %v7969_v30 = vsel %vm7822_vm1, %v6104_v16, %v7738_v15  ;;  %v10136_v55 = vor.u32 %v10942_v36, %v10133_v39  ;;  %v10149_v15 = vld [vmem:[%s11594_s28 + $0xf50] sm:$0xf0]  ;;  %v10816_v36 = vld [vmem:[%s11594_s28 + $0x74c] sm:$0xf0]  ;;  %v10689_v39 = vld [vmem:[%s11594_s28 + $0x35c] sm:$0xf] }
 0x3eb   : > { %v7970_v8 = vsel %vm7824_vm2, %v7739_v22, %v7740_v27  ;;  %v10147_v22 = vld [vmem:[%s11594_s28 + $0xb50] sm:$0xf]  ;;  %v3674_v27 = vperm.slane %v896_v6, 7 }
 0x3ec   : > { %v7971_v34 = vsel %vm7826_vm3, %v7969_v30, %v7970_v8  ;;  %v10688_v30 = vld [vmem:[%s11594_s28 + $0x354] sm:$0xf] }
 0x3ed   : > { %v6118_v47 = vpop.f32.mrf.mxu2  ;;  %v9125_v8 = vld [vmem:[%s11594_s28 + $0x750] sm:$0xf0] }
 0x3ee   : > { %v6131_v54 = vpop.f32.mrf.mxu3  ;;  %v10131_v47 = vld [vmem:[%s11594_s28 + $0xb40] sm:$0xf] }
 0x3ef   : > { %v6155_v46 = vpop.f32.mrf.mxu1  ;;  %v10141_v54 = vld [vmem:[%s11594_s28 + $0xf48] sm:$0xf0] }
 0x3f0   : > { %v6194_v59 = vpop.f32.mrf.mxu0  ;;  %v6156_v17 = vadd.f32 %v6155_v46, %v3663_v57  ;;  %v10686_v57 = vld [vmem:[%s11594_s28 + $0x344] sm:$0xf]  ;;  %v10144_v48 = vor.u32 %v10943_v53, %v10141_v54 }
 0x3f1   : > { %v6195_v23 = vadd.f32 %v6194_v59, %v3666_v58  ;;  %v9109_v46 = vld [vmem:[%s11594_s28 + $0x740] sm:$0xf0]  ;;  %v10132_v58 = vor.u32 %v11070_v49, %v10131_v47  ;;  %v9115_v59 = vld [vmem:[%s11594_s28 + $0x348] sm:$0xf] }
 0x3f2   : > { %10517 = vmatmul.msk.bf16.vlgmr.msrb.gmra.mxu1 %vm337_vm0, %v11641_v1  ;;  %10518 = vmatmul.msk.bf16.vlgmr.msrb.gmra.mxu2 %vm337_vm0, %v11641_v1  ;;  %v7741_v20 = vrot.slane %v6156_v17, 4  ;;  %v9112_v62 = vor.u32 %v10686_v57, %v9109_v46 }
 0x3f3   : > { %10519 = vmatmul.msk.bf16.vlgmr.msrb.gmra.mxu3 %vm337_vm0, %v11641_v1  ;;  %10520 = vmatmul.msk.bf16.vlgmr.msra.gmra.mxu0 %vm337_vm0, %v11641_v1  ;;  %v7744_v31 = vrot.slane %v6195_v23, 1 }
 0x3f4   : > { %6685 = vmatpush.bf16.msrb.mxu2 %v10120_v60  ;;  %6698 = vmatpush.bf16.msrb.mxu3 %v10124_v52  ;;  %v9107_v60 = vld [vmem:[%s11594_s28 + $0x340] sm:$0xf] }
 0x3f5   : > { %v6168_v12 = vpop.f32.mrf.mxu2  ;;  %6672 = vmatpush.bf16.msrb.mxu1 %v10116_v40  ;;  %6711 = vmatpush.bf16.msra.mxu0 %v10128_v63  ;;  %v10814_v52 = vld [vmem:[%s11594_s28 + $0x73c] sm:$0xf0] }
 0x3f6   : > { %v6169_v14 = vadd.f32 %v6168_v12, %v3664_v50  ;;  %v6181_v26 = vpop.f32.mrf.mxu3  ;;  %v10815_v50 = vld [vmem:[%s11594_s28 + $0x744] sm:$0xf0]  ;;  %v9108_v0 = vor.u32 %v10814_v52, %v9107_v60  ;;  %v11072_v12 = vld [vmem:[%s11594_s28 + $0xf4c] sm:$0xf0] }
 0x3f7   : > { %v6182_v18 = vadd.f32 %v6181_v26, %v3665_v13  ;;  %v6157_v28 = vpop.f32.mrf.mxu1  ;;  %v9116_v40 = vor.u32 %v10815_v50, %v9115_v59  ;;  %v10944_v13 = vld [vmem:[%s11594_s28 + $0xb54] sm:$0xf]  ;;  %v3671_v26 = vperm.slane %v896_v6, 4 }
 0x3f8   : > { %v7742_v29 = vrot.slane %v6169_v14, 3  ;;  %v6196_v21 = vpop.f32.mrf.mxu0  ;;  %6686 = vmatpush.bf16.msrb.mxu2 %v9096_v19  ;;  %6699 = vmatpush.bf16.msrb.mxu3 %v9100_v5  ;;  %v10155_v19 = vld [vmem:[%s11594_s28 + $0xb58] sm:$0xf]  ;;  %v3670_v14 = vperm.slane %v896_v6, 3 }
 0x3f9   : > { %v7743_v10 = vrot.slane %v6182_v18, 2  ;;  %6673 = vmatpush.bf16.msrb.mxu1 %v9092_v25  ;;  %6712 = vmatpush.bf16.msra.mxu0 %v9104_v24  ;;  %v11073_v5 = vld [vmem:[%s11594_s28 + $0xf54] sm:$0xf0]  ;;  %v10945_v25 = vld [vmem:[%s11594_s28 + $0xb5c] sm:$0xf] }
 0x3fa   : > { %v7972_v32 = vsel %vm7828_vm4, %v7741_v20, %v7742_v29  ;;  %v10157_v24 = vld [vmem:[%s11594_s28 + $0xf58] sm:$0xf0]  ;;  %v3672_v20 = vperm.slane %v896_v6, 5  ;;  %v10152_v29 = vor.u32 %v10944_v13, %v10149_v15  ;;  %v10156_v21 = vor.u32 %v11073_v5, %v10155_v19  ;;  %v11075_v15 = vld [vmem:[%s11594_s28 + $0xf64] sm:$0xf0] }
 0x3fb   : > { %v7973_v33 = vsel %vm7830_vm5, %v7743_v10, %v7744_v31  ;;  %v10148_v10 = vor.u32 %v11072_v12, %v10147_v22  ;;  %v11074_v19 = vld [vmem:[%s11594_s28 + $0xf5c] sm:$0xf0]  ;;  %v10947_v22 = vld [vmem:[%s11594_s28 + $0xb6c] sm:$0xf] }
 0x3fc   : > { %v7974_v35 = vsel %vm7832_vm6, %v7972_v32, %v7973_v33  ;;  %v10160_v32 = vor.u32 %v10945_v25, %v10157_v24  ;;  %v9131_v33 = vld [vmem:[%s11594_s28 + $0x358] sm:$0xf] }
 0x3fd   : > { %v7975_v41 = vsel %vm7834_vm7, %v7971_v34, %v7974_v35  ;;  %v6170_v43 = vpop.f32.mrf.mxu2  ;;  %v10817_v34 = vld [vmem:[%s11594_s28 + $0x754] sm:$0xf0]  ;;  %v9123_v35 = vld [vmem:[%s11594_s28 + $0x350] sm:$0xf] }
 0x3fe   : > { %8105 = vst [vmem:[%s11901_s6 + $0xa0] sm:$0xff] %v7975_v41  ;;  %v6183_v51 = vpop.f32.mrf.mxu3  ;;  %v3667_v41 = vperm.slane %v896_v6, 0  ;;  %v9132_v53 = vor.u32 %v10817_v34, %v9131_v33  ;;  %v9124_v57 = vor.u32 %v10816_v36, %v9123_v35  ;;  %v10165_v6 = vld [vmem:[%s11594_s28 + $0xf60] sm:$0xf0] }
 0x3ff   : > { %v13167_v42 = vpop.f32.mrf.mxu1  ;;  %v9128_v51 = vor.u32 %v10688_v30, %v9125_v8  ;;  %v10691_v30 = vld [vmem:[%s11594_s28 + $0x36c] sm:$0xf] }
 0x400   : > { %v13169_v56 = vpop.f32.mrf.mxu0  ;;  %v9149_v8 = vld [vmem:[%s11594_s28 + $0x768] sm:$0xf0] }
 0x401   : > { %v6247_v43 = vadd.f32 %v13169_v56, %v3670_v14  ;;  %v9136_v56 = vor.u32 %v10689_v39, %v9133_v38  ;;  %v9152_v34 = vor.u32 %v10691_v30, %v9149_v8  ;;  %v897_v38 = vld [vmem:[%s11858_s1 + $0xb0] sm:$0xff] }
 0x402   : > { %10521 = vmatmul.msk.bf16.vlgmr.msra.gmra.mxu1 %vm337_vm0, %v11641_v1  ;;  %10522 = vmatmul.msk.bf16.vlgmr.msra.gmra.mxu2 %vm337_vm0, %v11641_v1 }
 0x403   : > { %10523 = vmatmul.msk.bf16.vlgmr.msra.gmra.mxu3 %vm337_vm0, %v11641_v1  ;;  %10524 = vmatmul.msk.bf16.vlgmr.msrb.gmra.mxu0 %vm337_vm0, %v11641_v1  ;;  %v7747_v59 = vrot.slane %v6247_v43, 5  ;;  %v3677_v43 = vperm.slane %v897_v38, 2 }
 0x404   : > { %6737 = vmatpush.bf16.msra.mxu2 %v10136_v55  ;;  %6750 = vmatpush.bf16.msra.mxu3 %v10140_v44 }
 0x405   : > { %v6220_v63 = vpop.f32.mrf.mxu2  ;;  %6724 = vmatpush.bf16.msra.mxu1 %v10132_v58  ;;  %6763 = vmatpush.bf16.msrb.mxu0 %v10144_v48  ;;  %v6208_v48 = vadd.f32 %v13167_v42, %v3667_v41  ;;  %v3676_v41 = vperm.slane %v897_v38, 1 }
 0x406   : > { %v6233_v3 = vpop.f32.mrf.mxu3  ;;  %v6221_v18 = vadd.f32 %v6220_v63, %v3668_v9  ;;  %v10171_v9 = vld [vmem:[%s11594_s28 + $0xb68] sm:$0xf] }
 0x407   : > { %v6209_v4 = vpop.f32.mrf.mxu1  ;;  %v6234_v31 = vadd.f32 %v6233_v3, %v3669_v11  ;;  %v10172_v14 = vor.u32 %v11075_v15, %v10171_v9  ;;  %v9165_v9 = vld [vmem:[%s11594_s28 + $0x778] sm:$0xf0]  ;;  %v3681_v15 = vperm.slane %v897_v38, 6 }
 0x408   : > { %v6248_v7 = vpop.f32.mrf.mxu0  ;;  %6738 = vmatpush.bf16.msra.mxu2 %v9112_v62  ;;  %6751 = vmatpush.bf16.msra.mxu3 %v9116_v40  ;;  %v7745_v47 = vrot.slane %v6221_v18, 7 }
 0x409   : > { %6725 = vmatpush.bf16.msra.mxu1 %v9108_v0  ;;  %6764 = vmatpush.bf16.msrb.mxu0 %v9120_v2  ;;  %v7746_v54 = vrot.slane %v6234_v31, 6  ;;  %v10946_v7 = vld [vmem:[%s11594_s28 + $0xb64] sm:$0xf] }
 0x40a   : > { %v7976_v62 = vsel %vm7822_vm1, %v6208_v48, %v7745_v47  ;;  %v10168_v24 = vor.u32 %v10946_v7, %v10165_v6  ;;  %v10181_v47 = vld [vmem:[%s11594_s28 + $0xf70] sm:$0xf0]  ;;  %v10820_v7 = vld [vmem:[%s11594_s28 + $0x76c] sm:$0xf0]  ;;  %v10693_v6 = vld [vmem:[%s11594_s28 + $0x37c] sm:$0xf] }
 0x40b   : > { %v7977_v40 = vsel %vm7824_vm2, %v7746_v54, %v7747_v59  ;;  %v10179_v54 = vld [vmem:[%s11594_s28 + $0xb70] sm:$0xf]  ;;  %v3682_v59 = vperm.slane %v897_v38, 7 }
 0x40c   : > { %v7978_v3 = vsel %vm7826_vm3, %v7976_v62, %v7977_v40  ;;  %v10692_v62 = vld [vmem:[%s11594_s28 + $0x374] sm:$0xf] }
 0x40d   : > { %v6222_v17 = vpop.f32.mrf.mxu2  ;;  %v9157_v40 = vld [vmem:[%s11594_s28 + $0x770] sm:$0xf0] }
 0x40e   : > { %v6235_v23 = vpop.f32.mrf.mxu3  ;;  %v10163_v17 = vld [vmem:[%s11594_s28 + $0xb60] sm:$0xf] }
 0x40f   : > { %v6259_v16 = vpop.f32.mrf.mxu1  ;;  %v10173_v23 = vld [vmem:[%s11594_s28 + $0xf68] sm:$0xf0] }
 0x410   : > { %v6298_v28 = vpop.f32.mrf.mxu0  ;;  %v6260_v49 = vadd.f32 %v6259_v16, %v3671_v26  ;;  %v10690_v26 = vld [vmem:[%s11594_s28 + $0x364] sm:$0xf]  ;;  %v10176_v18 = vor.u32 %v10947_v22, %v10173_v23 }
 0x411   : > { %v6299_v55 = vadd.f32 %v6298_v28, %v3674_v27  ;;  %v9141_v16 = vld [vmem:[%s11594_s28 + $0x760] sm:$0xf0]  ;;  %v10164_v27 = vor.u32 %v11074_v19, %v10163_v17  ;;  %v9147_v28 = vld [vmem:[%s11594_s28 + $0x368] sm:$0xf] }
 0x412   : > { %10525 = vmatmul.msk.bf16.vlgmr.msrb.gmra.mxu1 %vm337_vm0, %v11641_v1  ;;  %10526 = vmatmul.msk.bf16.vlgmr.msrb.gmra.mxu2 %vm337_vm0, %v11641_v1  ;;  %v7748_v52 = vrot.slane %v6260_v49, 4  ;;  %v9144_v31 = vor.u32 %v10690_v26, %v9141_v16 }
 0x413   : > { %10527 = vmatmul.msk.bf16.vlgmr.msrb.gmra.mxu3 %vm337_vm0, %v11641_v1  ;;  %10528 = vmatmul.msk.bf16.vlgmr.msra.gmra.mxu0 %vm337_vm0, %v11641_v1  ;;  %v7751_v63 = vrot.slane %v6299_v55, 1 }
 0x414   : > { %6789 = vmatpush.bf16.msrb.mxu2 %v10152_v29  ;;  %6802 = vmatpush.bf16.msrb.mxu3 %v10156_v21  ;;  %v9139_v29 = vld [vmem:[%s11594_s28 + $0x360] sm:$0xf] }
 0x415   : > { %v6272_v44 = vpop.f32.mrf.mxu2  ;;  %6776 = vmatpush.bf16.msrb.mxu1 %v10148_v10  ;;  %6815 = vmatpush.bf16.msra.mxu0 %v10160_v32  ;;  %v10818_v21 = vld [vmem:[%s11594_s28 + $0x75c] sm:$0xf0] }
 0x416   : > { %v6273_v46 = vadd.f32 %v6272_v44, %v3672_v20  ;;  %v6285_v58 = vpop.f32.mrf.mxu3  ;;  %v10819_v20 = vld [vmem:[%s11594_s28 + $0x764] sm:$0xf0]  ;;  %v9140_v33 = vor.u32 %v10818_v21, %v9139_v29  ;;  %v11076_v44 = vld [vmem:[%s11594_s28 + $0xf6c] sm:$0xf0] }
 0x417   : > { %v6286_v50 = vadd.f32 %v6285_v58, %v3673_v45  ;;  %v6261_v60 = vpop.f32.mrf.mxu1  ;;  %v9148_v10 = vor.u32 %v10819_v20, %v9147_v28  ;;  %v10948_v45 = vld [vmem:[%s11594_s28 + $0xb74] sm:$0xf]  ;;  %v3679_v58 = vperm.slane %v897_v38, 4 }
 0x418   : > { %v7749_v61 = vrot.slane %v6273_v46, 3  ;;  %v6300_v37 = vpop.f32.mrf.mxu0  ;;  %6790 = vmatpush.bf16.msrb.mxu2 %v9128_v51  ;;  %6803 = vmatpush.bf16.msrb.mxu3 %v9132_v53  ;;  %v10187_v51 = vld [vmem:[%s11594_s28 + $0xb78] sm:$0xf]  ;;  %v3678_v46 = vperm.slane %v897_v38, 3 }
 0x419   : > { %v7750_v42 = vrot.slane %v6286_v50, 2  ;;  %6777 = vmatpush.bf16.msrb.mxu1 %v9124_v57  ;;  %6816 = vmatpush.bf16.msra.mxu0 %v9136_v56  ;;  %v11077_v53 = vld [vmem:[%s11594_s28 + $0xf74] sm:$0xf0]  ;;  %v10949_v57 = vld [vmem:[%s11594_s28 + $0xb7c] sm:$0xf] }
 0x41a   : > { %v7979_v0 = vsel %vm7828_vm4, %v7748_v52, %v7749_v61  ;;  %v10189_v56 = vld [vmem:[%s11594_s28 + $0xf78] sm:$0xf0]  ;;  %v3680_v52 = vperm.slane %v897_v38, 5  ;;  %v10184_v61 = vor.u32 %v10948_v45, %v10181_v47  ;;  %v10188_v37 = vor.u32 %v11077_v53, %v10187_v51  ;;  %v11079_v47 = vld [vmem:[%s11594_s28 + $0xf84] sm:$0xf0] }
 0x41b   : > { %v7980_v2 = vsel %vm7830_vm5, %v7750_v42, %v7751_v63  ;;  %v10180_v42 = vor.u32 %v11076_v44, %v10179_v54  ;;  %v11078_v51 = vld [vmem:[%s11594_s28 + $0xf7c] sm:$0xf0]  ;;  %v10951_v54 = vld [vmem:[%s11594_s28 + $0xb8c] sm:$0xf] }
 0x41c   : > { %v7981_v4 = vsel %vm7832_vm6, %v7979_v0, %v7980_v2  ;;  %v10192_v0 = vor.u32 %v10949_v57, %v10189_v56  ;;  %v9163_v2 = vld [vmem:[%s11594_s28 + $0x378] sm:$0xf] }
 0x41d   : > { %v7982_v11 = vsel %vm7834_vm7, %v7978_v3, %v7981_v4  ;;  %v6274_v13 = vpop.f32.mrf.mxu2  ;;  %v10821_v3 = vld [vmem:[%s11594_s28 + $0x774] sm:$0xf0]  ;;  %v9155_v4 = vld [vmem:[%s11594_s28 + $0x370] sm:$0xf] }
 0x41e   : > { %8106 = vst [vmem:[%s11901_s6 + $0xa8] sm:$0xff] %v7982_v11  ;;  %v6287_v5 = vpop.f32.mrf.mxu3  ;;  %v3675_v11 = vperm.slane %v897_v38, 0  ;;  %v9164_v22 = vor.u32 %v10821_v3, %v9163_v2  ;;  %v9156_v26 = vor.u32 %v10820_v7, %v9155_v4  ;;  %v10197_v38 = vld [vmem:[%s11594_s28 + $0xf80] sm:$0xf0] }
 0x41f   : > { %v13230_v12 = vpop.f32.mrf.mxu1  ;;  %v9160_v5 = vor.u32 %v10692_v62, %v9157_v40  ;;  %v10695_v62 = vld [vmem:[%s11594_s28 + $0x38c] sm:$0xf] }
 0x420   : > { %v13232_v25 = vpop.f32.mrf.mxu0  ;;  %v9181_v40 = vld [vmem:[%s11594_s28 + $0x788] sm:$0xf0] }
 0x421   : > { %v6351_v13 = vadd.f32 %v13232_v25, %v3678_v46  ;;  %v9168_v25 = vor.u32 %v10693_v6, %v9165_v9  ;;  %v9184_v3 = vor.u32 %v10695_v62, %v9181_v40  ;;  %v898_v9 = vld [vmem:[%s11858_s1 + $0xb8] sm:$0xff] }
 0x422   : > { %10529 = vmatmul.msk.bf16.vlgmr.msra.gmra.mxu1 %vm337_vm0, %v11641_v1  ;;  %10530 = vmatmul.msk.bf16.vlgmr.msra.gmra.mxu2 %vm337_vm0, %v11641_v1 }
 0x423   : > { %10531 = vmatmul.msk.bf16.vlgmr.msra.gmra.mxu3 %vm337_vm0, %v11641_v1  ;;  %10532 = vmatmul.msk.bf16.vlgmr.msrb.gmra.mxu0 %vm337_vm0, %v11641_v1  ;;  %v7754_v28 = vrot.slane %v6351_v13, 5  ;;  %v3685_v13 = vperm.slane %v898_v9, 2 }
 0x424   : > { %6841 = vmatpush.bf16.msra.mxu2 %v10168_v24  ;;  %6854 = vmatpush.bf16.msra.mxu3 %v10172_v14 }
 0x425   : > { %v6324_v32 = vpop.f32.mrf.mxu2  ;;  %6828 = vmatpush.bf16.msra.mxu1 %v10164_v27  ;;  %6867 = vmatpush.bf16.msrb.mxu0 %v10176_v18  ;;  %v6312_v18 = vadd.f32 %v13230_v12, %v3675_v11  ;;  %v3684_v11 = vperm.slane %v898_v9, 1 }
 0x426   : > { %v6337_v35 = vpop.f32.mrf.mxu3  ;;  %v6325_v50 = vadd.f32 %v6324_v32, %v3676_v41  ;;  %v10203_v41 = vld [vmem:[%s11594_s28 + $0xb88] sm:$0xf] }
 0x427   : > { %v6313_v36 = vpop.f32.mrf.mxu1  ;;  %v6338_v63 = vadd.f32 %v6337_v35, %v3677_v43  ;;  %v10204_v46 = vor.u32 %v11079_v47, %v10203_v41  ;;  %v9197_v41 = vld [vmem:[%s11594_s28 + $0x798] sm:$0xf0]  ;;  %v3689_v47 = vperm.slane %v898_v9, 6 }
 0x428   : > { %v6352_v39 = vpop.f32.mrf.mxu0  ;;  %6842 = vmatpush.bf16.msra.mxu2 %v9144_v31  ;;  %6855 = vmatpush.bf16.msra.mxu3 %v9148_v10  ;;  %v7752_v17 = vrot.slane %v6325_v50, 7 }
 0x429   : > { %6829 = vmatpush.bf16.msra.mxu1 %v9140_v33  ;;  %6868 = vmatpush.bf16.msrb.mxu0 %v9152_v34  ;;  %v7753_v23 = vrot.slane %v6338_v63, 6  ;;  %v10950_v39 = vld [vmem:[%s11594_s28 + $0xb84] sm:$0xf] }
 0x42a   : > { %v7983_v31 = vsel %vm7822_vm1, %v6312_v18, %v7752_v17  ;;  %v10200_v56 = vor.u32 %v10950_v39, %v10197_v38  ;;  %v10213_v17 = vld [vmem:[%s11594_s28 + $0xf90] sm:$0xf0]  ;;  %v10824_v39 = vld [vmem:[%s11594_s28 + $0x78c] sm:$0xf0]  ;;  %v10697_v38 = vld [vmem:[%s11594_s28 + $0x39c] sm:$0xf] }
 0x42b   : > { %v7984_v10 = vsel %vm7824_vm2, %v7753_v23, %v7754_v28  ;;  %v10211_v23 = vld [vmem:[%s11594_s28 + $0xb90] sm:$0xf]  ;;  %v3690_v28 = vperm.slane %v898_v9, 7 }
 0x42c   : > { %v7985_v35 = vsel %vm7826_vm3, %v7983_v31, %v7984_v10  ;;  %v10696_v31 = vld [vmem:[%s11594_s28 + $0x394] sm:$0xf] }
 0x42d   : > { %v6326_v49 = vpop.f32.mrf.mxu2  ;;  %v9189_v10 = vld [vmem:[%s11594_s28 + $0x790] sm:$0xf0] }
 0x42e   : > { %v6339_v55 = vpop.f32.mrf.mxu3  ;;  %v10195_v49 = vld [vmem:[%s11594_s28 + $0xb80] sm:$0xf] }
 0x42f   : > { %v6363_v48 = vpop.f32.mrf.mxu1  ;;  %v10205_v55 = vld [vmem:[%s11594_s28 + $0xf88] sm:$0xf0] }
 0x430   : > { %v6402_v60 = vpop.f32.mrf.mxu0  ;;  %v6364_v19 = vadd.f32 %v6363_v48, %v3679_v58  ;;  %v10694_v58 = vld [vmem:[%s11594_s28 + $0x384] sm:$0xf]  ;;  %v10208_v50 = vor.u32 %v10951_v54, %v10205_v55 }
 0x431   : > { %v6403_v24 = vadd.f32 %v6402_v60, %v3682_v59  ;;  %v9173_v48 = vld [vmem:[%s11594_s28 + $0x780] sm:$0xf0]  ;;  %v10196_v59 = vor.u32 %v11078_v51, %v10195_v49  ;;  %v9179_v60 = vld [vmem:[%s11594_s28 + $0x388] sm:$0xf] }
 0x432   : > { %10533 = vmatmul.msk.bf16.vlgmr.msrb.gmra.mxu1 %vm337_vm0, %v11641_v1  ;;  %10534 = vmatmul.msk.bf16.vlgmr.msrb.gmra.mxu2 %vm337_vm0, %v11641_v1  ;;  %v7755_v21 = vrot.slane %v6364_v19, 4  ;;  %v9176_v63 = vor.u32 %v10694_v58, %v9173_v48 }
 0x433   : > { %10535 = vmatmul.msk.bf16.vlgmr.msrb.gmra.mxu3 %vm337_vm0, %v11641_v1  ;;  %10536 = vmatmul.msk.bf16.vlgmr.msra.gmra.mxu0 %vm337_vm0, %v11641_v1  ;;  %v7758_v32 = vrot.slane %v6403_v24, 1 }
 0x434   : > { %6893 = vmatpush.bf16.msrb.mxu2 %v10184_v61  ;;  %6906 = vmatpush.bf16.msrb.mxu3 %v10188_v37  ;;  %v9171_v61 = vld [vmem:[%s11594_s28 + $0x380] sm:$0xf] }
 0x435   : > { %v6376_v14 = vpop.f32.mrf.mxu2  ;;  %6880 = vmatpush.bf16.msrb.mxu1 %v10180_v42  ;;  %6919 = vmatpush.bf16.msra.mxu0 %v10192_v0  ;;  %v10822_v37 = vld [vmem:[%s11594_s28 + $0x77c] sm:$0xf0] }
 0x436   : > { %v6377_v16 = vadd.f32 %v6376_v14, %v3680_v52  ;;  %v6389_v27 = vpop.f32.mrf.mxu3  ;;  %v10823_v52 = vld [vmem:[%s11594_s28 + $0x784] sm:$0xf0]  ;;  %v9172_v2 = vor.u32 %v10822_v37, %v9171_v61  ;;  %v11080_v14 = vld [vmem:[%s11594_s28 + $0xf8c] sm:$0xf0] }
 0x437   : > { %v6390_v20 = vadd.f32 %v6389_v27, %v3681_v15  ;;  %v6365_v29 = vpop.f32.mrf.mxu1  ;;  %v9180_v42 = vor.u32 %v10823_v52, %v9179_v60  ;;  %v10952_v15 = vld [vmem:[%s11594_s28 + $0xb94] sm:$0xf]  ;;  %v3687_v27 = vperm.slane %v898_v9, 4 }
 0x438   : > { %v7756_v30 = vrot.slane %v6377_v16, 3  ;;  %v6404_v8 = vpop.f32.mrf.mxu0  ;;  %6894 = vmatpush.bf16.msrb.mxu2 %v9160_v5  ;;  %6907 = vmatpush.bf16.msrb.mxu3 %v9164_v22  ;;  %v10219_v5 = vld [vmem:[%s11594_s28 + $0xb98] sm:$0xf]  ;;  %v3686_v16 = vperm.slane %v898_v9, 3 }
 0x439   : > { %v7757_v12 = vrot.slane %v6390_v20, 2  ;;  %6881 = vmatpush.bf16.msrb.mxu1 %v9156_v26  ;;  %6920 = vmatpush.bf16.msra.mxu0 %v9168_v25  ;;  %v11081_v22 = vld [vmem:[%s11594_s28 + $0xf94] sm:$0xf0]  ;;  %v10953_v26 = vld [vmem:[%s11594_s28 + $0xb9c] sm:$0xf] }
 0x43a   : > { %v7986_v33 = vsel %vm7828_vm4, %v7755_v21, %v7756_v30  ;;  %v10221_v25 = vld [vmem:[%s11594_s28 + $0xf98] sm:$0xf0]  ;;  %v3688_v21 = vperm.slane %v898_v9, 5  ;;  %v10216_v30 = vor.u32 %v10952_v15, %v10213_v17  ;;  %v10220_v8 = vor.u32 %v11081_v22, %v10219_v5  ;;  %v11083_v17 = vld [vmem:[%s11594_s28 + $0xfa4] sm:$0xf0] }
 0x43b   : > { %v7987_v34 = vsel %vm7830_vm5, %v7757_v12, %v7758_v32  ;;  %v10212_v12 = vor.u32 %v11080_v14, %v10211_v23  ;;  %v11082_v5 = vld [vmem:[%s11594_s28 + $0xf9c] sm:$0xf0]  ;;  %v10955_v23 = vld [vmem:[%s11594_s28 + $0xbac] sm:$0xf] }
 0x43c   : > { %v7988_v36 = vsel %vm7832_vm6, %v7986_v33, %v7987_v34  ;;  %v10224_v33 = vor.u32 %v10953_v26, %v10221_v25  ;;  %v9195_v34 = vld [vmem:[%s11594_s28 + $0x398] sm:$0xf] }
 0x43d   : > { %v7989_v43 = vsel %vm7834_vm7, %v7985_v35, %v7988_v36  ;;  %v6378_v45 = vpop.f32.mrf.mxu2  ;;  %v10825_v35 = vld [vmem:[%s11594_s28 + $0x794] sm:$0xf0]  ;;  %v9187_v36 = vld [vmem:[%s11594_s28 + $0x390] sm:$0xf] }
 0x43e   : > { %8107 = vst [vmem:[%s11901_s6 + $0xb0] sm:$0xff] %v7989_v43  ;;  %v6391_v53 = vpop.f32.mrf.mxu3  ;;  %v3683_v43 = vperm.slane %v898_v9, 0  ;;  %v9196_v54 = vor.u32 %v10825_v35, %v9195_v34  ;;  %v9188_v58 = vor.u32 %v10824_v39, %v9187_v36  ;;  %v10229_v9 = vld [vmem:[%s11594_s28 + $0xfa0] sm:$0xf0] }
 0x43f   : > { %v13293_v44 = vpop.f32.mrf.mxu1  ;;  %v9192_v53 = vor.u32 %v10696_v31, %v9189_v10  ;;  %v10699_v31 = vld [vmem:[%s11594_s28 + $0x3ac] sm:$0xf] }
 0x440   : > { %v13295_v57 = vpop.f32.mrf.mxu0  ;;  %v9213_v10 = vld [vmem:[%s11594_s28 + $0x7a8] sm:$0xf0] }
 0x441   : > { %v6455_v45 = vadd.f32 %v13295_v57, %v3686_v16  ;;  %v9200_v57 = vor.u32 %v10697_v38, %v9197_v41  ;;  %v9216_v35 = vor.u32 %v10699_v31, %v9213_v10  ;;  %v899_v41 = vld [vmem:[%s11858_s1 + $0xc0] sm:$0xff] }
 0x442   : > { %10537 = vmatmul.msk.bf16.vlgmr.msra.gmra.mxu1 %vm337_vm0, %v11641_v1  ;;  %10538 = vmatmul.msk.bf16.vlgmr.msra.gmra.mxu2 %vm337_vm0, %v11641_v1 }
 0x443   : > { %10539 = vmatmul.msk.bf16.vlgmr.msra.gmra.mxu3 %vm337_vm0, %v11641_v1  ;;  %10540 = vmatmul.msk.bf16.vlgmr.msrb.gmra.mxu0 %vm337_vm0, %v11641_v1  ;;  %v7761_v60 = vrot.slane %v6455_v45, 5  ;;  %v3693_v45 = vperm.slane %v899_v41, 2 }
 0x444   : > { %6945 = vmatpush.bf16.msra.mxu2 %v10200_v56  ;;  %6958 = vmatpush.bf16.msra.mxu3 %v10204_v46 }
 0x445   : > { %v6428_v0 = vpop.f32.mrf.mxu2  ;;  %6932 = vmatpush.bf16.msra.mxu1 %v10196_v59  ;;  %6971 = vmatpush.bf16.msrb.mxu0 %v10208_v50  ;;  %v6416_v50 = vadd.f32 %v13293_v44, %v3683_v43  ;;  %v3692_v43 = vperm.slane %v899_v41, 1 }
 0x446   : > { %v6441_v4 = vpop.f32.mrf.mxu3  ;;  %v6429_v20 = vadd.f32 %v6428_v0, %v3684_v11  ;;  %v10235_v11 = vld [vmem:[%s11594_s28 + $0xba8] sm:$0xf] }
 0x447   : > { %v6417_v7 = vpop.f32.mrf.mxu1  ;;  %v6442_v32 = vadd.f32 %v6441_v4, %v3685_v13  ;;  %v10236_v16 = vor.u32 %v11083_v17, %v10235_v11  ;;  %v9229_v11 = vld [vmem:[%s11594_s28 + $0x7b8] sm:$0xf0]  ;;  %v3697_v17 = vperm.slane %v899_v41, 6 }
 0x448   : > { %v6456_v6 = vpop.f32.mrf.mxu0  ;;  %6946 = vmatpush.bf16.msra.mxu2 %v9176_v63  ;;  %6959 = vmatpush.bf16.msra.mxu3 %v9180_v42  ;;  %v7759_v49 = vrot.slane %v6429_v20, 7 }
 0x449   : > { %6933 = vmatpush.bf16.msra.mxu1 %v9172_v2  ;;  %6972 = vmatpush.bf16.msrb.mxu0 %v9184_v3  ;;  %v7760_v55 = vrot.slane %v6442_v32, 6  ;;  %v10954_v6 = vld [vmem:[%s11594_s28 + $0xba4] sm:$0xf] }
 0x44a   : > { %v7990_v63 = vsel %vm7822_vm1, %v6416_v50, %v7759_v49  ;;  %v10232_v25 = vor.u32 %v10954_v6, %v10229_v9  ;;  %v10245_v49 = vld [vmem:[%s11594_s28 + $0xfb0] sm:$0xf0]  ;;  %v10828_v6 = vld [vmem:[%s11594_s28 + $0x7ac] sm:$0xf0]  ;;  %v10701_v9 = vld [vmem:[%s11594_s28 + $0x3bc] sm:$0xf] }
 0x44b   : > { %v7991_v42 = vsel %vm7824_vm2, %v7760_v55, %v7761_v60  ;;  %v10243_v55 = vld [vmem:[%s11594_s28 + $0xbb0] sm:$0xf]  ;;  %v3698_v60 = vperm.slane %v899_v41, 7 }
 0x44c   : > { %v7992_v4 = vsel %vm7826_vm3, %v7990_v63, %v7991_v42  ;;  %v10700_v63 = vld [vmem:[%s11594_s28 + $0x3b4] sm:$0xf] }
 0x44d   : > { %v6430_v19 = vpop.f32.mrf.mxu2  ;;  %v9221_v42 = vld [vmem:[%s11594_s28 + $0x7b0] sm:$0xf0] }
 0x44e   : > { %v6443_v24 = vpop.f32.mrf.mxu3  ;;  %v10227_v19 = vld [vmem:[%s11594_s28 + $0xba0] sm:$0xf] }
 0x44f   : > { %v6467_v18 = vpop.f32.mrf.mxu1  ;;  %v10237_v24 = vld [vmem:[%s11594_s28 + $0xfa8] sm:$0xf0] }
 0x450   : > { %v6506_v29 = vpop.f32.mrf.mxu0  ;;  %v6468_v51 = vadd.f32 %v6467_v18, %v3687_v27  ;;  %v10698_v27 = vld [vmem:[%s11594_s28 + $0x3a4] sm:$0xf]  ;;  %v10240_v20 = vor.u32 %v10955_v23, %v10237_v24 }
 0x451   : > { %v6507_v56 = vadd.f32 %v6506_v29, %v3690_v28  ;;  %v9205_v18 = vld [vmem:[%s11594_s28 + $0x7a0] sm:$0xf0]  ;;  %v10228_v28 = vor.u32 %v11082_v5, %v10227_v19  ;;  %v9211_v29 = vld [vmem:[%s11594_s28 + $0x3a8] sm:$0xf] }
 0x452   : > { %10541 = vmatmul.msk.bf16.vlgmr.msrb.gmra.mxu1 %vm337_vm0, %v11641_v1  ;;  %10542 = vmatmul.msk.bf16.vlgmr.msrb.gmra.mxu2 %vm337_vm0, %v11641_v1  ;;  %v7762_v37 = vrot.slane %v6468_v51, 4  ;;  %v9208_v32 = vor.u32 %v10698_v27, %v9205_v18 }
 0x453   : > { %10543 = vmatmul.msk.bf16.vlgmr.msrb.gmra.mxu3 %vm337_vm0, %v11641_v1  ;;  %10544 = vmatmul.msk.bf16.vlgmr.msra.gmra.mxu0 %vm337_vm0, %v11641_v1  ;;  %v7765_v0 = vrot.slane %v6507_v56, 1 }
 0x454   : > { %6997 = vmatpush.bf16.msrb.mxu2 %v10216_v30  ;;  %7010 = vmatpush.bf16.msrb.mxu3 %v10220_v8  ;;  %v9203_v30 = vld [vmem:[%s11594_s28 + $0x3a0] sm:$0xf] }
 0x455   : > { %v6480_v46 = vpop.f32.mrf.mxu2  ;;  %6984 = vmatpush.bf16.msrb.mxu1 %v10212_v12  ;;  %7023 = vmatpush.bf16.msra.mxu0 %v10224_v33  ;;  %v10826_v8 = vld [vmem:[%s11594_s28 + $0x79c] sm:$0xf0] }
 0x456   : > { %v6481_v48 = vadd.f32 %v6480_v46, %v3688_v21  ;;  %v6493_v59 = vpop.f32.mrf.mxu3  ;;  %v10827_v21 = vld [vmem:[%s11594_s28 + $0x7a4] sm:$0xf0]  ;;  %v9204_v34 = vor.u32 %v10826_v8, %v9203_v30  ;;  %v11084_v46 = vld [vmem:[%s11594_s28 + $0xfac] sm:$0xf0] }
 0x457   : > { %v6494_v52 = vadd.f32 %v6493_v59, %v3689_v47  ;;  %v6469_v61 = vpop.f32.mrf.mxu1  ;;  %v9212_v12 = vor.u32 %v10827_v21, %v9211_v29  ;;  %v10956_v47 = vld [vmem:[%s11594_s28 + $0xbb4] sm:$0xf]  ;;  %v3695_v59 = vperm.slane %v899_v41, 4 }
 0x458   : > { %v7763_v62 = vrot.slane %v6481_v48, 3  ;;  %v6508_v40 = vpop.f32.mrf.mxu0  ;;  %6998 = vmatpush.bf16.msrb.mxu2 %v9192_v53  ;;  %7011 = vmatpush.bf16.msrb.mxu3 %v9196_v54  ;;  %v10251_v53 = vld [vmem:[%s11594_s28 + $0xbb8] sm:$0xf]  ;;  %v3694_v48 = vperm.slane %v899_v41, 3 }
 0x459   : > { %v7764_v44 = vrot.slane %v6494_v52, 2  ;;  %6985 = vmatpush.bf16.msrb.mxu1 %v9188_v58  ;;  %7024 = vmatpush.bf16.msra.mxu0 %v9200_v57  ;;  %v11085_v54 = vld [vmem:[%s11594_s28 + $0xfb4] sm:$0xf0]  ;;  %v10957_v58 = vld [vmem:[%s11594_s28 + $0xbbc] sm:$0xf] }
 0x45a   : > { %v7993_v2 = vsel %vm7828_vm4, %v7762_v37, %v7763_v62  ;;  %v10253_v57 = vld [vmem:[%s11594_s28 + $0xfb8] sm:$0xf0]  ;;  %v3696_v37 = vperm.slane %v899_v41, 5  ;;  %v10248_v62 = vor.u32 %v10956_v47, %v10245_v49  ;;  %v10252_v40 = vor.u32 %v11085_v54, %v10251_v53  ;;  %v11087_v49 = vld [vmem:[%s11594_s28 + $0xfc4] sm:$0xf0] }
 0x45b   : > { %v7994_v3 = vsel %vm7830_vm5, %v7764_v44, %v7765_v0  ;;  %v10244_v44 = vor.u32 %v11084_v46, %v10243_v55  ;;  %v11086_v53 = vld [vmem:[%s11594_s28 + $0xfbc] sm:$0xf0]  ;;  %v10959_v55 = vld [vmem:[%s11594_s28 + $0xbcc] sm:$0xf] }
 0x45c   : > { %v7995_v7 = vsel %vm7832_vm6, %v7993_v2, %v7994_v3  ;;  %v10256_v2 = vor.u32 %v10957_v58, %v10253_v57  ;;  %v9227_v3 = vld [vmem:[%s11594_s28 + $0x3b8] sm:$0xf] }
 0x45d   : > { %v7996_v13 = vsel %vm7834_vm7, %v7992_v4, %v7995_v7  ;;  %v6482_v15 = vpop.f32.mrf.mxu2  ;;  %v10829_v4 = vld [vmem:[%s11594_s28 + $0x7b4] sm:$0xf0]  ;;  %v9219_v7 = vld [vmem:[%s11594_s28 + $0x3b0] sm:$0xf] }
 0x45e   : > { %8108 = vst [vmem:[%s11901_s6 + $0xb8] sm:$0xff] %v7996_v13  ;;  %v6495_v22 = vpop.f32.mrf.mxu3  ;;  %v3691_v13 = vperm.slane %v899_v41, 0  ;;  %v9228_v23 = vor.u32 %v10829_v4, %v9227_v3  ;;  %v9220_v27 = vor.u32 %v10828_v6, %v9219_v7  ;;  %v10261_v41 = vld [vmem:[%s11594_s28 + $0xfc0] sm:$0xf0] }
 0x45f   : > { %v13356_v14 = vpop.f32.mrf.mxu1  ;;  %v9224_v22 = vor.u32 %v10700_v63, %v9221_v42  ;;  %v10703_v63 = vld [vmem:[%s11594_s28 + $0x3cc] sm:$0xf] }
 0x460   : > { %v13358_v26 = vpop.f32.mrf.mxu0  ;;  %v9245_v42 = vld [vmem:[%s11594_s28 + $0x7c8] sm:$0xf0] }
 0x461   : > { %v6559_v15 = vadd.f32 %v13358_v26, %v3694_v48  ;;  %v9232_v26 = vor.u32 %v10701_v9, %v9229_v11  ;;  %v9248_v4 = vor.u32 %v10703_v63, %v9245_v42  ;;  %v900_v11 = vld [vmem:[%s11858_s1 + $0xc8] sm:$0xff] }
 0x462   : > { %10545 = vmatmul.msk.bf16.vlgmr.msra.gmra.mxu1 %vm337_vm0, %v11641_v1  ;;  %10546 = vmatmul.msk.bf16.vlgmr.msra.gmra.mxu2 %vm337_vm0, %v11641_v1 }
 0x463   : > { %10547 = vmatmul.msk.bf16.vlgmr.msra.gmra.mxu3 %vm337_vm0, %v11641_v1  ;;  %10548 = vmatmul.msk.bf16.vlgmr.msrb.gmra.mxu0 %vm337_vm0, %v11641_v1  ;;  %v7768_v29 = vrot.slane %v6559_v15, 5  ;;  %v3701_v15 = vperm.slane %v900_v11, 2 }
 0x464   : > { %7049 = vmatpush.bf16.msra.mxu2 %v10232_v25  ;;  %7062 = vmatpush.bf16.msra.mxu3 %v10236_v16 }
 0x465   : > { %v6532_v33 = vpop.f32.mrf.mxu2  ;;  %7036 = vmatpush.bf16.msra.mxu1 %v10228_v28  ;;  %7075 = vmatpush.bf16.msrb.mxu0 %v10240_v20  ;;  %v6520_v20 = vadd.f32 %v13356_v14, %v3691_v13  ;;  %v3700_v13 = vperm.slane %v900_v11, 1 }
 0x466   : > { %v6545_v36 = vpop.f32.mrf.mxu3  ;;  %v6533_v52 = vadd.f32 %v6532_v33, %v3692_v43  ;;  %v10267_v43 = vld [vmem:[%s11594_s28 + $0xbc8] sm:$0xf] }
 0x467   : > { %v6521_v39 = vpop.f32.mrf.mxu1  ;;  %v6546_v0 = vadd.f32 %v6545_v36, %v3693_v45  ;;  %v10268_v48 = vor.u32 %v11087_v49, %v10267_v43  ;;  %v9261_v43 = vld [vmem:[%s11594_s28 + $0x7d8] sm:$0xf0]  ;;  %v3705_v49 = vperm.slane %v900_v11, 6 }
 0x468   : > { %v6560_v38 = vpop.f32.mrf.mxu0  ;;  %7050 = vmatpush.bf16.msra.mxu2 %v9208_v32  ;;  %7063 = vmatpush.bf16.msra.mxu3 %v9212_v12  ;;  %v7766_v19 = vrot.slane %v6533_v52, 7 }
 0x469   : > { %7037 = vmatpush.bf16.msra.mxu1 %v9204_v34  ;;  %7076 = vmatpush.bf16.msrb.mxu0 %v9216_v35  ;;  %v7767_v24 = vrot.slane %v6546_v0, 6  ;;  %v10958_v38 = vld [vmem:[%s11594_s28 + $0xbc4] sm:$0xf] }
 0x46a   : > { %v7997_v32 = vsel %vm7822_vm1, %v6520_v20, %v7766_v19  ;;  %v10264_v57 = vor.u32 %v10958_v38, %v10261_v41  ;;  %v10277_v19 = vld [vmem:[%s11594_s28 + $0xfd0] sm:$0xf0]  ;;  %v10832_v38 = vld [vmem:[%s11594_s28 + $0x7cc] sm:$0xf0]  ;;  %v10705_v41 = vld [vmem:[%s11594_s28 + $0x3dc] sm:$0xf] }
 0x46b   : > { %v7998_v12 = vsel %vm7824_vm2, %v7767_v24, %v7768_v29  ;;  %v10275_v24 = vld [vmem:[%s11594_s28 + $0xbd0] sm:$0xf]  ;;  %v3706_v29 = vperm.slane %v900_v11, 7 }
 0x46c   : > { %v7999_v36 = vsel %vm7826_vm3, %v7997_v32, %v7998_v12  ;;  %v10704_v32 = vld [vmem:[%s11594_s28 + $0x3d4] sm:$0xf] }
 0x46d   : > { %v6534_v51 = vpop.f32.mrf.mxu2  ;;  %v9253_v12 = vld [vmem:[%s11594_s28 + $0x7d0] sm:$0xf0] }
 0x46e   : > { %v6547_v56 = vpop.f32.mrf.mxu3  ;;  %v10259_v51 = vld [vmem:[%s11594_s28 + $0xbc0] sm:$0xf] }
 0x46f   : > { %v6571_v50 = vpop.f32.mrf.mxu1  ;;  %v10269_v56 = vld [vmem:[%s11594_s28 + $0xfc8] sm:$0xf0] }
 0x470   : > { %v6610_v61 = vpop.f32.mrf.mxu0  ;;  %v6572_v5 = vadd.f32 %v6571_v50, %v3695_v59  ;;  %v10702_v59 = vld [vmem:[%s11594_s28 + $0x3c4] sm:$0xf]  ;;  %v10272_v52 = vor.u32 %v10959_v55, %v10269_v56 }
 0x471   : > { %v6611_v25 = vadd.f32 %v6610_v61, %v3698_v60  ;;  %v9237_v50 = vld [vmem:[%s11594_s28 + $0x7c0] sm:$0xf0]  ;;  %v10260_v60 = vor.u32 %v11086_v53, %v10259_v51  ;;  %v9243_v61 = vld [vmem:[%s11594_s28 + $0x3c8] sm:$0xf] }
 0x472   : > { %10549 = vmatmul.msk.bf16.vlgmr.msrb.gmra.mxu1 %vm337_vm0, %v11641_v1  ;;  %10550 = vmatmul.msk.bf16.vlgmr.msrb.gmra.mxu2 %vm337_vm0, %v11641_v1  ;;  %v7769_v8 = vrot.slane %v6572_v5, 4  ;;  %v9240_v0 = vor.u32 %v10702_v59, %v9237_v50 }
 0x473   : > { %10551 = vmatmul.msk.bf16.vlgmr.msrb.gmra.mxu3 %vm337_vm0, %v11641_v1  ;;  %10552 = vmatmul.msk.bf16.vlgmr.msra.gmra.mxu0 %vm337_vm0, %v11641_v1  ;;  %v7772_v33 = vrot.slane %v6611_v25, 1 }
 0x474   : > { %7101 = vmatpush.bf16.msrb.mxu2 %v10248_v62  ;;  %7114 = vmatpush.bf16.msrb.mxu3 %v10252_v40  ;;  %v9235_v62 = vld [vmem:[%s11594_s28 + $0x3c0] sm:$0xf] }
 0x475   : > { %v6584_v16 = vpop.f32.mrf.mxu2  ;;  %7088 = vmatpush.bf16.msrb.mxu1 %v10244_v44  ;;  %7127 = vmatpush.bf16.msra.mxu0 %v10256_v2  ;;  %v10830_v40 = vld [vmem:[%s11594_s28 + $0x7bc] sm:$0xf0] }
 0x476   : > { %v6585_v18 = vadd.f32 %v6584_v16, %v3696_v37  ;;  %v6597_v28 = vpop.f32.mrf.mxu3  ;;  %v10831_v37 = vld [vmem:[%s11594_s28 + $0x7c4] sm:$0xf0]  ;;  %v9236_v3 = vor.u32 %v10830_v40, %v9235_v62  ;;  %v11088_v16 = vld [vmem:[%s11594_s28 + $0xfcc] sm:$0xf0] }
 0x477   : > { %v6598_v21 = vadd.f32 %v6597_v28, %v3697_v17  ;;  %v6573_v30 = vpop.f32.mrf.mxu1  ;;  %v9244_v44 = vor.u32 %v10831_v37, %v9243_v61  ;;  %v10960_v17 = vld [vmem:[%s11594_s28 + $0xbd4] sm:$0xf]  ;;  %v3703_v28 = vperm.slane %v900_v11, 4 }
 0x478   : > { %v7770_v31 = vrot.slane %v6585_v18, 3  ;;  %v6612_v10 = vpop.f32.mrf.mxu0  ;;  %7102 = vmatpush.bf16.msrb.mxu2 %v9224_v22  ;;  %7115 = vmatpush.bf16.msrb.mxu3 %v9228_v23  ;;  %v10283_v22 = vld [vmem:[%s11594_s28 + $0xbd8] sm:$0xf]  ;;  %v3702_v18 = vperm.slane %v900_v11, 3 }
 0x479   : > { %v7771_v14 = vrot.slane %v6598_v21, 2  ;;  %7089 = vmatpush.bf16.msrb.mxu1 %v9220_v27  ;;  %7128 = vmatpush.bf16.msra.mxu0 %v9232_v26  ;;  %v11089_v23 = vld [vmem:[%s11594_s28 + $0xfd4] sm:$0xf0]  ;;  %v10961_v27 = vld [vmem:[%s11594_s28 + $0xbdc] sm:$0xf] }
 0x47a   : > { %v8000_v34 = vsel %vm7828_vm4, %v7769_v8, %v7770_v31  ;;  %v10285_v26 = vld [vmem:[%s11594_s28 + $0xfd8] sm:$0xf0]  ;;  %v3704_v8 = vperm.slane %v900_v11, 5  ;;  %v10280_v31 = vor.u32 %v10960_v17, %v10277_v19  ;;  %v10284_v10 = vor.u32 %v11089_v23, %v10283_v22  ;;  %v11091_v19 = vld [vmem:[%s11594_s28 + $0xfe4] sm:$0xf0] }
 0x47b   : > { %v8001_v35 = vsel %vm7830_vm5, %v7771_v14, %v7772_v33  ;;  %v10276_v14 = vor.u32 %v11088_v16, %v10275_v24  ;;  %v11090_v22 = vld [vmem:[%s11594_s28 + $0xfdc] sm:$0xf0]  ;;  %v10963_v24 = vld [vmem:[%s11594_s28 + $0xbec] sm:$0xf] }
 0x47c   : > { %v8002_v39 = vsel %vm7832_vm6, %v8000_v34, %v8001_v35  ;;  %v10288_v34 = vor.u32 %v10961_v27, %v10285_v26  ;;  %v9259_v35 = vld [vmem:[%s11594_s28 + $0x3d8] sm:$0xf] }
 0x47d   : > { %v8003_v45 = vsel %vm7834_vm7, %v7999_v36, %v8002_v39  ;;  %v6586_v47 = vpop.f32.mrf.mxu2  ;;  %v10833_v36 = vld [vmem:[%s11594_s28 + $0x7d4] sm:$0xf0]  ;;  %v9251_v39 = vld [vmem:[%s11594_s28 + $0x3d0] sm:$0xf] }
 0x47e   : > { %8109 = vst [vmem:[%s11901_s6 + $0xc0] sm:$0xff] %v8003_v45  ;;  %v6599_v54 = vpop.f32.mrf.mxu3  ;;  %v3699_v45 = vperm.slane %v900_v11, 0  ;;  %v9260_v55 = vor.u32 %v10833_v36, %v9259_v35  ;;  %v9252_v59 = vor.u32 %v10832_v38, %v9251_v39  ;;  %v10293_v11 = vld [vmem:[%s11594_s28 + $0xfe0] sm:$0xf0] }
 0x47f   : > { %v13419_v46 = vpop.f32.mrf.mxu1  ;;  %v9256_v54 = vor.u32 %v10704_v32, %v9253_v12  ;;  %v10707_v32 = vld [vmem:[%s11594_s28 + $0x3ec] sm:$0xf] }
 0x480   : > { %v13421_v58 = vpop.f32.mrf.mxu0  ;;  %v9277_v12 = vld [vmem:[%s11594_s28 + $0x7e8] sm:$0xf0] }
 0x481   : > { %v6663_v47 = vadd.f32 %v13421_v58, %v3702_v18  ;;  %v9264_v58 = vor.u32 %v10705_v41, %v9261_v43  ;;  %v9280_v36 = vor.u32 %v10707_v32, %v9277_v12  ;;  %v901_v43 = vld [vmem:[%s11858_s1 + $0xd0] sm:$0xff] }
 0x482   : > { %10553 = vmatmul.msk.bf16.vlgmr.msra.gmra.mxu1 %vm337_vm0, %v11641_v1  ;;  %10554 = vmatmul.msk.bf16.vlgmr.msra.gmra.mxu2 %vm337_vm0, %v11641_v1 }
 0x483   : > { %10555 = vmatmul.msk.bf16.vlgmr.msra.gmra.mxu3 %vm337_vm0, %v11641_v1  ;;  %10556 = vmatmul.msk.bf16.vlgmr.msrb.gmra.mxu0 %vm337_vm0, %v11641_v1  ;;  %v7775_v61 = vrot.slane %v6663_v47, 5  ;;  %v3709_v47 = vperm.slane %v901_v43, 2 }
 0x484   : > { %7153 = vmatpush.bf16.msra.mxu2 %v10264_v57  ;;  %7166 = vmatpush.bf16.msra.mxu3 %v10268_v48 }
 0x485   : > { %v6636_v2 = vpop.f32.mrf.mxu2  ;;  %7140 = vmatpush.bf16.msra.mxu1 %v10260_v60  ;;  %7179 = vmatpush.bf16.msrb.mxu0 %v10272_v52  ;;  %v6624_v52 = vadd.f32 %v13419_v46, %v3699_v45  ;;  %v3708_v45 = vperm.slane %v901_v43, 1 }
 0x486   : > { %v6649_v7 = vpop.f32.mrf.mxu3  ;;  %v6637_v21 = vadd.f32 %v6636_v2, %v3700_v13  ;;  %v10299_v13 = vld [vmem:[%s11594_s28 + $0xbe8] sm:$0xf] }
 0x487   : > { %v6625_v6 = vpop.f32.mrf.mxu1  ;;  %v6650_v33 = vadd.f32 %v6649_v7, %v3701_v15  ;;  %v10300_v18 = vor.u32 %v11091_v19, %v10299_v13  ;;  %v9293_v13 = vld [vmem:[%s11594_s28 + $0x7f8] sm:$0xf0]  ;;  %v3713_v19 = vperm.slane %v901_v43, 6 }
 0x488   : > { %v6664_v9 = vpop.f32.mrf.mxu0  ;;  %7154 = vmatpush.bf16.msra.mxu2 %v9240_v0  ;;  %7167 = vmatpush.bf16.msra.mxu3 %v9244_v44  ;;  %v7773_v51 = vrot.slane %v6637_v21, 7 }
 0x489   : > { %7141 = vmatpush.bf16.msra.mxu1 %v9236_v3  ;;  %7180 = vmatpush.bf16.msrb.mxu0 %v9248_v4  ;;  %v7774_v56 = vrot.slane %v6650_v33, 6  ;;  %v10962_v9 = vld [vmem:[%s11594_s28 + $0xbe4] sm:$0xf] }
 0x48a   : > { %v8004_v0 = vsel %vm7822_vm1, %v6624_v52, %v7773_v51  ;;  %v10296_v26 = vor.u32 %v10962_v9, %v10293_v11  ;;  %v10309_v51 = vld [vmem:[%s11594_s28 + $0xff0] sm:$0xf0]  ;;  %v10836_v9 = vld [vmem:[%s11594_s28 + $0x7ec] sm:$0xf0]  ;;  %v10709_v11 = vld [vmem:[%s11594_s28 + $0x3fc] sm:$0xf] }
 0x48b   : > { %v8005_v44 = vsel %vm7824_vm2, %v7774_v56, %v7775_v61  ;;  %v10307_v56 = vld [vmem:[%s11594_s28 + $0xbf0] sm:$0xf]  ;;  %v3714_v61 = vperm.slane %v901_v43, 7 }
 0x48c   : > { %v8006_v7 = vsel %vm7826_vm3, %v8004_v0, %v8005_v44  ;;  %v10708_v0 = vld [vmem:[%s11594_s28 + $0x3f4] sm:$0xf] }
 0x48d   : > { %v6638_v5 = vpop.f32.mrf.mxu2  ;;  %v9285_v44 = vld [vmem:[%s11594_s28 + $0x7f0] sm:$0xf0] }
 0x48e   : > { %v6651_v25 = vpop.f32.mrf.mxu3  ;;  %v10291_v5 = vld [vmem:[%s11594_s28 + $0xbe0] sm:$0xf] }
 0x48f   : > { %v6675_v20 = vpop.f32.mrf.mxu1  ;;  %v10301_v25 = vld [vmem:[%s11594_s28 + $0xfe8] sm:$0xf0] }
 0x490   : > { %v6714_v30 = vpop.f32.mrf.mxu0  ;;  %v6676_v53 = vadd.f32 %v6675_v20, %v3703_v28  ;;  %v10706_v28 = vld [vmem:[%s11594_s28 + $0x3e4] sm:$0xf]  ;;  %v10304_v21 = vor.u32 %v10963_v24, %v10301_v25 }
 0x491   : > { %v6715_v57 = vadd.f32 %v6714_v30, %v3706_v29  ;;  %v9269_v20 = vld [vmem:[%s11594_s28 + $0x7e0] sm:$0xf0]  ;;  %v10292_v29 = vor.u32 %v11090_v22, %v10291_v5  ;;  %v9275_v30 = vld [vmem:[%s11594_s28 + $0x3e8] sm:$0xf] }
 0x492   : > { %10557 = vmatmul.msk.bf16.vlgmr.msrb.gmra.mxu1 %vm337_vm0, %v11641_v1  ;;  %10558 = vmatmul.msk.bf16.vlgmr.msrb.gmra.mxu2 %vm337_vm0, %v11641_v1  ;;  %v7776_v40 = vrot.slane %v6676_v53, 4  ;;  %v9272_v33 = vor.u32 %v10706_v28, %v9269_v20 }
 0x493   : > { %10559 = vmatmul.msk.bf16.vlgmr.msrb.gmra.mxu3 %vm337_vm0, %v11641_v1  ;;  %10560 = vmatmul.msk.bf16.vlgmr.msra.gmra.mxu0 %vm337_vm0, %v11641_v1  ;;  %v7779_v2 = vrot.slane %v6715_v57, 1 }
 0x494   : > { %7205 = vmatpush.bf16.msrb.mxu2 %v10280_v31  ;;  %7218 = vmatpush.bf16.msrb.mxu3 %v10284_v10  ;;  %v9267_v31 = vld [vmem:[%s11594_s28 + $0x3e0] sm:$0xf] }
 0x495   : > { %v6688_v48 = vpop.f32.mrf.mxu2  ;;  %7192 = vmatpush.bf16.msrb.mxu1 %v10276_v14  ;;  %7231 = vmatpush.bf16.msra.mxu0 %v10288_v34  ;;  %v10834_v10 = vld [vmem:[%s11594_s28 + $0x7dc] sm:$0xf0] }
 0x496   : > { %v6689_v50 = vadd.f32 %v6688_v48, %v3704_v8  ;;  %v6701_v60 = vpop.f32.mrf.mxu3  ;;  %v10835_v8 = vld [vmem:[%s11594_s28 + $0x7e4] sm:$0xf0]  ;;  %v9268_v35 = vor.u32 %v10834_v10, %v9267_v31  ;;  %v11092_v48 = vld [vmem:[%s11594_s28 + $0xfec] sm:$0xf0] }
 0x497   : > { %v6702_v37 = vadd.f32 %v6701_v60, %v3705_v49  ;;  %v6677_v62 = vpop.f32.mrf.mxu1  ;;  %v9276_v14 = vor.u32 %v10835_v8, %v9275_v30  ;;  %v10964_v49 = vld [vmem:[%s11594_s28 + $0xbf4] sm:$0xf]  ;;  %v3711_v60 = vperm.slane %v901_v43, 4 }
 0x498   : > { %v7777_v63 = vrot.slane %v6689_v50, 3  ;;  %v6716_v42 = vpop.f32.mrf.mxu0  ;;  %7206 = vmatpush.bf16.msrb.mxu2 %v9256_v54  ;;  %7219 = vmatpush.bf16.msrb.mxu3 %v9260_v55  ;;  %v10315_v54 = vld [vmem:[%s11594_s28 + $0xbf8] sm:$0xf]  ;;  %v3710_v50 = vperm.slane %v901_v43, 3 }
 0x499   : > { %v7778_v46 = vrot.slane %v6702_v37, 2  ;;  %7193 = vmatpush.bf16.msrb.mxu1 %v9252_v59  ;;  %7232 = vmatpush.bf16.msra.mxu0 %v9264_v58  ;;  %v11093_v55 = vld [vmem:[%s11594_s28 + $0xff4] sm:$0xf0]  ;;  %v10965_v59 = vld [vmem:[%s11594_s28 + $0xbfc] sm:$0xf] }
 0x49a   : > { %v8007_v3 = vsel %vm7828_vm4, %v7776_v40, %v7777_v63  ;;  %v10317_v58 = vld [vmem:[%s11594_s28 + $0xff8] sm:$0xf0]  ;;  %v3712_v40 = vperm.slane %v901_v43, 5  ;;  %v10312_v63 = vor.u32 %v10964_v49, %v10309_v51  ;;  %v10316_v42 = vor.u32 %v11093_v55, %v10315_v54 }
 0x49b   : > { %v8008_v4 = vsel %vm7830_vm5, %v7778_v46, %v7779_v2  ;;  %v10308_v46 = vor.u32 %v11092_v48, %v10307_v56  ;;  %v902_v56 = vld [vmem:[%s11858_s1 + $0xd8] sm:$0xff] }
 0x49c   : > { %v8009_v6 = vsel %vm7832_vm6, %v8007_v3, %v8008_v4  ;;  %v10320_v3 = vor.u32 %v10965_v59, %v10317_v58  ;;  %v9291_v4 = vld [vmem:[%s11594_s28 + $0x3f8] sm:$0xf]  ;;  %v3717_v48 = vperm.slane %v902_v56, 2 }
 0x49d   : > { %v8010_v15 = vsel %vm7834_vm7, %v8006_v7, %v8009_v6  ;;  %v6690_v17 = vpop.f32.mrf.mxu2  ;;  %v10837_v7 = vld [vmem:[%s11594_s28 + $0x7f4] sm:$0xf0]  ;;  %v9283_v6 = vld [vmem:[%s11594_s28 + $0x3f0] sm:$0xf] }
 0x49e   : > { %8110 = vst [vmem:[%s11901_s6 + $0xc8] sm:$0xff] %v8010_v15  ;;  %v6703_v23 = vpop.f32.mrf.mxu3  ;;  %v3707_v15 = vperm.slane %v901_v43, 0  ;;  %v9292_v24 = vor.u32 %v10837_v7, %v9291_v4  ;;  %v9284_v28 = vor.u32 %v10836_v9, %v9283_v6 }
 0x49f   : > { %v13482_v16 = vpop.f32.mrf.mxu1  ;;  %v9288_v23 = vor.u32 %v10708_v0, %v9285_v44  ;;  %v3721_v44 = vperm.slane %v902_v56, 6 }
 0x4a0   : > { %v13484_v27 = vpop.f32.mrf.mxu0 }
 0x4a1   : > { %v6767_v17 = vadd.f32 %v13484_v27, %v3710_v50  ;;  %v9296_v27 = vor.u32 %v10709_v11, %v9293_v13  ;;  %v3718_v50 = vperm.slane %v902_v56, 3 }
 0x4a2   : > { %10561 = vmatmul.msk.bf16.vlgmr.msra.gmra.mxu1 %vm337_vm0, %v11641_v1  ;;  %10562 = vmatmul.msk.bf16.vlgmr.msra.gmra.mxu2 %vm337_vm0, %v11641_v1 }
 0x4a3   : > { %10563 = vmatmul.msk.bf16.vlgmr.msra.gmra.mxu3 %vm337_vm0, %v11641_v1  ;;  %10564 = vmatmul.msk.bf16.vlgmr.msrb.gmra.mxu0 %vm337_vm0, %v11641_v1  ;;  %v7782_v30 = vrot.slane %v6767_v17, 5 }
 0x4a4   : > { %7257 = vmatpush.bf16.msra.mxu2 %v10296_v26  ;;  %7270 = vmatpush.bf16.msra.mxu3 %v10300_v18 }
 0x4a5   : > { %v6740_v34 = vpop.f32.mrf.mxu2  ;;  %7244 = vmatpush.bf16.msra.mxu1 %v10292_v29  ;;  %7283 = vmatpush.bf16.msrb.mxu0 %v10304_v21  ;;  %v6728_v21 = vadd.f32 %v13482_v16, %v3707_v15 }
 0x4a6   : > { %v6753_v39 = vpop.f32.mrf.mxu3  ;;  %v6741_v37 = vadd.f32 %v6740_v34, %v3708_v45 }
 0x4a7   : > { %v6729_v38 = vpop.f32.mrf.mxu1  ;;  %v6754_v2 = vadd.f32 %v6753_v39, %v3709_v47 }
 0x4a8   : > { %v6768_v41 = vpop.f32.mrf.mxu0  ;;  %7258 = vmatpush.bf16.msra.mxu2 %v9272_v33  ;;  %7271 = vmatpush.bf16.msra.mxu3 %v9276_v14  ;;  %v7780_v5 = vrot.slane %v6741_v37, 7 }
 0x4a9   : > { %7245 = vmatpush.bf16.msra.mxu1 %v9268_v35  ;;  %7284 = vmatpush.bf16.msrb.mxu0 %v9280_v36  ;;  %v7781_v25 = vrot.slane %v6754_v2, 6 }
 0x4aa   : > { %v8011_v33 = vsel %vm7822_vm1, %v6728_v21, %v7780_v5 }
 0x4ab   : > { %v8012_v14 = vsel %vm7824_vm2, %v7781_v25, %v7782_v30 }
 0x4ac   : > { %v8013_v39 = vsel %vm7826_vm3, %v8011_v33, %v8012_v14  ;;  %v903_v33 = vld [vmem:[%s11858_s1 + $0xe0] sm:$0xff] }
 0x4ad   : > { %v6742_v53 = vpop.f32.mrf.mxu2  ;;  %v3724_v14 = vperm.slane %v903_v33, 1 }
 0x4ae   : > { %v6755_v57 = vpop.f32.mrf.mxu3 }
 0x4af   : > { %v6779_v52 = vpop.f32.mrf.mxu1  ;;  %v3716_v57 = vperm.slane %v902_v56, 1 }
 0x4b0   : > { %v6818_v62 = vpop.f32.mrf.mxu0  ;;  %v6780_v22 = vadd.f32 %v6779_v52, %v3711_v60  ;;  %v3719_v52 = vperm.slane %v902_v56, 4 }
 0x4b1   : > { %v6819_v26 = vadd.f32 %v6818_v62, %v3714_v61 }
 0x4b2   : > { %10565 = vmatmul.msk.bf16.vlgmr.msrb.gmra.mxu1 %vm337_vm0, %v11641_v1  ;;  %10566 = vmatmul.msk.bf16.vlgmr.msrb.gmra.mxu2 %vm337_vm0, %v11641_v1  ;;  %v7783_v10 = vrot.slane %v6780_v22, 4 }
 0x4b3   : > { %10567 = vmatmul.msk.bf16.vlgmr.msrb.gmra.mxu3 %vm337_vm0, %v11641_v1  ;;  %10568 = vmatmul.msk.bf16.vlgmr.msra.gmra.mxu0 %vm337_vm0, %v11641_v1  ;;  %v7786_v34 = vrot.slane %v6819_v26, 1 }
 0x4b4   : > { %7309 = vmatpush.bf16.msrb.mxu2 %v10312_v63  ;;  %7322 = vmatpush.bf16.msrb.mxu3 %v10316_v42  ;;  %v3720_v63 = vperm.slane %v902_v56, 5  ;;  %v3715_v42 = vperm.slane %v902_v56, 0 }
 0x4b5   : > { %v6792_v18 = vpop.f32.mrf.mxu2  ;;  %7296 = vmatpush.bf16.msrb.mxu1 %v10308_v46  ;;  %7335 = vmatpush.bf16.msra.mxu0 %v10320_v3 }
 0x4b6   : > { %v6793_v20 = vadd.f32 %v6792_v18, %v3712_v40  ;;  %v6805_v29 = vpop.f32.mrf.mxu3  ;;  %v3722_v40 = vperm.slane %v902_v56, 7 }
 0x4b7   : > { %v6806_v8 = vadd.f32 %v6805_v29, %v3713_v19  ;;  %v6781_v31 = vpop.f32.mrf.mxu1 }
 0x4b8   : > { %v7784_v32 = vrot.slane %v6793_v20, 3  ;;  %v6820_v12 = vpop.f32.mrf.mxu0  ;;  %7310 = vmatpush.bf16.msrb.mxu2 %v9288_v23  ;;  %7323 = vmatpush.bf16.msrb.mxu3 %v9292_v24 }
 0x4b9   : > { %v7785_v35 = vrot.slane %v6806_v8, 2  ;;  %7297 = vmatpush.bf16.msrb.mxu1 %v9284_v28  ;;  %7336 = vmatpush.bf16.msra.mxu0 %v9296_v27 }
 0x4ba   : > { %v8014_v36 = vsel %vm7828_vm4, %v7783_v10, %v7784_v32 }
 0x4bb   : > { %v8015_v16 = vsel %vm7830_vm5, %v7785_v35, %v7786_v34  ;;  %v3725_v34 = vperm.slane %v903_v33, 2 }
 0x4bc   : > { %v8016_v38 = vsel %vm7832_vm6, %v8014_v36, %v8015_v16  ;;  %v3726_v16 = vperm.slane %v903_v33, 3 }
 0x4bd   : > { %v8017_v41 = vsel %vm7834_vm7, %v8013_v39, %v8016_v38  ;;  %v6794_v43 = vpop.f32.mrf.mxu2  ;;  %v3727_v38 = vperm.slane %v903_v33, 4 }
 0x4be   : > { %8111 = vst [vmem:[%s11901_s6 + $0xd0] sm:$0xff] %v8017_v41  ;;  %v6807_v45 = vpop.f32.mrf.mxu3 }
 0x4bf   : > { %v6831_v47 = vpop.f32.mrf.mxu1 }
 0x4c0   : > { %v6870_v49 = vpop.f32.mrf.mxu0  ;;  %v6832_v11 = vadd.f32 %v6831_v47, %v3715_v42  ;;  %v3730_v47 = vperm.slane %v903_v33, 7 }
 0x4c1   : > { %v6871_v0 = vadd.f32 %v6870_v49, %v3718_v50  ;;  %v3728_v49 = vperm.slane %v903_v33, 5 }
 0x4c2   : > { %10569 = vmatmul.msk.bf16.vlgmr.msra.gmra.mxu1 %vm337_vm0, %v11641_v1  ;;  %10570 = vmatmul.msk.bf16.vlgmr.msra.gmra.mxu2 %vm337_vm0, %v11641_v1 }
 0x4c3   : > { %10571 = vmatmul.msk.bf16.vlgmr.msra.gmra.mxu3 %vm337_vm0, %v11641_v1  ;;  %10572 = vmatmul.msk.bf16.vlgmr.msrb.gmra.mxu0 %vm337_vm0, %v11641_v1  ;;  %v7789_v13 = vrot.slane %v6871_v0, 5 }
 0x4c5   : > { %v6844_v51 = vpop.f32.mrf.mxu2 }
 0x4c6   : > { %v6857_v53 = vpop.f32.mrf.mxu3  ;;  %v6845_v37 = vadd.f32 %v6844_v51, %v3716_v57  ;;  %v3723_v51 = vperm.slane %v903_v33, 0 }
 0x4c7   : > { %v6833_v54 = vpop.f32.mrf.mxu1  ;;  %v6858_v62 = vadd.f32 %v6857_v53, %v3717_v48 }
 0x4c8   : > { %v6872_v55 = vpop.f32.mrf.mxu0  ;;  %v7787_v46 = vrot.slane %v6845_v37, 7  ;;  %v3729_v54 = vperm.slane %v903_v33, 6 }
 0x4c9   : > { %v7788_v3 = vrot.slane %v6858_v62, 6 }
 0x4ca   : > { %v8018_v23 = vsel %vm7822_vm1, %v6832_v11, %v7787_v46 }
 0x4cd   : > { %v6846_v59 = vpop.f32.mrf.mxu2 }
 0x4ce   : > { %v6859_v58 = vpop.f32.mrf.mxu3 }
 0x4cf   : > { %v6883_v60 = vpop.f32.mrf.mxu1 }
 0x4d0   : > { %v6922_v61 = vpop.f32.mrf.mxu0  ;;  %v6884_v2 = vadd.f32 %v6883_v60, %v3719_v52 }
 0x4d1   : > { %v6923_v4 = vadd.f32 %v6922_v61, %v3722_v40 }
 0x4d2   : > { %10573 = vmatmul.msk.bf16.vlgmr.msrb.gmra.mxu1 %vm337_vm0, %v11641_v1  ;;  %10574 = vmatmul.msk.bf16.vlgmr.msrb.gmra.mxu2 %vm337_vm0, %v11641_v1  ;;  %v7790_v19 = vrot.slane %v6884_v2, 4 }
 0x4d3   : > { %10575 = vmatmul.msk.bf16.vlgmr.msrb.gmra.mxu3 %vm337_vm0, %v11641_v1  ;;  %10576 = vmatmul.msk.bf16.vlgmr.msra.gmra.mxu0 %vm337_vm0, %v11641_v1  ;;  %v8019_v1 = vsel %vm7824_vm2, %v7788_v3, %v7789_v13  ;;  %v7793_v24 = vrot.slane %v6923_v4, 1 }
 0x4d4   : > { %v8020_v28 = vsel %vm7826_vm3, %v8018_v23, %v8019_v1  ;;  %v904_v23 = vld [vmem:[%s11858_s1 + $0xe8] sm:$0xff] }
 0x4d5   : > { %v6896_v7 = vpop.f32.mrf.mxu2  ;;  %v3732_v1 = vperm.slane %v904_v23, 1 }
 0x4d6   : > { %v6897_v6 = vadd.f32 %v6896_v7, %v3720_v63  ;;  %v6909_v9 = vpop.f32.mrf.mxu3 }
 0x4d7   : > { %v6910_v15 = vadd.f32 %v6909_v9, %v3721_v44  ;;  %v6885_v17 = vpop.f32.mrf.mxu1 }
 0x4d8   : > { %v7791_v5 = vrot.slane %v6897_v6, 3  ;;  %v6924_v22 = vpop.f32.mrf.mxu0 }
 0x4d9   : > { %v7792_v25 = vrot.slane %v6910_v15, 2 }
 0x4da   : > { %v8021_v26 = vsel %vm7828_vm4, %v7790_v19, %v7791_v5 }
 0x4db   : > { %v8022_v18 = vsel %vm7830_vm5, %v7792_v25, %v7793_v24  ;;  %v3733_v24 = vperm.slane %v904_v23, 2 }
 0x4dc   : > { %v8023_v27 = vsel %vm7832_vm6, %v8021_v26, %v8022_v18  ;;  %v3734_v18 = vperm.slane %v904_v23, 3 }
 0x4dd   : > { %v8024_v20 = vsel %vm7834_vm7, %v8020_v28, %v8023_v27  ;;  %v6898_v29 = vpop.f32.mrf.mxu2  ;;  %v3735_v27 = vperm.slane %v904_v23, 4 }
 0x4de   : > { %8112 = vst [vmem:[%s11901_s6 + $0xd8] sm:$0xff] %v8024_v20  ;;  %v6911_v21 = vpop.f32.mrf.mxu3 }
 0x4df   : > { %v6935_v30 = vpop.f32.mrf.mxu1 }
 0x4e0   : > { %v6974_v8 = vpop.f32.mrf.mxu0  ;;  %v6936_v60 = vadd.f32 %v6935_v30, %v3723_v51  ;;  %v3738_v30 = vperm.slane %v904_v23, 7 }
 0x4e1   : > { %v6975_v53 = vadd.f32 %v6974_v8, %v3726_v16  ;;  %v3736_v8 = vperm.slane %v904_v23, 5 }
 0x4e3   : > { %v7796_v52 = vrot.slane %v6975_v53, 5 }
 0x4e5   : > { %v6948_v31 = vpop.f32.mrf.mxu2 }
 0x4e6   : > { %v6961_v10 = vpop.f32.mrf.mxu3  ;;  %v6949_v43 = vadd.f32 %v6948_v31, %v3724_v14  ;;  %v3731_v31 = vperm.slane %v904_v23, 0 }
 0x4e7   : > { %v6937_v32 = vpop.f32.mrf.mxu1  ;;  %v6962_v45 = vadd.f32 %v6961_v10, %v3725_v34 }
 0x4e8   : > { %v6976_v12 = vpop.f32.mrf.mxu0  ;;  %v7794_v56 = vrot.slane %v6949_v43, 7  ;;  %v3737_v32 = vperm.slane %v904_v23, 6 }
 0x4e9   : > { %v7795_v57 = vrot.slane %v6962_v45, 6 }
 0x4ea   : > { %v8025_v42 = vsel %vm7822_vm1, %v6936_v60, %v7794_v56 }
 0x4eb   : > { %v8026_v0 = vsel %vm7824_vm2, %v7795_v57, %v7796_v52 }
 0x4ec   : > { %v8027_v4 = vsel %vm7826_vm3, %v8025_v42, %v8026_v0  ;;  %v905_v42 = vld [vmem:[%s11858_s1 + $0xf0] sm:$0xff] }
 0x4ed   : > { %v6950_v35 = vpop.f32.mrf.mxu2  ;;  %v3740_v0 = vperm.slane %v905_v42, 1 }
 0x4ee   : > { %v6963_v36 = vpop.f32.mrf.mxu3 }
 0x4ef   : > { %v6987_v39 = vpop.f32.mrf.mxu1 }
 0x4f0   : > { %v7026_v41 = vpop.f32.mrf.mxu0  ;;  %v6988_v55 = vadd.f32 %v6987_v39, %v3727_v38 }
 0x4f1   : > { %v7027_v48 = vadd.f32 %v7026_v41, %v3730_v47 }
 0x4f2   : > { %v7797_v62 = vrot.slane %v6988_v55, 4 }
 0x4f3   : > { %v7800_v44 = vrot.slane %v7027_v48, 1 }
 0x4f5   : > { %v7000_v59 = vpop.f32.mrf.mxu2 }
 0x4f6   : > { %v7001_v58 = vadd.f32 %v7000_v59, %v3728_v49  ;;  %v7013_v50 = vpop.f32.mrf.mxu3 }
 0x4f7   : > { %v7014_v61 = vadd.f32 %v7013_v50, %v3729_v54  ;;  %v6989_v37 = vpop.f32.mrf.mxu1 }
 0x4f8   : > { %v7798_v40 = vrot.slane %v7001_v58, 3  ;;  %v7028_v63 = vpop.f32.mrf.mxu0 }
 0x4f9   : > { %v7799_v2 = vrot.slane %v7014_v61, 2 }
 0x4fa   : > { %v8028_v46 = vsel %vm7828_vm4, %v7797_v62, %v7798_v40 }
 0x4fb   : > { %v8029_v3 = vsel %vm7830_vm5, %v7799_v2, %v7800_v44  ;;  %v3741_v44 = vperm.slane %v905_v42, 2 }
 0x4fc   : > { %v8030_v7 = vsel %vm7832_vm6, %v8028_v46, %v8029_v3  ;;  %v3742_v3 = vperm.slane %v905_v42, 3 }
 0x4fd   : > { %v8031_v6 = vsel %vm7834_vm7, %v8027_v4, %v8030_v7  ;;  %v7002_v9 = vpop.f32.mrf.mxu2  ;;  %v3743_v7 = vperm.slane %v905_v42, 4 }
 0x4fe   : > { %8113 = vst [vmem:[%s11901_s6 + $0xe0] sm:$0xff] %v8031_v6  ;;  %v7015_v11 = vpop.f32.mrf.mxu3 }
 0x4ff   : > { %v7039_v13 = vpop.f32.mrf.mxu1 }
 0x500   : > { %v7078_v15 = vpop.f32.mrf.mxu0  ;;  %v7040_v39 = vadd.f32 %v7039_v13, %v3731_v31  ;;  %v3746_v13 = vperm.slane %v905_v42, 7 }
 0x501   : > { %v7079_v10 = vadd.f32 %v7078_v15, %v3734_v18  ;;  %v3744_v15 = vperm.slane %v905_v42, 5 }
 0x503   : > { %v7803_v38 = vrot.slane %v7079_v10, 5 }
 0x505   : > { %v7052_v17 = vpop.f32.mrf.mxu2 }
 0x506   : > { %v7065_v19 = vpop.f32.mrf.mxu3  ;;  %v7053_v29 = vadd.f32 %v7052_v17, %v3732_v1  ;;  %v3739_v17 = vperm.slane %v905_v42, 0 }
 0x507   : > { %v7041_v5 = vpop.f32.mrf.mxu1  ;;  %v7066_v21 = vadd.f32 %v7065_v19, %v3733_v24 }
 0x508   : > { %v7080_v22 = vpop.f32.mrf.mxu0  ;;  %v7801_v33 = vrot.slane %v7053_v29, 7  ;;  %v3745_v5 = vperm.slane %v905_v42, 6 }
 0x509   : > { %v7802_v14 = vrot.slane %v7066_v21, 6 }
 0x50a   : > { %v8032_v51 = vsel %vm7822_vm1, %v7040_v39, %v7801_v33 }
 0x50b   : > { %v8033_v53 = vsel %vm7824_vm2, %v7802_v14, %v7803_v38 }
 0x50c   : > { %v8034_v48 = vsel %vm7826_vm3, %v8032_v51, %v8033_v53  ;;  %v906_v51 = vld [vmem:[%s11858_s1 + $0xf8] sm:$0xff] }
 0x50d   : > { %v7054_v25 = vpop.f32.mrf.mxu2  ;;  %v3748_v53 = vperm.slane %v906_v51, 1 }
 0x50e   : > { %v7067_v26 = vpop.f32.mrf.mxu3 }
 0x50f   : > { %v7091_v28 = vpop.f32.mrf.mxu1 }
 0x510   : > { %v7130_v20 = vpop.f32.mrf.mxu0  ;;  %v7092_v12 = vadd.f32 %v7091_v28, %v3735_v27 }
 0x511   : > { %v7131_v34 = vadd.f32 %v7130_v20, %v3738_v30 }
 0x512   : > { %v7804_v45 = vrot.slane %v7092_v12, 4 }
 0x513   : > { %v7807_v54 = vrot.slane %v7131_v34, 1 }
 0x515   : > { %v7104_v35 = vpop.f32.mrf.mxu2 }
 0x516   : > { %v7105_v36 = vadd.f32 %v7104_v35, %v3736_v8  ;;  %v7117_v16 = vpop.f32.mrf.mxu3 }
 0x517   : > { %v7118_v41 = vadd.f32 %v7117_v16, %v3737_v32  ;;  %v7093_v43 = vpop.f32.mrf.mxu1 }
 0x518   : > { %v7805_v47 = vrot.slane %v7105_v36, 3  ;;  %v7132_v49 = vpop.f32.mrf.mxu0 }
 0x519   : > { %v7806_v55 = vrot.slane %v7118_v41, 2 }
 0x51a   : > { %v8035_v56 = vsel %vm7828_vm4, %v7804_v45, %v7805_v47 }
 0x51b   : > { %v8036_v57 = vsel %vm7830_vm5, %v7806_v55, %v7807_v54  ;;  %v3749_v54 = vperm.slane %v906_v51, 2 }
 0x51c   : > { %v8037_v59 = vsel %vm7832_vm6, %v8035_v56, %v8036_v57  ;;  %v3750_v57 = vperm.slane %v906_v51, 3 }
 0x51d   : > { %v8038_v58 = vsel %vm7834_vm7, %v8034_v48, %v8037_v59  ;;  %v7106_v50 = vpop.f32.mrf.mxu2  ;;  %v3751_v59 = vperm.slane %v906_v51, 4 }
 0x51e   : > { %8114 = vst [vmem:[%s11901_s6 + $0xe8] sm:$0xff] %v8038_v58  ;;  %v7119_v60 = vpop.f32.mrf.mxu3 }
 0x51f   : > { %v7143_v52 = vpop.f32.mrf.mxu1 }
 0x520   : > { %v7182_v61 = vpop.f32.mrf.mxu0  ;;  %v7144_v28 = vadd.f32 %v7143_v52, %v3739_v17  ;;  %v3754_v52 = vperm.slane %v906_v51, 7 }
 0x521   : > { %v7183_v19 = vadd.f32 %v7182_v61, %v3742_v3  ;;  %v3752_v61 = vperm.slane %v906_v51, 5 }
 0x523   : > { %v7810_v27 = vrot.slane %v7183_v19, 5 }
 0x525   : > { %v7156_v37 = vpop.f32.mrf.mxu2 }
 0x526   : > { %v7169_v62 = vpop.f32.mrf.mxu3  ;;  %v7157_v9 = vadd.f32 %v7156_v37, %v3740_v0  ;;  %v3747_v37 = vperm.slane %v906_v51, 0 }
 0x527   : > { %v7145_v40 = vpop.f32.mrf.mxu1  ;;  %v7170_v11 = vadd.f32 %v7169_v62, %v3741_v44 }
 0x528   : > { %v7184_v63 = vpop.f32.mrf.mxu0  ;;  %v7808_v23 = vrot.slane %v7157_v9, 7  ;;  %v3753_v40 = vperm.slane %v906_v51, 6 }
 0x529   : > { %v7809_v1 = vrot.slane %v7170_v11, 6 }
 0x52a   : > { %v8039_v31 = vsel %vm7822_vm1, %v7144_v28, %v7808_v23 }
 0x52b   : > { %v8040_v10 = vsel %vm7824_vm2, %v7809_v1, %v7810_v27 }
 0x52c   : > { %v8041_v34 = vsel %vm7826_vm3, %v8039_v31, %v8040_v10 }
 0x52d   : > { %v7158_v2 = vpop.f32.mrf.mxu2 }
 0x52e   : > { %v7171_v46 = vpop.f32.mrf.mxu3 }
 0x52f   : > { %v7195_v4 = vpop.f32.mrf.mxu1 }
 0x530   : > { %v7234_v6 = vpop.f32.mrf.mxu0  ;;  %v7196_v22 = vadd.f32 %v7195_v4, %v3743_v7 }
 0x531   : > { %v7235_v24 = vadd.f32 %v7234_v6, %v3746_v13 }
 0x532   : > { %v7811_v21 = vrot.slane %v7196_v22, 4 }
 0x533   : > { %v7814_v32 = vrot.slane %v7235_v24, 1 }
 0x535   : > { %v7208_v25 = vpop.f32.mrf.mxu2 }
 0x536   : > { %v7209_v26 = vadd.f32 %v7208_v25, %v3744_v15  ;;  %v7221_v18 = vpop.f32.mrf.mxu3 }
 0x537   : > { %v7222_v20 = vadd.f32 %v7221_v18, %v3745_v5  ;;  %v7197_v29 = vpop.f32.mrf.mxu1 }
 0x538   : > { %v7812_v30 = vrot.slane %v7209_v26, 3  ;;  %v7236_v8 = vpop.f32.mrf.mxu0 }
 0x539   : > { %v7813_v12 = vrot.slane %v7222_v20, 2 }
 0x53a   : > { %v8042_v33 = vsel %vm7828_vm4, %v7811_v21, %v7812_v30 }
 0x53b   : > { %v8043_v14 = vsel %vm7830_vm5, %v7813_v12, %v7814_v32 }
 0x53c   : > { %v8044_v35 = vsel %vm7832_vm6, %v8042_v33, %v8043_v14 }
 0x53d   : > { %v8045_v36 = vsel %vm7834_vm7, %v8041_v34, %v8044_v35  ;;  %v7210_v16 = vpop.f32.mrf.mxu2 }
 0x53e   : > { %8115 = vst [vmem:[%s11901_s6 + $0xf0] sm:$0xff] %v8045_v36  ;;  %v7223_v39 = vpop.f32.mrf.mxu3 }
 0x53f   : > { %v7247_v38 = vpop.f32.mrf.mxu1 }
 0x540   : > { %v7286_v41 = vpop.f32.mrf.mxu0  ;;  %v7248_v4 = vadd.f32 %v7247_v38, %v3747_v37 }
 0x541   : > { %v7287_v62 = vadd.f32 %v7286_v41, %v3750_v57 }
 0x543   : > { %v7817_v7 = vrot.slane %v7287_v62, 5 }
 0x545   : > { %v7260_v43 = vpop.f32.mrf.mxu2 }
 0x546   : > { %v7273_v45 = vpop.f32.mrf.mxu3  ;;  %v7261_v50 = vadd.f32 %v7260_v43, %v3748_v53 }
 0x547   : > { %v7249_v47 = vpop.f32.mrf.mxu1  ;;  %v7274_v60 = vadd.f32 %v7273_v45, %v3749_v54 }
 0x548   : > { %v7288_v49 = vpop.f32.mrf.mxu0  ;;  %v7815_v42 = vrot.slane %v7261_v50, 7 }
 0x549   : > { %v7816_v0 = vrot.slane %v7274_v60, 6 }
 0x54a   : > { %v8046_v17 = vsel %vm7822_vm1, %v7248_v4, %v7815_v42 }
 0x54b   : > { %v8047_v19 = vsel %vm7824_vm2, %v7816_v0, %v7817_v7 }
 0x54c   : > { %v8048_v24 = vsel %vm7826_vm3, %v8046_v17, %v8047_v19 }
 0x54d   : > { %v7262_v55 = vpop.f32.mrf.mxu2 }
 0x54e   : > { %v7275_v56 = vpop.f32.mrf.mxu3 }
 0x54f   : > { %v7299_v48 = vpop.f32.mrf.mxu1 }
 0x550   : > { %v7338_v58 = vpop.f32.mrf.mxu0  ;;  %v7300_v63 = vadd.f32 %v7299_v48, %v3751_v59 }
 0x551   : > { %v7339_v44 = vadd.f32 %v7338_v58, %v3754_v52 }
 0x552   : > { %v7818_v11 = vrot.slane %v7300_v63, 4 }
 0x553   : > { %v7821_v5 = vrot.slane %v7339_v44, 1 }
 0x555   : > { %v7312_v2 = vpop.f32.mrf.mxu2 }
 0x556   : > { %v7313_v46 = vadd.f32 %v7312_v2, %v3752_v61  ;;  %v7325_v3 = vpop.f32.mrf.mxu3 }
 0x557   : > { %v7326_v6 = vadd.f32 %v7325_v3, %v3753_v40  ;;  %v7301_v9 = vpop.f32.mrf.mxu1 }
 0x558   : > { %v7819_v13 = vrot.slane %v7313_v46, 3  ;;  %v7340_v15 = vpop.f32.mrf.mxu0 }
 0x559   : > { %v7820_v22 = vrot.slane %v7326_v6, 2 }
 0x55a   : > { %v8049_v23 = vsel %vm7828_vm4, %v7818_v11, %v7819_v13 }
 0x55b   : > { %v8050_v1 = vsel %vm7830_vm5, %v7820_v22, %v7821_v5 }
 0x55c   : > { %v8051_v25 = vsel %vm7832_vm6, %v8049_v23, %v8050_v1 }
 0x55d   : > { %v8052_v26 = vsel %vm7834_vm7, %v8048_v24, %v8051_v25  ;;  %v7314_v18 = vpop.f32.mrf.mxu2 }
 0x55e   : > { %8116 = vst [vmem:[%s11901_s6 + $0xf8] sm:$0xff] %v8052_v26  ;;  %v7327_v28 = vpop.f32.mrf.mxu3 }
 0x55f   : > { %11358 = shalt.err (!%p11355_p13)
}
 0x560   : > { %11110 = dma.vmem_to_hbm [thread:$0]  (%p11517_p5), %s8131_s22, 4096, %s8133_s23, %s8118_s16  }
 0x561 PF: > { %p11140_p0 = scmp.ge.s32.totalorder %s11405_s21, 2  ;;  %s8144_s11 = sand.u32 1, %s11393_s18  }
 0x562   : > { %s8145_s29 = scalar_lea.sflag [#allocation4], %s8144_s11 }
 0x563   : > { %p11130_p9 = pnand %p11140_p0, %p11480_p6 }
 0x565   : > { %p11131_p3 = pneg %p11130_p9 }
 0x567   : > { %11388 = dma.done.wait (%p11131_p3), %s8145_s29, 4096  }
 0x568   : > { %11390 = vsyncadd (%p11131_p3), %s8145_s29, 4294963200  ;;  %s13661_s21 = sld [smem:[#allocation17_spill]]  ;;  %s13663_s18 = smov %s11397_s19 }
 0x569   : > { %s13662_s26 = sld [smem:[#allocation18_spill]]  ;;  %s13664_s19 = smov %s11401_s20 }
 0x56e   : > { %p20_p1 = scmp.ge.s32.totalorder %s13661_s21, 13  }
 0x56f   : > { %s13665_s20 = smov %s13662_s26 }
 0x570   :  { %22 = sbr.rel (!%p20_p1) target bundleno = 10 (0xa), region = 109 }
 0x575   :  { %8151 = vsyncpa [#allocation3], 1 }
 0x576   :  { %8153 = vsyncpa [#allocation3 + $0x1], 1 }
 0x577   :  { %8154 = vsyncpa [#allocation6], 1 }
 0x578   :  { %8155 = vsyncpa [#allocation9], 1 }
 0x579   :  { %8157 = vsyncpa [#allocation9 + $0x1], 1 }
 0x57a   :  { %8158 = vsyncpa [#allocation4], 1 }
 0x57b   :  { %8160 = vsyncpa [#allocation4 + $0x1], 1 }

</bundles_post_ra>
